<compile_context>
chip_gen: v5e
topology: v5e:2x2
jax: 0.10.0
libtpu: 0.0.40
codegen_flags: <defaults>
</compile_context>

<pallas_src>
import math
import functools

import jax
import jax.numpy as jnp
from jax.experimental import pallas as pl
from jax.experimental.pallas import tpu as pltpu


# ----------------------------------------------------------------------------
# small helpers
# ----------------------------------------------------------------------------
def _round_up(x, m):
    return ((x + m - 1) // m) * m


def _pick_tile(n, candidates):
    for c in candidates:
        if n % c == 0:
            return c
    return n


@functools.lru_cache(maxsize=None)
def _vmem_limit_bytes():
    """Generation-aware scoped-VMEM limit: ~75% of physical, capped at 96 MiB."""
    try:
        cap = int(pltpu.get_tpu_info().vmem_capacity_bytes)
        return min((cap * 3) // 4, 96 * 1024 * 1024)
    except Exception:
        return 32 * 1024 * 1024  # conservative, known-good fallback


# ----------------------------------------------------------------------------
# Pallas kernels
# ----------------------------------------------------------------------------
def _conv3x3_s2_kernel(y_ref, w_ref, b_ref, o_ref, *, Ho, Wo, relu):
    """3x3 / stride-2 conv expressed as a 2x2 / stride-1 conv on a
    space-to-depth input.

    y_ref: (1, Ho+1, Wo+1, 4*Cin) bf16  y[0, a, b, (r*2+s)*Cin + c] = xpad[2a+r, 2b+s, c]
    w_ref: (2, 2, 4*Cin, Cout)     bf16 (VMEM resident across the batch grid)
    b_ref: (1, Cout)               f32
    o_ref: (1, Ho*Wo, Cout)        bf16 (single lane-dense store)
    """
    acc = None
    for dy in range(2):
        for dx in range(2):
            tap = y_ref[0, dy:dy + Ho, dx:dx + Wo, :]          # (Ho, Wo, 4*Cin)
            tap = tap.reshape(Ho * Wo, tap.shape[-1])          # (Ho*Wo, 4*Cin)
            d = jnp.dot(tap, w_ref[dy, dx],
                        preferred_element_type=jnp.float32)    # (Ho*Wo, Cout)
            acc = d if acc is None else acc + d
    acc = acc + b_ref[...]
    if relu:
        acc = jnp.maximum(acc, 0.0)
    o_ref[0] = acc.astype(o_ref.dtype)


def _xattn_kernel(q_ref, kv_ref, o_ref):
    """Single-head cross-attention with residual, q-tiled, KV resident.

    Softmax normalization is deferred past the PV matmul and the 1/sqrt(C)
    scale is folded into the (tq, C) query tile (not the (tq, L) scores).
    """
    q = q_ref[0]                                   # (TQ, C) bf16
    kv = kv_ref[0]                                 # (L,  C) bf16
    scale = 1.0 / math.sqrt(q.shape[-1])
    qs = (q.astype(jnp.float32) * scale).astype(jnp.bfloat16)
    s = jnp.einsum('qd,kd->qk', qs, kv,
                   preferred_element_type=jnp.float32)          # (TQ, L) f32
    p = jnp.exp(s - jnp.max(s, axis=-1, keepdims=True))         # unnormalized
    denom = jnp.sum(p, axis=-1, keepdims=True)                   # (TQ, 1) f32
    attn_un = jnp.einsum('qk,kd->qd', p.astype(kv.dtype), kv,
                         preferred_element_type=jnp.float32)     # (TQ, C)
    attn = attn_un * pl.reciprocal(denom, approx=True)
    o_ref[0] = (q.astype(jnp.float32) + attn).astype(o_ref.dtype)


def _corr_flow_kernel(f0_ref, f1_ref, ct_ref, ctq_ref, o_ref):
    """Global correlation + soft-argmax -> flow, lane-dense (2, L) output.

    ct_ref rows are [x, y, 1]: the ones row produces the softmax denominator
    through the same f32 MXU reduction, so normalization is deferred to a
    (2, tq)-sized multiply.
    """
    f0 = f0_ref[0]                                 # (TQ, C) bf16
    f1 = f1_ref[0]                                 # (L,  C) bf16
    scale = 1.0 / math.sqrt(f0.shape[-1])
    f0s = (f0.astype(jnp.float32) * scale).astype(jnp.bfloat16)
    s = jnp.einsum('qd,kd->qk', f0s, f1,
                   preferred_element_type=jnp.float32)           # (TQ, L) f32
    p = jnp.exp(s - jnp.max(s, axis=-1, keepdims=True))          # unnormalized
    # explicitly f32 coordinate reduction (correctness requirement)
    num = jnp.einsum('tk,qk->tq', ct_ref[...], p,
                     preferred_element_type=jnp.float32)         # (3, TQ)
    flow_t = num[:2] * pl.reciprocal(num[2:3], approx=True) - ctq_ref[...]
    o_ref[0] = flow_t.astype(o_ref.dtype)


def _head_kernel(a_ref, wt_ref, b_ref, o_ref):
    """Fusion head: (Nt, K) x (tm, K)^T -> transposed (Nt, tm) lane-dense output."""
    acc = jnp.einsum('nk,mk->nm', wt_ref[...], a_ref[...],
                     preferred_element_type=jnp.float32)
    o_ref[...] = acc + b_ref[...]


# ----------------------------------------------------------------------------
# Pallas wrappers
# ----------------------------------------------------------------------------
def conv3x3_s2(x_nhwc, w, b, relu=True):
    """3x3 conv, stride 2, padding 1.  x: (N,H,W,Cin) -> (N,H/2,W/2,Cout) bf16."""
    N, H, W, Cin = x_nhwc.shape
    assert H % 2 == 0 and W % 2 == 0
    Ho, Wo = H // 2, W // 2
    Cout = w.shape[-1]
    Cin_p = _round_up(Cin, 32)          # 4*Cin_p is a multiple of 128 (lane dense)
    C4 = 4 * Cin_p

    # zero-pad spatially (padding=1) + pad channels, bf16.
    xp = jnp.pad(x_nhwc,
                 ((0, 0), (1, 1), (1, 1), (0, Cin_p - Cin))).astype(jnp.bfloat16)
    # space-to-depth: y[n, a, b, (r*2+s)*Cin_p + c] = xp[n, 2a+r, 2b+s, c]
    y = xp.reshape(N, Ho + 1, 2, Wo + 1, 2, Cin_p)
    y = y.transpose(0, 1, 3, 2, 4, 5).reshape(N, Ho + 1, Wo + 1, C4)

    # 3x3/stride-2 conv == 2x2/stride-1 conv on y; build the 4 depth-folded taps.
    w_pad = jnp.zeros((4, 4, Cin_p, Cout), w.dtype)
    w_pad = w_pad.at[:3, :3, :Cin, :].set(w)
    w4 = w_pad.reshape(2, 2, 2, 2, Cin_p, Cout).transpose(0, 2, 1, 3, 4, 5)
    w4 = w4.reshape(2, 2, C4, Cout).astype(jnp.bfloat16)
    b_p = b.reshape(1, Cout).astype(jnp.float32)

    # TODO(synk): for very large images (v7x, 64 MiB VMEM), add a second grid
    # axis over output-row bands with a +1 halo row instead of whole-image blocks.
    out = pl.pallas_call(
        functools.partial(_conv3x3_s2_kernel, Ho=Ho, Wo=Wo, relu=relu),
        out_shape=jax.ShapeDtypeStruct((N, Ho * Wo, Cout), jnp.bfloat16),
        grid=(N,),
        in_specs=[pl.BlockSpec((1, Ho + 1, Wo + 1, C4), lambda n: (n, 0, 0, 0)),
                  pl.BlockSpec((2, 2, C4, Cout), lambda n: (0, 0, 0, 0)),
                  pl.BlockSpec((1, Cout), lambda n: (0, 0))],
        out_specs=pl.BlockSpec((1, Ho * Wo, Cout), lambda n: (n, 0, 0)),
        compiler_params=pltpu.CompilerParams(
            dimension_semantics=("parallel",),
            allow_input_fusion=[True, False, False],   # fuse pad/space-to-depth
            vmem_limit_bytes=_vmem_limit_bytes()),
    )(y, w4, b_p)
    return out.reshape(N, Ho, Wo, Cout)


def cross_attention(q_blc, kv_blc):
    """q + softmax(q kv^T / sqrt(C)) kv, batched, q-tiled, KV VMEM resident."""
    B2, L, C = q_blc.shape
    tq = _pick_tile(L, (256, 128, 64, 32, 16, 8))
    # TODO(synk): at production L on 64 MiB-VMEM parts, flash-tile the KV axis
    # (running max/sum scratch) so live score tensors are (tq, tk) not (tq, L).
    return pl.pallas_call(
        _xattn_kernel,
        out_shape=jax.ShapeDtypeStruct((B2, L, C), jnp.bfloat16),
        grid=(B2, L // tq),
        in_specs=[pl.BlockSpec((1, tq, C), lambda b, q: (b, q, 0)),
                  pl.BlockSpec((1, L, C), lambda b, q: (b, 0, 0))],
        out_specs=pl.BlockSpec((1, tq, C), lambda b, q: (b, q, 0)),
        compiler_params=pltpu.CompilerParams(
            dimension_semantics=("parallel", "arbitrary"),
            vmem_limit_bytes=_vmem_limit_bytes()),
    )(q_blc.astype(jnp.bfloat16), kv_blc.astype(jnp.bfloat16))


def global_corr_flow(f0_bhwc, f1_bhwc):
    """Global correlation soft-argmax flow (dx, dy), GMFlow-style."""
    B, H, W, C = f0_bhwc.shape
    L = H * W
    xs = jnp.arange(W, dtype=jnp.float32)
    ys = jnp.arange(H, dtype=jnp.float32)
    xx, yy = jnp.meshgrid(xs, ys)                               # (H, W)
    # rows [x, y, 1]: ones row doubles as the softmax denominator in-kernel
    ct = jnp.stack([xx.reshape(-1), yy.reshape(-1),
                    jnp.ones((L,), jnp.float32)], axis=0)       # (3, L)
    ctq = ct[:2]                                                # (2, L)

    f0 = f0_bhwc.reshape(B, L, C).astype(jnp.bfloat16)
    f1 = f1_bhwc.reshape(B, L, C).astype(jnp.bfloat16)
    tq = _pick_tile(L, (256, 128, 64, 32, 16, 8))

    flow_t = pl.pallas_call(
        _corr_flow_kernel,
        out_shape=jax.ShapeDtypeStruct((B, 2, L), jnp.float32),
        grid=(B, L // tq),
        in_specs=[pl.BlockSpec((1, tq, C), lambda b, q: (b, q, 0)),
                  pl.BlockSpec((1, L, C), lambda b, q: (b, 0, 0)),
                  pl.BlockSpec((3, L), lambda b, q: (0, 0)),      # coords + ones
                  pl.BlockSpec((2, tq), lambda b, q: (0, q))],    # query coords
        out_specs=pl.BlockSpec((1, 2, tq), lambda b, q: (b, 0, q)),
        compiler_params=pltpu.CompilerParams(
            dimension_semantics=("parallel", "arbitrary"),
            vmem_limit_bytes=_vmem_limit_bytes()),
    )(f0, f1, ct, ctq)
    return jnp.transpose(flow_t, (0, 2, 1)).reshape(B, H, W, 2)


def fusion_head(a, w, b):
    """(M, K) @ (K, N) + b with tiny N.  Output is produced transposed (8, Mp)
    so stores stay lane-dense (M on lanes) instead of padding N=3 to 128 f32."""
    M, K = a.shape
    N = w.shape[-1]
    Nt = 8                                         # sublane-pad the tiny N dim
    Mp, Kp = _round_up(M, 128), _round_up(K, 128)
    a_p = jnp.pad(a.astype(jnp.bfloat16), ((0, Mp - M), (0, Kp - K)))
    wt_p = jnp.pad(w.T.astype(jnp.bfloat16), ((0, Nt - N), (0, Kp - K)))
    b_p = jnp.pad(b, (0, Nt - N)).astype(jnp.float32).reshape(Nt, 1)
    tm = _pick_tile(Mp, (1024, 512, 256, 128))

    out_t = pl.pallas_call(
        _head_kernel,
        out_shape=jax.ShapeDtypeStruct((Nt, Mp), jnp.float32),
        grid=(Mp // tm,),
        in_specs=[pl.BlockSpec((tm, Kp), lambda i: (i, 0)),
                  pl.BlockSpec((Nt, Kp), lambda i: (0, 0)),   # weight resident
                  pl.BlockSpec((Nt, 1), lambda i: (0, 0))],
        out_specs=pl.BlockSpec((Nt, tm), lambda i: (0, i)),
        compiler_params=pltpu.CompilerParams(
            dimension_semantics=("parallel",),
            vmem_limit_bytes=_vmem_limit_bytes()),
    )(a_p, wt_p, b_p)
    return out_t[:N, :M].T                          # (M, N)


# ----------------------------------------------------------------------------
# JAX glue (bilinear resize, warping)
# ----------------------------------------------------------------------------
def upsample_bilinear_ac(x, factor):
    """Bilinear upsample, align_corners=True (matches F.interpolate). x: (B,H,W,C)."""
    B, H, W, C = x.shape
    Ho, Wo = H * factor, W * factor
    ys = jnp.linspace(0.0, H - 1.0, Ho) if H > 1 else jnp.zeros((Ho,), jnp.float32)
    xs = jnp.linspace(0.0, W - 1.0, Wo) if W > 1 else jnp.zeros((Wo,), jnp.float32)
    y0 = jnp.clip(jnp.floor(ys).astype(jnp.int32), 0, H - 1)
    x0 = jnp.clip(jnp.floor(xs).astype(jnp.int32), 0, W - 1)
    y1 = jnp.clip(y0 + 1, 0, H - 1)
    x1 = jnp.clip(x0 + 1, 0, W - 1)
    wy = (ys - y0.astype(jnp.float32))[None, :, None, None]
    wx = (xs - x0.astype(jnp.float32))[None, None, :, None]
    g = lambda yi, xi: x[:, yi][:, :, xi]
    top = g(y0, x0) * (1.0 - wx) + g(y0, x1) * wx
    bot = g(y1, x0) * (1.0 - wx) + g(y1, x1) * wx
    return top * (1.0 - wy) + bot * wy


# TODO(synk): grid_sample-style warping is a data-dependent gather with no
# clean Pallas TPU equivalent; implemented in plain JAX glue.
def flow_wrap(feat, flow):
    """Warp feat (B,H,W,C) by flow (B,H,W,2) in pixel units, bilinear, clamped."""
    B, H, W, C = feat.shape
    xs = jnp.arange(W, dtype=jnp.float32)
    ys = jnp.arange(H, dtype=jnp.float32)
    xx, yy = jnp.meshgrid(xs, ys)
    sx = xx[None] + flow[..., 0]
    sy = yy[None] + flow[..., 1]
    x0 = jnp.clip(jnp.floor(sx).astype(jnp.int32), 0, W - 1)
    y0 = jnp.clip(jnp.floor(sy).astype(jnp.int32), 0, H - 1)
    x1 = jnp.clip(x0 + 1, 0, W - 1)
    y1 = jnp.clip(y0 + 1, 0, H - 1)
    wx = (sx - x0.astype(jnp.float32))[..., None]
    wy = (sy - y0.astype(jnp.float32))[..., None]
    bidx = jnp.arange(B)[:, None, None]
    g = lambda yi, xi: feat[bidx, yi, xi]
    top = g(y0, x0) * (1.0 - wx) + g(y0, x1) * wx
    bot = g(y1, x0) * (1.0 - wx) + g(y1, x1) * wx
    return top * (1.0 - wy) + bot * wy


# ----------------------------------------------------------------------------
# Parameters (deterministic, synthetic stand-ins for the unavailable sub-nets)
# ----------------------------------------------------------------------------
def init_params(key, feature_channels=128):
    C = feature_channels
    keys = jax.random.split(key, 4)
    w = lambda k, shape: jax.random.normal(k, shape, jnp.float32) * 0.1
    return {
        # CNNEncoder stand-in: 3 strided 3x3 convs -> 1/2, 1/4, 1/8 pyramid
        'conv1_w': w(keys[0], (3, 3, 3, 32)),  'conv1_b': jnp.zeros((32,), jnp.float32),
        'conv2_w': w(keys[1], (3, 3, 32, C)),  'conv2_b': jnp.zeros((C,), jnp.float32),
        'conv3_w': w(keys[2], (3, 3, C, C)),   'conv3_b': jnp.zeros((C,), jnp.float32),
        # ScaleNet stand-in: 1x1 fusion conv -> [scale(1), flow residual(2)]
        'scale_w': w(keys[3], (4 * C + 4, 3)), 'scale_b': jnp.zeros((3,), jnp.float32),
    }


# ----------------------------------------------------------------------------
# MonoFusion forward (simplified, num_scales = 2)
# ----------------------------------------------------------------------------
def monofusion_forward(params, img0, img1):
    """img0, img1: NCHW float32 in [0, 255]. Returns (scale, flows, None)."""
    B = img0.shape[0]
    to_nhwc = lambda t: jnp.transpose(t, (0, 2, 3, 1))
    mean = jnp.array([0.485, 0.456, 0.406], jnp.float32)
    std = jnp.array([0.229, 0.224, 0.225], jnp.float32)

    # normalize_img folded into conv1 weights (exact, incl. zero padding):
    #   conv_W((x/255 - mean)/std) == conv_{W/(255*std)}(x - 255*mean)
    concat = jnp.concatenate([to_nhwc(img0), to_nhwc(img1)], axis=0) - 255.0 * mean
    w1_folded = params['conv1_w'] / (255.0 * std)[None, None, :, None]

    # --- extract_feature: concat along batch, shared encoder, reverse, chunk ---
    # conv1 (Cin=3, K<=27) cannot fill the MXU; left to XLA's conv emitter.
    c1 = jax.lax.conv_general_dilated(
        concat, w1_folded, window_strides=(2, 2), padding=((1, 1), (1, 1)),
        dimension_numbers=('NHWC', 'HWIO', 'NHWC'))
    c1 = jnp.maximum(c1 + params['conv1_b'], 0.0).astype(jnp.bfloat16)      # 1/2
    c2 = conv3x3_s2(c1, params['conv2_w'], params['conv2_b'])               # 1/4
    c3 = conv3x3_s2(c2, params['conv3_w'], params['conv3_b'])               # 1/8
    features = [c2, c3][::-1]                                               # coarse -> fine

    flows = []
    mlvl_feats0, mlvl_feats1 = [], []
    corr, ini_flow0 = None, None
    num_scales = 2
    for scale_idx in range(num_scales):
        feat = features[scale_idx]                   # (2B, Hs, Ws, C) bf16
        B2, Hs, Ws, Cs = feat.shape
        q = feat.reshape(B2, Hs * Ws, Cs)
        kv = jnp.concatenate([q[B:], q[:B]], axis=0)  # f0<->f1 in one fused call
        attn = cross_attention(q, kv)                 # FeatureNet stand-in
        f0a = attn[:B].reshape(B, Hs, Ws, Cs)
        f1a = attn[B:].reshape(B, Hs, Ws, Cs)

        if scale_idx < 1:
            # TextureNet stand-in: global correlation soft-argmax -> flow
            corr = global_corr_flow(f0a, f1a)
            final = [corr]
            mlvl_feats0.append(f0a)
            mlvl_feats1.append(flow_wrap(f1a, corr))
            corr = upsample_bilinear_ac(corr, 2) * 2.0
            ini_flow0 = corr
            for f in final:
                flows.append(upsample_bilinear_ac(f, 8) * 8.0)
        else:
            mlvl_feats0.append(f0a)
            mlvl_feats1.append(f1a)
            residual = global_corr_flow(f0a, f1a)
            corr = corr + residual
            final = [corr]
            for f in final:
                flows.append(upsample_bilinear_ac(f, 4) * 4.0)

    ini_flow = corr

    # --- ScaleNet stand-in: fuse multi-level features + flows (Pallas matmul) ---
    f0_lvl0_up = upsample_bilinear_ac(mlvl_feats0[0], 2)
    f1_lvl0_up = upsample_bilinear_ac(mlvl_feats1[0], 2)
    fused = jnp.concatenate(
        [f0_lvl0_up.astype(jnp.bfloat16), mlvl_feats0[1].astype(jnp.bfloat16),
         f1_lvl0_up.astype(jnp.bfloat16), mlvl_feats1[1].astype(jnp.bfloat16),
         ini_flow.astype(jnp.bfloat16), ini_flow0.astype(jnp.bfloat16)], axis=-1)
    Bf, Hf, Wf, Cf = fused.shape
    out = fusion_head(fused.reshape(Bf * Hf * Wf, Cf),
                      params['scale_w'], params['scale_b'])
    out = out.reshape(Bf, Hf, Wf, 3)
    scale_map = upsample_bilinear_ac(out[..., :1], 4)                   # (B,H,W,1)
    flow_ref = upsample_bilinear_ac(ini_flow + out[..., 1:3], 4) * 4.0  # (B,H,W,2)
    flows.append(flow_ref)

    # back to PyTorch NCHW convention
    to_nchw = lambda t: jnp.transpose(t, (0, 3, 1, 2))
    return to_nchw(scale_map), [to_nchw(f.astype(jnp.float32)) for f in flows], None


# ----------------------------------------------------------------------------
if __name__ == "__main__":
    key = jax.random.PRNGKey(0)
    k0, k1, kp = jax.random.split(key, 3)
    B, H, W = 2, 64, 64
    img0 = jax.random.uniform(k0, (B, 3, H, W), jnp.float32, 0.0, 255.0)
    img1 = jax.random.uniform(k1, (B, 3, H, W), jnp.float32, 0.0, 255.0)
    params = init_params(kp, feature_channels=128)

    fwd = jax.jit(functools.partial(monofusion_forward, params))
    scale, flows, _ = fwd(img0, img1)
    jax.block_until_ready(scale)
    for f in flows:
        jax.block_until_ready(f)

    assert scale.shape == (B, 1, H, W), scale.shape
    assert len(flows) == 3
    assert all(f.shape == (B, 2, H, W) for f in flows)
    assert bool(jnp.all(jnp.isfinite(scale)))
    assert all(bool(jnp.all(jnp.isfinite(f))) for f in flows)
    print("KERNEL_OK")
</pallas_src>

<mosaic_0001>
module attributes {stable_mosaic.version = 11 : i64} {
  func.func @_conv3x3_s2_kernel(%arg0: i32, %arg1: memref<1x17x17x128xbf16, #tpu.memory_space<vmem>>, %arg2: memref<2x2x128x128xbf16, #tpu.memory_space<vmem>>, %arg3: memref<1x128xf32, #tpu.memory_space<vmem>>, %arg4: memref<1x256x128xbf16, #tpu.memory_space<vmem>>) attributes {dimension_semantics = [#tpu.dimension_semantics<parallel>], iteration_bounds = array<i64: 4>, scalar_prefetch = 0 : i64, scratch_operands = 0 : i64, tpu.core_type = #tpu.core_type<tc>, window_params = [{transform_indices = @transform_0, window_bounds = array<i64: 1, 17, 17, 128>}, {pipeline_mode = #tpu.pipeline_mode<synchronous>, transform_indices = @transform_1, window_bounds = array<i64: 2, 2, 128, 128>}, {pipeline_mode = #tpu.pipeline_mode<synchronous>, transform_indices = @transform_2, window_bounds = array<i64: 1, 128>}, {transform_indices = @transform_3, window_bounds = array<i64: 1, 256, 128>}]} {
    %c0 = arith.constant 0 : index
    %c0_0 = arith.constant 0 : index
    %c0_1 = arith.constant 0 : index
    %c0_2 = arith.constant 0 : index
    %0 = vector.load %arg1[%c0, %c0_0, %c0_1, %c0_2] : memref<1x17x17x128xbf16, #tpu.memory_space<vmem>>, vector<1x16x16x128xbf16>
    %1 = vector.shape_cast %0 : vector<1x16x16x128xbf16> to vector<16x16x128xbf16>
    %2 = vector.shape_cast %1 : vector<16x16x128xbf16> to vector<256x128xbf16>
    %c0_3 = arith.constant 0 : index
    %c0_4 = arith.constant 0 : index
    %c0_5 = arith.constant 0 : index
    %c0_6 = arith.constant 0 : index
    %3 = vector.load %arg2[%c0_3, %c0_4, %c0_5, %c0_6] : memref<2x2x128x128xbf16, #tpu.memory_space<vmem>>, vector<1x1x128x128xbf16>
    %4 = vector.shape_cast %3 : vector<1x1x128x128xbf16> to vector<128x128xbf16>
    %cst = arith.constant dense<0.000000e+00> : vector<256x128xf32>
    %5 = tpu.matmul %2, %4, %cst {dimension_numbers = #tpu.dot_dimension_numbers<[1], [0], [0], [1], [0, 0, 1, 1], [], []>} : vector<256x128xbf16>, vector<128x128xbf16>, vector<256x128xf32> -> vector<256x128xf32>
    %c0_7 = arith.constant 0 : index
    %c0_8 = arith.constant 0 : index
    %c1 = arith.constant 1 : index
    %c0_9 = arith.constant 0 : index
    %6 = vector.load %arg1[%c0_7, %c0_8, %c1, %c0_9] : memref<1x17x17x128xbf16, #tpu.memory_space<vmem>>, vector<1x16x16x128xbf16>
    %7 = vector.shape_cast %6 : vector<1x16x16x128xbf16> to vector<16x16x128xbf16>
    %8 = vector.shape_cast %7 : vector<16x16x128xbf16> to vector<256x128xbf16>
    %c0_10 = arith.constant 0 : index
    %c1_11 = arith.constant 1 : index
    %c0_12 = arith.constant 0 : index
    %c0_13 = arith.constant 0 : index
    %9 = vector.load %arg2[%c0_10, %c1_11, %c0_12, %c0_13] : memref<2x2x128x128xbf16, #tpu.memory_space<vmem>>, vector<1x1x128x128xbf16>
    %10 = vector.shape_cast %9 : vector<1x1x128x128xbf16> to vector<128x128xbf16>
    %cst_14 = arith.constant dense<0.000000e+00> : vector<256x128xf32>
    %11 = tpu.matmul %8, %10, %cst_14 {dimension_numbers = #tpu.dot_dimension_numbers<[1], [0], [0], [1], [0, 0, 1, 1], [], []>} : vector<256x128xbf16>, vector<128x128xbf16>, vector<256x128xf32> -> vector<256x128xf32>
    %12 = arith.addf %5, %11 : vector<256x128xf32>
    %c0_15 = arith.constant 0 : index
    %c1_16 = arith.constant 1 : index
    %c0_17 = arith.constant 0 : index
    %c0_18 = arith.constant 0 : index
    %13 = vector.load %arg1[%c0_15, %c1_16, %c0_17, %c0_18] : memref<1x17x17x128xbf16, #tpu.memory_space<vmem>>, vector<1x16x16x128xbf16>
    %14 = vector.shape_cast %13 : vector<1x16x16x128xbf16> to vector<16x16x128xbf16>
    %15 = vector.shape_cast %14 : vector<16x16x128xbf16> to vector<256x128xbf16>
    %c1_19 = arith.constant 1 : index
    %c0_20 = arith.constant 0 : index
    %c0_21 = arith.constant 0 : index
    %c0_22 = arith.constant 0 : index
    %16 = vector.load %arg2[%c1_19, %c0_20, %c0_21, %c0_22] : memref<2x2x128x128xbf16, #tpu.memory_space<vmem>>, vector<1x1x128x128xbf16>
    %17 = vector.shape_cast %16 : vector<1x1x128x128xbf16> to vector<128x128xbf16>
    %cst_23 = arith.constant dense<0.000000e+00> : vector<256x128xf32>
    %18 = tpu.matmul %15, %17, %cst_23 {dimension_numbers = #tpu.dot_dimension_numbers<[1], [0], [0], [1], [0, 0, 1, 1], [], []>} : vector<256x128xbf16>, vector<128x128xbf16>, vector<256x128xf32> -> vector<256x128xf32>
    %19 = arith.addf %12, %18 : vector<256x128xf32>
    %c0_24 = arith.constant 0 : index
    %c1_25 = arith.constant 1 : index
    %c1_26 = arith.constant 1 : index
    %c0_27 = arith.constant 0 : index
    %20 = vector.load %arg1[%c0_24, %c1_25, %c1_26, %c0_27] : memref<1x17x17x128xbf16, #tpu.memory_space<vmem>>, vector<1x16x16x128xbf16>
    %21 = vector.shape_cast %20 : vector<1x16x16x128xbf16> to vector<16x16x128xbf16>
    %22 = vector.shape_cast %21 : vector<16x16x128xbf16> to vector<256x128xbf16>
    %c1_28 = arith.constant 1 : index
    %c1_29 = arith.constant 1 : index
    %c0_30 = arith.constant 0 : index
    %c0_31 = arith.constant 0 : index
    %23 = vector.load %arg2[%c1_28, %c1_29, %c0_30, %c0_31] : memref<2x2x128x128xbf16, #tpu.memory_space<vmem>>, vector<1x1x128x128xbf16>
    %24 = vector.shape_cast %23 : vector<1x1x128x128xbf16> to vector<128x128xbf16>
    %cst_32 = arith.constant dense<0.000000e+00> : vector<256x128xf32>
    %25 = tpu.matmul %22, %24, %cst_32 {dimension_numbers = #tpu.dot_dimension_numbers<[1], [0], [0], [1], [0, 0, 1, 1], [], []>} : vector<256x128xbf16>, vector<128x128xbf16>, vector<256x128xf32> -> vector<256x128xf32>
    %26 = arith.addf %19, %25 : vector<256x128xf32>
    %c0_33 = arith.constant 0 : index
    %c0_34 = arith.constant 0 : index
    %27 = vector.load %arg3[%c0_33, %c0_34] : memref<1x128xf32, #tpu.memory_space<vmem>>, vector<1x128xf32>
    %28 = vector.broadcast %27 : vector<1x128xf32> to vector<256x128xf32>
    %29 = arith.addf %26, %28 : vector<256x128xf32>
    %cst_35 = arith.constant 0.000000e+00 : f32
    %30 = vector.broadcast %cst_35 : f32 to vector<256x128xf32>
    %31 = arith.maximumf %29, %30 : vector<256x128xf32>
    %32 = arith.truncf %31 : vector<256x128xf32> to vector<256x128xbf16>
    %c0_36 = arith.constant 0 : index
    %c0_37 = arith.constant 0 : index
    %c0_38 = arith.constant 0 : index
    %33 = vector.load %arg4[%c0_36, %c0_37, %c0_38] : memref<1x256x128xbf16, #tpu.memory_space<vmem>>, vector<1x256x128xbf16>
    %34 = vector.shape_cast %33 : vector<1x256x128xbf16> to vector<256x128xbf16>
    %35 = vector.shape_cast %32 : vector<256x128xbf16> to vector<1x256x128xbf16>
    tpu.vector_store %arg4[%c0_36, %c0_37, %c0_38], %35 {strides = array<i32>} : memref<1x256x128xbf16, #tpu.memory_space<vmem>>, vector<1x256x128xbf16>,
    return
  }
  func.func @transform_0(%arg0: i32) -> (i32, i32, i32, i32) {
    %c0_i32 = arith.constant 0 : i32
    %c0_i32_0 = arith.constant 0 : i32
    %c0_i32_1 = arith.constant 0 : i32
    %c0_i32_2 = arith.constant 0 : i32
    return %arg0, %c0_i32, %c0_i32_0, %c0_i32_1 : i32, i32, i32, i32
  }
  func.func @transform_1(%arg0: i32) -> (i32, i32, i32, i32) {
    %c0_i32 = arith.constant 0 : i32
    %c0_i32_0 = arith.constant 0 : i32
    %c0_i32_1 = arith.constant 0 : i32
    %c0_i32_2 = arith.constant 0 : i32
    %c0_i32_3 = arith.constant 0 : i32
    return %c0_i32, %c0_i32_0, %c0_i32_1, %c0_i32_2 : i32, i32, i32, i32
  }
  func.func @transform_2(%arg0: i32) -> (i32, i32) {
    %c0_i32 = arith.constant 0 : i32
    %c0_i32_0 = arith.constant 0 : i32
    %c0_i32_1 = arith.constant 0 : i32
    return %c0_i32, %c0_i32_0 : i32, i32
  }
  func.func @transform_3(%arg0: i32) -> (i32, i32, i32) {
    %c0_i32 = arith.constant 0 : i32
    %c0_i32_0 = arith.constant 0 : i32
    %c0_i32_1 = arith.constant 0 : i32
    return %arg0, %c0_i32, %c0_i32_0 : i32, i32, i32
  }
}

module attributes {stable_mosaic.version = 11 : i64} {
  func.func @_conv3x3_s2_kernel(%arg0: i32, %arg1: memref<1x9x9x512xbf16, #tpu.memory_space<vmem>>, %arg2: memref<2x2x512x128xbf16, #tpu.memory_space<vmem>>, %arg3: memref<1x128xf32, #tpu.memory_space<vmem>>, %arg4: memref<1x64x128xbf16, #tpu.memory_space<vmem>>) attributes {dimension_semantics = [#tpu.dimension_semantics<parallel>], iteration_bounds = array<i64: 4>, scalar_prefetch = 0 : i64, scratch_operands = 0 : i64, tpu.core_type = #tpu.core_type<tc>, window_params = [{transform_indices = @transform_0, window_bounds = array<i64: 1, 9, 9, 512>}, {pipeline_mode = #tpu.pipeline_mode<synchronous>, transform_indices = @transform_1, window_bounds = array<i64: 2, 2, 512, 128>}, {pipeline_mode = #tpu.pipeline_mode<synchronous>, transform_indices = @transform_2, window_bounds = array<i64: 1, 128>}, {transform_indices = @transform_3, window_bounds = array<i64: 1, 64, 128>}]} {
    %c0 = arith.constant 0 : index
    %c0_0 = arith.constant 0 : index
    %c0_1 = arith.constant 0 : index
    %c0_2 = arith.constant 0 : index
    %0 = vector.load %arg1[%c0, %c0_0, %c0_1, %c0_2] : memref<1x9x9x512xbf16, #tpu.memory_space<vmem>>, vector<1x8x8x512xbf16>
    %1 = vector.shape_cast %0 : vector<1x8x8x512xbf16> to vector<8x8x512xbf16>
    %2 = vector.shape_cast %1 : vector<8x8x512xbf16> to vector<64x512xbf16>
    %c0_3 = arith.constant 0 : index
    %c0_4 = arith.constant 0 : index
    %c0_5 = arith.constant 0 : index
    %c0_6 = arith.constant 0 : index
    %3 = vector.load %arg2[%c0_3, %c0_4, %c0_5, %c0_6] : memref<2x2x512x128xbf16, #tpu.memory_space<vmem>>, vector<1x1x512x128xbf16>
    %4 = vector.shape_cast %3 : vector<1x1x512x128xbf16> to vector<512x128xbf16>
    %cst = arith.constant dense<0.000000e+00> : vector<64x128xf32>
    %5 = tpu.matmul %2, %4, %cst {dimension_numbers = #tpu.dot_dimension_numbers<[1], [0], [0], [1], [0, 0, 1, 1], [], []>} : vector<64x512xbf16>, vector<512x128xbf16>, vector<64x128xf32> -> vector<64x128xf32>
    %c0_7 = arith.constant 0 : index
    %c0_8 = arith.constant 0 : index
    %c1 = arith.constant 1 : index
    %c0_9 = arith.constant 0 : index
    %6 = vector.load %arg1[%c0_7, %c0_8, %c1, %c0_9] : memref<1x9x9x512xbf16, #tpu.memory_space<vmem>>, vector<1x8x8x512xbf16>
    %7 = vector.shape_cast %6 : vector<1x8x8x512xbf16> to vector<8x8x512xbf16>
    %8 = vector.shape_cast %7 : vector<8x8x512xbf16> to vector<64x512xbf16>
    %c0_10 = arith.constant 0 : index
    %c1_11 = arith.constant 1 : index
    %c0_12 = arith.constant 0 : index
    %c0_13 = arith.constant 0 : index
    %9 = vector.load %arg2[%c0_10, %c1_11, %c0_12, %c0_13] : memref<2x2x512x128xbf16, #tpu.memory_space<vmem>>, vector<1x1x512x128xbf16>
    %10 = vector.shape_cast %9 : vector<1x1x512x128xbf16> to vector<512x128xbf16>
    %cst_14 = arith.constant dense<0.000000e+00> : vector<64x128xf32>
    %11 = tpu.matmul %8, %10, %cst_14 {dimension_numbers = #tpu.dot_dimension_numbers<[1], [0], [0], [1], [0, 0, 1, 1], [], []>} : vector<64x512xbf16>, vector<512x128xbf16>, vector<64x128xf32> -> vector<64x128xf32>
    %12 = arith.addf %5, %11 : vector<64x128xf32>
    %c0_15 = arith.constant 0 : index
    %c1_16 = arith.constant 1 : index
    %c0_17 = arith.constant 0 : index
    %c0_18 = arith.constant 0 : index
    %13 = vector.load %arg1[%c0_15, %c1_16, %c0_17, %c0_18] : memref<1x9x9x512xbf16, #tpu.memory_space<vmem>>, vector<1x8x8x512xbf16>
    %14 = vector.shape_cast %13 : vector<1x8x8x512xbf16> to vector<8x8x512xbf16>
    %15 = vector.shape_cast %14 : vector<8x8x512xbf16> to vector<64x512xbf16>
    %c1_19 = arith.constant 1 : index
    %c0_20 = arith.constant 0 : index
    %c0_21 = arith.constant 0 : index
    %c0_22 = arith.constant 0 : index
    %16 = vector.load %arg2[%c1_19, %c0_20, %c0_21, %c0_22] : memref<2x2x512x128xbf16, #tpu.memory_space<vmem>>, vector<1x1x512x128xbf16>
    %17 = vector.shape_cast %16 : vector<1x1x512x128xbf16> to vector<512x128xbf16>
    %cst_23 = arith.constant dense<0.000000e+00> : vector<64x128xf32>
    %18 = tpu.matmul %15, %17, %cst_23 {dimension_numbers = #tpu.dot_dimension_numbers<[1], [0], [0], [1], [0, 0, 1, 1], [], []>} : vector<64x512xbf16>, vector<512x128xbf16>, vector<64x128xf32> -> vector<64x128xf32>
    %19 = arith.addf %12, %18 : vector<64x128xf32>
    %c0_24 = arith.constant 0 : index
    %c1_25 = arith.constant 1 : index
    %c1_26 = arith.constant 1 : index
    %c0_27 = arith.constant 0 : index
    %20 = vector.load %arg1[%c0_24, %c1_25, %c1_26, %c0_27] : memref<1x9x9x512xbf16, #tpu.memory_space<vmem>>, vector<1x8x8x512xbf16>
    %21 = vector.shape_cast %20 : vector<1x8x8x512xbf16> to vector<8x8x512xbf16>
    %22 = vector.shape_cast %21 : vector<8x8x512xbf16> to vector<64x512xbf16>
    %c1_28 = arith.constant 1 : index
    %c1_29 = arith.constant 1 : index
    %c0_30 = arith.constant 0 : index
    %c0_31 = arith.constant 0 : index
    %23 = vector.load %arg2[%c1_28, %c1_29, %c0_30, %c0_31] : memref<2x2x512x128xbf16, #tpu.memory_space<vmem>>, vector<1x1x512x128xbf16>
    %24 = vector.shape_cast %23 : vector<1x1x512x128xbf16> to vector<512x128xbf16>
    %cst_32 = arith.constant dense<0.000000e+00> : vector<64x128xf32>
    %25 = tpu.matmul %22, %24, %cst_32 {dimension_numbers = #tpu.dot_dimension_numbers<[1], [0], [0], [1], [0, 0, 1, 1], [], []>} : vector<64x512xbf16>, vector<512x128xbf16>, vector<64x128xf32> -> vector<64x128xf32>
    %26 = arith.addf %19, %25 : vector<64x128xf32>
    %c0_33 = arith.constant 0 : index
    %c0_34 = arith.constant 0 : index
    %27 = vector.load %arg3[%c0_33, %c0_34] : memref<1x128xf32, #tpu.memory_space<vmem>>, vector<1x128xf32>
    %28 = vector.broadcast %27 : vector<1x128xf32> to vector<64x128xf32>
    %29 = arith.addf %26, %28 : vector<64x128xf32>
    %cst_35 = arith.constant 0.000000e+00 : f32
    %30 = vector.broadcast %cst_35 : f32 to vector<64x128xf32>
    %31 = arith.maximumf %29, %30 : vector<64x128xf32>
    %32 = arith.truncf %31 : vector<64x128xf32> to vector<64x128xbf16>
    %c0_36 = arith.constant 0 : index
    %c0_37 = arith.constant 0 : index
    %c0_38 = arith.constant 0 : index
    %33 = vector.load %arg4[%c0_36, %c0_37, %c0_38] : memref<1x64x128xbf16, #tpu.memory_space<vmem>>, vector<1x64x128xbf16>
    %34 = vector.shape_cast %33 : vector<1x64x128xbf16> to vector<64x128xbf16>
    %35 = vector.shape_cast %32 : vector<64x128xbf16> to vector<1x64x128xbf16>
    tpu.vector_store %arg4[%c0_36, %c0_37, %c0_38], %35 {strides = array<i32>} : memref<1x64x128xbf16, #tpu.memory_space<vmem>>, vector<1x64x128xbf16>,
    return
  }
  func.func @transform_0(%arg0: i32) -> (i32, i32, i32, i32) {
    %c0_i32 = arith.constant 0 : i32
    %c0_i32_0 = arith.constant 0 : i32
    %c0_i32_1 = arith.constant 0 : i32
    %c0_i32_2 = arith.constant 0 : i32
    return %arg0, %c0_i32, %c0_i32_0, %c0_i32_1 : i32, i32, i32, i32
  }
  func.func @transform_1(%arg0: i32) -> (i32, i32, i32, i32) {
    %c0_i32 = arith.constant 0 : i32
    %c0_i32_0 = arith.constant 0 : i32
    %c0_i32_1 = arith.constant 0 : i32
    %c0_i32_2 = arith.constant 0 : i32
    %c0_i32_3 = arith.constant 0 : i32
    return %c0_i32, %c0_i32_0, %c0_i32_1, %c0_i32_2 : i32, i32, i32, i32
  }
  func.func @transform_2(%arg0: i32) -> (i32, i32) {
    %c0_i32 = arith.constant 0 : i32
    %c0_i32_0 = arith.constant 0 : i32
    %c0_i32_1 = arith.constant 0 : i32
    return %c0_i32, %c0_i32_0 : i32, i32
  }
  func.func @transform_3(%arg0: i32) -> (i32, i32, i32) {
    %c0_i32 = arith.constant 0 : i32
    %c0_i32_0 = arith.constant 0 : i32
    %c0_i32_1 = arith.constant 0 : i32
    return %arg0, %c0_i32, %c0_i32_0 : i32, i32, i32
  }
}

module attributes {stable_mosaic.version = 11 : i64} {
  func.func @_xattn_kernel(%arg0: i32, %arg1: i32, %arg2: memref<1x64x128xbf16, #tpu.memory_space<vmem>>, %arg3: memref<1x64x128xbf16, #tpu.memory_space<vmem>>, %arg4: memref<1x64x128xbf16, #tpu.memory_space<vmem>>) attributes {dimension_semantics = [#tpu.dimension_semantics<parallel>, #tpu.dimension_semantics<arbitrary>], iteration_bounds = array<i64: 4, 1>, scalar_prefetch = 0 : i64, scratch_operands = 0 : i64, tpu.core_type = #tpu.core_type<tc>, window_params = [{transform_indices = @transform_0, window_bounds = array<i64: 1, 64, 128>}, {transform_indices = @transform_1, window_bounds = array<i64: 1, 64, 128>}, {transform_indices = @transform_2, window_bounds = array<i64: 1, 64, 128>}]} {
    %c0 = arith.constant 0 : index
    %c0_0 = arith.constant 0 : index
    %c0_1 = arith.constant 0 : index
    %0 = vector.load %arg2[%c0, %c0_0, %c0_1] : memref<1x64x128xbf16, #tpu.memory_space<vmem>>, vector<1x64x128xbf16>
    %1 = vector.shape_cast %0 : vector<1x64x128xbf16> to vector<64x128xbf16>
    %c0_2 = arith.constant 0 : index
    %c0_3 = arith.constant 0 : index
    %c0_4 = arith.constant 0 : index
    %2 = vector.load %arg3[%c0_2, %c0_3, %c0_4] : memref<1x64x128xbf16, #tpu.memory_space<vmem>>, vector<1x64x128xbf16>
    %3 = vector.shape_cast %2 : vector<1x64x128xbf16> to vector<64x128xbf16>
    %4 = arith.extf %1 : vector<64x128xbf16> to vector<64x128xf32>
    %cst = arith.constant 0.0883883461 : f32
    %5 = vector.broadcast %cst : f32 to vector<64x128xf32>
    %6 = arith.mulf %4, %5 : vector<64x128xf32>
    %7 = arith.truncf %6 : vector<64x128xf32> to vector<64x128xbf16>
    "tpu.trace_start"() <{level = 10 : i32, message = "qd,kd->qk"}> : () -> ()
    %cst_5 = arith.constant dense<0.000000e+00> : vector<64x64xf32>
    %8 = tpu.matmul %7, %3, %cst_5 {dimension_numbers = #tpu.dot_dimension_numbers<[1], [1], [0], [0], [0, 0, 1, 0], [], []>} : vector<64x128xbf16>, vector<64x128xbf16>, vector<64x64xf32> -> vector<64x64xf32>
    "tpu.trace_stop"() : () -> ()
    %cst_6 = arith.constant dense<0xFF800000> : vector<64xf32>
    %9 = vector.multi_reduction <maximumf>, %8, %cst_6 [1] : vector<64x64xf32> to vector<64xf32>
    %10 = vector.shape_cast %9 : vector<64xf32> to vector<64x1xf32>
    %11 = vector.broadcast %10 : vector<64x1xf32> to vector<64x64xf32>
    %12 = arith.subf %8, %11 : vector<64x64xf32>
    %13 = math.exp %12 : vector<64x64xf32>
    %cst_7 = arith.constant dense<0.000000e+00> : vector<64xf32>
    %14 = vector.multi_reduction <add>, %13, %cst_7 [1] : vector<64x64xf32> to vector<64xf32>
    %15 = vector.shape_cast %14 : vector<64xf32> to vector<64x1xf32>
    %16 = arith.truncf %13 : vector<64x64xf32> to vector<64x64xbf16>
    "tpu.trace_start"() <{level = 10 : i32, message = "qk,kd->qd"}> : () -> ()
    %cst_8 = arith.constant dense<0.000000e+00> : vector<64x128xf32>
    %17 = tpu.matmul %16, %3, %cst_8 {dimension_numbers = #tpu.dot_dimension_numbers<[1], [0], [0], [1], [0, 0, 1, 1], [], []>} : vector<64x64xbf16>, vector<64x128xbf16>, vector<64x128xf32> -> vector<64x128xf32>
    "tpu.trace_stop"() : () -> ()
    %18 = tpu.reciprocal %15 {approx = true} : vector<64x1xf32> -> vector<64x1xf32>
    %19 = vector.broadcast %18 : vector<64x1xf32> to vector<64x128xf32>
    %20 = arith.mulf %17, %19 : vector<64x128xf32>
    %21 = arith.extf %1 : vector<64x128xbf16> to vector<64x128xf32>
    %22 = arith.addf %21, %20 : vector<64x128xf32>
    %23 = arith.truncf %22 : vector<64x128xf32> to vector<64x128xbf16>
    %c0_9 = arith.constant 0 : index
    %c0_10 = arith.constant 0 : index
    %c0_11 = arith.constant 0 : index
    %24 = vector.load %arg4[%c0_9, %c0_10, %c0_11] : memref<1x64x128xbf16, #tpu.memory_space<vmem>>, vector<1x64x128xbf16>
    %25 = vector.shape_cast %24 : vector<1x64x128xbf16> to vector<64x128xbf16>
    %26 = vector.shape_cast %23 : vector<64x128xbf16> to vector<1x64x128xbf16>
    tpu.vector_store %arg4[%c0_9, %c0_10, %c0_11], %26 {strides = array<i32>} : memref<1x64x128xbf16, #tpu.memory_space<vmem>>, vector<1x64x128xbf16>,
    return
  }
  func.func @transform_0(%arg0: i32, %arg1: i32) -> (i32, i32, i32) {
    %c0_i32 = arith.constant 0 : i32
    %c0_i32_0 = arith.constant 0 : i32
    return %arg0, %arg1, %c0_i32 : i32, i32, i32
  }
  func.func @transform_1(%arg0: i32, %arg1: i32) -> (i32, i32, i32) {
    %c0_i32 = arith.constant 0 : i32
    %c0_i32_0 = arith.constant 0 : i32
    %c0_i32_1 = arith.constant 0 : i32
    return %arg0, %c0_i32, %c0_i32_0 : i32, i32, i32
  }
  func.func @transform_2(%arg0: i32, %arg1: i32) -> (i32, i32, i32) {
    %c0_i32 = arith.constant 0 : i32
    %c0_i32_0 = arith.constant 0 : i32
    return %arg0, %arg1, %c0_i32 : i32, i32, i32
  }
}

module attributes {stable_mosaic.version = 11 : i64} {
  func.func @_corr_flow_kernel(%arg0: i32, %arg1: i32, %arg2: memref<1x64x128xbf16, #tpu.memory_space<vmem>>, %arg3: memref<1x64x128xbf16, #tpu.memory_space<vmem>>, %arg4: memref<3x64xf32, #tpu.memory_space<vmem>>, %arg5: memref<2x64xf32, #tpu.memory_space<vmem>>, %arg6: memref<1x2x64xf32, #tpu.memory_space<vmem>>) attributes {dimension_semantics = [#tpu.dimension_semantics<parallel>, #tpu.dimension_semantics<arbitrary>], iteration_bounds = array<i64: 2, 1>, scalar_prefetch = 0 : i64, scratch_operands = 0 : i64, tpu.core_type = #tpu.core_type<tc>, window_params = [{transform_indices = @transform_0, window_bounds = array<i64: 1, 64, 128>}, {transform_indices = @transform_1, window_bounds = array<i64: 1, 64, 128>}, {pipeline_mode = #tpu.pipeline_mode<synchronous>, transform_indices = @transform_2, window_bounds = array<i64: 3, 64>}, {transform_indices = @transform_3, window_bounds = array<i64: 2, 64>}, {transform_indices = @transform_4, window_bounds = array<i64: 1, 2, 64>}]} {
    %c0 = arith.constant 0 : index
    %c0_0 = arith.constant 0 : index
    %c0_1 = arith.constant 0 : index
    %0 = vector.load %arg2[%c0, %c0_0, %c0_1] : memref<1x64x128xbf16, #tpu.memory_space<vmem>>, vector<1x64x128xbf16>
    %1 = vector.shape_cast %0 : vector<1x64x128xbf16> to vector<64x128xbf16>
    %c0_2 = arith.constant 0 : index
    %c0_3 = arith.constant 0 : index
    %c0_4 = arith.constant 0 : index
    %2 = vector.load %arg3[%c0_2, %c0_3, %c0_4] : memref<1x64x128xbf16, #tpu.memory_space<vmem>>, vector<1x64x128xbf16>
    %3 = vector.shape_cast %2 : vector<1x64x128xbf16> to vector<64x128xbf16>
    %4 = arith.extf %1 : vector<64x128xbf16> to vector<64x128xf32>
    %cst = arith.constant 0.0883883461 : f32
    %5 = vector.broadcast %cst : f32 to vector<64x128xf32>
    %6 = arith.mulf %4, %5 : vector<64x128xf32>
    %7 = arith.truncf %6 : vector<64x128xf32> to vector<64x128xbf16>
    "tpu.trace_start"() <{level = 10 : i32, message = "qd,kd->qk"}> : () -> ()
    %cst_5 = arith.constant dense<0.000000e+00> : vector<64x64xf32>
    %8 = tpu.matmul %7, %3, %cst_5 {dimension_numbers = #tpu.dot_dimension_numbers<[1], [1], [0], [0], [0, 0, 1, 0], [], []>} : vector<64x128xbf16>, vector<64x128xbf16>, vector<64x64xf32> -> vector<64x64xf32>
    "tpu.trace_stop"() : () -> ()
    %cst_6 = arith.constant dense<0xFF800000> : vector<64xf32>
    %9 = vector.multi_reduction <maximumf>, %8, %cst_6 [1] : vector<64x64xf32> to vector<64xf32>
    %10 = vector.shape_cast %9 : vector<64xf32> to vector<64x1xf32>
    %11 = vector.broadcast %10 : vector<64x1xf32> to vector<64x64xf32>
    %12 = arith.subf %8, %11 : vector<64x64xf32>
    %13 = math.exp %12 : vector<64x64xf32>
    %c0_7 = arith.constant 0 : index
    %c0_8 = arith.constant 0 : index
    %14 = vector.load %arg4[%c0_7, %c0_8] : memref<3x64xf32, #tpu.memory_space<vmem>>, vector<3x64xf32>
    "tpu.trace_start"() <{level = 10 : i32, message = "tk,qk->tq"}> : () -> ()
    %cst_9 = arith.constant dense<0.000000e+00> : vector<3x64xf32>
    %15 = tpu.matmul %14, %13, %cst_9 {dimension_numbers = #tpu.dot_dimension_numbers<[1], [1], [0], [0], [0, 0, 1, 0], [], []>} : vector<3x64xf32>, vector<64x64xf32>, vector<3x64xf32> -> vector<3x64xf32>
    "tpu.trace_stop"() : () -> ()
    %16 = vector.extract_strided_slice %15 {offsets = [0, 0], sizes = [2, 64], strides = [1, 1]} : vector<3x64xf32> to vector<2x64xf32>
    %17 = vector.extract_strided_slice %15 {offsets = [2, 0], sizes = [1, 64], strides = [1, 1]} : vector<3x64xf32> to vector<1x64xf32>
    %18 = tpu.reciprocal %17 {approx = true} : vector<1x64xf32> -> vector<1x64xf32>
    %19 = vector.broadcast %18 : vector<1x64xf32> to vector<2x64xf32>
    %20 = arith.mulf %16, %19 : vector<2x64xf32>
    %c0_10 = arith.constant 0 : index
    %c0_11 = arith.constant 0 : index
    %21 = vector.load %arg5[%c0_10, %c0_11] : memref<2x64xf32, #tpu.memory_space<vmem>>, vector<2x64xf32>
    %22 = arith.subf %20, %21 : vector<2x64xf32>
    %c0_12 = arith.constant 0 : index
    %c0_13 = arith.constant 0 : index
    %c0_14 = arith.constant 0 : index
    %23 = vector.load %arg6[%c0_12, %c0_13, %c0_14] : memref<1x2x64xf32, #tpu.memory_space<vmem>>, vector<1x2x64xf32>
    %24 = vector.shape_cast %23 : vector<1x2x64xf32> to vector<2x64xf32>
    %25 = vector.shape_cast %22 : vector<2x64xf32> to vector<1x2x64xf32>
    tpu.vector_store %arg6[%c0_12, %c0_13, %c0_14], %25 {strides = array<i32>} : memref<1x2x64xf32, #tpu.memory_space<vmem>>, vector<1x2x64xf32>,
    return
  }
  func.func @transform_0(%arg0: i32, %arg1: i32) -> (i32, i32, i32) {
    %c0_i32 = arith.constant 0 : i32
    %c0_i32_0 = arith.constant 0 : i32
    return %arg0, %arg1, %c0_i32 : i32, i32, i32
  }
  func.func @transform_1(%arg0: i32, %arg1: i32) -> (i32, i32, i32) {
    %c0_i32 = arith.constant 0 : i32
    %c0_i32_0 = arith.constant 0 : i32
    %c0_i32_1 = arith.constant 0 : i32
    return %arg0, %c0_i32, %c0_i32_0 : i32, i32, i32
  }
  func.func @transform_2(%arg0: i32, %arg1: i32) -> (i32, i32) {
    %c0_i32 = arith.constant 0 : i32
    %c0_i32_0 = arith.constant 0 : i32
    %c0_i32_1 = arith.constant 0 : i32
    return %c0_i32, %c0_i32_0 : i32, i32
  }
  func.func @transform_3(%arg0: i32, %arg1: i32) -> (i32, i32) {
    %c0_i32 = arith.constant 0 : i32
    %c0_i32_0 = arith.constant 0 : i32
    return %c0_i32, %arg1 : i32, i32
  }
  func.func @transform_4(%arg0: i32, %arg1: i32) -> (i32, i32, i32) {
    %c0_i32 = arith.constant 0 : i32
    %c0_i32_0 = arith.constant 0 : i32
    return %arg0, %c0_i32, %arg1 : i32, i32, i32
  }
}

module attributes {stable_mosaic.version = 11 : i64} {
  func.func @_xattn_kernel(%arg0: i32, %arg1: i32, %arg2: memref<1x256x128xbf16, #tpu.memory_space<vmem>>, %arg3: memref<1x256x128xbf16, #tpu.memory_space<vmem>>, %arg4: memref<1x256x128xbf16, #tpu.memory_space<vmem>>) attributes {dimension_semantics = [#tpu.dimension_semantics<parallel>, #tpu.dimension_semantics<arbitrary>], iteration_bounds = array<i64: 4, 1>, scalar_prefetch = 0 : i64, scratch_operands = 0 : i64, tpu.core_type = #tpu.core_type<tc>, window_params = [{transform_indices = @transform_0, window_bounds = array<i64: 1, 256, 128>}, {transform_indices = @transform_1, window_bounds = array<i64: 1, 256, 128>}, {transform_indices = @transform_2, window_bounds = array<i64: 1, 256, 128>}]} {
    %c0 = arith.constant 0 : index
    %c0_0 = arith.constant 0 : index
    %c0_1 = arith.constant 0 : index
    %0 = vector.load %arg2[%c0, %c0_0, %c0_1] : memref<1x256x128xbf16, #tpu.memory_space<vmem>>, vector<1x256x128xbf16>
    %1 = vector.shape_cast %0 : vector<1x256x128xbf16> to vector<256x128xbf16>
    %c0_2 = arith.constant 0 : index
    %c0_3 = arith.constant 0 : index
    %c0_4 = arith.constant 0 : index
    %2 = vector.load %arg3[%c0_2, %c0_3, %c0_4] : memref<1x256x128xbf16, #tpu.memory_space<vmem>>, vector<1x256x128xbf16>
    %3 = vector.shape_cast %2 : vector<1x256x128xbf16> to vector<256x128xbf16>
    %4 = arith.extf %1 : vector<256x128xbf16> to vector<256x128xf32>
    %cst = arith.constant 0.0883883461 : f32
    %5 = vector.broadcast %cst : f32 to vector<256x128xf32>
    %6 = arith.mulf %4, %5 : vector<256x128xf32>
    %7 = arith.truncf %6 : vector<256x128xf32> to vector<256x128xbf16>
    "tpu.trace_start"() <{level = 10 : i32, message = "qd,kd->qk"}> : () -> ()
    %cst_5 = arith.constant dense<0.000000e+00> : vector<256x256xf32>
    %8 = tpu.matmul %7, %3, %cst_5 {dimension_numbers = #tpu.dot_dimension_numbers<[1], [1], [0], [0], [0, 0, 1, 0], [], []>} : vector<256x128xbf16>, vector<256x128xbf16>, vector<256x256xf32> -> vector<256x256xf32>
    "tpu.trace_stop"() : () -> ()
    %cst_6 = arith.constant dense<0xFF800000> : vector<256xf32>
    %9 = vector.multi_reduction <maximumf>, %8, %cst_6 [1] : vector<256x256xf32> to vector<256xf32>
    %10 = vector.shape_cast %9 : vector<256xf32> to vector<256x1xf32>
    %11 = vector.broadcast %10 : vector<256x1xf32> to vector<256x256xf32>
    %12 = arith.subf %8, %11 : vector<256x256xf32>
    %13 = math.exp %12 : vector<256x256xf32>
    %cst_7 = arith.constant dense<0.000000e+00> : vector<256xf32>
    %14 = vector.multi_reduction <add>, %13, %cst_7 [1] : vector<256x256xf32> to vector<256xf32>
    %15 = vector.shape_cast %14 : vector<256xf32> to vector<256x1xf32>
    %16 = arith.truncf %13 : vector<256x256xf32> to vector<256x256xbf16>
    "tpu.trace_start"() <{level = 10 : i32, message = "qk,kd->qd"}> : () -> ()
    %cst_8 = arith.constant dense<0.000000e+00> : vector<256x128xf32>
    %17 = tpu.matmul %16, %3, %cst_8 {dimension_numbers = #tpu.dot_dimension_numbers<[1], [0], [0], [1], [0, 0, 1, 1], [], []>} : vector<256x256xbf16>, vector<256x128xbf16>, vector<256x128xf32> -> vector<256x128xf32>
    "tpu.trace_stop"() : () -> ()
    %18 = tpu.reciprocal %15 {approx = true} : vector<256x1xf32> -> vector<256x1xf32>
    %19 = vector.broadcast %18 : vector<256x1xf32> to vector<256x128xf32>
    %20 = arith.mulf %17, %19 : vector<256x128xf32>
    %21 = arith.extf %1 : vector<256x128xbf16> to vector<256x128xf32>
    %22 = arith.addf %21, %20 : vector<256x128xf32>
    %23 = arith.truncf %22 : vector<256x128xf32> to vector<256x128xbf16>
    %c0_9 = arith.constant 0 : index
    %c0_10 = arith.constant 0 : index
    %c0_11 = arith.constant 0 : index
    %24 = vector.load %arg4[%c0_9, %c0_10, %c0_11] : memref<1x256x128xbf16, #tpu.memory_space<vmem>>, vector<1x256x128xbf16>
    %25 = vector.shape_cast %24 : vector<1x256x128xbf16> to vector<256x128xbf16>
    %26 = vector.shape_cast %23 : vector<256x128xbf16> to vector<1x256x128xbf16>
    tpu.vector_store %arg4[%c0_9, %c0_10, %c0_11], %26 {strides = array<i32>} : memref<1x256x128xbf16, #tpu.memory_space<vmem>>, vector<1x256x128xbf16>,
    return
  }
  func.func @transform_0(%arg0: i32, %arg1: i32) -> (i32, i32, i32) {
    %c0_i32 = arith.constant 0 : i32
    %c0_i32_0 = arith.constant 0 : i32
    return %arg0, %arg1, %c0_i32 : i32, i32, i32
  }
  func.func @transform_1(%arg0: i32, %arg1: i32) -> (i32, i32, i32) {
    %c0_i32 = arith.constant 0 : i32
    %c0_i32_0 = arith.constant 0 : i32
    %c0_i32_1 = arith.constant 0 : i32
    return %arg0, %c0_i32, %c0_i32_0 : i32, i32, i32
  }
  func.func @transform_2(%arg0: i32, %arg1: i32) -> (i32, i32, i32) {
    %c0_i32 = arith.constant 0 : i32
    %c0_i32_0 = arith.constant 0 : i32
    return %arg0, %arg1, %c0_i32 : i32, i32, i32
  }
}

module attributes {stable_mosaic.version = 11 : i64} {
  func.func @_corr_flow_kernel(%arg0: i32, %arg1: i32, %arg2: memref<1x256x128xbf16, #tpu.memory_space<vmem>>, %arg3: memref<1x256x128xbf16, #tpu.memory_space<vmem>>, %arg4: memref<3x256xf32, #tpu.memory_space<vmem>>, %arg5: memref<2x256xf32, #tpu.memory_space<vmem>>, %arg6: memref<1x2x256xf32, #tpu.memory_space<vmem>>) attributes {dimension_semantics = [#tpu.dimension_semantics<parallel>, #tpu.dimension_semantics<arbitrary>], iteration_bounds = array<i64: 2, 1>, scalar_prefetch = 0 : i64, scratch_operands = 0 : i64, tpu.core_type = #tpu.core_type<tc>, window_params = [{transform_indices = @transform_0, window_bounds = array<i64: 1, 256, 128>}, {transform_indices = @transform_1, window_bounds = array<i64: 1, 256, 128>}, {pipeline_mode = #tpu.pipeline_mode<synchronous>, transform_indices = @transform_2, window_bounds = array<i64: 3, 256>}, {transform_indices = @transform_3, window_bounds = array<i64: 2, 256>}, {transform_indices = @transform_4, window_bounds = array<i64: 1, 2, 256>}]} {
    %c0 = arith.constant 0 : index
    %c0_0 = arith.constant 0 : index
    %c0_1 = arith.constant 0 : index
    %0 = vector.load %arg2[%c0, %c0_0, %c0_1] : memref<1x256x128xbf16, #tpu.memory_space<vmem>>, vector<1x256x128xbf16>
    %1 = vector.shape_cast %0 : vector<1x256x128xbf16> to vector<256x128xbf16>
    %c0_2 = arith.constant 0 : index
    %c0_3 = arith.constant 0 : index
    %c0_4 = arith.constant 0 : index
    %2 = vector.load %arg3[%c0_2, %c0_3, %c0_4] : memref<1x256x128xbf16, #tpu.memory_space<vmem>>, vector<1x256x128xbf16>
    %3 = vector.shape_cast %2 : vector<1x256x128xbf16> to vector<256x128xbf16>
    %4 = arith.extf %1 : vector<256x128xbf16> to vector<256x128xf32>
    %cst = arith.constant 0.0883883461 : f32
    %5 = vector.broadcast %cst : f32 to vector<256x128xf32>
    %6 = arith.mulf %4, %5 : vector<256x128xf32>
    %7 = arith.truncf %6 : vector<256x128xf32> to vector<256x128xbf16>
    "tpu.trace_start"() <{level = 10 : i32, message = "qd,kd->qk"}> : () -> ()
    %cst_5 = arith.constant dense<0.000000e+00> : vector<256x256xf32>
    %8 = tpu.matmul %7, %3, %cst_5 {dimension_numbers = #tpu.dot_dimension_numbers<[1], [1], [0], [0], [0, 0, 1, 0], [], []>} : vector<256x128xbf16>, vector<256x128xbf16>, vector<256x256xf32> -> vector<256x256xf32>
    "tpu.trace_stop"() : () -> ()
    %cst_6 = arith.constant dense<0xFF800000> : vector<256xf32>
    %9 = vector.multi_reduction <maximumf>, %8, %cst_6 [1] : vector<256x256xf32> to vector<256xf32>
    %10 = vector.shape_cast %9 : vector<256xf32> to vector<256x1xf32>
    %11 = vector.broadcast %10 : vector<256x1xf32> to vector<256x256xf32>
    %12 = arith.subf %8, %11 : vector<256x256xf32>
    %13 = math.exp %12 : vector<256x256xf32>
    %c0_7 = arith.constant 0 : index
    %c0_8 = arith.constant 0 : index
    %14 = vector.load %arg4[%c0_7, %c0_8] : memref<3x256xf32, #tpu.memory_space<vmem>>, vector<3x256xf32>
    "tpu.trace_start"() <{level = 10 : i32, message = "tk,qk->tq"}> : () -> ()
    %cst_9 = arith.constant dense<0.000000e+00> : vector<3x256xf32>
    %15 = tpu.matmul %14, %13, %cst_9 {dimension_numbers = #tpu.dot_dimension_numbers<[1], [1], [0], [0], [0, 0, 1, 0], [], []>} : vector<3x256xf32>, vector<256x256xf32>, vector<3x256xf32> -> vector<3x256xf32>
    "tpu.trace_stop"() : () -> ()
    %16 = vector.extract_strided_slice %15 {offsets = [0, 0], sizes = [2, 256], strides = [1, 1]} : vector<3x256xf32> to vector<2x256xf32>
    %17 = vector.extract_strided_slice %15 {offsets = [2, 0], sizes = [1, 256], strides = [1, 1]} : vector<3x256xf32> to vector<1x256xf32>
    %18 = tpu.reciprocal %17 {approx = true} : vector<1x256xf32> -> vector<1x256xf32>
    %19 = vector.broadcast %18 : vector<1x256xf32> to vector<2x256xf32>
    %20 = arith.mulf %16, %19 : vector<2x256xf32>
    %c0_10 = arith.constant 0 : index
    %c0_11 = arith.constant 0 : index
    %21 = vector.load %arg5[%c0_10, %c0_11] : memref<2x256xf32, #tpu.memory_space<vmem>>, vector<2x256xf32>
    %22 = arith.subf %20, %21 : vector<2x256xf32>
    %c0_12 = arith.constant 0 : index
    %c0_13 = arith.constant 0 : index
    %c0_14 = arith.constant 0 : index
    %23 = vector.load %arg6[%c0_12, %c0_13, %c0_14] : memref<1x2x256xf32, #tpu.memory_space<vmem>>, vector<1x2x256xf32>
    %24 = vector.shape_cast %23 : vector<1x2x256xf32> to vector<2x256xf32>
    %25 = vector.shape_cast %22 : vector<2x256xf32> to vector<1x2x256xf32>
    tpu.vector_store %arg6[%c0_12, %c0_13, %c0_14], %25 {strides = array<i32>} : memref<1x2x256xf32, #tpu.memory_space<vmem>>, vector<1x2x256xf32>,
    return
  }
  func.func @transform_0(%arg0: i32, %arg1: i32) -> (i32, i32, i32) {
    %c0_i32 = arith.constant 0 : i32
    %c0_i32_0 = arith.constant 0 : i32
    return %arg0, %arg1, %c0_i32 : i32, i32, i32
  }
  func.func @transform_1(%arg0: i32, %arg1: i32) -> (i32, i32, i32) {
    %c0_i32 = arith.constant 0 : i32
    %c0_i32_0 = arith.constant 0 : i32
    %c0_i32_1 = arith.constant 0 : i32
    return %arg0, %c0_i32, %c0_i32_0 : i32, i32, i32
  }
  func.func @transform_2(%arg0: i32, %arg1: i32) -> (i32, i32) {
    %c0_i32 = arith.constant 0 : i32
    %c0_i32_0 = arith.constant 0 : i32
    %c0_i32_1 = arith.constant 0 : i32
    return %c0_i32, %c0_i32_0 : i32, i32
  }
  func.func @transform_3(%arg0: i32, %arg1: i32) -> (i32, i32) {
    %c0_i32 = arith.constant 0 : i32
    %c0_i32_0 = arith.constant 0 : i32
    return %c0_i32, %arg1 : i32, i32
  }
  func.func @transform_4(%arg0: i32, %arg1: i32) -> (i32, i32, i32) {
    %c0_i32 = arith.constant 0 : i32
    %c0_i32_0 = arith.constant 0 : i32
    return %arg0, %c0_i32, %arg1 : i32, i32, i32
  }
}

module attributes {stable_mosaic.version = 11 : i64} {
  func.func @_head_kernel(%arg0: i32, %arg1: memref<512x640xbf16, #tpu.memory_space<vmem>>, %arg2: memref<8x640xbf16, #tpu.memory_space<vmem>>, %arg3: memref<8x1xf32, #tpu.memory_space<vmem>>, %arg4: memref<8x512xf32, #tpu.memory_space<vmem>>) attributes {dimension_semantics = [#tpu.dimension_semantics<parallel>], iteration_bounds = array<i64: 1>, scalar_prefetch = 0 : i64, scratch_operands = 0 : i64, tpu.core_type = #tpu.core_type<tc>, window_params = [{transform_indices = @transform_0, window_bounds = array<i64: 512, 640>}, {pipeline_mode = #tpu.pipeline_mode<synchronous>, transform_indices = @transform_1, window_bounds = array<i64: 8, 640>}, {pipeline_mode = #tpu.pipeline_mode<synchronous>, transform_indices = @transform_2, window_bounds = array<i64: 8, 1>}, {transform_indices = @transform_3, window_bounds = array<i64: 8, 512>}]} {
    %c0 = arith.constant 0 : index
    %c0_0 = arith.constant 0 : index
    %0 = vector.load %arg2[%c0, %c0_0] : memref<8x640xbf16, #tpu.memory_space<vmem>>, vector<8x640xbf16>
    %c0_1 = arith.constant 0 : index
    %c0_2 = arith.constant 0 : index
    %1 = vector.load %arg1[%c0_1, %c0_2] : memref<512x640xbf16, #tpu.memory_space<vmem>>, vector<512x640xbf16>
    "tpu.trace_start"() <{level = 10 : i32, message = "nk,mk->nm"}> : () -> ()
    %cst = arith.constant dense<0.000000e+00> : vector<8x512xf32>
    %2 = tpu.matmul %0, %1, %cst {dimension_numbers = #tpu.dot_dimension_numbers<[1], [1], [0], [0], [0, 0, 1, 0], [], []>} : vector<8x640xbf16>, vector<512x640xbf16>, vector<8x512xf32> -> vector<8x512xf32>
    "tpu.trace_stop"() : () -> ()
    %c0_3 = arith.constant 0 : index
    %c0_4 = arith.constant 0 : index
    %3 = vector.load %arg3[%c0_3, %c0_4] : memref<8x1xf32, #tpu.memory_space<vmem>>, vector<8x1xf32>
    %4 = vector.broadcast %3 : vector<8x1xf32> to vector<8x512xf32>
    %5 = arith.addf %2, %4 : vector<8x512xf32>
    %c0_5 = arith.constant 0 : index
    %c0_6 = arith.constant 0 : index
    %6 = vector.load %arg4[%c0_5, %c0_6] : memref<8x512xf32, #tpu.memory_space<vmem>>, vector<8x512xf32>
    tpu.vector_store %arg4[%c0_5, %c0_6], %5 {strides = array<i32>} : memref<8x512xf32, #tpu.memory_space<vmem>>, vector<8x512xf32>,
    return
  }
  func.func @transform_0(%arg0: i32) -> (i32, i32) {
    %c0_i32 = arith.constant 0 : i32
    %c0_i32_0 = arith.constant 0 : i32
    return %arg0, %c0_i32 : i32, i32
  }
  func.func @transform_1(%arg0: i32) -> (i32, i32) {
    %c0_i32 = arith.constant 0 : i32
    %c0_i32_0 = arith.constant 0 : i32
    %c0_i32_1 = arith.constant 0 : i32
    return %c0_i32, %c0_i32_0 : i32, i32
  }
  func.func @transform_2(%arg0: i32) -> (i32, i32) {
    %c0_i32 = arith.constant 0 : i32
    %c0_i32_0 = arith.constant 0 : i32
    %c0_i32_1 = arith.constant 0 : i32
    return %c0_i32, %c0_i32_0 : i32, i32
  }
  func.func @transform_3(%arg0: i32) -> (i32, i32) {
    %c0_i32 = arith.constant 0 : i32
    %c0_i32_0 = arith.constant 0 : i32
    return %c0_i32, %arg0 : i32, i32
  }
}

</mosaic_0001>

<bundles_post_ra>
// kernel: monofusion_forward.7
= control target key start
LH: loop header
LB: loop body
LE: loop exit
PB: predicated region body
PF: predicated region fallthrough
CT: control target
= control target key end

     0   :  { %s2850_s12 = smov 0   ;;  %s3329_s0 = inlined_call_operand.vmem [shape: bf16[4,17,17,128], index: 0, kind: input, shape index: {}]   ;;  %s3330_s1 = inlined_call_operand.vmem [shape: bf16[2,2,128,128], index: 1, kind: input, shape index: {}]   ;;  %s3331_s2 = inlined_call_operand.vmem [shape: f32[1,128], index: 2, kind: input, shape index: {}]   ;;  %s3332_s3 = inlined_call_operand.vmem [shape: bf16[4,256,128], index: 3, kind: output, shape index: {}]  }
   0x1 LB: > { %s2257_s13 = sadd.s32 4294967295, %s2828_s12   ;;  %p2261_p0 = scmp.ge.s32.totalorder %s2828_s12, 1  ;;  %s2828_s12 = sphi %s2850_s12, %s13_s12  }
   0x2   : > { %p137_p1 = scmp.lt.s32.totalorder %s2828_s12, 5 }
   0x4   : > { %p138_p2 = pnand %p2261_p0, %p137_p1 }
   0x5   : > { %p161_p3 = scmp.lt.s32.totalorder (!%p138_p2), %s2257_s13, 3 }
   0x6   : > { %141 = sbr.rel (%p138_p2) target bundleno = 436 (0x1b4), region = 32 }
   0xb   : > { %v2683_v0 = vld [vmem:[%s3330_s1 + $0x78] sm:$0xff]  ;;  %v2682_v4 = vld [vmem:[%s3330_s1 + $0x70] sm:$0xff]  ;;  %s3336_s13 = smov (!%p161_p3, %s2257_s13), 3  ;;  %v2681_v8 = vld [vmem:[%s3330_s1 + $0x68] sm:$0xff]  ;;  %vm235_vm0 = vsmask.f32 3328 }
   0xc   : > { %v2675_v1 = vld [vmem:[%s3330_s1 + $0x38] sm:$0xff]  ;;  %751 = vmatpush.bf16.msra.mxu0 %v2683_v0  ;;  %v2674_v5 = vld [vmem:[%s3330_s1 + $0x30] sm:$0xff]  ;;  %s2811_s30 = smul.u32 204, %s3336_s13  ;;  %v2673_v9 = vld [vmem:[%s3330_s1 + $0x28] sm:$0xff]  ;;  %vm236_vm1 = vsmask.f32 7440 }
   0xd   : > { %v2707_v2 = vld [vmem:[%s3330_s1 + $0xb8] sm:$0xff]  ;;  %984 = vmatpush.bf16.msra.mxu1 %v2675_v1  ;;  %v2706_v6 = vld [vmem:[%s3330_s1 + $0xb0] sm:$0xff]  ;;  %v2705_v10 = vld [vmem:[%s3330_s1 + $0xa8] sm:$0xff]  ;;  %s2651_s8 = sshll.u32 %s3336_s13, 7 }
   0xe   : > { %v2715_v3 = vld [vmem:[%s3330_s1 + $0xf8] sm:$0xff]  ;;  %1267 = vmatpush.bf16.msra.mxu2 %v2707_v2  ;;  %v2714_v7 = vld [vmem:[%s3330_s1 + $0xf0] sm:$0xff]  ;;  %v2713_v11 = vld [vmem:[%s3330_s1 + $0xe8] sm:$0xff]  ;;  %s2900_s16 = scalar_lea.vmem %s3329_s0, %s2811_s30  ;;  %s3173_s10 = scalar_lea.vmem %s3332_s3, %s2651_s8 }
   0xf   : > { %1949 = vmatpush.bf16.msra.mxu3 %v2715_v3  ;;  %v2680_v12 = vld [vmem:[%s3330_s1 + $0x60] sm:$0xff]  ;;  %v219_v18 = vld [vmem:[%s2900_s16 + $0x8] sm:$0x1]  ;;  %v2679_v21 = vld [vmem:[%s3330_s1 + $0x58] sm:$0xff] }
  0x10   : > { %752 = vmatpush.bf16.msra.mxu0 %v2682_v4  ;;  %v2672_v13 = vld [vmem:[%s3330_s1 + $0x20] sm:$0xff]  ;;  %v258_v24 = vshll.u32 %v219_v18, 16  ;;  %v2553_v27 = vld [vmem:[%s2900_s16 + $0xc] sm:$0xf]  ;;  %v2554_v28 = vld [vmem:[%s2900_s16 + $0x10] sm:$0xf] }
  0x11   : > { %985 = vmatpush.bf16.msra.mxu1 %v2674_v5  ;;  %v2704_v14 = vld [vmem:[%s3330_s1 + $0xa0] sm:$0xff]  ;;  %v2671_v29 = vld [vmem:[%s3330_s1 + $0x18] sm:$0xff]  ;;  %v2555_v32 = vld [vmem:[%s2900_s16 + $0x14] sm:$0x1]  ;;  %v1437_v33 = vshrl.u32 %v2553_v27, 16  ;;  %v1440_v37 = vshll.u32 %v2553_v27, 16 }
  0x12   : > { %1268 = vmatpush.bf16.msra.mxu2 %v2706_v6  ;;  %v2712_v15 = vld [vmem:[%s3330_s1 + $0xe0] sm:$0xff]  ;;  %v2703_v34 = vld [vmem:[%s3330_s1 + $0x98] sm:$0xff]  ;;  %v1446_v38 = vshll.u32 %v2554_v28, 16  ;;  %v1450_v39 = vshrl.u32 %v2554_v28, 16  ;;  %v260_v41 = vrot.slane %v258_v24, 5  ;;  %v1456_v43 = vshll.u32 %v2555_v32, 16  ;;  %vm2934_vm2 = vmor %vm235_vm0, %vm236_vm1 }
  0x13   : > { %1950 = vmatpush.bf16.msra.mxu3 %v2714_v7  ;;  %v171_v16 = vld [vmem:[%s2900_s16] sm:$0xf]  ;;  %v172_v17 = vld [vmem:[%s2900_s16 + $0x4] sm:$0xf]  ;;  %v2711_v35 = vld [vmem:[%s3330_s1 + $0xd8] sm:$0xff]  ;;  %v1439_v42 = vrot.slane %v1437_v33, 4 }
  0x14   : > { %753 = vmatpush.bf16.msra.mxu0 %v2681_v8  ;;  %v239_v19 = vshrl.u32 %v171_v16, 16  ;;  %v242_v20 = vshll.u32 %v171_v16, 16  ;;  %v248_v22 = vshll.u32 %v172_v17, 16  ;;  %v252_v23 = vshrl.u32 %v172_v17, 16  ;;  %v173_v49 = vld [vmem:[%s2900_s16 + $0xc] sm:$0xf] }
  0x15   : > { %986 = vmatpush.bf16.msra.mxu1 %v2673_v9  ;;  %v1442_v46 = vrot.slane %v1440_v37, 5  ;;  %v1448_v47 = vrot.slane %v1446_v38, 5  ;;  %v1452_v48 = vrot.slane %v1450_v39, 4  ;;  %v2678_v50 = vld [vmem:[%s3330_s1 + $0x50] sm:$0xff]  ;;  %v1458_v58 = vrot.slane %v1456_v43, 5  ;;  %v2677_v3 = vld [vmem:[%s3330_s1 + $0x48] sm:$0xff] }
  0x16   : > { %1269 = vmatpush.bf16.msra.mxu2 %v2705_v10  ;;  %v241_v25 = vrot.slane %v239_v19, 4  ;;  %v244_v26 = vrot.slane %v242_v20, 5  ;;  %v250_v30 = vrot.slane %v248_v22, 5  ;;  %v254_v31 = vrot.slane %v252_v23, 4  ;;  %v2670_v51 = vld [vmem:[%s3330_s1 + $0x10] sm:$0xff]  ;;  %v2669_v4 = vld [vmem:[%s3330_s1 + $0x8] sm:$0xff] }
  0x17   : > { %1951 = vmatpush.bf16.msra.mxu3 %v2713_v11  ;;  %v174_v53 = vld [vmem:[%s2900_s16 + $0x10] sm:$0xf]  ;;  %v1443_v56 = vor.u32 %v1442_v46, %v1439_v42  ;;  %v1453_v57 = vor.u32 %v1452_v48, %v1448_v47  ;;  %v2556_v59 = vld [vmem:[%s2900_s16 + $0x18] sm:$0xf]  ;;  %v263_v61 = vshrl.u32 %v173_v49, 16  ;;  %v266_v62 = vshll.u32 %v173_v49, 16 }
  0x18   : > { %754 = vmatpush.bf16.msra.mxu0 %v2680_v12  ;;  %v245_v36 = vor.u32 %v244_v26, %v241_v25  ;;  %v255_v40 = vor.u32 %v254_v31, %v250_v30  ;;  %v2702_v54 = vld [vmem:[%s3330_s1 + $0x90] sm:$0xff]  ;;  %v272_v2 = vshll.u32 %v174_v53, 16  ;;  %v276_v5 = vshrl.u32 %v174_v53, 16  ;;  %v2557_v6 = vld [vmem:[%s2900_s16 + $0x1c] sm:$0xf]  ;;  %v2701_v8 = vld [vmem:[%s3330_s1 + $0x88] sm:$0xff] }
  0x19   : > { %987 = vmatpush.bf16.msra.mxu1 %v2672_v13  ;;  %v2710_v55 = vld [vmem:[%s3330_s1 + $0xd0] sm:$0xff]  ;;  %v1444_v0 = vrot.slane %v1443_v56, 4  ;;  %v1454_v1 = vrot.slane %v1453_v57, 4  ;;  %v1461_v7 = vshrl.u32 %v2556_v59, 16  ;;  %v2709_v9 = vld [vmem:[%s3330_s1 + $0xc8] sm:$0xff]  ;;  %v1464_v12 = vshll.u32 %v2556_v59, 16 }
  0x1a   : > { %1270 = vmatpush.bf16.msra.mxu2 %v2704_v14  ;;  %v246_v45 = vrot.slane %v245_v36, 4  ;;  %v256_v52 = vrot.slane %v255_v40, 4  ;;  %v268_v16 = vrot.slane %v266_v62, 5  ;;  %v2676_v17 = vld [vmem:[%s3330_s1 + $0x40] sm:$0xff]  ;;  %v2977_v19 = vrot.slane %v272_v2, 5  ;;  %v2684_v38 = vld [vmem:[%s2900_s16 + $0xc] sm:$0xff] }
  0x1b   : > { %1952 = vmatpush.bf16.msra.mxu3 %v2712_v15  ;;  %v1449_v10 = vsel %vm2934_vm2, %v1444_v0, %v1448_v47  ;;  %v1459_v11 = vsel %vm2934_vm2, %v1454_v1, %v1458_v58  ;;  %v265_v15 = vrot.slane %v263_v61, 4  ;;  %v278_v20 = vrot.slane %v276_v5, 4  ;;  %v2668_v22 = vld [vmem:[%s3330_s1] sm:$0xff]  ;;  %v220_v24 = vld [vmem:[%s2900_s16 + $0x14] sm:$0x1] }
  0x1c   : > { %755 = vmatpush.bf16.msra.mxu0 %v2679_v21  ;;  %v251_v60 = vsel %vm2934_vm2, %v246_v45, %v250_v30  ;;  %v261_v63 = vsel %vm2934_vm2, %v256_v52, %v260_v41  ;;  %v1837_v18 = vunpack.c.l.b16 %v1449_v10  ;;  %v1470_v21 = vshll.u32 %v2557_v6, 16  ;;  %v2700_v28 = vld [vmem:[%s3330_s1 + $0x80] sm:$0xff]  ;;  %v175_v41 = vld [vmem:[%s2900_s16 + $0x18] sm:$0xf]  ;;  %v176_v45 = vld [vmem:[%s2900_s16 + $0x1c] sm:$0xf] }
  0x1d   : > { %988 = vmatpush.bf16.msra.mxu1 %v2671_v29  ;;  %v639_v13 = vunpack.c.l.b16 %v251_v60  ;;  %v640_v14 = vunpack.c.l.b16 %v261_v63  ;;  %v1838_v23 = vunpack.c.l.b16 %v1459_v11  ;;  %v1463_v25 = vrot.slane %v1461_v7, 4  ;;  %v2708_v29 = vld [vmem:[%s3330_s1 + $0xc0] sm:$0xff]  ;;  %v2560_v57 = vld [vmem:[%s2900_s16 + $0x28] sm:$0xf] }
  0x1e   : > { %1271 = vmatpush.bf16.msra.mxu2 %v2703_v34  ;;  %v1466_v26 = vrot.slane %v1464_v12, 5  ;;  %v1474_v27 = vshrl.u32 %v2557_v6, 16  ;;  %v1472_v30 = vrot.slane %v1470_v21, 5  ;;  %v269_v31 = vor.u32 %v268_v16, %v265_v15  ;;  %v2558_v32 = vld [vmem:[%s2900_s16 + $0x20] sm:$0x1]  ;;  %v2685_v21 = vld [vmem:[%s2900_s16 + $0x18] sm:$0xff] }
  0x1f   : > { %1953 = vmatpush.bf16.msra.mxu3 %v2711_v35  ;;  %v671_v34 = vpack.c.b16 %v640_v14, %v639_v13  ;;  %v2652_v35 = vld [vmem:[%s2900_s16] sm:$0xff]  ;;  %v279_v36 = vor.u32 %v278_v20, %v2977_v19  ;;  %v282_v37 = vshll.u32 %v220_v24, 16  ;;  %v1869_v39 = vpack.c.b16 %v1838_v23, %v1837_v18  ;;  %v2561_v18 = vld [vmem:[%s2900_s16 + $0x2c] sm:$0x1] }
  0x20   : > { %756 = vmatpush.bf16.msra.mxu0 %v2678_v50  ;;  %v1476_v33 = vrot.slane %v1474_v27, 4  ;;  %v1467_v40 = vor.u32 %v1466_v26, %v1463_v25  ;;  %v1480_v43 = vshll.u32 %v2558_v32, 16  ;;  %v270_v46 = vrot.slane %v269_v31, 4  ;;  %v2559_v56 = vld [vmem:[%s2900_s16 + $0x24] sm:$0xf]  ;;  %v2653_v20 = vld [vmem:[%s2900_s16 + $0xc] sm:$0xff] }
  0x21   : > { %989 = vmatpush.bf16.msra.mxu1 %v2670_v51  ;;  %v280_v47 = vrot.slane %v279_v36, 4  ;;  %v284_v48 = vrot.slane %v282_v37, 5  ;;  %v287_v49 = vshrl.u32 %v175_v41, 16  ;;  %v290_v50 = vshll.u32 %v175_v41, 16  ;;  %v2562_v32 = vld [vmem:[%s2900_s16 + $0x30] sm:$0xf] }
  0x22   : > { %1272 = vmatpush.bf16.msra.mxu2 %v2702_v54  ;;  %v1477_v42 = vor.u32 %v1476_v33, %v1472_v30  ;;  %v1468_v51 = vrot.slane %v1467_v40, 4  ;;  %v296_v52 = vshll.u32 %v176_v45, 16  ;;  %v300_v53 = vshrl.u32 %v176_v45, 16  ;;  %v2563_v33 = vld [vmem:[%s2900_s16 + $0x34] sm:$0xf] }
  0x23   : > { %1954 = vmatpush.bf16.msra.mxu3 %v2710_v55  ;;  %v1482_v55 = vrot.slane %v1480_v43, 5  ;;  %v275_v58 = vsel %vm2934_vm2, %v270_v46, %v2977_v19  ;;  %v285_v59 = vsel %vm2934_vm2, %v280_v47, %v284_v48  ;;  %v289_v60 = vrot.slane %v287_v49, 4 }
  0x24   : > { %757 = vmatpush.bf16.msra.mxu0 %v2677_v3  ;;  %v1478_v54 = vrot.slane %v1477_v42, 4  ;;  %v292_v61 = vrot.slane %v290_v50, 5  ;;  %v1473_v62 = vsel %vm2934_vm2, %v1468_v51, %v1472_v30  ;;  %v298_v63 = vrot.slane %v296_v52, 5  ;;  %v221_v3 = vld [vmem:[%s2900_s16 + $0x20] sm:$0x1] }
  0x25   : > { %990 = vmatpush.bf16.msra.mxu1 %v2669_v4  ;;  %v302_v0 = vrot.slane %v300_v53, 4  ;;  %v1485_v1 = vshrl.u32 %v2559_v56, 16  ;;  %v1488_v4 = vshll.u32 %v2559_v56, 16  ;;  %v1494_v5 = vshll.u32 %v2560_v57, 16  ;;  %v178_v30 = vld [vmem:[%s2900_s16 + $0x28] sm:$0xf] }
  0x26   : > { %1273 = vmatpush.bf16.msra.mxu2 %v2701_v8  ;;  %v1483_v2 = vsel %vm2934_vm2, %v1478_v54, %v1482_v55  ;;  %v1498_v6 = vshrl.u32 %v2560_v57, 16  ;;  %v641_v7 = vunpack.c.l.b16 %v275_v58  ;;  %v642_v8 = vunpack.c.l.b16 %v285_v59  ;;  %v222_v55 = vld [vmem:[%s2900_s16 + $0x2c] sm:$0x1] }
  0x27   : > { %1955 = vmatpush.bf16.msra.mxu3 %v2709_v9  ;;  %v1839_v9 = vunpack.c.l.b16 %v1473_v62  ;;  %v1840_v10 = vunpack.c.l.b16 %v1483_v2  ;;  %v293_v11 = vor.u32 %v292_v61, %v289_v60  ;;  %v303_v12 = vor.u32 %v302_v0, %v298_v63  ;;  %v2564_v62 = vld [vmem:[%s2900_s16 + $0x38] sm:$0x1] }
  0x28   : > { %758 = vmatpush.bf16.msra.mxu0 %v2676_v17  ;;  %v306_v13 = vshll.u32 %v221_v3, 16  ;;  %v1487_v14 = vrot.slane %v1485_v1, 4  ;;  %v1490_v15 = vrot.slane %v1488_v4, 5  ;;  %v1496_v16 = vrot.slane %v1494_v5, 5  ;;  %v2654_v2 = vld [vmem:[%s2900_s16 + $0x18] sm:$0xff] }
  0x29   : > { %991 = vmatpush.bf16.msra.mxu1 %v2668_v22  ;;  %v1500_v17 = vrot.slane %v1498_v6, 4  ;;  %v672_v19 = vpack.c.b16 %v642_v8, %v641_v7  ;;  %v1870_v22 = vpack.c.b16 %v1840_v10, %v1839_v9  ;;  %v294_v23 = vrot.slane %v293_v11, 4  ;;  %v2686_v7 = vld [vmem:[%s2900_s16 + $0x24] sm:$0xff]  ;;  %v179_v9 = vld [vmem:[%s2900_s16 + $0x30] sm:$0xf] }
  0x2a   : > { %1274 = vmatpush.bf16.msra.mxu2 %v2700_v28  ;;  %v308_v24 = vrot.slane %v306_v13, 5  ;;  %v304_v25 = vrot.slane %v303_v12, 4  ;;  %v1491_v26 = vor.u32 %v1490_v15, %v1487_v14  ;;  %v1504_v28 = vshll.u32 %v2561_v18, 16  ;;  %v180_v10 = vld [vmem:[%s2900_s16 + $0x34] sm:$0xf] }
  0x2b   : > { %1956 = vmatpush.bf16.msra.mxu3 %v2708_v29  ;;  %759 = vmatmul.bf16.vlgmr.msra.gmra.mxu0 %v671_v34  ;;  %v1501_v27 = vor.u32 %v1500_v17, %v1496_v16  ;;  %v177_v29 = vld [vmem:[%s2900_s16 + $0x24] sm:$0xf]  ;;  %v299_v31 = vsel %vm2934_vm2, %v294_v23, %v298_v63  ;;  %v320_v40 = vshll.u32 %v178_v30, 16  ;;  %v324_v41 = vshrl.u32 %v178_v30, 16 }
  0x2c   : > { %992 = vmatmul.bf16.vlgmr.msra.gmra.mxu1 %v2652_v35  ;;  %v309_v34 = vsel %vm2934_vm2, %v304_v25, %v308_v24  ;;  %v1492_v35 = vrot.slane %v1491_v26, 4  ;;  %v1506_v37 = vrot.slane %v1504_v28, 5  ;;  %v1509_v42 = vshrl.u32 %v2562_v32, 16 }
  0x2d   : > { %1275 = vmatmul.bf16.vlgmr.msra.gmra.mxu2 %v2684_v38  ;;  %v1502_v36 = vrot.slane %v1501_v27, 4  ;;  %v311_v38 = vshrl.u32 %v177_v29, 16  ;;  %v1512_v43 = vshll.u32 %v2562_v32, 16  ;;  %v1518_v45 = vshll.u32 %v2563_v33, 16 }
  0x2e   : > { %1957 = vmatmul.bf16.vlgmr.msra.gmra.mxu3 %v1869_v39  ;;  %v314_v39 = vshll.u32 %v177_v29, 16  ;;  %v1522_v46 = vshrl.u32 %v2563_v33, 16  ;;  %v643_v47 = vunpack.c.l.b16 %v299_v31  ;;  %v644_v48 = vunpack.c.l.b16 %v309_v34  ;;  %v223_v31 = vld [vmem:[%s2900_s16 + $0x38] sm:$0x1] }
  0x2f   : > { %v1497_v49 = vsel %vm2934_vm2, %v1492_v35, %v1496_v16  ;;  %v1507_v50 = vsel %vm2934_vm2, %v1502_v36, %v1506_v37  ;;  %v313_v51 = vrot.slane %v311_v38, 4  ;;  %v322_v53 = vrot.slane %v320_v40, 5 }
  0x30   : > { %v316_v52 = vrot.slane %v314_v39, 5  ;;  %v326_v54 = vrot.slane %v324_v41, 4  ;;  %v1511_v56 = vrot.slane %v1509_v42, 4  ;;  %v1514_v57 = vrot.slane %v1512_v43, 5 }
  0x31   : > { %v1520_v58 = vrot.slane %v1518_v45, 5  ;;  %v1524_v59 = vrot.slane %v1522_v46, 4  ;;  %v1841_v60 = vunpack.c.l.b16 %v1497_v49  ;;  %v1842_v61 = vunpack.c.l.b16 %v1507_v50  ;;  %v2655_v50 = vld [vmem:[%s2900_s16 + $0x24] sm:$0xff] }
  0x32   : > { %v673_v63 = vpack.c.b16 %v644_v48, %v643_v47  ;;  %v317_v0 = vor.u32 %v316_v52, %v313_v51  ;;  %v330_v1 = vshll.u32 %v222_v55, 16  ;;  %v327_v3 = vor.u32 %v326_v54, %v322_v53  ;;  %v2567_v48 = vld [vmem:[%s2900_s16 + $0x44] sm:$0x1]  ;;  %v2687_v51 = vld [vmem:[%s2900_s16 + $0x30] sm:$0xff] }
  0x33   : > { %v1515_v4 = vor.u32 %v1514_v57, %v1511_v56  ;;  %v1525_v5 = vor.u32 %v1524_v59, %v1520_v58  ;;  %v1528_v6 = vshll.u32 %v2564_v62, 16  ;;  %v1871_v8 = vpack.c.b16 %v1842_v61, %v1841_v60  ;;  %v181_v59 = vld [vmem:[%s2900_s16 + $0x3c] sm:$0xf]  ;;  %v182_v60 = vld [vmem:[%s2900_s16 + $0x40] sm:$0xf] }
  0x34   : > { %v318_v11 = vrot.slane %v317_v0, 4  ;;  %v332_v12 = vrot.slane %v330_v1, 5  ;;  %v328_v13 = vrot.slane %v327_v3, 4  ;;  %v335_v17 = vshrl.u32 %v179_v9, 16  ;;  %v2568_v62 = vld [vmem:[%s2900_s16 + $0x48] sm:$0xf] }
  0x35   : > { %v1516_v14 = vrot.slane %v1515_v4, 4  ;;  %v1526_v15 = vrot.slane %v1525_v5, 4  ;;  %v1530_v16 = vrot.slane %v1528_v6, 5  ;;  %v338_v18 = vshll.u32 %v179_v9, 16 }
  0x36   : > { %v323_v23 = vsel %vm2934_vm2, %v318_v11, %v322_v53  ;;  %v333_v24 = vsel %vm2934_vm2, %v328_v13, %v332_v12  ;;  %v337_v27 = vrot.slane %v335_v17, 4  ;;  %v354_v42 = vshll.u32 %v223_v31, 16  ;;  %v2656_v31 = vld [vmem:[%s2900_s16 + $0x30] sm:$0xff] }
  0x37   : > { %v1521_v25 = vsel %vm2934_vm2, %v1516_v14, %v1520_v58  ;;  %v1531_v26 = vsel %vm2934_vm2, %v1526_v15, %v1530_v16  ;;  %v340_v28 = vrot.slane %v338_v18, 5  ;;  %v645_v36 = vunpack.c.l.b16 %v323_v23 }
  0x38   : > { %v646_v37 = vunpack.c.l.b16 %v333_v24  ;;  %v1843_v38 = vunpack.c.l.b16 %v1521_v25  ;;  %v1844_v39 = vunpack.c.l.b16 %v1531_v26  ;;  %v356_v54 = vrot.slane %v354_v42, 5 }
  0x39   : > { %v341_v40 = vor.u32 %v340_v28, %v337_v27  ;;  %v1552_v58 = vshll.u32 %v2567_v48, 16  ;;  %v359_v4 = vshrl.u32 %v181_v59, 16  ;;  %v362_v5 = vshll.u32 %v181_v59, 16  ;;  %v2570_v27 = vld [vmem:[%s2900_s16 + $0x50] sm:$0x1] }
  0x3a   : > { %v674_v49 = vpack.c.b16 %v646_v37, %v645_v36  ;;  %v1872_v52 = vpack.c.b16 %v1844_v39, %v1843_v38  ;;  %v368_v6 = vshll.u32 %v182_v60, 16  ;;  %v1560_v9 = vshll.u32 %v2568_v62, 16  ;;  %v2688_v36 = vld [vmem:[%s2900_s16 + $0x3c] sm:$0xff]  ;;  %v183_v38 = vld [vmem:[%s2900_s16 + $0x48] sm:$0xf] }
  0x3b   : > { %764 = vmatmul.bf16.gmra.mxu0 %v672_v19  ;;  %v344_v19 = vshll.u32 %v180_v10, 16  ;;  %v342_v53 = vrot.slane %v341_v40, 4  ;;  %v1554_v3 = vrot.slane %v1552_v58, 5  ;;  %v361_v16 = vrot.slane %v359_v4, 4  ;;  %v184_v39 = vld [vmem:[%s2900_s16 + $0x4c] sm:$0xf] }
  0x3c   : > { %997 = vmatmul.bf16.gmra.mxu1 %v2653_v20  ;;  %v348_v20 = vshrl.u32 %v180_v10, 16  ;;  %v364_v17 = vrot.slane %v362_v5, 5  ;;  %v370_v18 = vrot.slane %v368_v6, 5  ;;  %v386_v48 = vshll.u32 %v183_v38, 16 }
  0x3d   : > { %1280 = vmatmul.bf16.gmra.mxu2 %v2685_v21  ;;  %v2565_v21 = vld [vmem:[%s2900_s16 + $0x3c] sm:$0xf]  ;;  %v346_v29 = vrot.slane %v344_v19, 5 }
  0x3e   : > { %1962 = vmatmul.bf16.gmra.mxu3 %v1870_v22  ;;  %v2566_v22 = vld [vmem:[%s2900_s16 + $0x40] sm:$0xf]  ;;  %v350_v30 = vrot.slane %v348_v20, 4  ;;  %v1533_v32 = vshrl.u32 %v2565_v21, 16  ;;  %v1536_v33 = vshll.u32 %v2565_v21, 16  ;;  %v388_v58 = vrot.slane %v386_v48, 5 }
  0x3f   : > { %v1542_v34 = vshll.u32 %v2566_v22, 16  ;;  %v1546_v35 = vshrl.u32 %v2566_v22, 16  ;;  %v347_v61 = vsel %vm2934_vm2, %v342_v53, %v346_v29  ;;  %v224_v20 = vld [vmem:[%s2900_s16 + $0x44] sm:$0x1]  ;;  %v1562_v22 = vrot.slane %v1560_v9, 5 }
  0x40   : > { %v351_v41 = vor.u32 %v350_v30, %v346_v29  ;;  %v1535_v43 = vrot.slane %v1533_v32, 4  ;;  %v1538_v45 = vrot.slane %v1536_v33, 5  ;;  %v647_v12 = vunpack.c.l.b16 %v347_v61  ;;  %v225_v61 = vld [vmem:[%s2900_s16 + $0x50] sm:$0x1] }
  0x41   : > { %v1544_v46 = vrot.slane %v1542_v34, 5  ;;  %v1548_v47 = vrot.slane %v1546_v35, 4  ;;  %v365_v29 = vor.u32 %v364_v17, %v361_v16  ;;  %v378_v30 = vshll.u32 %v224_v20, 16  ;;  %v2689_v16 = vld [vmem:[%s2900_s16 + $0x48] sm:$0xff] }
  0x42   : > { %v352_v55 = vrot.slane %v351_v41, 4  ;;  %v1539_v56 = vor.u32 %v1538_v45, %v1535_v43  ;;  %v1576_v35 = vshll.u32 %v2570_v27, 16  ;;  %v2574_v27 = vld [vmem:[%s2900_s16 + $0x60] sm:$0xf] }
  0x43   : > { %v1549_v57 = vor.u32 %v1548_v47, %v1544_v46  ;;  %v366_v40 = vrot.slane %v365_v29, 4  ;;  %v380_v41 = vrot.slane %v378_v30, 5  ;;  %v383_v47 = vshrl.u32 %v183_v38, 16 }
  0x44   : > { %v357_v0 = vsel %vm2934_vm2, %v352_v55, %v356_v54  ;;  %v1540_v1 = vrot.slane %v1539_v56, 4  ;;  %v1608_v38 = vshll.u32 %v2574_v27, 16 }
  0x45   : > { %v648_v13 = vunpack.c.l.b16 %v357_v0  ;;  %v371_v53 = vsel %vm2934_vm2, %v366_v40, %v370_v18 }
  0x46   : > { %v1545_v14 = vsel %vm2934_vm2, %v1540_v1, %v1544_v46  ;;  %v1578_v46 = vrot.slane %v1576_v35, 5 }
  0x47   : > { %v1845_v25 = vunpack.c.l.b16 %v1545_v14  ;;  %v675_v28 = vpack.c.b16 %v648_v13, %v647_v12  ;;  %v2573_v13 = vld [vmem:[%s2900_s16 + $0x5c] sm:$0x1] }
  0x4b   : > { %769 = vmatmul.bf16.gmra.mxu0 %v673_v63  ;;  %v2569_v63 = vld [vmem:[%s2900_s16 + $0x4c] sm:$0xf] }
  0x4c   : > { %1002 = vmatmul.bf16.gmra.mxu1 %v2654_v2  ;;  %v1550_v2 = vrot.slane %v1549_v57, 4  ;;  %v1566_v10 = vshll.u32 %v2569_v63, 16  ;;  %v1570_v11 = vshrl.u32 %v2569_v63, 16  ;;  %v385_v57 = vrot.slane %v383_v47, 4 }
  0x4d   : > { %1285 = vmatmul.bf16.gmra.mxu2 %v2686_v7  ;;  %v372_v7 = vshrl.u32 %v182_v60, 16 }
  0x4e   : > { %1967 = vmatmul.bf16.gmra.mxu3 %v1871_v8  ;;  %v1557_v8 = vshrl.u32 %v2568_v62, 16  ;;  %v1555_v15 = vsel %vm2934_vm2, %v1550_v2, %v1554_v3  ;;  %v1568_v23 = vrot.slane %v1566_v10, 5  ;;  %v1572_v24 = vrot.slane %v1570_v11, 4 }
  0x4f   : > { %v374_v19 = vrot.slane %v372_v7, 4  ;;  %v1846_v26 = vunpack.c.l.b16 %v1555_v15  ;;  %v649_v2 = vunpack.c.l.b16 %v371_v53  ;;  %v389_v6 = vor.u32 %v388_v58, %v385_v57  ;;  %v2657_v15 = vld [vmem:[%s2900_s16 + $0x3c] sm:$0xff]  ;;  %v2576_v57 = vld [vmem:[%s2900_s16 + $0x68] sm:$0x1] }
  0x50   : > { %v1559_v21 = vrot.slane %v1557_v8, 4  ;;  %v1573_v34 = vor.u32 %v1572_v24, %v1568_v23  ;;  %v402_v8 = vshll.u32 %v225_v61, 16  ;;  %v185_v24 = vld [vmem:[%s2900_s16 + $0x54] sm:$0xf]  ;;  %v2658_v61 = vld [vmem:[%s2900_s16 + $0x48] sm:$0xff] }
  0x51   : > { %v375_v32 = vor.u32 %v374_v19, %v370_v18  ;;  %v1873_v37 = vpack.c.b16 %v1846_v26, %v1845_v25  ;;  %v390_v18 = vrot.slane %v389_v6, 4  ;;  %v186_v25 = vld [vmem:[%s2900_s16 + $0x58] sm:$0xf] }
  0x52   : > { %v1563_v33 = vor.u32 %v1562_v22, %v1559_v21  ;;  %v1574_v45 = vrot.slane %v1573_v34, 4  ;;  %v404_v19 = vrot.slane %v402_v8, 5  ;;  %v410_v34 = vshll.u32 %v185_v24, 16 }
  0x53   : > { %v376_v42 = vrot.slane %v375_v32, 4  ;;  %v416_v35 = vshll.u32 %v186_v25, 16 }
  0x54   : > { %v1564_v43 = vrot.slane %v1563_v33, 4  ;;  %v1579_v56 = vsel %vm2934_vm2, %v1574_v45, %v1578_v46  ;;  %v407_v33 = vshrl.u32 %v185_v24, 16  ;;  %v412_v47 = vrot.slane %v410_v34, 5 }
  0x55   : > { %v381_v54 = vsel %vm2934_vm2, %v376_v42, %v380_v41  ;;  %v1848_v5 = vunpack.c.l.b16 %v1579_v56  ;;  %v418_v48 = vrot.slane %v416_v35, 5 }
  0x56   : > { %v1569_v55 = vsel %vm2934_vm2, %v1564_v43, %v1568_v23  ;;  %v650_v3 = vunpack.c.l.b16 %v381_v54  ;;  %v1600_v23 = vshll.u32 %v2573_v13, 16  ;;  %v409_v46 = vrot.slane %v407_v33, 4 }
  0x57   : > { %v1847_v4 = vunpack.c.l.b16 %v1569_v55 }
  0x58   : > { %v676_v14 = vpack.c.b16 %v650_v3, %v649_v2  ;;  %v1602_v32 = vrot.slane %v1600_v23, 5  ;;  %v2690_v2 = vld [vmem:[%s2900_s16 + $0x54] sm:$0xff] }
  0x59   : > { %v1874_v17 = vpack.c.b16 %v1848_v5, %v1847_v4  ;;  %v187_v4 = vld [vmem:[%s2900_s16 + $0x60] sm:$0xf] }
  0x5a   : > { %v434_v13 = vshll.u32 %v187_v4, 16 }
  0x5b   : > { %774 = vmatmul.bf16.gmra.mxu0 %v674_v49  ;;  %v392_v49 = vshll.u32 %v184_v39, 16 }
  0x5c   : > { %1007 = vmatmul.bf16.gmra.mxu1 %v2655_v50  ;;  %v396_v50 = vshrl.u32 %v184_v39, 16  ;;  %v436_v23 = vrot.slane %v434_v13, 5 }
  0x5d   : > { %1290 = vmatmul.bf16.gmra.mxu2 %v2687_v51  ;;  %v2571_v51 = vld [vmem:[%s2900_s16 + $0x54] sm:$0xf]  ;;  %v394_v59 = vrot.slane %v392_v49, 5 }
  0x5e   : > { %1972 = vmatmul.bf16.gmra.mxu3 %v1872_v52  ;;  %v2572_v52 = vld [vmem:[%s2900_s16 + $0x58] sm:$0xf]  ;;  %v398_v60 = vrot.slane %v396_v50, 4  ;;  %v1581_v62 = vshrl.u32 %v2571_v51, 16  ;;  %v1584_v63 = vshll.u32 %v2571_v51, 16 }
  0x5f   : > { %v1590_v0 = vshll.u32 %v2572_v52, 16  ;;  %v1594_v1 = vshrl.u32 %v2572_v52, 16  ;;  %v395_v26 = vsel %vm2934_vm2, %v390_v18, %v394_v59  ;;  %v226_v50 = vld [vmem:[%s2900_s16 + $0x5c] sm:$0x1]  ;;  %v1610_v52 = vrot.slane %v1608_v38, 5 }
  0x60   : > { %v399_v7 = vor.u32 %v398_v60, %v394_v59  ;;  %v1583_v9 = vrot.slane %v1581_v62, 4  ;;  %v1586_v10 = vrot.slane %v1584_v63, 5  ;;  %v651_v41 = vunpack.c.l.b16 %v395_v26 }
  0x61   : > { %v1592_v11 = vrot.slane %v1590_v0, 5  ;;  %v1596_v12 = vrot.slane %v1594_v1, 4  ;;  %v413_v59 = vor.u32 %v412_v47, %v409_v46  ;;  %v426_v60 = vshll.u32 %v226_v50, 16  ;;  %v2691_v46 = vld [vmem:[%s2900_s16 + $0x60] sm:$0xff] }
  0x62   : > { %v400_v20 = vrot.slane %v399_v7, 4  ;;  %v1587_v21 = vor.u32 %v1586_v10, %v1583_v9  ;;  %v1624_v1 = vshll.u32 %v2576_v57, 16  ;;  %v188_v7 = vld [vmem:[%s2900_s16 + $0x64] sm:$0xf]  ;;  %v2580_v57 = vld [vmem:[%s2900_s16 + $0x78] sm:$0xf] }
  0x63   : > { %v1597_v22 = vor.u32 %v1596_v12, %v1592_v11  ;;  %v414_v5 = vrot.slane %v413_v59, 4  ;;  %v428_v6 = vrot.slane %v426_v60, 5  ;;  %v431_v12 = vshrl.u32 %v187_v4, 16 }
  0x64   : > { %v405_v29 = vsel %vm2934_vm2, %v400_v20, %v404_v19  ;;  %v1588_v30 = vrot.slane %v1587_v21, 4  ;;  %v1656_v4 = vshll.u32 %v2580_v57, 16 }
  0x65   : > { %v652_v42 = vunpack.c.l.b16 %v405_v29  ;;  %v419_v18 = vsel %vm2934_vm2, %v414_v5, %v418_v48 }
  0x66   : > { %v1593_v43 = vsel %vm2934_vm2, %v1588_v30, %v1592_v11  ;;  %v1626_v11 = vrot.slane %v1624_v1, 5  ;;  %v227_v30 = vld [vmem:[%s2900_s16 + $0x68] sm:$0x1] }
  0x67   : > { %v1849_v55 = vunpack.c.l.b16 %v1593_v43  ;;  %v677_v58 = vpack.c.b16 %v652_v42, %v651_v41 }
  0x6b   : > { %779 = vmatmul.bf16.gmra.mxu0 %v675_v28  ;;  %v2575_v28 = vld [vmem:[%s2900_s16 + $0x64] sm:$0xf] }
  0x6c   : > { %1012 = vmatmul.bf16.gmra.mxu1 %v2656_v31  ;;  %v1598_v31 = vrot.slane %v1597_v22, 4  ;;  %v1614_v39 = vshll.u32 %v2575_v28, 16  ;;  %v1618_v40 = vshrl.u32 %v2575_v28, 16  ;;  %v433_v22 = vrot.slane %v431_v12, 4 }
  0x6d   : > { %1295 = vmatmul.bf16.gmra.mxu2 %v2688_v36  ;;  %v420_v36 = vshrl.u32 %v186_v25, 16 }
  0x6e   : > { %1977 = vmatmul.bf16.gmra.mxu3 %v1873_v37  ;;  %v1605_v37 = vshrl.u32 %v2574_v27, 16  ;;  %v1603_v45 = vsel %vm2934_vm2, %v1598_v31, %v1602_v32  ;;  %v1616_v53 = vrot.slane %v1614_v39, 5  ;;  %v1620_v54 = vrot.slane %v1618_v40, 4  ;;  %v2579_v40 = vld [vmem:[%s2900_s16 + $0x74] sm:$0x1] }
  0x6f   : > { %v422_v49 = vrot.slane %v420_v36, 4  ;;  %v1850_v56 = vunpack.c.l.b16 %v1603_v45  ;;  %v653_v31 = vunpack.c.l.b16 %v419_v18  ;;  %v437_v35 = vor.u32 %v436_v23, %v433_v22  ;;  %v2659_v45 = vld [vmem:[%s2900_s16 + $0x54] sm:$0xff]  ;;  %v2582_v22 = vld [vmem:[%s2900_s16 + $0x80] sm:$0x1] }
  0x70   : > { %v1607_v51 = vrot.slane %v1605_v37, 4  ;;  %v1621_v0 = vor.u32 %v1620_v54, %v1616_v53  ;;  %v450_v39 = vshll.u32 %v227_v30, 16  ;;  %v189_v54 = vld [vmem:[%s2900_s16 + $0x6c] sm:$0xf]  ;;  %v1672_v30 = vshll.u32 %v2582_v22, 16 }
  0x71   : > { %v423_v62 = vor.u32 %v422_v49, %v418_v48  ;;  %v1875_v3 = vpack.c.b16 %v1850_v56, %v1849_v55  ;;  %v1648_v49 = vshll.u32 %v2579_v40, 16  ;;  %v438_v50 = vrot.slane %v437_v35, 4  ;;  %v190_v55 = vld [vmem:[%s2900_s16 + $0x70] sm:$0xf]  ;;  %v191_v35 = vld [vmem:[%s2900_s16 + $0x78] sm:$0xf] }
  0x72   : > { %v1611_v63 = vor.u32 %v1610_v52, %v1607_v51  ;;  %v1622_v10 = vrot.slane %v1621_v0, 4  ;;  %v452_v52 = vrot.slane %v450_v39, 5  ;;  %v458_v0 = vshll.u32 %v189_v54, 16  ;;  %v2583_v39 = vld [vmem:[%s2900_s16 + $0x84] sm:$0xf] }
  0x73   : > { %v424_v8 = vrot.slane %v423_v62, 4  ;;  %v1650_v62 = vrot.slane %v1648_v49, 5  ;;  %v464_v1 = vshll.u32 %v190_v55, 16  ;;  %v2584_v40 = vld [vmem:[%s2900_s16 + $0x88] sm:$0xf] }
  0x74   : > { %v1612_v9 = vrot.slane %v1611_v63, 4  ;;  %v1627_v21 = vsel %vm2934_vm2, %v1622_v10, %v1626_v11  ;;  %v455_v63 = vshrl.u32 %v189_v54, 16  ;;  %v460_v12 = vrot.slane %v458_v0, 5 }
  0x75   : > { %v429_v19 = vsel %vm2934_vm2, %v424_v8, %v428_v6  ;;  %v1852_v34 = vunpack.c.l.b16 %v1627_v21  ;;  %v3118_v13 = vrot.slane %v464_v1, 5  ;;  %v228_v21 = vld [vmem:[%s2900_s16 + $0x74] sm:$0x1] }
  0x76   : > { %v1617_v20 = vsel %vm2934_vm2, %v1612_v9, %v1616_v53  ;;  %v654_v32 = vunpack.c.l.b16 %v429_v19  ;;  %v457_v11 = vrot.slane %v455_v63, 4 }
  0x77   : > { %v1851_v33 = vunpack.c.l.b16 %v1617_v20 }
  0x78   : > { %v678_v43 = vpack.c.b16 %v654_v32, %v653_v31 }
  0x79   : > { %v1876_v47 = vpack.c.b16 %v1852_v34, %v1851_v33  ;;  %v2692_v33 = vld [vmem:[%s2900_s16 + $0x6c] sm:$0xff] }
  0x7b   : > { %784 = vmatmul.bf16.gmra.mxu0 %v676_v14  ;;  %v440_v14 = vshll.u32 %v188_v7, 16 }
  0x7c   : > { %1017 = vmatmul.bf16.gmra.mxu1 %v2657_v15  ;;  %v444_v15 = vshrl.u32 %v188_v7, 16 }
  0x7d   : > { %1300 = vmatmul.bf16.gmra.mxu2 %v2689_v16  ;;  %v2577_v16 = vld [vmem:[%s2900_s16 + $0x6c] sm:$0xf]  ;;  %v442_v26 = vrot.slane %v440_v14, 5 }
  0x7e   : > { %1982 = vmatmul.bf16.gmra.mxu3 %v1874_v17  ;;  %v2578_v17 = vld [vmem:[%s2900_s16 + $0x70] sm:$0xf]  ;;  %v1629_v24 = vshrl.u32 %v2577_v16, 16  ;;  %v1632_v25 = vshll.u32 %v2577_v16, 16  ;;  %v446_v27 = vrot.slane %v444_v15, 4  ;;  %v1658_v16 = vrot.slane %v1656_v4, 5 }
  0x7f   : > { %v1638_v28 = vshll.u32 %v2578_v17, 16  ;;  %v1642_v29 = vshrl.u32 %v2578_v17, 16  ;;  %v443_v59 = vsel %vm2934_vm2, %v438_v50, %v442_v26  ;;  %v1677_v50 = vshrl.u32 %v2583_v39, 16 }
  0x80   : > { %v1631_v36 = vrot.slane %v1629_v24, 4  ;;  %v1634_v37 = vrot.slane %v1632_v25, 5  ;;  %v447_v38 = vor.u32 %v446_v27, %v442_v26  ;;  %v655_v7 = vunpack.c.l.b16 %v443_v59  ;;  %v2660_v26 = vld [vmem:[%s2900_s16 + $0x60] sm:$0xff] }
  0x81   : > { %v1640_v41 = vrot.slane %v1638_v28, 5  ;;  %v1644_v42 = vrot.slane %v1642_v29, 4  ;;  %v461_v24 = vor.u32 %v460_v12, %v457_v11  ;;  %v474_v27 = vshll.u32 %v228_v21, 16  ;;  %v3149_v21 = vld [vmem:[%s3331_s2] ss:$0 sm:$0xff] }
  0x82   : > { %v1635_v48 = vor.u32 %v1634_v37, %v1631_v36  ;;  %v448_v51 = vrot.slane %v447_v38, 4  ;;  %v192_v36 = vld [vmem:[%s2900_s16 + $0x7c] sm:$0xf] }
  0x83   : > { %v1645_v53 = vor.u32 %v1644_v42, %v1640_v41  ;;  %v462_v37 = vrot.slane %v461_v24, 4  ;;  %v492_v49 = vshrl.u32 %v192_v36, 16 }
  0x84   : > { %v1636_v56 = vrot.slane %v1635_v48, 4  ;;  %v453_v60 = vsel %vm2934_vm2, %v448_v51, %v452_v52  ;;  %v488_v48 = vshll.u32 %v192_v36, 16  ;;  %v1680_v51 = vshll.u32 %v2583_v39, 16 }
  0x85   : > { %v656_v8 = vunpack.c.l.b16 %v453_v60  ;;  %v1686_v52 = vshll.u32 %v2584_v40, 16 }
  0x86   : > { %v1641_v9 = vsel %vm2934_vm2, %v1636_v56, %v1640_v41  ;;  %v476_v41 = vrot.slane %v474_v27, 5  ;;  %v3138_v1 = vrot.slane %v488_v48, 5  ;;  %v1682_v4 = vrot.slane %v1680_v51, 5 }
  0x87   : > { %v1853_v19 = vunpack.c.l.b16 %v1641_v9  ;;  %v679_v23 = vpack.c.b16 %v656_v8, %v655_v7  ;;  %v229_v8 = vld [vmem:[%s2900_s16 + $0x80] sm:$0x1]  ;;  %v2585_v9 = vld [vmem:[%s2900_s16 + $0x8c] sm:$0x1] }
  0x8b   : > { %789 = vmatmul.bf16.gmra.mxu0 %v677_v58  ;;  %v2581_v58 = vld [vmem:[%s2900_s16 + $0x7c] sm:$0xf] }
  0x8c   : > { %1022 = vmatmul.bf16.gmra.mxu1 %v2658_v61  ;;  %v1646_v61 = vrot.slane %v1645_v53, 4  ;;  %v1662_v5 = vshll.u32 %v2581_v58, 16  ;;  %v1666_v6 = vshrl.u32 %v2581_v58, 16  ;;  %v1690_v53 = vshrl.u32 %v2584_v40, 16  ;;  %v193_v40 = vld [vmem:[%s2900_s16 + $0x84] sm:$0xf] }
  0x8d   : > { %1305 = vmatmul.bf16.gmra.mxu2 %v2690_v2  ;;  %v468_v2 = vshrl.u32 %v190_v55, 16 }
  0x8e   : > { %1987 = vmatmul.bf16.gmra.mxu3 %v1875_v3  ;;  %v1653_v3 = vshrl.u32 %v2580_v57, 16  ;;  %v1651_v10 = vsel %vm2934_vm2, %v1646_v61, %v1650_v62  ;;  %v1664_v17 = vrot.slane %v1662_v5, 5  ;;  %v1668_v18 = vrot.slane %v1666_v6, 4 }
  0x8f   : > { %v470_v14 = vrot.slane %v468_v2, 4  ;;  %v1854_v20 = vunpack.c.l.b16 %v1651_v10  ;;  %v467_v57 = vsel %vm2934_vm2, %v462_v37, %v3118_v13  ;;  %v494_v2 = vrot.slane %v492_v49, 4  ;;  %v2587_v49 = vld [vmem:[%s2900_s16 + $0x94] sm:$0xf] }
  0x90   : > { %v1655_v15 = vrot.slane %v1653_v3, 4  ;;  %v1669_v29 = vor.u32 %v1668_v18, %v1664_v17  ;;  %v1679_v3 = vrot.slane %v1677_v50, 4  ;;  %v3140_v5 = vrot.slane %v1686_v52, 5 }
  0x91   : > { %v471_v25 = vor.u32 %v470_v14, %v3118_v13  ;;  %v1877_v34 = vpack.c.b16 %v1854_v20, %v1853_v19  ;;  %v1692_v6 = vrot.slane %v1690_v53, 4  ;;  %v657_v10 = vunpack.c.l.b16 %v467_v57 }
  0x92   : > { %v1659_v28 = vor.u32 %v1658_v16, %v1655_v15  ;;  %v495_v15 = vor.u32 %v494_v2, %v3138_v1  ;;  %v498_v16 = vshll.u32 %v229_v8, 16  ;;  %v1696_v19 = vshll.u32 %v2585_v9, 16 }
  0x93   : > { %v472_v38 = vrot.slane %v471_v25, 4  ;;  %v1693_v18 = vor.u32 %v1692_v6, %v3140_v5  ;;  %v503_v53 = vshrl.u32 %v193_v40, 16 }
  0x94   : > { %v1660_v42 = vrot.slane %v1659_v28, 4  ;;  %v1698_v37 = vrot.slane %v1696_v19, 5 }
  0x95   : > { %v477_v58 = vsel %vm2934_vm2, %v472_v38, %v476_v41  ;;  %v1694_v36 = vrot.slane %v1693_v18, 4  ;;  %v505_v8 = vrot.slane %v503_v53, 4 }
  0x96   : > { %v1665_v59 = vsel %vm2934_vm2, %v1660_v42, %v1664_v17  ;;  %v658_v11 = vunpack.c.l.b16 %v477_v58  ;;  %v1683_v17 = vor.u32 %v1682_v4, %v1679_v3  ;;  %v194_v42 = vld [vmem:[%s2900_s16 + $0x88] sm:$0xf] }
  0x97   : > { %v1855_v12 = vunpack.c.l.b16 %v1665_v59  ;;  %v1699_v48 = vsel %vm2934_vm2, %v1694_v36, %v1698_v37  ;;  %v512_v57 = vshll.u32 %v194_v42, 16  ;;  %v516_v58 = vshrl.u32 %v194_v42, 16 }
  0x98   : > { %v680_v25 = vpack.c.b16 %v658_v11, %v657_v10  ;;  %v1858_v6 = vunpack.c.l.b16 %v1699_v48 }
  0x99   : > { %v3177_v10 = vrot.slane %v512_v57, 5  ;;  %v518_v11 = vrot.slane %v516_v58, 4 }
  0x9b   : > { %794 = vmatmul.bf16.gmra.mxu0 %v678_v43  ;;  %v1670_v43 = vrot.slane %v1669_v29, 4 }
  0x9c   : > { %1027 = vmatmul.bf16.gmra.mxu1 %v2659_v45  ;;  %v1674_v45 = vrot.slane %v1672_v30, 5  ;;  %v2693_v30 = vld [vmem:[%s2900_s16 + $0x78] sm:$0xff] }
  0x9d   : > { %1310 = vmatmul.bf16.gmra.mxu2 %v2691_v46  ;;  %v479_v46 = vshrl.u32 %v191_v35, 16 }
  0x9e   : > { %1992 = vmatmul.bf16.gmra.mxu3 %v1876_v47  ;;  %v482_v47 = vshll.u32 %v191_v35, 16  ;;  %v1675_v60 = vsel %vm2934_vm2, %v1670_v43, %v1674_v45  ;;  %v1684_v35 = vrot.slane %v1683_v17, 4  ;;  %v2586_v43 = vld [vmem:[%s2900_s16 + $0x90] sm:$0xf] }
  0x9f   : > { %v481_v63 = vrot.slane %v479_v46, 4  ;;  %v1856_v13 = vunpack.c.l.b16 %v1675_v60  ;;  %v1701_v59 = vshrl.u32 %v2586_v43, 16 }
  0xa0   : > { %v484_v0 = vrot.slane %v482_v47, 5  ;;  %v1689_v47 = vsel %vm2934_vm2, %v1684_v35, %v3140_v5  ;;  %v195_v35 = vld [vmem:[%s2900_s16 + $0x90] sm:$0xf] }
  0xa1   : > { %v1857_v5 = vunpack.c.l.b16 %v1689_v47  ;;  %v527_v48 = vshrl.u32 %v195_v35, 16 }
  0xa2   : > { %v485_v14 = vor.u32 %v484_v0, %v481_v63  ;;  %v1704_v63 = vshll.u32 %v2586_v43, 16  ;;  %v1710_v0 = vshll.u32 %v2587_v49, 16 }
  0xa8   : > { %v760_v31 = vpop.f32.mrf.mxu0 }
  0xa9   : > { %v993_v32 = vpop.f32.mrf.mxu1 }
  0xaa   : > { %v994_v54 = vadd.f32 %v993_v32, %v760_v31  ;;  %v1878_v31 = vpack.c.b16 %v1856_v13, %v1855_v12  ;;  %v486_v32 = vrot.slane %v485_v14, 4  ;;  %v2588_v12 = vld [vmem:[%s2900_s16 + $0x98] sm:$0x1]  ;;  %v1703_v13 = vrot.slane %v1701_v59, 4 }
  0xab   : > { %799 = vmatmul.bf16.gmra.mxu0 %v679_v23  ;;  %v1706_v14 = vrot.slane %v1704_v63, 5 }
  0xac   : > { %1032 = vmatmul.bf16.gmra.mxu1 %v2660_v26  ;;  %v2661_v26 = vld [vmem:[%s2900_s16 + $0x6c] sm:$0xff]  ;;  %v491_v45 = vsel %vm2934_vm2, %v486_v32, %v3138_v1  ;;  %v1714_v1 = vshrl.u32 %v2587_v49, 16  ;;  %v1879_v32 = vpack.c.b16 %v1858_v6, %v1857_v5  ;;  %v2590_v49 = vld [vmem:[%s2900_s16 + $0xa0] sm:$0xf]  ;;  %v529_v5 = vrot.slane %v527_v48, 4 }
  0xad   : > { %1315 = vmatmul.bf16.gmra.mxu2 %v2692_v33  ;;  %v496_v33 = vrot.slane %v495_v15, 4  ;;  %v659_v2 = vunpack.c.l.b16 %v491_v45  ;;  %v3180_v15 = vrot.slane %v1710_v0, 5 }
  0xae   : > { %1997 = vmatmul.bf16.gmra.mxu3 %v1877_v34  ;;  %v500_v34 = vrot.slane %v498_v16, 5  ;;  %v1716_v16 = vrot.slane %v1714_v1, 4 }
  0xb0   : > { %v1276_v55 = vpop.f32.mrf.mxu2  ;;  %v762_v61 = vpop.f32.mrf.mxu0  ;;  %v501_v46 = vsel %vm2934_vm2, %v496_v33, %v500_v34  ;;  %v1707_v33 = vor.u32 %v1706_v14, %v1703_v13  ;;  %v1717_v34 = vor.u32 %v1716_v16, %v3180_v15 }
  0xb1   : > { %v1958_v56 = vpop.f32.mrf.mxu3  ;;  %v995_v62 = vpop.f32.mrf.mxu1  ;;  %v1356_v7 = vadd.f32 %v1276_v55, %v994_v54  ;;  %v660_v4 = vunpack.c.l.b16 %v501_v46 }
  0xb2   : > { %v996_v22 = vadd.f32 %v995_v62, %v762_v61  ;;  %v1708_v46 = vrot.slane %v1707_v33, 4  ;;  %v1718_v47 = vrot.slane %v1717_v34, 4 }
  0xb3   : > { %v2038_v20 = vadd.f32 %v1958_v56, %v1356_v7  ;;  %v506_v56 = vshll.u32 %v193_v40, 16  ;;  %v230_v7 = vld [vmem:[%s2900_s16 + $0x8c] sm:$0x1]  ;;  %v681_v19 = vpack.c.b16 %v660_v4, %v659_v2 }
  0xb5   : > { %v2074_v38 = vadd.f32 %v3149_v21, %v2038_v20  ;;  %v508_v9 = vrot.slane %v506_v56, 5 }
  0xb7   : > { %v2106_v50 = vmax.f32 %v2074_v38, 0.0  ;;  %v196_v38 = vld [vmem:[%s2900_s16 + $0x94] sm:$0xf] }
  0xb8   : > { %v1278_v23 = vpop.f32.mrf.mxu2  ;;  %v765_v28 = vpop.f32.mrf.mxu0 }
  0xb9   : > { %v1960_v24 = vpop.f32.mrf.mxu3  ;;  %v1357_v27 = vadd.f32 %v1278_v23, %v996_v22  ;;  %v998_v29 = vpop.f32.mrf.mxu1  ;;  %v2662_v23 = vld [vmem:[%s2900_s16 + $0x78] sm:$0xff] }
  0xba   : > { %v999_v52 = vadd.f32 %v998_v29, %v765_v28 }
  0xbb   : > { %v2039_v39 = vadd.f32 %v1960_v24, %v1357_v27  ;;  %804 = vmatmul.bf16.gmra.mxu0 %v680_v25  ;;  %v509_v24 = vor.u32 %v508_v9, %v505_v8  ;;  %v519_v25 = vor.u32 %v518_v11, %v3177_v10  ;;  %v1720_v27 = vshll.u32 %v2588_v12, 16 }
  0xbc   : > { %1037 = vmatmul.bf16.gmra.mxu1 %v2661_v26  ;;  %v522_v26 = vshll.u32 %v230_v7, 16 }
  0xbd   : > { %v2075_v41 = vadd.f32 %v3149_v21, %v2039_v39  ;;  %1320 = vmatmul.bf16.gmra.mxu2 %v2693_v30  ;;  %v2589_v39 = vld [vmem:[%s2900_s16 + $0x9c] sm:$0xf]  ;;  %v510_v40 = vrot.slane %v509_v24, 4  ;;  %v1722_v43 = vrot.slane %v1720_v27, 5 }
  0xbe   : > { %2002 = vmatmul.bf16.gmra.mxu3 %v1878_v31  ;;  %v2694_v31 = vld [vmem:[%s2900_s16 + $0x84] sm:$0xff]  ;;  %v524_v42 = vrot.slane %v522_v26, 5  ;;  %v1725_v53 = vshrl.u32 %v2589_v39, 16  ;;  %v1728_v57 = vshll.u32 %v2589_v39, 16 }
  0xbf   : > { %v2107_v51 = vmax.f32 %v2075_v41, 0.0  ;;  %v520_v41 = vrot.slane %v519_v25, 4  ;;  %v1723_v4 = vsel %vm2934_vm2, %v1718_v47, %v1722_v43 }
  0xc0   : > { %v1281_v54 = vpop.f32.mrf.mxu2  ;;  %v767_v61 = vpop.f32.mrf.mxu0  ;;  %v1727_v11 = vrot.slane %v1725_v53, 4  ;;  %v1730_v12 = vrot.slane %v1728_v57, 5 }
  0xc1   : > { %v1963_v55 = vpop.f32.mrf.mxu3  ;;  %v2719_v60 = vpack.c.bf16 %v2107_v51, %v2106_v50  ;;  %v1000_v62 = vpop.f32.mrf.mxu1  ;;  %v1358_v3 = vadd.f32 %v1281_v54, %v999_v52  ;;  %v530_v50 = vshll.u32 %v195_v35, 16  ;;  %v536_v51 = vshll.u32 %v196_v38, 16 }
  0xc2   : > { %v1001_v18 = vadd.f32 %v1000_v62, %v767_v61  ;;  %v540_v52 = vshrl.u32 %v196_v38, 16  ;;  %v1734_v61 = vshll.u32 %v2590_v49, 16  ;;  %v1738_v62 = vshrl.u32 %v2590_v49, 16  ;;  %v197_v38 = vld [vmem:[%s2900_s16 + $0x9c] sm:$0xf] }
  0xc3   : > { %2720 = vst [vmem:[%s3173_s10] sm:$0xff] %v2719_v60   ;;  %v2040_v17 = vadd.f32 %v1963_v55, %v1358_v3  ;;  %v515_v60 = vsel %vm2934_vm2, %v510_v40, %v3177_v10  ;;  %v525_v2 = vsel %vm2934_vm2, %v520_v41, %v524_v42  ;;  %v1713_v3 = vsel %vm2934_vm2, %v1708_v46, %v3180_v15  ;;  %v231_v10 = vld [vmem:[%s2900_s16 + $0x98] sm:$0x1]  ;;  %v198_v42 = vld [vmem:[%s2900_s16 + $0xa0] sm:$0xf] }
  0xc4   : > { %v532_v6 = vrot.slane %v530_v50, 5  ;;  %v3202_v7 = vrot.slane %v536_v51, 5  ;;  %v542_v8 = vrot.slane %v540_v52, 4  ;;  %v661_v13 = vunpack.c.l.b16 %v515_v60 }
  0xc5   : > { %v2076_v36 = vadd.f32 %v3149_v21, %v2040_v17  ;;  %v662_v14 = vunpack.c.l.b16 %v525_v2  ;;  %v3206_v16 = vrot.slane %v1734_v61, 5  ;;  %v1740_v15 = vrot.slane %v1738_v62, 4  ;;  %v2593_v61 = vld [vmem:[%s2900_s16 + $0xac] sm:$0xf] }
  0xc6   : > { %v1859_v17 = vunpack.c.l.b16 %v1713_v3  ;;  %v1731_v26 = vor.u32 %v1730_v12, %v1727_v11  ;;  %v551_v49 = vshrl.u32 %v197_v38, 16  ;;  %v554_v50 = vshll.u32 %v197_v38, 16 }
  0xc7   : > { %v2108_v54 = vmax.f32 %v2076_v36, 0.0  ;;  %v2695_v36 = vld [vmem:[%s2900_s16 + $0x90] sm:$0xff]  ;;  %v560_v52 = vshll.u32 %v198_v42, 16  ;;  %v564_v53 = vshrl.u32 %v198_v42, 16  ;;  %v1758_v11 = vshll.u32 %v2593_v61, 16 }
  0xc8   : > { %v1283_v20 = vpop.f32.mrf.mxu2  ;;  %v770_v29 = vpop.f32.mrf.mxu0  ;;  %v1732_v46 = vrot.slane %v1731_v26, 4  ;;  %v556_v2 = vrot.slane %v554_v50, 5  ;;  %v1762_v12 = vshrl.u32 %v2593_v61, 16 }
  0xc9   : > { %v1965_v22 = vpop.f32.mrf.mxu3  ;;  %v1359_v28 = vadd.f32 %v1283_v20, %v1001_v18  ;;  %v1003_v30 = vpop.f32.mrf.mxu1  ;;  %v1860_v18 = vunpack.c.l.b16 %v1723_v4  ;;  %v533_v20 = vor.u32 %v532_v6, %v529_v5 }
  0xca   : > { %v1004_v56 = vadd.f32 %v1003_v30, %v770_v29  ;;  %v682_v29 = vpack.c.b16 %v662_v14, %v661_v13  ;;  %v2663_v30 = vld [vmem:[%s2900_s16 + $0x84] sm:$0xff]  ;;  %v1737_v60 = vsel %vm2934_vm2, %v1732_v46, %v3206_v16  ;;  %v1764_v26 = vrot.slane %v1762_v12, 4 }
  0xcb   : > { %v2041_v37 = vadd.f32 %v1965_v22, %v1359_v28  ;;  %809 = vmatmul.bf16.gmra.mxu0 %v681_v19  ;;  %v2591_v19 = vld [vmem:[%s2900_s16 + $0xa4] sm:$0x1]  ;;  %v543_v22 = vor.u32 %v542_v8, %v3202_v7  ;;  %v534_v39 = vrot.slane %v533_v20, 4  ;;  %v3230_v8 = vrot.slane %v560_v52, 5 }
  0xcc   : > { %1042 = vmatmul.bf16.gmra.mxu1 %v2662_v23  ;;  %v546_v23 = vshll.u32 %v231_v10, 16 }
  0xcd   : > { %v2077_v45 = vadd.f32 %v3149_v21, %v2041_v37  ;;  %1325 = vmatmul.bf16.gmra.mxu2 %v2694_v31  ;;  %v1741_v31 = vor.u32 %v1740_v15, %v3206_v16  ;;  %v1880_v37 = vpack.c.b16 %v1860_v18, %v1859_v17  ;;  %v544_v40 = vrot.slane %v543_v22, 4 }
  0xce   : > { %2007 = vmatmul.bf16.gmra.mxu3 %v1879_v32  ;;  %v1744_v32 = vshll.u32 %v2591_v19, 16  ;;  %v548_v41 = vrot.slane %v546_v23, 5  ;;  %v1861_v15 = vunpack.c.l.b16 %v1737_v60 }
  0xcf   : > { %v2109_v55 = vmax.f32 %v2077_v45, 0.0  ;;  %v1742_v47 = vrot.slane %v1741_v31, 4 }
  0xd0   : > { %v1286_v58 = vpop.f32.mrf.mxu2  ;;  %v772_v0 = vpop.f32.mrf.mxu0  ;;  %v1746_v48 = vrot.slane %v1744_v32, 5  ;;  %v2664_v32 = vld [vmem:[%s2900_s16 + $0x90] sm:$0xff] }
  0xd1   : > { %v1968_v59 = vpop.f32.mrf.mxu3  ;;  %v2724_v63 = vpack.c.bf16 %v2109_v55, %v2108_v54  ;;  %v1005_v1 = vpop.f32.mrf.mxu1  ;;  %v1360_v9 = vadd.f32 %v1286_v58, %v1004_v56  ;;  %v2592_v54 = vld [vmem:[%s2900_s16 + $0xa8] sm:$0xf]  ;;  %v539_v55 = vsel %vm2934_vm2, %v534_v39, %v3202_v7  ;;  %v549_v56 = vsel %vm2934_vm2, %v544_v40, %v548_v41  ;;  %v232_v7 = vld [vmem:[%s2900_s16 + $0xa4] sm:$0x1]  ;;  %v2696_v39 = vld [vmem:[%s2900_s16 + $0x9c] sm:$0xff] }
  0xd2   : > { %v1006_v25 = vadd.f32 %v1005_v1, %v772_v0  ;;  %v1747_v0 = vsel %vm2934_vm2, %v1742_v47, %v1746_v48  ;;  %v553_v1 = vrot.slane %v551_v49, 4  ;;  %v1749_v3 = vshrl.u32 %v2592_v54, 16  ;;  %v199_v47 = vld [vmem:[%s2900_s16 + $0xa8] sm:$0xf]  ;;  %v200_v48 = vld [vmem:[%s2900_s16 + $0xac] sm:$0xf] }
  0xd3   : > { %2796 = vst [vmem:[%s3173_s10 + $0x8] sm:$0xff] %v2724_v63   ;;  %v2042_v24 = vadd.f32 %v1968_v59, %v1360_v9  ;;  %v566_v9 = vrot.slane %v564_v53, 4  ;;  %v1752_v10 = vshll.u32 %v2592_v54, 16  ;;  %v663_v14 = vunpack.c.l.b16 %v539_v55  ;;  %v2595_v54 = vld [vmem:[%s2900_s16 + $0xb4] sm:$0xf] }
  0xd4   : > { %v664_v16 = vunpack.c.l.b16 %v549_v56  ;;  %v1862_v17 = vunpack.c.l.b16 %v1747_v0  ;;  %v557_v18 = vor.u32 %v556_v2, %v553_v1  ;;  %v570_v19 = vshll.u32 %v232_v7, 16  ;;  %v2596_v55 = vld [vmem:[%s2900_s16 + $0xb8] sm:$0xf] }
  0xd5   : > { %v2078_v43 = vadd.f32 %v3149_v21, %v2042_v24  ;;  %v567_v20 = vor.u32 %v566_v9, %v3230_v8  ;;  %v1751_v22 = vrot.slane %v1749_v3, 4  ;;  %v1754_v23 = vrot.slane %v1752_v10, 5  ;;  %v2594_v24 = vld [vmem:[%s2900_s16 + $0xb0] sm:$0x1] }
  0xd6   : > { %v683_v31 = vpack.c.b16 %v664_v16, %v663_v14  ;;  %v1768_v42 = vshll.u32 %v2594_v24, 16  ;;  %v1773_v2 = vshrl.u32 %v2595_v54, 16  ;;  %v1776_v3 = vshll.u32 %v2595_v54, 16  ;;  %v201_v54 = vld [vmem:[%s2900_s16 + $0xb4] sm:$0xf] }
  0xd7   : > { %v2110_v57 = vmax.f32 %v2078_v43, 0.0  ;;  %v568_v40 = vrot.slane %v567_v20, 4  ;;  %v1755_v41 = vor.u32 %v1754_v23, %v1751_v22 }
  0xd8   : > { %v1288_v27 = vpop.f32.mrf.mxu2  ;;  %v775_v34 = vpop.f32.mrf.mxu0  ;;  %v1770_v53 = vrot.slane %v1768_v42, 5  ;;  %v1778_v20 = vrot.slane %v1776_v3, 5  ;;  %v2697_v42 = vld [vmem:[%s2900_s16 + $0xa8] sm:$0xff]  ;;  %v599_v3 = vshrl.u32 %v201_v54, 16 }
  0xd9   : > { %v1970_v28 = vpop.f32.mrf.mxu3  ;;  %v1361_v33 = vadd.f32 %v1288_v27, %v1006_v25  ;;  %v1008_v35 = vpop.f32.mrf.mxu1  ;;  %v3235_v25 = vrot.slane %v1758_v11, 5  ;;  %v1756_v52 = vrot.slane %v1755_v41, 4 }
  0xda   : > { %v1009_v59 = vadd.f32 %v1008_v35, %v775_v34  ;;  %v558_v34 = vrot.slane %v557_v18, 4  ;;  %v572_v35 = vrot.slane %v570_v19, 5  ;;  %v233_v18 = vld [vmem:[%s2900_s16 + $0xb0] sm:$0x1]  ;;  %v1775_v19 = vrot.slane %v1773_v2, 4 }
  0xdb   : > { %v2043_v45 = vadd.f32 %v1970_v28, %v1361_v33  ;;  %814 = vmatmul.bf16.gmra.mxu0 %v682_v29  ;;  %v1881_v33 = vpack.c.b16 %v1862_v17, %v1861_v15  ;;  %v1765_v43 = vor.u32 %v1764_v26, %v3235_v25  ;;  %v1761_v11 = vsel %vm2934_vm2, %v1756_v52, %v3235_v25  ;;  %v2597_v25 = vld [vmem:[%s2900_s16 + $0xbc] sm:$0x1] }
  0xdc   : > { %1047 = vmatmul.bf16.gmra.mxu1 %v2663_v30  ;;  %v563_v49 = vsel %vm2934_vm2, %v558_v34, %v3230_v8  ;;  %v1863_v24 = vunpack.c.l.b16 %v1761_v11  ;;  %v2665_v34 = vld [vmem:[%s2900_s16 + $0x9c] sm:$0xff] }
  0xdd   : > { %v2079_v51 = vadd.f32 %v3149_v21, %v2043_v45  ;;  %1330 = vmatmul.bf16.gmra.mxu2 %v2695_v36  ;;  %v1766_v56 = vrot.slane %v1765_v43, 4  ;;  %v665_v9 = vunpack.c.l.b16 %v563_v49 }
  0xde   : > { %2012 = vmatmul.bf16.gmra.mxu3 %v1880_v37 }
  0xdf   : > { %v2111_v58 = vmax.f32 %v2079_v51, 0.0  ;;  %v573_v51 = vsel %vm2934_vm2, %v568_v40, %v572_v35  ;;  %v1771_v12 = vsel %vm2934_vm2, %v1766_v56, %v1770_v53 }
  0xe0   : > { %v1291_v62 = vpop.f32.mrf.mxu2  ;;  %v777_v5 = vpop.f32.mrf.mxu0  ;;  %v666_v10 = vunpack.c.l.b16 %v573_v51  ;;  %v1864_v26 = vunpack.c.l.b16 %v1771_v12 }
  0xe1   : > { %v1973_v63 = vpop.f32.mrf.mxu3  ;;  %v2729_v4 = vpack.c.bf16 %v2111_v58, %v2110_v57  ;;  %v1010_v6 = vpop.f32.mrf.mxu1  ;;  %v1362_v13 = vadd.f32 %v1291_v62, %v1009_v59  ;;  %v575_v57 = vshrl.u32 %v199_v47, 16  ;;  %v578_v58 = vshll.u32 %v199_v47, 16 }
  0xe2   : > { %v1011_v28 = vadd.f32 %v1010_v6, %v777_v5  ;;  %v584_v59 = vshll.u32 %v200_v48, 16  ;;  %v1786_v5 = vshrl.u32 %v2596_v55, 16  ;;  %v1882_v43 = vpack.c.b16 %v1864_v26, %v1863_v24  ;;  %v234_v24 = vld [vmem:[%s2900_s16 + $0xbc] sm:$0x1] }
  0xe3   : > { %2797 = vst [vmem:[%s3173_s10 + $0x10] sm:$0xff] %v2729_v4   ;;  %v2044_v27 = vadd.f32 %v1973_v63, %v1362_v13  ;;  %v588_v63 = vshrl.u32 %v200_v48, 16  ;;  %v1782_v4 = vshll.u32 %v2596_v55, 16  ;;  %v577_v13 = vrot.slane %v575_v57, 4  ;;  %v202_v55 = vld [vmem:[%s2900_s16 + $0xb8] sm:$0xf] }
  0xe4   : > { %v580_v16 = vrot.slane %v578_v58, 5  ;;  %v3257_v15 = vrot.slane %v584_v59, 5  ;;  %v1788_v23 = vrot.slane %v1786_v5, 4 }
  0xe5   : > { %v2080_v45 = vadd.f32 %v3149_v21, %v2044_v27  ;;  %v590_v17 = vrot.slane %v588_v63, 4  ;;  %v3260_v22 = vrot.slane %v1782_v4, 5  ;;  %v684_v27 = vpack.c.b16 %v666_v10, %v665_v9 }
  0xe6   : > { %v612_v9 = vshrl.u32 %v202_v55, 16 }
  0xe7   : > { %v2112_v60 = vmax.f32 %v2080_v45, 0.0  ;;  %v591_v35 = vor.u32 %v590_v17, %v3257_v15 }
  0xe8   : > { %v1293_v29 = vpop.f32.mrf.mxu2  ;;  %v780_v37 = vpop.f32.mrf.mxu0 }
  0xe9   : > { %v1975_v30 = vpop.f32.mrf.mxu3  ;;  %v1363_v36 = vadd.f32 %v1293_v29, %v1011_v28  ;;  %v1013_v38 = vpop.f32.mrf.mxu1  ;;  %v592_v49 = vrot.slane %v591_v35, 4  ;;  %v2666_v35 = vld [vmem:[%s2900_s16 + $0xa8] sm:$0xff] }
  0xea   : > { %v1014_v62 = vadd.f32 %v1013_v38, %v780_v37  ;;  %v1789_v37 = vor.u32 %v1788_v23, %v3260_v22  ;;  %v1792_v38 = vshll.u32 %v2597_v25, 16  ;;  %v614_v23 = vrot.slane %v612_v9, 4 }
  0xeb   : > { %v2045_v46 = vadd.f32 %v1975_v30, %v1363_v36  ;;  %819 = vmatmul.bf16.gmra.mxu0 %v683_v31  ;;  %v581_v30 = vor.u32 %v580_v16, %v577_v13  ;;  %v594_v31 = vshll.u32 %v233_v18, 16  ;;  %v1779_v36 = vor.u32 %v1778_v20, %v1775_v19 }
  0xec   : > { %1052 = vmatmul.bf16.gmra.mxu1 %v2664_v32  ;;  %v1790_v51 = vrot.slane %v1789_v37, 4  ;;  %v1794_v52 = vrot.slane %v1792_v38, 5  ;;  %v601_v19 = vrot.slane %v599_v3, 4 }
  0xed   : > { %v2081_v50 = vadd.f32 %v3149_v21, %v2045_v46  ;;  %1335 = vmatmul.bf16.gmra.mxu2 %v2696_v39  ;;  %v582_v47 = vrot.slane %v581_v30, 4  ;;  %v596_v48 = vrot.slane %v594_v31, 5  ;;  %v2600_v31 = vld [vmem:[%s2900_s16 + $0xc8] sm:$0x1] }
  0xee   : > { %2017 = vmatmul.bf16.gmra.mxu3 %v1881_v33  ;;  %v1795_v2 = vsel %vm2934_vm2, %v1790_v51, %v1794_v52 }
  0xef   : > { %v2113_v61 = vmax.f32 %v2081_v50, 0.0  ;;  %v1780_v50 = vrot.slane %v1779_v36, 4  ;;  %v587_v59 = vsel %vm2934_vm2, %v582_v47, %v3257_v15  ;;  %v1866_v18 = vunpack.c.l.b16 %v1795_v2 }
  0xf0   : > { %v1296_v0 = vpop.f32.mrf.mxu2  ;;  %v782_v7 = vpop.f32.mrf.mxu0  ;;  %v667_v16 = vunpack.c.l.b16 %v587_v59  ;;  %v1816_v47 = vshll.u32 %v2600_v31, 16 }
  0xf1   : > { %v1978_v1 = vpop.f32.mrf.mxu3  ;;  %v2734_v6 = vpack.c.bf16 %v2113_v61, %v2112_v60  ;;  %v1015_v8 = vpop.f32.mrf.mxu1  ;;  %v1364_v14 = vadd.f32 %v1296_v0, %v1014_v62  ;;  %v2598_v60 = vld [vmem:[%s2900_s16 + $0xc0] sm:$0xf]  ;;  %v2599_v61 = vld [vmem:[%s2900_s16 + $0xc4] sm:$0xf]  ;;  %v597_v0 = vsel %vm2934_vm2, %v592_v49, %v596_v48 }
  0xf2   : > { %v1016_v29 = vadd.f32 %v1015_v8, %v782_v7  ;;  %v602_v7 = vshll.u32 %v201_v54, 16  ;;  %v608_v8 = vshll.u32 %v202_v55, 16  ;;  %v1797_v10 = vshrl.u32 %v2598_v60, 16 }
  0xf3   : > { %2798 = vst [vmem:[%s3173_s10 + $0x18] sm:$0xff] %v2734_v6   ;;  %v2046_v28 = vadd.f32 %v1978_v1, %v1364_v14  ;;  %v1785_v1 = vsel %vm2934_vm2, %v1780_v50, %v3260_v22  ;;  %v1800_v11 = vshll.u32 %v2598_v60, 16  ;;  %v1806_v12 = vshll.u32 %v2599_v61, 16 }
  0xf4   : > { %v1810_v13 = vshrl.u32 %v2599_v61, 16  ;;  %v668_v15 = vunpack.c.l.b16 %v597_v0  ;;  %v1865_v17 = vunpack.c.l.b16 %v1785_v1  ;;  %v604_v20 = vrot.slane %v602_v7, 5 }
  0xf5   : > { %v2082_v45 = vadd.f32 %v3149_v21, %v2046_v28  ;;  %v610_v22 = vrot.slane %v608_v8, 5  ;;  %v1799_v26 = vrot.slane %v1797_v10, 4  ;;  %v1802_v25 = vrot.slane %v1800_v11, 5 }
  0xf6   : > { %v1812_v28 = vrot.slane %v1810_v13, 4  ;;  %v1883_v36 = vpack.c.b16 %v1866_v18, %v1865_v17 }
  0xf7   : > { %v2114_v56 = vmax.f32 %v2082_v45, 0.0  ;;  %v1803_v45 = vor.u32 %v1802_v25, %v1799_v26 }
  0xf8   : > { %v1298_v32 = vpop.f32.mrf.mxu2  ;;  %v785_v40 = vpop.f32.mrf.mxu0 }
  0xf9   : > { %v1980_v33 = vpop.f32.mrf.mxu3  ;;  %v1365_v39 = vadd.f32 %v1298_v32, %v1016_v29  ;;  %v1018_v41 = vpop.f32.mrf.mxu1  ;;  %v1804_v54 = vrot.slane %v1803_v45, 4 }
  0xfa   : > { %v1019_v58 = vadd.f32 %v1018_v41, %v785_v40  ;;  %v2698_v40 = vld [vmem:[%s2900_s16 + $0xb4] sm:$0xff]  ;;  %v605_v41 = vor.u32 %v604_v20, %v601_v19  ;;  %v2699_v19 = vld [vmem:[%s2900_s16 + $0xc0] sm:$0xff] }
  0xfb   : > { %v2047_v46 = vadd.f32 %v1980_v33, %v1365_v39  ;;  %824 = vmatmul.bf16.gmra.mxu0 %v684_v27  ;;  %v1808_v27 = vrot.slane %v1806_v12, 5 }
  0xfc   : > { %1057 = vmatmul.bf16.gmra.mxu1 %v2665_v34  ;;  %v685_v34 = vpack.c.b16 %v668_v15, %v667_v16  ;;  %v606_v51 = vrot.slane %v605_v41, 4  ;;  %v2667_v16 = vld [vmem:[%s2900_s16 + $0xb4] sm:$0xff] }
  0xfd   : > { %v2083_v53 = vadd.f32 %v3149_v21, %v2047_v46  ;;  %1340 = vmatmul.bf16.gmra.mxu2 %v2697_v42  ;;  %v615_v42 = vor.u32 %v614_v23, %v610_v22  ;;  %v1813_v46 = vor.u32 %v1812_v28, %v1808_v27  ;;  %v1809_v3 = vsel %vm2934_vm2, %v1804_v54, %v1808_v27 }
  0xfe   : > { %2022 = vmatmul.bf16.gmra.mxu3 %v1882_v43  ;;  %v618_v43 = vshll.u32 %v234_v24, 16  ;;  %v611_v1 = vsel %vm2934_vm2, %v606_v51, %v610_v22  ;;  %v1867_v8 = vunpack.c.l.b16 %v1809_v3 }
  0xff   : > { %v2115_v57 = vmax.f32 %v2083_v53, 0.0  ;;  %v616_v52 = vrot.slane %v615_v42, 4  ;;  %v1814_v55 = vrot.slane %v1813_v46, 4 }
 0x100   : > { %v1301_v62 = vpop.f32.mrf.mxu2  ;;  %v787_v5 = vpop.f32.mrf.mxu0  ;;  %v620_v53 = vrot.slane %v618_v43, 5 }
 0x101   : > { %v1983_v63 = vpop.f32.mrf.mxu3  ;;  %v2739_v4 = vpack.c.bf16 %v2115_v57, %v2114_v56  ;;  %v1020_v6 = vpop.f32.mrf.mxu1  ;;  %v1366_v14 = vadd.f32 %v1301_v62, %v1019_v58  ;;  %v1818_v56 = vrot.slane %v1816_v47, 5 }
 0x102   : > { %v1021_v30 = vadd.f32 %v1020_v6, %v787_v5  ;;  %v621_v2 = vsel %vm2934_vm2, %v616_v52, %v620_v53  ;;  %v669_v6 = vunpack.c.l.b16 %v611_v1 }
 0x103   : > { %2799 = vst [vmem:[%s3173_s10 + $0x20] sm:$0xff] %v2739_v4   ;;  %v2048_v29 = vadd.f32 %v1983_v63, %v1366_v14  ;;  %v1819_v4 = vsel %vm2934_vm2, %v1814_v55, %v1818_v56  ;;  %v670_v7 = vunpack.c.l.b16 %v621_v2 }
 0x104   : > { %v1868_v9 = vunpack.c.l.b16 %v1819_v4 }
 0x105   : > { %v2084_v48 = vadd.f32 %v3149_v21, %v2048_v29  ;;  %v686_v14 = vpack.c.b16 %v670_v7, %v669_v6 }
 0x106   : > { %v1884_v20 = vpack.c.b16 %v1868_v9, %v1867_v8 }
 0x107   : > { %v2116_v57 = vmax.f32 %v2084_v48, 0.0 }
 0x108   : > { %v1303_v32 = vpop.f32.mrf.mxu2  ;;  %v790_v38 = vpop.f32.mrf.mxu0 }
 0x109   : > { %v1985_v33 = vpop.f32.mrf.mxu3  ;;  %v1367_v37 = vadd.f32 %v1303_v32, %v1021_v30  ;;  %v1023_v39 = vpop.f32.mrf.mxu1 }
 0x10a   : > { %v1024_v59 = vadd.f32 %v1023_v39, %v790_v38 }
 0x10b   : > { %v2049_v49 = vadd.f32 %v1985_v33, %v1367_v37  ;;  %829 = vmatmul.bf16.gmra.mxu0 %v685_v34 }
 0x10c   : > { %1062 = vmatmul.bf16.gmra.mxu1 %v2666_v35 }
 0x10d   : > { %v2085_v50 = vadd.f32 %v3149_v21, %v2049_v49  ;;  %1345 = vmatmul.bf16.gmra.mxu2 %v2698_v40 }
 0x10e   : > { %2027 = vmatmul.bf16.gmra.mxu3 %v1883_v36 }
 0x10f   : > { %v2117_v58 = vmax.f32 %v2085_v50, 0.0 }
 0x110   : > { %v1306_v60 = vpop.f32.mrf.mxu2  ;;  %v792_v63 = vpop.f32.mrf.mxu0 }
 0x111   : > { %v1988_v61 = vpop.f32.mrf.mxu3  ;;  %v2744_v62 = vpack.c.bf16 %v2117_v58, %v2116_v57  ;;  %v1025_v0 = vpop.f32.mrf.mxu1  ;;  %v1368_v5 = vadd.f32 %v1306_v60, %v1024_v59 }
 0x112   : > { %v1026_v11 = vadd.f32 %v1025_v0, %v792_v63 }
 0x113   : > { %2800 = vst [vmem:[%s3173_s10 + $0x28] sm:$0xff] %v2744_v62   ;;  %v2050_v10 = vadd.f32 %v1988_v61, %v1368_v5 }
 0x115   : > { %v2086_v44 = vadd.f32 %v3149_v21, %v2050_v10 }
 0x117   : > { %v2118_v24 = vmax.f32 %v2086_v44, 0.0 }
 0x118   : > { %v1308_v12 = vpop.f32.mrf.mxu2  ;;  %v795_v17 = vpop.f32.mrf.mxu0 }
 0x119   : > { %v1990_v13 = vpop.f32.mrf.mxu3  ;;  %v1369_v15 = vadd.f32 %v1308_v12, %v1026_v11  ;;  %v1028_v18 = vpop.f32.mrf.mxu1 }
 0x11a   : > { %v1029_v25 = vadd.f32 %v1028_v18, %v795_v17 }
 0x11b   : > { %v2051_v22 = vadd.f32 %v1990_v13, %v1369_v15  ;;  %834 = vmatmul.bf16.gmra.mxu0 %v686_v14 }
 0x11c   : > { %1067 = vmatmul.bf16.gmra.mxu1 %v2667_v16 }
 0x11d   : > { %v2087_v23 = vadd.f32 %v3149_v21, %v2051_v22  ;;  %1350 = vmatmul.bf16.gmra.mxu2 %v2699_v19 }
 0x11e   : > { %2032 = vmatmul.bf16.gmra.mxu3 %v1884_v20 }
 0x11f   : > { %v2119_v26 = vmax.f32 %v2087_v23, 0.0 }
 0x120   : > { %v1311_v27 = vpop.f32.mrf.mxu2  ;;  %v797_v30 = vpop.f32.mrf.mxu0 }
 0x121   : > { %v1993_v28 = vpop.f32.mrf.mxu3  ;;  %v2749_v29 = vpack.c.bf16 %v2119_v26, %v2118_v24  ;;  %v1030_v31 = vpop.f32.mrf.mxu1  ;;  %v1370_v32 = vadd.f32 %v1311_v27, %v1029_v25 }
 0x122   : > { %v1031_v34 = vadd.f32 %v1030_v31, %v797_v30 }
 0x123   : > { %2801 = vst [vmem:[%s3173_s10 + $0x30] sm:$0xff] %v2749_v29   ;;  %v2052_v33 = vadd.f32 %v1993_v28, %v1370_v32 }
 0x125   : > { %v2088_v40 = vadd.f32 %v3149_v21, %v2052_v33 }
 0x127   : > { %v2120_v43 = vmax.f32 %v2088_v40, 0.0 }
 0x128   : > { %v1313_v35 = vpop.f32.mrf.mxu2  ;;  %v800_v38 = vpop.f32.mrf.mxu0 }
 0x129   : > { %v1995_v36 = vpop.f32.mrf.mxu3  ;;  %v1371_v37 = vadd.f32 %v1313_v35, %v1031_v34  ;;  %v1033_v39 = vpop.f32.mrf.mxu1 }
 0x12a   : > { %v1034_v46 = vadd.f32 %v1033_v39, %v800_v38 }
 0x12b   : > { %v2053_v41 = vadd.f32 %v1995_v36, %v1371_v37 }
 0x12d   : > { %v2089_v42 = vadd.f32 %v3149_v21, %v2053_v41 }
 0x12f   : > { %v2121_v45 = vmax.f32 %v2089_v42, 0.0 }
 0x130   : > { %v1316_v47 = vpop.f32.mrf.mxu2  ;;  %v802_v50 = vpop.f32.mrf.mxu0 }
 0x131   : > { %v1998_v48 = vpop.f32.mrf.mxu3  ;;  %v2754_v49 = vpack.c.bf16 %v2121_v45, %v2120_v43  ;;  %v1035_v51 = vpop.f32.mrf.mxu1  ;;  %v1372_v52 = vadd.f32 %v1316_v47, %v1034_v46 }
 0x132   : > { %v1036_v54 = vadd.f32 %v1035_v51, %v802_v50 }
 0x133   : > { %2802 = vst [vmem:[%s3173_s10 + $0x38] sm:$0xff] %v2754_v49   ;;  %v2054_v53 = vadd.f32 %v1998_v48, %v1372_v52 }
 0x135   : > { %v2090_v60 = vadd.f32 %v3149_v21, %v2054_v53 }
 0x137   : > { %v2122_v63 = vmax.f32 %v2090_v60, 0.0 }
 0x138   : > { %v1318_v55 = vpop.f32.mrf.mxu2  ;;  %v805_v58 = vpop.f32.mrf.mxu0 }
 0x139   : > { %v2000_v56 = vpop.f32.mrf.mxu3  ;;  %v1373_v57 = vadd.f32 %v1318_v55, %v1036_v54  ;;  %v1038_v59 = vpop.f32.mrf.mxu1 }
 0x13a   : > { %v1039_v1 = vadd.f32 %v1038_v59, %v805_v58 }
 0x13b   : > { %v2055_v61 = vadd.f32 %v2000_v56, %v1373_v57 }
 0x13d   : > { %v2091_v62 = vadd.f32 %v3149_v21, %v2055_v61 }
 0x13f   : > { %v2123_v0 = vmax.f32 %v2091_v62, 0.0 }
 0x140   : > { %v1321_v2 = vpop.f32.mrf.mxu2  ;;  %v807_v5 = vpop.f32.mrf.mxu0 }
 0x141   : > { %v2003_v3 = vpop.f32.mrf.mxu3  ;;  %v2759_v4 = vpack.c.bf16 %v2123_v0, %v2122_v63  ;;  %v1040_v6 = vpop.f32.mrf.mxu1  ;;  %v1374_v7 = vadd.f32 %v1321_v2, %v1039_v1 }
 0x142   : > { %v1041_v9 = vadd.f32 %v1040_v6, %v807_v5 }
 0x143   : > { %2803 = vst [vmem:[%s3173_s10 + $0x40] sm:$0xff] %v2759_v4   ;;  %v2056_v8 = vadd.f32 %v2003_v3, %v1374_v7 }
 0x145   : > { %v2092_v16 = vadd.f32 %v3149_v21, %v2056_v8 }
 0x147   : > { %v2124_v18 = vmax.f32 %v2092_v16, 0.0 }
 0x148   : > { %v1323_v10 = vpop.f32.mrf.mxu2  ;;  %v810_v13 = vpop.f32.mrf.mxu0 }
 0x149   : > { %v2005_v11 = vpop.f32.mrf.mxu3  ;;  %v1375_v12 = vadd.f32 %v1323_v10, %v1041_v9  ;;  %v1043_v14 = vpop.f32.mrf.mxu1 }
 0x14a   : > { %v1044_v20 = vadd.f32 %v1043_v14, %v810_v13 }
 0x14b   : > { %v2057_v15 = vadd.f32 %v2005_v11, %v1375_v12 }
 0x14d   : > { %v2093_v17 = vadd.f32 %v3149_v21, %v2057_v15 }
 0x14f   : > { %v2125_v19 = vmax.f32 %v2093_v17, 0.0 }
 0x150   : > { %v1326_v44 = vpop.f32.mrf.mxu2  ;;  %v812_v24 = vpop.f32.mrf.mxu0 }
 0x151   : > { %v2008_v22 = vpop.f32.mrf.mxu3  ;;  %v2764_v23 = vpack.c.bf16 %v2125_v19, %v2124_v18  ;;  %v1045_v26 = vpop.f32.mrf.mxu1  ;;  %v1376_v25 = vadd.f32 %v1326_v44, %v1044_v20 }
 0x152   : > { %v1046_v28 = vadd.f32 %v1045_v26, %v812_v24 }
 0x153   : > { %2804 = vst [vmem:[%s3173_s10 + $0x48] sm:$0xff] %v2764_v23   ;;  %v2058_v27 = vadd.f32 %v2008_v22, %v1376_v25 }
 0x155   : > { %v2094_v34 = vadd.f32 %v3149_v21, %v2058_v27 }
 0x157   : > { %v2126_v37 = vmax.f32 %v2094_v34, 0.0 }
 0x158   : > { %v1328_v29 = vpop.f32.mrf.mxu2  ;;  %v815_v32 = vpop.f32.mrf.mxu0 }
 0x159   : > { %v2010_v30 = vpop.f32.mrf.mxu3  ;;  %v1377_v31 = vadd.f32 %v1328_v29, %v1046_v28  ;;  %v1048_v33 = vpop.f32.mrf.mxu1 }
 0x15a   : > { %v1049_v39 = vadd.f32 %v1048_v33, %v815_v32 }
 0x15b   : > { %v2059_v35 = vadd.f32 %v2010_v30, %v1377_v31 }
 0x15d   : > { %v2095_v36 = vadd.f32 %v3149_v21, %v2059_v35 }
 0x15f   : > { %v2127_v38 = vmax.f32 %v2095_v36, 0.0 }
 0x160   : > { %v1331_v40 = vpop.f32.mrf.mxu2  ;;  %v817_v43 = vpop.f32.mrf.mxu0 }
 0x161   : > { %v2013_v41 = vpop.f32.mrf.mxu3  ;;  %v2769_v42 = vpack.c.bf16 %v2127_v38, %v2126_v37  ;;  %v1050_v45 = vpop.f32.mrf.mxu1  ;;  %v1378_v46 = vadd.f32 %v1331_v40, %v1049_v39 }
 0x162   : > { %v1051_v48 = vadd.f32 %v1050_v45, %v817_v43 }
 0x163   : > { %2805 = vst [vmem:[%s3173_s10 + $0x50] sm:$0xff] %v2769_v42   ;;  %v2060_v47 = vadd.f32 %v2013_v41, %v1378_v46 }
 0x165   : > { %v2096_v54 = vadd.f32 %v3149_v21, %v2060_v47 }
 0x167   : > { %v2128_v57 = vmax.f32 %v2096_v54, 0.0 }
 0x168   : > { %v1333_v49 = vpop.f32.mrf.mxu2  ;;  %v820_v52 = vpop.f32.mrf.mxu0 }
 0x169   : > { %v2015_v50 = vpop.f32.mrf.mxu3  ;;  %v1379_v51 = vadd.f32 %v1333_v49, %v1051_v48  ;;  %v1053_v53 = vpop.f32.mrf.mxu1 }
 0x16a   : > { %v1054_v59 = vadd.f32 %v1053_v53, %v820_v52 }
 0x16b   : > { %v2061_v55 = vadd.f32 %v2015_v50, %v1379_v51 }
 0x16d   : > { %v2097_v56 = vadd.f32 %v3149_v21, %v2061_v55  ;;  %v2821_v21 = vld [vmem:[%s3331_s2] ss:$0 sm:$0xff] }
 0x16f   : > { %v2129_v58 = vmax.f32 %v2097_v56, 0.0 }
 0x170   : > { %v1336_v60 = vpop.f32.mrf.mxu2  ;;  %v822_v63 = vpop.f32.mrf.mxu0 }
 0x171   : > { %v2018_v61 = vpop.f32.mrf.mxu3  ;;  %v2774_v62 = vpack.c.bf16 %v2129_v58, %v2128_v57  ;;  %v1055_v0 = vpop.f32.mrf.mxu1  ;;  %v1380_v1 = vadd.f32 %v1336_v60, %v1054_v59 }
 0x172   : > { %v1056_v3 = vadd.f32 %v1055_v0, %v822_v63 }
 0x173   : > { %2806 = vst [vmem:[%s3173_s10 + $0x58] sm:$0xff] %v2774_v62   ;;  %v2062_v2 = vadd.f32 %v2018_v61, %v1380_v1 }
 0x175   : > { %v2098_v9 = vadd.f32 %v2821_v21, %v2062_v2 }
 0x177   : > { %v2130_v12 = vmax.f32 %v2098_v9, 0.0 }
 0x178   : > { %v1338_v4 = vpop.f32.mrf.mxu2  ;;  %v825_v7 = vpop.f32.mrf.mxu0 }
 0x179   : > { %v2020_v5 = vpop.f32.mrf.mxu3  ;;  %v1381_v6 = vadd.f32 %v1338_v4, %v1056_v3  ;;  %v1058_v8 = vpop.f32.mrf.mxu1 }
 0x17a   : > { %v1059_v14 = vadd.f32 %v1058_v8, %v825_v7 }
 0x17b   : > { %v2063_v10 = vadd.f32 %v2020_v5, %v1381_v6 }
 0x17d   : > { %v2099_v11 = vadd.f32 %v2821_v21, %v2063_v10 }
 0x17f   : > { %v2131_v13 = vmax.f32 %v2099_v11, 0.0 }
 0x180   : > { %v1341_v16 = vpop.f32.mrf.mxu2  ;;  %v827_v18 = vpop.f32.mrf.mxu0 }
 0x181   : > { %v2023_v15 = vpop.f32.mrf.mxu3  ;;  %v2779_v17 = vpack.c.bf16 %v2131_v13, %v2130_v12  ;;  %v1060_v19 = vpop.f32.mrf.mxu1  ;;  %v1382_v20 = vadd.f32 %v1341_v16, %v1059_v14 }
 0x182   : > { %v1061_v22 = vadd.f32 %v1060_v19, %v827_v18 }
 0x183   : > { %2807 = vst [vmem:[%s3173_s10 + $0x60] sm:$0xff] %v2779_v17   ;;  %v2064_v44 = vadd.f32 %v2023_v15, %v1382_v20 }
 0x185   : > { %v2100_v28 = vadd.f32 %v2821_v21, %v2064_v44 }
 0x187   : > { %v2132_v31 = vmax.f32 %v2100_v28, 0.0 }
 0x188   : > { %v1343_v23 = vpop.f32.mrf.mxu2  ;;  %v830_v25 = vpop.f32.mrf.mxu0 }
 0x189   : > { %v2025_v24 = vpop.f32.mrf.mxu3  ;;  %v1383_v26 = vadd.f32 %v1343_v23, %v1061_v22  ;;  %v1063_v27 = vpop.f32.mrf.mxu1 }
 0x18a   : > { %v1064_v33 = vadd.f32 %v1063_v27, %v830_v25 }
 0x18b   : > { %v2065_v29 = vadd.f32 %v2025_v24, %v1383_v26 }
 0x18d   : > { %v2101_v30 = vadd.f32 %v2821_v21, %v2065_v29 }
 0x18f   : > { %v2133_v32 = vmax.f32 %v2101_v30, 0.0 }
 0x190   : > { %v1346_v34 = vpop.f32.mrf.mxu2  ;;  %v832_v37 = vpop.f32.mrf.mxu0 }
 0x191   : > { %v2028_v35 = vpop.f32.mrf.mxu3  ;;  %v2784_v36 = vpack.c.bf16 %v2133_v32, %v2132_v31  ;;  %v1065_v38 = vpop.f32.mrf.mxu1  ;;  %v1384_v39 = vadd.f32 %v1346_v34, %v1064_v33 }
 0x192   : > { %v1066_v41 = vadd.f32 %v1065_v38, %v832_v37 }
 0x193   : > { %2808 = vst [vmem:[%s3173_s10 + $0x68] sm:$0xff] %v2784_v36   ;;  %v2066_v40 = vadd.f32 %v2028_v35, %v1384_v39 }
 0x195   : > { %v2102_v48 = vadd.f32 %v2821_v21, %v2066_v40 }
 0x197   : > { %v2134_v51 = vmax.f32 %v2102_v48, 0.0 }
 0x198   : > { %v1348_v42 = vpop.f32.mrf.mxu2  ;;  %v835_v46 = vpop.f32.mrf.mxu0 }
 0x199   : > { %v2030_v43 = vpop.f32.mrf.mxu3  ;;  %v1385_v45 = vadd.f32 %v1348_v42, %v1066_v41  ;;  %v1068_v47 = vpop.f32.mrf.mxu1 }
 0x19a   : > { %v1069_v53 = vadd.f32 %v1068_v47, %v835_v46 }
 0x19b   : > { %v2067_v49 = vadd.f32 %v2030_v43, %v1385_v45 }
 0x19d   : > { %v2103_v50 = vadd.f32 %v2821_v21, %v2067_v49 }
 0x19f   : > { %v2135_v52 = vmax.f32 %v2103_v50, 0.0 }
 0x1a0   : > { %v1351_v54 = vpop.f32.mrf.mxu2  ;;  %v837_v58 = vpop.f32.mrf.mxu0 }
 0x1a1   : > { %v2033_v55 = vpop.f32.mrf.mxu3  ;;  %v2789_v56 = vpack.c.bf16 %v2135_v52, %v2134_v51  ;;  %v1386_v57 = vadd.f32 %v1351_v54, %v1069_v53  ;;  %v1070_v59 = vpop.f32.mrf.mxu1 }
 0x1a2   : > { %v1071_v61 = vadd.f32 %v1070_v59, %v837_v58 }
 0x1a3   : > { %2809 = vst [vmem:[%s3173_s10 + $0x70] sm:$0xff] %v2789_v56   ;;  %v2068_v60 = vadd.f32 %v2033_v55, %v1386_v57 }
 0x1a5   : > { %v2104_v1 = vadd.f32 %v2821_v21, %v2068_v60 }
 0x1a7   : > { %v2136_v4 = vmax.f32 %v2104_v1, 0.0 }
 0x1a8   : > { %v1353_v62 = vpop.f32.mrf.mxu2 }
 0x1a9   : > { %v1387_v63 = vadd.f32 %v1353_v62, %v1071_v61  ;;  %v2035_v0 = vpop.f32.mrf.mxu3 }
 0x1ab   : > { %v2069_v2 = vadd.f32 %v2035_v0, %v1387_v63 }
 0x1ad   : > { %v2105_v3 = vadd.f32 %v2821_v21, %v2069_v2 }
 0x1af   : > { %v2137_v5 = vmax.f32 %v2105_v3, 0.0 }
 0x1b1   : > { %v2794_v6 = vpack.c.bf16 %v2137_v5, %v2136_v4 }
 0x1b3   : > { %2810 = vst [vmem:[%s3173_s10 + $0x78] sm:$0xff] %v2794_v6  }
 0x1b4 PF: > { %s13_s12 = sadd.s32 1, %s2828_s12  }
 0x1b5   : > { %p10_p4 = scmp.ge.s32.totalorder %s13_s12, 6  }
 0x1b7   :  { %12 = sbr.rel (!%p10_p4) target bundleno = 1 (0x1), region = 66 }

// kernel: monofusion_forward.8
= control target key start
LH: loop header
LB: loop body
LE: loop exit
PB: predicated region body
PF: predicated region fallthrough
CT: control target
= control target key end

     0   :  { %s3701_s12 = smov 0   ;;  %s4406_s0 = inlined_call_operand.vmem [shape: bf16[4,9,9,512], index: 0, kind: input, shape index: {}]   ;;  %s4407_s1 = inlined_call_operand.vmem [shape: bf16[2,2,512,128], index: 1, kind: input, shape index: {}]   ;;  %s4408_s2 = inlined_call_operand.vmem [shape: f32[1,128], index: 2, kind: input, shape index: {}]   ;;  %s4409_s3 = inlined_call_operand.vmem [shape: bf16[4,64,128], index: 3, kind: output, shape index: {}]  }
   0x1 LB: > { %s2589_s13 = sadd.s32 4294967295, %s3679_s12   ;;  %p2593_p0 = scmp.ge.s32.totalorder %s3679_s12, 1  ;;  %s3679_s12 = sphi %s3701_s12, %s13_s12  }
   0x2   : > { %p137_p1 = scmp.lt.s32.totalorder %s3679_s12, 5 }
   0x4   : > { %p138_p2 = pnand %p2593_p0, %p137_p1 }
   0x5   : > { %p161_p3 = scmp.lt.s32.totalorder (!%p138_p2), %s2589_s13, 3 }
   0x6   : > { %141 = sbr.rel (%p138_p2) target bundleno = 438 (0x1b6), region = 32 }
   0xb   : > { %v3535_v0 = vld [vmem:[%s4407_s1 + $0x138] sm:$0xff]  ;;  %v3534_v4 = vld [vmem:[%s4407_s1 + $0x130] sm:$0xff]  ;;  %s4413_s13 = smov (!%p161_p3, %s2589_s13), 3  ;;  %v3533_v8 = vld [vmem:[%s4407_s1 + $0x128] sm:$0xff]  ;;  %vm267_vm0 = vsmask.f32 3328 }
   0xc   : > { %v3543_v1 = vld [vmem:[%s4407_s1 + $0x178] sm:$0xff]  ;;  %815 = vmatpush.bf16.msra.mxu0 %v3535_v0  ;;  %v3542_v5 = vld [vmem:[%s4407_s1 + $0x170] sm:$0xff]  ;;  %s3663_s30 = smul.u32 288, %s4413_s13  ;;  %v3541_v9 = vld [vmem:[%s4407_s1 + $0x168] sm:$0xff]  ;;  %vm268_vm1 = vsmask.f32 7440 }
   0xd   : > { %v3551_v2 = vld [vmem:[%s4407_s1 + $0x1b8] sm:$0xff]  ;;  %844 = vmatpush.bf16.msra.mxu1 %v3543_v1  ;;  %v3550_v6 = vld [vmem:[%s4407_s1 + $0x1b0] sm:$0xff]  ;;  %v3549_v10 = vld [vmem:[%s4407_s1 + $0x1a8] sm:$0xff]  ;;  %s3479_s7 = sshll.u32 %s4413_s13, 5 }
   0xe   : > { %v3559_v3 = vld [vmem:[%s4407_s1 + $0x1f8] sm:$0xff]  ;;  %873 = vmatpush.bf16.msra.mxu2 %v3551_v2  ;;  %v3558_v7 = vld [vmem:[%s4407_s1 + $0x1f0] sm:$0xff]  ;;  %v3557_v11 = vld [vmem:[%s4407_s1 + $0x1e8] sm:$0xff]  ;;  %s3751_s16 = scalar_lea.vmem %s4406_s0, %s3663_s30  ;;  %s4376_s10 = scalar_lea.vmem %s4409_s3, %s3479_s7 }
   0xf   : > { %902 = vmatpush.bf16.msra.mxu3 %v3559_v3  ;;  %v3532_v12 = vld [vmem:[%s4407_s1 + $0x120] sm:$0xff]  ;;  %v251_v18 = vld [vmem:[%s3751_s16 + $0x10] sm:$0x11]  ;;  %v172_v25 = vld [vmem:[%s3751_s16 + $0x8] sm:$0xff] }
  0x10   : > { %816 = vmatpush.bf16.msra.mxu0 %v3534_v4  ;;  %v3540_v13 = vld [vmem:[%s4407_s1 + $0x160] sm:$0xff]  ;;  %v253_v19 = vld [vmem:[%s3751_s16 + $0x30] sm:$0x11]  ;;  %v280_v22 = vshll.u32 %v251_v18, 16  ;;  %v3531_v26 = vld [vmem:[%s4407_s1 + $0x118] sm:$0xff]  ;;  %v285_v39 = vshrl.u32 %v172_v25, 16 }
  0x11   : > { %845 = vmatpush.bf16.msra.mxu1 %v3542_v5  ;;  %v3548_v14 = vld [vmem:[%s4407_s1 + $0x1a0] sm:$0xff]  ;;  %v308_v28 = vshll.u32 %v253_v19, 16  ;;  %v174_v29 = vld [vmem:[%s3751_s16 + $0x28] sm:$0xff]  ;;  %v252_v30 = vld [vmem:[%s3751_s16 + $0x18] sm:$0x11]  ;;  %v288_v40 = vshll.u32 %v172_v25, 16 }
  0x12   : > { %874 = vmatpush.bf16.msra.mxu2 %v3550_v6  ;;  %v3556_v15 = vld [vmem:[%s4407_s1 + $0x1e0] sm:$0xff]  ;;  %v3539_v31 = vld [vmem:[%s4407_s1 + $0x158] sm:$0xff]  ;;  %v282_v38 = vrot.slane %v280_v22, 5  ;;  %v294_v41 = vshll.u32 %v252_v30, 16  ;;  %v313_v44 = vshrl.u32 %v174_v29, 16  ;;  %v316_v45 = vshll.u32 %v174_v29, 16  ;;  %vm3787_vm2 = vmor %vm267_vm0, %vm268_vm1 }
  0x13   : > { %903 = vmatpush.bf16.msra.mxu3 %v3558_v7  ;;  %v171_v16 = vld [vmem:[%s3751_s16] sm:$0xff]  ;;  %v254_v35 = vld [vmem:[%s3751_s16 + $0x38] sm:$0x11]  ;;  %v310_v47 = vrot.slane %v308_v28, 5  ;;  %v287_v48 = vrot.slane %v285_v39, 4  ;;  %v290_v49 = vrot.slane %v288_v40, 5 }
  0x14   : > { %817 = vmatpush.bf16.msra.mxu0 %v3533_v8  ;;  %v173_v17 = vld [vmem:[%s3751_s16 + $0x20] sm:$0xff]  ;;  %v271_v20 = vshrl.u32 %v171_v16, 16  ;;  %v274_v21 = vshll.u32 %v171_v16, 16  ;;  %v3547_v36 = vld [vmem:[%s4407_s1 + $0x198] sm:$0xff]  ;;  %v322_v50 = vshll.u32 %v254_v35, 16  ;;  %v3530_v52 = vld [vmem:[%s4407_s1 + $0x110] sm:$0xff] }
  0x15   : > { %846 = vmatpush.bf16.msra.mxu1 %v3541_v9  ;;  %v299_v23 = vshrl.u32 %v173_v17, 16  ;;  %v302_v24 = vshll.u32 %v173_v17, 16  ;;  %v3555_v37 = vld [vmem:[%s4407_s1 + $0x1d8] sm:$0xff]  ;;  %v175_v51 = vld [vmem:[%s3751_s16 + $0x40] sm:$0xff]  ;;  %v3538_v53 = vld [vmem:[%s4407_s1 + $0x150] sm:$0xff]  ;;  %v315_v56 = vrot.slane %v313_v44, 4  ;;  %v291_v60 = vor.u32 %v290_v49, %v287_v48 }
  0x16   : > { %875 = vmatpush.bf16.msra.mxu2 %v3549_v10  ;;  %v273_v27 = vrot.slane %v271_v20, 4  ;;  %v276_v32 = vrot.slane %v274_v21, 5  ;;  %v318_v57 = vrot.slane %v316_v45, 5  ;;  %v3546_v58 = vld [vmem:[%s4407_s1 + $0x190] sm:$0xff]  ;;  %v296_v61 = vrot.slane %v294_v41, 5  ;;  %v177_v2 = vld [vmem:[%s3751_s16 + $0x60] sm:$0xff] }
  0x17   : > { %904 = vmatpush.bf16.msra.mxu3 %v3557_v11  ;;  %v301_v33 = vrot.slane %v299_v23, 4  ;;  %v304_v34 = vrot.slane %v302_v24, 5  ;;  %v3554_v59 = vld [vmem:[%s4407_s1 + $0x1d0] sm:$0xff]  ;;  %v327_v62 = vshrl.u32 %v175_v51, 16  ;;  %v324_v1 = vrot.slane %v322_v50, 5  ;;  %v3529_v5 = vld [vmem:[%s4407_s1 + $0x108] sm:$0xff] }
  0x18   : > { %818 = vmatpush.bf16.msra.mxu0 %v3532_v12  ;;  %v277_v42 = vor.u32 %v276_v32, %v273_v27  ;;  %v319_v0 = vor.u32 %v318_v57, %v315_v56  ;;  %v330_v3 = vshll.u32 %v175_v51, 16  ;;  %v3537_v6 = vld [vmem:[%s4407_s1 + $0x148] sm:$0xff]  ;;  %v292_v7 = vrot.slane %v291_v60, 4  ;;  %v255_v18 = vld [vmem:[%s3751_s16 + $0x50] sm:$0x11]  ;;  %v3528_v21 = vld [vmem:[%s4407_s1 + $0x100] sm:$0xff] }
  0x19   : > { %847 = vmatpush.bf16.msra.mxu1 %v3540_v13  ;;  %v305_v43 = vor.u32 %v304_v34, %v301_v33  ;;  %v3545_v9 = vld [vmem:[%s4407_s1 + $0x188] sm:$0xff]  ;;  %v329_v12 = vrot.slane %v327_v62, 4  ;;  %v358_v19 = vshll.u32 %v177_v2, 16  ;;  %v3536_v22 = vld [vmem:[%s4407_s1 + $0x140] sm:$0xff]  ;;  %v257_v27 = vld [vmem:[%s3751_s16 + $0x70] sm:$0x11] }
  0x1a   : > { %876 = vmatpush.bf16.msra.mxu2 %v3548_v14  ;;  %v278_v54 = vrot.slane %v277_v42, 4  ;;  %v320_v8 = vrot.slane %v319_v0, 4  ;;  %v3553_v10 = vld [vmem:[%s4407_s1 + $0x1c8] sm:$0xff]  ;;  %v332_v13 = vrot.slane %v330_v3, 5  ;;  %v355_v14 = vshrl.u32 %v177_v2, 16  ;;  %v3544_v28 = vld [vmem:[%s4407_s1 + $0x180] sm:$0xff] }
  0x1b   : > { %905 = vmatpush.bf16.msra.mxu3 %v3556_v15  ;;  %v306_v55 = vrot.slane %v305_v43, 4  ;;  %v297_v16 = vsel %vm3787_vm2, %v292_v7, %v296_v61  ;;  %v176_v20 = vld [vmem:[%s3751_s16 + $0x48] sm:$0xff]  ;;  %v3552_v29 = vld [vmem:[%s4407_s1 + $0x1c0] sm:$0xff]  ;;  %v360_v33 = vrot.slane %v358_v19, 5  ;;  %v3519_v39 = vld [vmem:[%s4407_s1 + $0xb8] sm:$0xff]  ;;  %v364_v42 = vshll.u32 %v257_v27, 16 }
  0x1c   : > { %819 = vmatpush.bf16.msra.mxu0 %v3531_v26  ;;  %v283_v63 = vsel %vm3787_vm2, %v278_v54, %v282_v38  ;;  %v325_v17 = vsel %vm3787_vm2, %v320_v8, %v324_v1  ;;  %v561_v25 = vunpack.c.l.b16 %v297_v16  ;;  %v562_v30 = vunpack.c.h.b16 %v297_v16  ;;  %v178_v34 = vld [vmem:[%s3751_s16 + $0x68] sm:$0xff]  ;;  %v3527_v40 = vld [vmem:[%s4407_s1 + $0xf8] sm:$0xff]  ;;  %v3518_v60 = vld [vmem:[%s4407_s1 + $0xb0] sm:$0xff] }
  0x1d   : > { %848 = vmatpush.bf16.msra.mxu1 %v3539_v31  ;;  %v311_v4 = vsel %vm3787_vm2, %v306_v55, %v310_v47  ;;  %v559_v11 = vunpack.c.l.b16 %v283_v63  ;;  %v560_v23 = vunpack.c.h.b16 %v283_v63  ;;  %v565_v26 = vunpack.c.l.b16 %v325_v17  ;;  %v258_v43 = vld [vmem:[%s3751_s16 + $0x78] sm:$0x11]  ;;  %v3526_v61 = vld [vmem:[%s4407_s1 + $0xf0] sm:$0xff]  ;;  %v179_v3 = vld [vmem:[%s3751_s16 + $0x80] sm:$0xff] }
  0x1e   : > { %877 = vmatpush.bf16.msra.mxu2 %v3547_v36  ;;  %v563_v15 = vunpack.c.l.b16 %v311_v4  ;;  %v564_v24 = vunpack.c.h.b16 %v311_v4  ;;  %v566_v31 = vunpack.c.h.b16 %v325_v17  ;;  %v357_v32 = vrot.slane %v355_v14, 4  ;;  %v3503_v54 = vld [vmem:[%s4407_s1 + $0x38] sm:$0xff]  ;;  %v3502_v7 = vld [vmem:[%s4407_s1 + $0x30] sm:$0xff]  ;;  %v3517_v14 = vld [vmem:[%s4407_s1 + $0xa8] sm:$0xff] }
  0x1f   : > { %906 = vmatpush.bf16.msra.mxu3 %v3555_v37  ;;  %v333_v35 = vor.u32 %v332_v13, %v329_v12  ;;  %v336_v36 = vshll.u32 %v255_v18, 16  ;;  %v256_v37 = vld [vmem:[%s3751_s16 + $0x58] sm:$0x11]  ;;  %v341_v38 = vshrl.u32 %v176_v20, 16  ;;  %v344_v44 = vshll.u32 %v176_v20, 16  ;;  %v3510_v8 = vld [vmem:[%s4407_s1 + $0x70] sm:$0xff] }
  0x20   : > { %820 = vmatpush.bf16.msra.mxu0 %v3530_v52  ;;  %v361_v41 = vor.u32 %v360_v33, %v357_v32  ;;  %v591_v45 = vpack.c.b16 %v563_v15, %v559_v11  ;;  %v592_v47 = vpack.c.b16 %v564_v24, %v560_v23  ;;  %v593_v48 = vpack.c.b16 %v565_v26, %v561_v25  ;;  %v3511_v55 = vld [vmem:[%s4407_s1 + $0x78] sm:$0xff]  ;;  %v180_v12 = vld [vmem:[%s3751_s16 + $0x88] sm:$0xff]  ;;  %v3516_v32 = vld [vmem:[%s4407_s1 + $0xa0] sm:$0xff] }
  0x21   : > { %849 = vmatpush.bf16.msra.mxu1 %v3538_v53  ;;  %v343_v49 = vrot.slane %v341_v38, 4  ;;  %v594_v50 = vpack.c.b16 %v566_v31, %v562_v30  ;;  %v346_v51 = vrot.slane %v344_v44, 5  ;;  %v350_v52 = vshll.u32 %v256_v37, 16  ;;  %v3525_v15 = vld [vmem:[%s4407_s1 + $0xe8] sm:$0xff]  ;;  %v3524_v33 = vld [vmem:[%s4407_s1 + $0xe0] sm:$0xff] }
  0x22   : > { %878 = vmatpush.bf16.msra.mxu2 %v3546_v58  ;;  %v369_v53 = vshrl.u32 %v178_v34, 16  ;;  %v334_v56 = vrot.slane %v333_v35, 4  ;;  %v338_v57 = vrot.slane %v336_v36, 5  ;;  %v372_v58 = vshll.u32 %v178_v34, 16  ;;  %v261_v44 = vld [vmem:[%s3751_s16 + $0xb0] sm:$0x11] }
  0x23   : > { %907 = vmatpush.bf16.msra.mxu3 %v3554_v59  ;;  %v378_v59 = vshll.u32 %v258_v43, 16  ;;  %v362_v62 = vrot.slane %v361_v41, 4  ;;  %v366_v63 = vrot.slane %v364_v42, 5  ;;  %v347_v0 = vor.u32 %v346_v51, %v343_v49  ;;  %v3508_v49 = vld [vmem:[%s4407_s1 + $0x60] sm:$0xff] }
  0x24   : > { %821 = vmatpush.bf16.msra.mxu0 %v3529_v5  ;;  %v371_v1 = vrot.slane %v369_v53, 4  ;;  %v374_v2 = vrot.slane %v372_v58, 5  ;;  %v352_v5 = vrot.slane %v350_v52, 5  ;;  %v383_v16 = vshrl.u32 %v179_v3, 16  ;;  %v3523_v58 = vld [vmem:[%s4407_s1 + $0xd8] sm:$0xff] }
  0x25   : > { %850 = vmatpush.bf16.msra.mxu1 %v3537_v6  ;;  %v348_v4 = vrot.slane %v347_v0, 4  ;;  %v181_v6 = vld [vmem:[%s3751_s16 + $0xa0] sm:$0xff]  ;;  %v380_v11 = vrot.slane %v378_v59, 5  ;;  %v367_v13 = vsel %vm3787_vm2, %v362_v62, %v366_v63  ;;  %v386_v17 = vshll.u32 %v179_v3, 16 }
  0x26   : > { %879 = vmatpush.bf16.msra.mxu2 %v3545_v9  ;;  %v339_v9 = vsel %vm3787_vm2, %v334_v56, %v338_v57  ;;  %v411_v19 = vshrl.u32 %v181_v6, 16  ;;  %v414_v20 = vshll.u32 %v181_v6, 16  ;;  %v397_v24 = vshrl.u32 %v180_v12, 16  ;;  %v3515_v57 = vld [vmem:[%s4407_s1 + $0x98] sm:$0xff] }
  0x27   : > { %908 = vmatpush.bf16.msra.mxu3 %v3553_v10  ;;  %v375_v10 = vor.u32 %v374_v2, %v371_v1  ;;  %v353_v23 = vsel %vm3787_vm2, %v348_v4, %v352_v5  ;;  %v571_v25 = vunpack.c.l.b16 %v367_v13  ;;  %v568_v26 = vunpack.c.h.b16 %v339_v9  ;;  %v3499_v4 = vld [vmem:[%s4407_s1 + $0x18] sm:$0xff] }
  0x28   : > { %822 = vmatpush.bf16.msra.mxu0 %v3528_v21  ;;  %v182_v21 = vld [vmem:[%s3751_s16 + $0xa8] sm:$0xff]  ;;  %v400_v30 = vshll.u32 %v180_v12, 16  ;;  %v572_v31 = vunpack.c.h.b16 %v367_v13  ;;  %v385_v34 = vrot.slane %v383_v16, 4  ;;  %v388_v35 = vrot.slane %v386_v17, 5  ;;  %v3507_v5 = vld [vmem:[%s4407_s1 + $0x58] sm:$0xff]  ;;  %v183_v16 = vld [vmem:[%s3751_s16 + $0xc0] sm:$0xff] }
  0x29   : > { %851 = vmatpush.bf16.msra.mxu1 %v3536_v22  ;;  %v376_v18 = vrot.slane %v375_v10, 4  ;;  %v567_v22 = vunpack.c.l.b16 %v339_v9  ;;  %v425_v36 = vshrl.u32 %v182_v21, 16  ;;  %v569_v37 = vunpack.c.l.b16 %v353_v23 }
  0x2a   : > { %880 = vmatpush.bf16.msra.mxu2 %v3544_v28  ;;  %v3501_v28 = vld [vmem:[%s4407_s1 + $0x28] sm:$0xff]  ;;  %v570_v38 = vunpack.c.h.b16 %v353_v23  ;;  %v416_v41 = vrot.slane %v414_v20, 5  ;;  %v428_v51 = vshll.u32 %v182_v21, 16  ;;  %v596_v53 = vpack.c.b16 %v572_v31, %v568_v26  ;;  %v185_v20 = vld [vmem:[%s3751_s16 + $0xe0] sm:$0xff] }
  0x2b   : > { %909 = vmatpush.bf16.msra.mxu3 %v3552_v29  ;;  %823 = vmatmul.bf16.vlgmr.msra.gmra.mxu0 %v591_v45  ;;  %v381_v27 = vsel %vm3787_vm2, %v376_v18, %v380_v11  ;;  %v3509_v29 = vld [vmem:[%s4407_s1 + $0x68] sm:$0xff]  ;;  %v399_v45 = vrot.slane %v397_v24, 4  ;;  %v595_v52 = vpack.c.b16 %v571_v25, %v567_v22  ;;  %v427_v56 = vrot.slane %v425_v36, 4 }
  0x2c   : > { %852 = vmatmul.bf16.vlgmr.msra.gmra.mxu1 %v592_v47  ;;  %1203 = vmatpush.bf16.msrb.mxu0 %v3503_v54  ;;  %v573_v42 = vunpack.c.l.b16 %v381_v27  ;;  %v574_v43 = vunpack.c.h.b16 %v381_v27  ;;  %v402_v47 = vrot.slane %v400_v30, 5  ;;  %v389_v59 = vor.u32 %v388_v35, %v385_v34  ;;  %v184_v21 = vld [vmem:[%s3751_s16 + $0xc8] sm:$0xff] }
  0x2d   : > { %881 = vmatmul.bf16.vlgmr.msra.gmra.mxu2 %v593_v48  ;;  %1232 = vmatpush.bf16.msrb.mxu1 %v3511_v55  ;;  %v3500_v48 = vld [vmem:[%s4407_s1 + $0x20] sm:$0xff]  ;;  %v262_v55 = vld [vmem:[%s3751_s16 + $0xb8] sm:$0x11]  ;;  %v430_v62 = vrot.slane %v428_v51, 5  ;;  %v186_v22 = vld [vmem:[%s3751_s16 + $0xe8] sm:$0xff]  ;;  %v439_v27 = vshrl.u32 %v183_v16, 16 }
  0x2e   : > { %1261 = vmatpush.bf16.msrb.mxu2 %v3519_v39  ;;  %910 = vmatmul.bf16.vlgmr.msra.gmra.mxu3 %v594_v50  ;;  %v259_v39 = vld [vmem:[%s3751_s16 + $0x90] sm:$0x11]  ;;  %v260_v50 = vld [vmem:[%s3751_s16 + $0x98] sm:$0x11]  ;;  %v597_v63 = vpack.c.b16 %v573_v42, %v569_v37  ;;  %v598_v0 = vpack.c.b16 %v574_v43, %v570_v38  ;;  %v403_v1 = vor.u32 %v402_v47, %v399_v45  ;;  %v434_v3 = vshll.u32 %v262_v55, 16  ;;  %v3513_v23 = vld [vmem:[%s4407_s1 + $0x88] sm:$0xff] }
  0x2f   : > { %1290 = vmatpush.bf16.msrb.mxu3 %v3527_v40  ;;  %v413_v40 = vrot.slane %v411_v19, 4  ;;  %v392_v54 = vshll.u32 %v259_v39, 16  ;;  %v406_v2 = vshll.u32 %v260_v50, 16  ;;  %v431_v6 = vor.u32 %v430_v62, %v427_v56  ;;  %v3506_v19 = vld [vmem:[%s4407_s1 + $0x50] sm:$0xff]  ;;  %v3521_v24 = vld [vmem:[%s4407_s1 + $0xc8] sm:$0xff]  ;;  %v3512_v43 = vld [vmem:[%s4407_s1 + $0x80] sm:$0xff] }
  0x30   : > { %1204 = vmatpush.bf16.msrb.mxu0 %v3502_v7  ;;  %v3514_v7 = vld [vmem:[%s4407_s1 + $0x90] sm:$0xff]  ;;  %v390_v9 = vrot.slane %v389_v59, 4  ;;  %v404_v13 = vrot.slane %v403_v1, 4  ;;  %v436_v18 = vrot.slane %v434_v3, 5  ;;  %v467_v30 = vshrl.u32 %v185_v20, 16  ;;  %v3497_v37 = vld [vmem:[%s4407_s1 + $0x8] sm:$0xff] }
  0x31   : > { %1233 = vmatpush.bf16.msrb.mxu1 %v3510_v8  ;;  %v3522_v8 = vld [vmem:[%s4407_s1 + $0xd0] sm:$0xff]  ;;  %v394_v10 = vrot.slane %v392_v54, 5  ;;  %v432_v17 = vrot.slane %v431_v6, 4  ;;  %v470_v31 = vshll.u32 %v185_v20, 16  ;;  %v456_v34 = vshll.u32 %v184_v21, 16  ;;  %v3505_v38 = vld [vmem:[%s4407_s1 + $0x48] sm:$0xff] }
  0x32   : > { %1262 = vmatpush.bf16.msrb.mxu2 %v3518_v60  ;;  %v417_v60 = vor.u32 %v416_v41, %v413_v40  ;;  %v481_v35 = vshrl.u32 %v186_v22, 16  ;;  %v484_v36 = vshll.u32 %v186_v22, 16  ;;  %v469_v54 = vrot.slane %v467_v30, 4  ;;  %v264_v62 = vld [vmem:[%s3751_s16 + $0xd8] sm:$0x11] }
  0x33   : > { %1291 = vmatpush.bf16.msrb.mxu3 %v3526_v61  ;;  %v420_v61 = vshll.u32 %v261_v44, 16  ;;  %v395_v25 = vsel %vm3787_vm2, %v390_v9, %v394_v10  ;;  %v3520_v44 = vld [vmem:[%s4407_s1 + $0xc0] sm:$0xff]  ;;  %v472_v55 = vrot.slane %v470_v31, 5  ;;  %v462_v9 = vshll.u32 %v264_v62, 16 }
  0x34   : > { %1205 = vmatpush.bf16.msrb.mxu0 %v3501_v28  ;;  %v418_v11 = vrot.slane %v417_v60, 4  ;;  %v442_v28 = vshll.u32 %v183_v16, 16  ;;  %v575_v39 = vunpack.c.l.b16 %v395_v25  ;;  %v576_v41 = vunpack.c.h.b16 %v395_v25  ;;  %v3496_v60 = vld [vmem:[%s4407_s1] sm:$0xff]  ;;  %v3599_v16 = vld [vmem:[%s4407_s1 + $0x2b8] sm:$0xff]  ;;  %v3606_v25 = vld [vmem:[%s4407_s1 + $0x2f0] sm:$0xff] }
  0x35   : > { %1234 = vmatpush.bf16.msrb.mxu1 %v3509_v29  ;;  %v422_v12 = vrot.slane %v420_v61, 5  ;;  %v486_v59 = vrot.slane %v484_v36, 5  ;;  %v3504_v61 = vld [vmem:[%s4407_s1 + $0x40] sm:$0xff]  ;;  %v473_v6 = vor.u32 %v472_v55, %v469_v54  ;;  %v464_v20 = vrot.slane %v462_v9, 5 }
  0x36   : > { %1263 = vmatpush.bf16.msrb.mxu2 %v3517_v14  ;;  %v408_v14 = vrot.slane %v406_v2, 5  ;;  %v3482_v54 = vld [vmem:[%s3751_s16 + $0x1c] sm:$0xf0]  ;;  %v3480_v55 = vld [vmem:[%s3751_s16 + $0x4] sm:$0xf] }
  0x37   : > { %1292 = vmatpush.bf16.msrb.mxu3 %v3525_v15  ;;  %v3498_v15 = vld [vmem:[%s4407_s1 + $0x10] sm:$0xff]  ;;  %v423_v26 = vsel %vm3787_vm2, %v418_v11, %v422_v12  ;;  %v2807_v9 = vld [vmem:[%s3751_s16 + $0x40] sm:$0xf] }
  0x38   : > { %1206 = vmatpush.bf16.msrb.mxu0 %v3500_v48  ;;  %v409_v29 = vsel %vm3787_vm2, %v404_v13, %v408_v14  ;;  %v579_v40 = vunpack.c.l.b16 %v423_v26  ;;  %v580_v42 = vunpack.c.h.b16 %v423_v26  ;;  %v441_v48 = vrot.slane %v439_v27, 4  ;;  %v3582_v26 = vld [vmem:[%s4407_s1 + $0x230] sm:$0xff] }
  0x39   : > { %1235 = vmatpush.bf16.msrb.mxu1 %v3508_v49  ;;  %v577_v45 = vunpack.c.l.b16 %v409_v29  ;;  %v578_v47 = vunpack.c.h.b16 %v409_v29  ;;  %v444_v49 = vrot.slane %v442_v28, 5  ;;  %v474_v14 = vrot.slane %v473_v6, 4  ;;  %v3590_v27 = vld [vmem:[%s4407_s1 + $0x270] sm:$0xff] }
  0x3a   : > { %1264 = vmatpush.bf16.msrb.mxu2 %v3516_v32  ;;  %v453_v32 = vshrl.u32 %v184_v21, 16  ;;  %v600_v1 = vpack.c.b16 %v580_v42, %v576_v41  ;;  %v3602_v6 = vld [vmem:[%s4407_s1 + $0x2d0] sm:$0xff] }
  0x3b   : > { %1293 = vmatpush.bf16.msrb.mxu3 %v3524_v33  ;;  %828 = vmatmul.bf16.gmra.mxu0 %v595_v52  ;;  %v437_v33 = vsel %vm3787_vm2, %v432_v17, %v436_v18  ;;  %v263_v52 = vld [vmem:[%s3751_s16 + $0xd0] sm:$0x11]  ;;  %v445_v2 = vor.u32 %v444_v49, %v441_v48  ;;  %v3607_v17 = vld [vmem:[%s4407_s1 + $0x2f8] sm:$0xff]  ;;  %v3589_v48 = vld [vmem:[%s4407_s1 + $0x268] sm:$0xff] }
  0x3c   : > { %857 = vmatmul.bf16.gmra.mxu1 %v596_v53  ;;  %1207 = vmatpush.bf16.msrb.mxu0 %v3499_v4  ;;  %v581_v50 = vunpack.c.l.b16 %v437_v33  ;;  %v582_v51 = vunpack.c.h.b16 %v437_v33  ;;  %v265_v53 = vld [vmem:[%s3751_s16 + $0xf0] sm:$0x11]  ;;  %v455_v56 = vrot.slane %v453_v32, 4  ;;  %v448_v3 = vshll.u32 %v263_v52, 16  ;;  %v3583_v18 = vld [vmem:[%s4407_s1 + $0x238] sm:$0xff]  ;;  %v3596_v49 = vld [vmem:[%s4407_s1 + $0x2a0] sm:$0xff] }
  0x3d   : > { %886 = vmatmul.bf16.gmra.mxu2 %v597_v63  ;;  %1236 = vmatpush.bf16.msrb.mxu1 %v3507_v5  ;;  %v266_v63 = vld [vmem:[%s3751_s16 + $0xf8] sm:$0x11]  ;;  %v446_v13 = vrot.slane %v445_v2, 4  ;;  %v3588_v52 = vld [vmem:[%s4407_s1 + $0x260] sm:$0xff] }
  0x3e   : > { %1265 = vmatpush.bf16.msrb.mxu2 %v3515_v57  ;;  %915 = vmatmul.bf16.gmra.mxu3 %v598_v0  ;;  %v458_v57 = vrot.slane %v456_v34, 5  ;;  %v599_v0 = vpack.c.b16 %v579_v40, %v575_v39  ;;  %v601_v4 = vpack.c.b16 %v581_v50, %v577_v45  ;;  %v602_v5 = vpack.c.b16 %v582_v51, %v578_v47  ;;  %v3605_v45 = vld [vmem:[%s4407_s1 + $0x2e8] sm:$0xff]  ;;  %v3604_v50 = vld [vmem:[%s4407_s1 + $0x2e0] sm:$0xff]  ;;  %v3603_v2 = vld [vmem:[%s4407_s1 + $0x2d8] sm:$0xff] }
  0x3f   : > { %1294 = vmatpush.bf16.msrb.mxu3 %v3523_v58  ;;  %v483_v58 = vrot.slane %v481_v35, 4  ;;  %v490_v11 = vshll.u32 %v266_v63, 16  ;;  %v450_v12 = vrot.slane %v448_v3, 5  ;;  %v3581_v47 = vld [vmem:[%s4407_s1 + $0x228] sm:$0xff]  ;;  %v3580_v51 = vld [vmem:[%s4407_s1 + $0x220] sm:$0xff]  ;;  %v3579_v3 = vld [vmem:[%s4407_s1 + $0x218] sm:$0xff] }
  0x40   : > { %1208 = vmatpush.bf16.msrb.mxu0 %v3498_v15 }
  0x41   : > { %1237 = vmatpush.bf16.msrb.mxu1 %v3506_v19  ;;  %v487_v10 = vor.u32 %v486_v59, %v483_v58  ;;  %v492_v22 = vrot.slane %v490_v11, 5  ;;  %v451_v28 = vsel %vm3787_vm2, %v446_v13, %v450_v12  ;;  %v3483_v58 = vld [vmem:[%s3751_s16 + $0x24] sm:$0xf0]  ;;  %v3481_v59 = vld [vmem:[%s3751_s16 + $0xc] sm:$0xf] }
  0x42   : > { %1266 = vmatpush.bf16.msrb.mxu2 %v3514_v7  ;;  %v476_v7 = vshll.u32 %v265_v53, 16  ;;  %v583_v32 = vunpack.c.l.b16 %v451_v28  ;;  %v584_v34 = vunpack.c.h.b16 %v451_v28  ;;  %v2791_v53 = vld [vmem:[%s3751_s16] sm:$0xf]  ;;  %v3484_v11 = vld [vmem:[%s3751_s16 + $0x44] sm:$0xf] }
  0x43   : > { %1295 = vmatpush.bf16.msrb.mxu3 %v3522_v8  ;;  %v459_v8 = vor.u32 %v458_v57, %v455_v56  ;;  %v488_v21 = vrot.slane %v487_v10, 4  ;;  %v2793_v56 = vld [vmem:[%s3751_s16 + $0x20] sm:$0xf0]  ;;  %v2799_v57 = vld [vmem:[%s3751_s16 + $0x8] sm:$0xf] }
  0x44   : > { %1209 = vmatpush.bf16.msrb.mxu0 %v3497_v37  ;;  %v478_v15 = vrot.slane %v476_v7, 5  ;;  %v2796_v62 = vor.u32 %v3480_v55, %v2793_v56  ;;  %v2800_v63 = vor.u32 %v3483_v58, %v2799_v57  ;;  %v3578_v7 = vld [vmem:[%s4407_s1 + $0x210] sm:$0xff]  ;;  %v3486_v10 = vld [vmem:[%s3751_s16 + $0x5c] sm:$0xf0]  ;;  %v2809_v12 = vld [vmem:[%s3751_s16 + $0x60] sm:$0xf0] }
  0x45   : > { %1238 = vmatpush.bf16.msrb.mxu1 %v3505_v38  ;;  %v460_v19 = vrot.slane %v459_v8, 4  ;;  %v493_v31 = vsel %vm3787_vm2, %v488_v21, %v492_v22  ;;  %v3586_v8 = vld [vmem:[%s4407_s1 + $0x250] sm:$0xff]  ;;  %v2815_v13 = vld [vmem:[%s3751_s16 + $0x48] sm:$0xf]  ;;  %v3584_v28 = vld [vmem:[%s4407_s1 + $0x240] sm:$0xff] }
  0x46   : > { %1267 = vmatpush.bf16.msrb.mxu2 %v3513_v23  ;;  %v3591_v23 = vld [vmem:[%s4407_s1 + $0x278] sm:$0xff]  ;;  %v479_v29 = vsel %vm3787_vm2, %v474_v14, %v478_v15  ;;  %v589_v37 = vunpack.c.l.b16 %v493_v31  ;;  %v590_v39 = vunpack.c.h.b16 %v493_v31  ;;  %v3487_v14 = vld [vmem:[%s3751_s16 + $0x64] sm:$0xf0]  ;;  %v3485_v15 = vld [vmem:[%s3751_s16 + $0x4c] sm:$0xf] }
  0x47   : > { %1296 = vmatpush.bf16.msrb.mxu3 %v3521_v24  ;;  %v3598_v24 = vld [vmem:[%s4407_s1 + $0x2b0] sm:$0xff]  ;;  %v465_v30 = vsel %vm3787_vm2, %v460_v19, %v464_v20  ;;  %v587_v33 = vunpack.c.l.b16 %v479_v29  ;;  %v588_v35 = vunpack.c.h.b16 %v479_v29  ;;  %v2816_v19 = vor.u32 %v3487_v14, %v2815_v13  ;;  %v3593_v21 = vld [vmem:[%s4407_s1 + $0x288] sm:$0xff]  ;;  %v2823_v29 = vld [vmem:[%s3751_s16 + $0x80] sm:$0xf] }
  0x48   : > { %1210 = vmatpush.bf16.msrb.mxu0 %v3496_v60  ;;  %v585_v36 = vunpack.c.l.b16 %v465_v30  ;;  %v586_v38 = vunpack.c.h.b16 %v465_v30  ;;  %v2801_v60 = vld [vmem:[%s3751_s16 + $0x28] sm:$0xf0]  ;;  %v3490_v30 = vld [vmem:[%s3751_s16 + $0x9c] sm:$0xf0]  ;;  %v3488_v31 = vld [vmem:[%s3751_s16 + $0x84] sm:$0xf] }
  0x49   : > { %1239 = vmatpush.bf16.msrb.mxu1 %v3504_v61  ;;  %v603_v40 = vpack.c.b16 %v587_v33, %v583_v32  ;;  %v604_v41 = vpack.c.b16 %v588_v35, %v584_v34  ;;  %v2792_v61 = vor.u32 %v3482_v54, %v2791_v53  ;;  %v3601_v22 = vld [vmem:[%s4407_s1 + $0x2c8] sm:$0xff]  ;;  %v2825_v32 = vld [vmem:[%s3751_s16 + $0xa0] sm:$0xf0] }
  0x4a   : > { %1268 = vmatpush.bf16.msrb.mxu2 %v3512_v43  ;;  %v605_v42 = vpack.c.b16 %v589_v37, %v585_v36  ;;  %v606_v43 = vpack.c.b16 %v590_v39, %v586_v38  ;;  %v2831_v33 = vld [vmem:[%s3751_s16 + $0x88] sm:$0xf]  ;;  %v3489_v35 = vld [vmem:[%s3751_s16 + $0x8c] sm:$0xf]  ;;  %v2824_v37 = vor.u32 %v3490_v30, %v2823_v29  ;;  %v2828_v38 = vor.u32 %v3488_v31, %v2825_v32  ;;  %v3611_v30 = vld [vmem:[%s4407_s1 + $0x318] sm:$0xff] }
  0x4b   : > { %1297 = vmatpush.bf16.msrb.mxu3 %v3520_v44  ;;  %833 = vmatmul.bf16.gmra.mxu0 %v599_v0  ;;  %v3597_v44 = vld [vmem:[%s4407_s1 + $0x2a8] sm:$0xff]  ;;  %v2804_v0 = vor.u32 %v3481_v59, %v2801_v60  ;;  %v3614_v60 = vld [vmem:[%s4407_s1 + $0x330] sm:$0xff]  ;;  %v3619_v31 = vld [vmem:[%s4407_s1 + $0x358] sm:$0xff] }
  0x4c   : > { %862 = vmatmul.bf16.gmra.mxu1 %v600_v1  ;;  %1673 = vmatpush.bf16.msra.mxu0 %v3583_v18  ;;  %v3595_v1 = vld [vmem:[%s4407_s1 + $0x298] sm:$0xff]  ;;  %v2812_v18 = vor.u32 %v3484_v11, %v2809_v12  ;;  %v3491_v34 = vld [vmem:[%s3751_s16 + $0xa4] sm:$0xf0]  ;;  %v2833_v36 = vld [vmem:[%s3751_s16 + $0xa8] sm:$0xf0] }
  0x4d   : > { %891 = vmatmul.bf16.gmra.mxu2 %v601_v4  ;;  %1702 = vmatpush.bf16.msra.mxu1 %v3591_v23  ;;  %v3587_v4 = vld [vmem:[%s4407_s1 + $0x258] sm:$0xff]  ;;  %v3577_v23 = vld [vmem:[%s4407_s1 + $0x208] sm:$0xff]  ;;  %v2832_v39 = vor.u32 %v3491_v34, %v2831_v33  ;;  %v3626_v32 = vld [vmem:[%s4407_s1 + $0x390] sm:$0xff] }
  0x4e   : > { %920 = vmatmul.bf16.gmra.mxu3 %v602_v5  ;;  %1731 = vmatpush.bf16.msra.mxu2 %v3599_v16  ;;  %v3594_v5 = vld [vmem:[%s4407_s1 + $0x290] sm:$0xff]  ;;  %v2817_v16 = vld [vmem:[%s3751_s16 + $0x68] sm:$0xf0]  ;;  %v3495_v53 = vld [vmem:[%s3751_s16 + $0xe4] sm:$0xf0] }
  0x4f   : > { %1760 = vmatpush.bf16.msra.mxu3 %v3607_v17  ;;  %v2808_v17 = vor.u32 %v3486_v10, %v2807_v9  ;;  %v2820_v20 = vor.u32 %v3485_v15, %v2817_v16  ;;  %v3493_v54 = vld [vmem:[%s3751_s16 + $0xcc] sm:$0xf]  ;;  %v3563_v9 = vld [vmem:[%s3751_s16 + $0x44] sm:$0xf0]  ;;  %v3079_v33 = vld [vmem:[%s3751_s16 + $0x60] sm:$0xf] }
  0x50   : > { %1674 = vmatpush.bf16.msra.mxu0 %v3582_v26  ;;  %v3600_v26 = vld [vmem:[%s4407_s1 + $0x2c0] sm:$0xff]  ;;  %v2849_v55 = vld [vmem:[%s3751_s16 + $0xe8] sm:$0xf0] }
  0x51   : > { %1703 = vmatpush.bf16.msra.mxu1 %v3590_v27  ;;  %v3576_v27 = vld [vmem:[%s4407_s1 + $0x200] sm:$0xff]  ;;  %v2852_v59 = vor.u32 %v3493_v54, %v2849_v55  ;;  %v3561_v10 = vld [vmem:[%s3751_s16 + $0x2c] sm:$0xf]  ;;  %v3610_v54 = vld [vmem:[%s4407_s1 + $0x310] sm:$0xff] }
  0x52   : > { %1732 = vmatpush.bf16.msra.mxu2 %v3598_v24  ;;  %v3585_v24 = vld [vmem:[%s4407_s1 + $0x248] sm:$0xff]  ;;  %v3566_v34 = vld [vmem:[%s3751_s16 + $0x7c] sm:$0xf0]  ;;  %v3618_v55 = vld [vmem:[%s4407_s1 + $0x350] sm:$0xff] }
  0x53   : > { %1761 = vmatpush.bf16.msra.mxu3 %v3606_v25  ;;  %v3592_v25 = vld [vmem:[%s4407_s1 + $0x280] sm:$0xff]  ;;  %v3073_v11 = vld [vmem:[%s3751_s16 + $0x48] sm:$0xf0] }
  0x54   : > { %1675 = vmatpush.bf16.msra.mxu0 %v3581_v47  ;;  %v2839_v47 = vld [vmem:[%s3751_s16 + $0xc0] sm:$0xf] }
  0x55   : > { %1704 = vmatpush.bf16.msra.mxu1 %v3589_v48  ;;  %v3494_v48 = vld [vmem:[%s3751_s16 + $0xdc] sm:$0xf0] }
  0x56   : > { %1733 = vmatpush.bf16.msra.mxu2 %v3597_v44  ;;  %v3623_v44 = vld [vmem:[%s4407_s1 + $0x378] sm:$0xff]  ;;  %v2840_v56 = vor.u32 %v3494_v48, %v2839_v47 }
  0x57   : > { %1762 = vmatpush.bf16.msra.mxu3 %v3605_v45  ;;  %v3630_v45 = vld [vmem:[%s4407_s1 + $0x3b0] sm:$0xff] }
  0x58   : > { %1676 = vmatpush.bf16.msra.mxu0 %v3580_v51  ;;  %v2841_v51 = vld [vmem:[%s3751_s16 + $0xe0] sm:$0xf0] }
  0x59   : > { %1705 = vmatpush.bf16.msra.mxu1 %v3588_v52  ;;  %v2847_v52 = vld [vmem:[%s3751_s16 + $0xc8] sm:$0xf] }
  0x5a   : > { %1734 = vmatpush.bf16.msra.mxu2 %v3596_v49  ;;  %v3638_v49 = vld [vmem:[%s4407_s1 + $0x3f0] sm:$0xff]  ;;  %v2848_v58 = vor.u32 %v3495_v53, %v2847_v52 }
  0x5b   : > { %838 = vmatmul.bf16.gmra.mxu0 %v603_v40  ;;  %1763 = vmatpush.bf16.msra.mxu3 %v3604_v50  ;;  %v2836_v40 = vor.u32 %v3489_v35, %v2833_v36  ;;  %v3492_v50 = vld [vmem:[%s3751_s16 + $0xc4] sm:$0xf]  ;;  %v3634_v35 = vld [vmem:[%s4407_s1 + $0x3d0] sm:$0xff] }
  0x5c   : > { %867 = vmatmul.bf16.gmra.mxu1 %v604_v41  ;;  %1677 = vmatpush.bf16.msra.mxu0 %v3579_v3  ;;  %v3631_v41 = vld [vmem:[%s4407_s1 + $0x3b8] sm:$0xff]  ;;  %v2844_v57 = vor.u32 %v3492_v50, %v2841_v51  ;;  %v3063_v3 = vld [vmem:[%s3751_s16 + $0x20] sm:$0xf]  ;;  %v3564_v36 = vld [vmem:[%s3751_s16 + $0x64] sm:$0xf] }
  0x5d   : > { %896 = vmatmul.bf16.gmra.mxu2 %v605_v42  ;;  %1706 = vmatpush.bf16.msra.mxu1 %v3587_v4  ;;  %v3639_v42 = vld [vmem:[%s4407_s1 + $0x3f8] sm:$0xff]  ;;  %v3562_v4 = vld [vmem:[%s3751_s16 + $0x3c] sm:$0xf0] }
  0x5e   : > { %925 = vmatmul.bf16.gmra.mxu3 %v606_v43  ;;  %1735 = vmatpush.bf16.msra.mxu2 %v3595_v1  ;;  %v3615_v43 = vld [vmem:[%s4407_s1 + $0x338] sm:$0xff]  ;;  %v3621_v1 = vld [vmem:[%s4407_s1 + $0x368] sm:$0xff]  ;;  %v3064_v12 = vor.u32 %v3562_v4, %v3063_v3  ;;  %v3624_v3 = vld [vmem:[%s4407_s1 + $0x380] sm:$0xff] }
  0x5f   : > { %1764 = vmatpush.bf16.msra.mxu3 %v3603_v2  ;;  %v3628_v2 = vld [vmem:[%s4407_s1 + $0x3a0] sm:$0xff] }
  0x60   : > { %1678 = vmatpush.bf16.msra.mxu0 %v3578_v7  ;;  %v3065_v7 = vld [vmem:[%s3751_s16 + $0x40] sm:$0xf0]  ;;  %v3095_v4 = vld [vmem:[%s3751_s16 + $0xa0] sm:$0xf] }
  0x61   : > { %1707 = vmatpush.bf16.msra.mxu1 %v3586_v8  ;;  %v3071_v8 = vld [vmem:[%s3751_s16 + $0x28] sm:$0xf] }
  0x62   : > { %1736 = vmatpush.bf16.msra.mxu2 %v3594_v5  ;;  %v3636_v5 = vld [vmem:[%s4407_s1 + $0x3e0] sm:$0xff]  ;;  %v3072_v16 = vor.u32 %v3563_v9, %v3071_v8  ;;  %v3103_v9 = vld [vmem:[%s3751_s16 + $0xa8] sm:$0xf] }
  0x63   : > { %1765 = vmatpush.bf16.msra.mxu3 %v3602_v6  ;;  %v3560_v6 = vld [vmem:[%s3751_s16 + $0x24] sm:$0xf] }
  0x64   : > { %1679 = vmatpush.bf16.msra.mxu0 %v3577_v23  ;;  %v3068_v13 = vor.u32 %v3560_v6, %v3065_v7  ;;  %v3632_v6 = vld [vmem:[%s4407_s1 + $0x3c0] sm:$0xff] }
  0x65   : > { %1708 = vmatpush.bf16.msra.mxu1 %v3585_v24  ;;  %v3568_v7 = vld [vmem:[%s3751_s16 + $0xa4] sm:$0xf] }
  0x66   : > { %1737 = vmatpush.bf16.msra.mxu2 %v3593_v21  ;;  %v3627_v21 = vld [vmem:[%s4407_s1 + $0x398] sm:$0xff]  ;;  %v3097_v8 = vld [vmem:[%s3751_s16 + $0xc0] sm:$0xf0] }
  0x67   : > { %1766 = vmatpush.bf16.msra.mxu3 %v3601_v22  ;;  %v3635_v22 = vld [vmem:[%s4407_s1 + $0x3d8] sm:$0xff] }
  0x68   : > { %1680 = vmatpush.bf16.msra.mxu0 %v3576_v27 }
  0x69   : > { %1709 = vmatpush.bf16.msra.mxu1 %v3584_v28 }
  0x6a   : > { %1738 = vmatpush.bf16.msra.mxu2 %v3592_v25 }
  0x6b   : > { %1211 = vmatmul.bf16.vlgmr.msrb.gmra.mxu0 %v2792_v61  ;;  %1767 = vmatpush.bf16.msra.mxu3 %v3600_v26  ;;  %v3622_v61 = vld [vmem:[%s4407_s1 + $0x370] sm:$0xff] }
  0x6c   : > { %1240 = vmatmul.bf16.vlgmr.msrb.gmra.mxu1 %v2796_v62  ;;  %2374 = vmatpush.bf16.msrb.mxu0 %v3615_v43  ;;  %v3629_v62 = vld [vmem:[%s4407_s1 + $0x3a8] sm:$0xff] }
  0x6d   : > { %1269 = vmatmul.bf16.vlgmr.msrb.gmra.mxu2 %v2800_v63  ;;  %2403 = vmatpush.bf16.msrb.mxu1 %v3623_v44  ;;  %v3637_v63 = vld [vmem:[%s4407_s1 + $0x3e8] sm:$0xff]  ;;  %v3080_v44 = vor.u32 %v3566_v34, %v3079_v33 }
  0x6e   : > { %1298 = vmatmul.bf16.vlgmr.msrb.gmra.mxu3 %v2804_v0  ;;  %2432 = vmatpush.bf16.msrb.mxu2 %v3631_v41  ;;  %v3613_v0 = vld [vmem:[%s4407_s1 + $0x328] sm:$0xff] }
  0x6f   : > { %2461 = vmatpush.bf16.msrb.mxu3 %v3639_v42  ;;  %v3089_v41 = vld [vmem:[%s3751_s16 + $0x88] sm:$0xf0] }
  0x70   : > { %2375 = vmatpush.bf16.msrb.mxu0 %v3614_v60  ;;  %v3258_v34 = vld [vmem:[%s3751_s16 + $0x48] sm:$0xff] }
  0x71   : > { %2404 = vmatpush.bf16.msrb.mxu1 %v3622_v61 }
  0x72   : > { %2433 = vmatpush.bf16.msrb.mxu2 %v3630_v45 }
  0x73   : > { %2462 = vmatpush.bf16.msrb.mxu3 %v3638_v49 }
  0x74   : > { %2376 = vmatpush.bf16.msrb.mxu0 %v3613_v0 }
  0x75   : > { %2405 = vmatpush.bf16.msrb.mxu1 %v3621_v1  ;;  %v3609_v1 = vld [vmem:[%s4407_s1 + $0x308] sm:$0xff] }
  0x76   : > { %2434 = vmatpush.bf16.msrb.mxu2 %v3629_v62 }
  0x77   : > { %2463 = vmatpush.bf16.msrb.mxu3 %v3637_v63 }
  0x7a   : > { %2435 = vmatpush.bf16.msrb.mxu2 %v3628_v2  ;;  %v3617_v2 = vld [vmem:[%s4407_s1 + $0x348] sm:$0xff] }
  0x7b   : > { %1216 = vmatmul.bf16.gmra.mxu0 %v2808_v17  ;;  %2464 = vmatpush.bf16.msrb.mxu3 %v3636_v5  ;;  %v3076_v17 = vor.u32 %v3561_v10, %v3073_v11  ;;  %v3570_v5 = vld [vmem:[%s3751_s16 + $0xbc] sm:$0xf0]  ;;  %v3571_v10 = vld [vmem:[%s3751_s16 + $0xc4] sm:$0xf0]  ;;  %v3569_v11 = vld [vmem:[%s3751_s16 + $0xac] sm:$0xf] }
  0x7c   : > { %1245 = vmatmul.bf16.gmra.mxu1 %v2812_v18 }
  0x7d   : > { %1274 = vmatmul.bf16.gmra.mxu2 %v2816_v19  ;;  %v3612_v19 = vld [vmem:[%s4407_s1 + $0x320] sm:$0xff] }
  0x7e   : > { %1303 = vmatmul.bf16.gmra.mxu3 %v2820_v20  ;;  %v3620_v20 = vld [vmem:[%s4407_s1 + $0x360] sm:$0xff]  ;;  %2377 = vmatpush.bf16.msrb.mxu0 %v3612_v19 }
  0x7f   : > { %2406 = vmatpush.bf16.msrb.mxu1 %v3620_v20  ;;  %2436 = vmatpush.bf16.msrb.mxu2 %v3627_v21  ;;  %v3253_v19 = vld [vmem:[%s3751_s16 + $0x20] sm:$0xff] }
  0x80   : > { %2465 = vmatpush.bf16.msrb.mxu3 %v3635_v22 }
  0x82   : > { %2378 = vmatpush.bf16.msrb.mxu0 %v3611_v30  ;;  %v1833_v30 = vshll.u32 %v3253_v19, 16 }
  0x83   : > { %2407 = vmatpush.bf16.msrb.mxu1 %v3619_v31  ;;  %2437 = vmatpush.bf16.msrb.mxu2 %v3626_v32  ;;  %v3254_v31 = vld [vmem:[%s3751_s16 + $0x28] sm:$0xff] }
  0x84   : > { %2466 = vmatpush.bf16.msrb.mxu3 %v3634_v35  ;;  %v1844_v35 = vshrl.u32 %v3254_v31, 16 }
  0x86   : > { %2379 = vmatpush.bf16.msrb.mxu0 %v3610_v54 }
  0x87   : > { %2408 = vmatpush.bf16.msrb.mxu1 %v3618_v55 }
  0x8a   : > { %2380 = vmatpush.bf16.msrb.mxu0 %v3609_v1  ;;  %v3260_v1 = vld [vmem:[%s3751_s16 + $0x58] sm:$0x11] }
  0x8b   : > { %1221 = vmatmul.bf16.gmra.mxu0 %v2824_v37  ;;  %v3081_v37 = vld [vmem:[%s3751_s16 + $0x80] sm:$0xf0]  ;;  %2409 = vmatpush.bf16.msrb.mxu1 %v3617_v2 }
  0x8c   : > { %1250 = vmatmul.bf16.gmra.mxu1 %v2828_v38  ;;  %v3087_v38 = vld [vmem:[%s3751_s16 + $0x68] sm:$0xf]  ;;  %v3084_v45 = vor.u32 %v3564_v36, %v3081_v37  ;;  %v1847_v36 = vshll.u32 %v3254_v31, 16  ;;  %v3265_v31 = vld [vmem:[%s3751_s16 + $0x80] sm:$0xff] }
  0x8d   : > { %1279 = vmatmul.bf16.gmra.mxu2 %v2832_v39  ;;  %v3567_v39 = vld [vmem:[%s3751_s16 + $0x84] sm:$0xf0] }
  0x8e   : > { %1308 = vmatmul.bf16.gmra.mxu3 %v2836_v40  ;;  %v3565_v40 = vld [vmem:[%s3751_s16 + $0x6c] sm:$0xf]  ;;  %v3088_v50 = vor.u32 %v3567_v39, %v3087_v38  ;;  %v1835_v38 = vrot.slane %v1833_v30, 5  ;;  %v1872_v39 = vshrl.u32 %v3258_v34, 16  ;;  %v1849_v54 = vrot.slane %v1847_v36, 5 }
  0x8f   : > { %v3092_v51 = vor.u32 %v3565_v40, %v3089_v41 }
  0x9b   : > { %1226 = vmatmul.bf16.gmra.mxu0 %v2840_v56  ;;  %v3625_v56 = vld [vmem:[%s4407_s1 + $0x388] sm:$0xff] }
  0x9c   : > { %1255 = vmatmul.bf16.gmra.mxu1 %v2844_v57  ;;  %v3633_v57 = vld [vmem:[%s4407_s1 + $0x3c8] sm:$0xff]  ;;  %2438 = vmatpush.bf16.msrb.mxu2 %v3625_v56  ;;  %v3111_v56 = vld [vmem:[%s3751_s16 + $0xe0] sm:$0xf] }
  0x9d   : > { %1284 = vmatmul.bf16.gmra.mxu2 %v2848_v58  ;;  %2467 = vmatpush.bf16.msrb.mxu3 %v3633_v57  ;;  %v3574_v57 = vld [vmem:[%s3751_s16 + $0xfc] sm:$0xf0] }
  0x9e   : > { %1313 = vmatmul.bf16.gmra.mxu3 %v2852_v59 }
  0xa0   : > { %2439 = vmatpush.bf16.msrb.mxu2 %v3624_v3  ;;  %v3572_v3 = vld [vmem:[%s3751_s16 + $0xe4] sm:$0xf] }
  0xa1   : > { %2468 = vmatpush.bf16.msrb.mxu3 %v3632_v6  ;;  %v3112_v6 = vor.u32 %v3574_v57, %v3111_v56 }
  0xa8   : > { %v824_v14 = vpop.f32.mrf.mxu0 }
  0xa9   : > { %v853_v15 = vpop.f32.mrf.mxu1 }
  0xaa   : > { %v854_v18 = vadd.f32 %v853_v15, %v824_v14  ;;  %v3096_v15 = vor.u32 %v3570_v5, %v3095_v4  ;;  %v3113_v4 = vld [vmem:[%s3751_s16 + $0x100] sm:$0xf0]  ;;  %v3119_v5 = vld [vmem:[%s3751_s16 + $0xe8] sm:$0xf] }
  0xab   : > { %1681 = vmatmul.bf16.vlgmr.msra.gmra.mxu0 %v3064_v12  ;;  %v3105_v12 = vld [vmem:[%s3751_s16 + $0xc8] sm:$0xf0] }
  0xac   : > { %1710 = vmatmul.bf16.vlgmr.msra.gmra.mxu1 %v3068_v13 }
  0xad   : > { %1739 = vmatmul.bf16.vlgmr.msra.gmra.mxu2 %v3072_v16  ;;  %v3100_v16 = vor.u32 %v3568_v7, %v3097_v8  ;;  %v3575_v7 = vld [vmem:[%s3751_s16 + $0x104] sm:$0xf0]  ;;  %v3573_v8 = vld [vmem:[%s3751_s16 + $0xec] sm:$0xf] }
  0xae   : > { %1768 = vmatmul.bf16.vlgmr.msra.gmra.mxu3 %v3076_v17  ;;  %v3608_v17 = vld [vmem:[%s4407_s1 + $0x300] sm:$0xff] }
  0xaf   : > { %2381 = vmatpush.bf16.msrb.mxu0 %v3608_v17  ;;  %v3116_v17 = vor.u32 %v3572_v3, %v3113_v4 }
  0xb0   : > { %v882_v23 = vpop.f32.mrf.mxu2  ;;  %v826_v26 = vpop.f32.mrf.mxu0 }
  0xb1   : > { %v911_v24 = vpop.f32.mrf.mxu3  ;;  %v883_v25 = vadd.f32 %v882_v23, %v854_v18  ;;  %v855_v27 = vpop.f32.mrf.mxu1  ;;  %v3616_v18 = vld [vmem:[%s4407_s1 + $0x340] sm:$0xff]  ;;  %v3104_v23 = vor.u32 %v3571_v10, %v3103_v9  ;;  %v3121_v9 = vld [vmem:[%s3751_s16 + $0x108] sm:$0xf0] }
  0xb2   : > { %v856_v28 = vadd.f32 %v855_v27, %v826_v26  ;;  %2410 = vmatpush.bf16.msrb.mxu1 %v3616_v18 }
  0xb3   : > { %v4169_v29 = vadd.f32 %v911_v24, %v883_v25  ;;  %v3108_v24 = vor.u32 %v3569_v11, %v3105_v12  ;;  %v3257_v25 = vld [vmem:[%s3751_s16 + $0x40] sm:$0xff] }
  0xb4   : > { %v1858_v32 = vshrl.u32 %v3257_v25, 16  ;;  %v1861_v33 = vshll.u32 %v3257_v25, 16  ;;  %v3124_v25 = vor.u32 %v3573_v8, %v3121_v9 }
  0xb8   : > { %v884_v42 = vpop.f32.mrf.mxu2  ;;  %v829_v48 = vpop.f32.mrf.mxu0 }
  0xb9   : > { %v913_v43 = vpop.f32.mrf.mxu3  ;;  %v885_v47 = vadd.f32 %v884_v42, %v856_v28  ;;  %v858_v49 = vpop.f32.mrf.mxu1  ;;  %v1830_v28 = vshrl.u32 %v3253_v19, 16  ;;  %v3255_v42 = vld [vmem:[%s3751_s16 + $0x30] sm:$0x11] }
  0xba   : > { %v859_v52 = vadd.f32 %v858_v49, %v829_v48 }
  0xbb   : > { %v4191_v53 = vadd.f32 %v913_v43, %v885_v47  ;;  %1686 = vmatmul.bf16.gmra.mxu0 %v3080_v44  ;;  %v1832_v37 = vrot.slane %v1830_v28, 4  ;;  %v1860_v43 = vrot.slane %v1858_v32, 4  ;;  %v1863_v44 = vrot.slane %v1861_v33, 5 }
  0xbc   : > { %1715 = vmatmul.bf16.gmra.mxu1 %v3084_v45  ;;  %v1875_v45 = vshll.u32 %v3258_v34, 16 }
  0xbd   : > { %1744 = vmatmul.bf16.gmra.mxu2 %v3088_v50  ;;  %v3259_v50 = vld [vmem:[%s3751_s16 + $0x50] sm:$0x11] }
  0xbe   : > { %1773 = vmatmul.bf16.gmra.mxu3 %v3092_v51  ;;  %v1877_v2 = vrot.slane %v1875_v45, 5 }
  0xc0   : > { %v887_v58 = vpop.f32.mrf.mxu2  ;;  %v831_v61 = vpop.f32.mrf.mxu0 }
  0xc1   : > { %v916_v59 = vpop.f32.mrf.mxu3  ;;  %v888_v60 = vadd.f32 %v887_v58, %v859_v52  ;;  %v860_v62 = vpop.f32.mrf.mxu1  ;;  %v1846_v52 = vrot.slane %v1844_v35, 4  ;;  %v1836_v58 = vor.u32 %v1835_v38, %v1832_v37 }
  0xc2   : > { %v861_v63 = vadd.f32 %v860_v62, %v831_v61  ;;  %v1864_v61 = vor.u32 %v1863_v44, %v1860_v43  ;;  %v1867_v62 = vshll.u32 %v3259_v50, 16 }
  0xc3   : > { %v4205_v0 = vadd.f32 %v916_v59, %v888_v60  ;;  %v1839_v59 = vshll.u32 %v3255_v42, 16  ;;  %v1874_v60 = vrot.slane %v1872_v39, 4  ;;  %v1850_v10 = vor.u32 %v1849_v54, %v1846_v52  ;;  %v3262_v42 = vld [vmem:[%s3751_s16 + $0x68] sm:$0xff]  ;;  %v3263_v54 = vld [vmem:[%s3751_s16 + $0x70] sm:$0x11] }
  0xc4   : > { %v1837_v11 = vrot.slane %v1836_v58, 4  ;;  %v1865_v18 = vrot.slane %v1864_v61, 4  ;;  %v1869_v19 = vrot.slane %v1867_v62, 5  ;;  %v1900_v58 = vshrl.u32 %v3262_v42, 16  ;;  %v3267_v62 = vld [vmem:[%s3751_s16 + $0x90] sm:$0x11] }
  0xc5   : > { %v1841_v12 = vrot.slane %v1839_v59, 5  ;;  %v1851_v30 = vrot.slane %v1850_v10, 4 }
  0xc6   : > { %v1870_v36 = vsel %vm3787_vm2, %v1865_v18, %v1869_v19  ;;  %v3268_v18 = vld [vmem:[%s3751_s16 + $0x98] sm:$0x11] }
  0xc7   : > { %v1842_v33 = vsel %vm3787_vm2, %v1837_v11, %v1841_v12  ;;  %v2122_v44 = vunpack.c.l.b16 %v1870_v36  ;;  %v1895_v12 = vshll.u32 %v3263_v54, 16 }
  0xc8   : > { %v889_v13 = vpop.f32.mrf.mxu2  ;;  %v834_v21 = vpop.f32.mrf.mxu0  ;;  %v2118_v43 = vunpack.c.l.b16 %v1842_v33  ;;  %v2119_v45 = vunpack.c.h.b16 %v1842_v33 }
  0xc9   : > { %v918_v14 = vpop.f32.mrf.mxu3  ;;  %v890_v20 = vadd.f32 %v889_v13, %v861_v63  ;;  %v863_v22 = vpop.f32.mrf.mxu1  ;;  %v3256_v63 = vld [vmem:[%s3751_s16 + $0x38] sm:$0x11] }
  0xca   : > { %v864_v26 = vadd.f32 %v863_v22, %v834_v21  ;;  %v1853_v13 = vshll.u32 %v3256_v63, 16 }
  0xcb   : > { %v4235_v27 = vadd.f32 %v918_v14, %v890_v20  ;;  %1691 = vmatmul.bf16.gmra.mxu0 %v3096_v15  ;;  %v1881_v14 = vshll.u32 %v3260_v1, 16  ;;  %v1878_v20 = vor.u32 %v1877_v2, %v1874_v60  ;;  %v1903_v2 = vshll.u32 %v3262_v42, 16 }
  0xcc   : > { %1720 = vmatmul.bf16.gmra.mxu1 %v3100_v16  ;;  %v1855_v34 = vrot.slane %v1853_v13, 5  ;;  %v1923_v13 = vshll.u32 %v3267_v62, 16 }
  0xcd   : > { %1749 = vmatmul.bf16.gmra.mxu2 %v3104_v23  ;;  %v1883_v35 = vrot.slane %v1881_v14, 5  ;;  %v1879_v37 = vrot.slane %v1878_v20, 4 }
  0xce   : > { %1778 = vmatmul.bf16.gmra.mxu3 %v3108_v24  ;;  %v3120_v24 = vor.u32 %v3575_v7, %v3119_v5  ;;  %v1925_v33 = vrot.slane %v1923_v13, 5 }
  0xcf   : > { %v1884_v52 = vsel %vm3787_vm2, %v1879_v37, %v1883_v35  ;;  %v3273_v35 = vld [vmem:[%s3751_s16 + $0xc0] sm:$0xff] }
  0xd0   : > { %v892_v40 = vpop.f32.mrf.mxu2  ;;  %v836_v48 = vpop.f32.mrf.mxu0  ;;  %v2124_v8 = vunpack.c.l.b16 %v1884_v52  ;;  %v2125_v10 = vunpack.c.h.b16 %v1884_v52  ;;  %v3270_v52 = vld [vmem:[%s3751_s16 + $0xa8] sm:$0xff] }
  0xd1   : > { %v921_v41 = vpop.f32.mrf.mxu3  ;;  %v893_v47 = vadd.f32 %v892_v40, %v864_v26  ;;  %v865_v49 = vpop.f32.mrf.mxu1  ;;  %v3261_v26 = vld [vmem:[%s3751_s16 + $0x60] sm:$0xff]  ;;  %v1914_v40 = vshrl.u32 %v3265_v31, 16 }
  0xd2   : > { %v866_v51 = vadd.f32 %v865_v49, %v836_v48  ;;  %v1886_v38 = vshrl.u32 %v3261_v26, 16  ;;  %v1889_v39 = vshll.u32 %v3261_v26, 16  ;;  %v1856_v48 = vsel %vm3787_vm2, %v1851_v30, %v1855_v34  ;;  %v3266_v49 = vld [vmem:[%s3751_s16 + $0x88] sm:$0xff] }
  0xd3   : > { %v4241_v55 = vadd.f32 %v921_v41, %v893_v47  ;;  %v1917_v41 = vshll.u32 %v3265_v31, 16  ;;  %v2123_v47 = vunpack.c.h.b16 %v1870_v36  ;;  %v1916_v63 = vrot.slane %v1914_v40, 4 }
  0xd4   : > { %v1888_v56 = vrot.slane %v1886_v38, 4  ;;  %v1891_v57 = vrot.slane %v1889_v39, 5  ;;  %v2120_v4 = vunpack.c.l.b16 %v1856_v48  ;;  %v1928_v5 = vshrl.u32 %v3266_v49, 16 }
  0xd5   : > { %v1919_v1 = vrot.slane %v1917_v41, 5  ;;  %v2121_v9 = vunpack.c.h.b16 %v1856_v48  ;;  %v1897_v31 = vrot.slane %v1895_v12, 5  ;;  %v1937_v41 = vshll.u32 %v3268_v18, 16 }
  0xd6   : > { %v1892_v11 = vor.u32 %v1891_v57, %v1888_v56  ;;  %v1930_v19 = vrot.slane %v1928_v5, 4  ;;  %v1970_v48 = vshrl.u32 %v3273_v35, 16  ;;  %v3274_v57 = vld [vmem:[%s3751_s16 + $0xc8] sm:$0xff] }
  0xd7   : > { %v1920_v14 = vor.u32 %v1919_v1, %v1916_v63  ;;  %v3271_v63 = vld [vmem:[%s3751_s16 + $0xb0] sm:$0x11] }
  0xd8   : > { %v894_v15 = vpop.f32.mrf.mxu2  ;;  %v839_v22 = vpop.f32.mrf.mxu0  ;;  %v1893_v30 = vrot.slane %v1892_v11, 4  ;;  %v1972_v1 = vrot.slane %v1970_v48, 4  ;;  %v1987_v11 = vshll.u32 %v3274_v57, 16 }
  0xd9   : > { %v923_v16 = vpop.f32.mrf.mxu3  ;;  %v895_v21 = vadd.f32 %v894_v15, %v866_v51  ;;  %v868_v23 = vpop.f32.mrf.mxu1  ;;  %v3264_v15 = vld [vmem:[%s3751_s16 + $0x78] sm:$0x11]  ;;  %v1921_v39 = vrot.slane %v1920_v14, 4 }
  0xda   : > { %v869_v28 = vadd.f32 %v868_v23, %v839_v22  ;;  %v2151_v22 = vpack.c.b16 %v2123_v47, %v2119_v45  ;;  %v2152_v23 = vpack.c.b16 %v2124_v8, %v2120_v4  ;;  %v1909_v34 = vshll.u32 %v3264_v15, 16  ;;  %v3275_v8 = vld [vmem:[%s3751_s16 + $0xd0] sm:$0x11] }
  0xdb   : > { %v4255_v32 = vadd.f32 %v923_v16, %v895_v21  ;;  %1696 = vmatmul.bf16.gmra.mxu0 %v3112_v6  ;;  %v1931_v6 = vshll.u32 %v3266_v49, 16  ;;  %v1902_v16 = vrot.slane %v1900_v58, 4  ;;  %v2150_v21 = vpack.c.b16 %v2122_v44, %v2118_v43 }
  0xdc   : > { %1725 = vmatmul.bf16.gmra.mxu1 %v3116_v17  ;;  %v1905_v17 = vrot.slane %v1903_v2, 5  ;;  %v1973_v49 = vshll.u32 %v3273_v35, 16  ;;  %v1911_v56 = vrot.slane %v1909_v34, 5 }
  0xdd   : > { %1754 = vmatmul.bf16.gmra.mxu2 %v3120_v24  ;;  %v1933_v20 = vrot.slane %v1931_v6, 5  ;;  %v2153_v24 = vpack.c.b16 %v2125_v10, %v2121_v9  ;;  %v1959_v9 = vshll.u32 %v3270_v52, 16  ;;  %v1984_v10 = vshrl.u32 %v3274_v57, 16 }
  0xde   : > { %1783 = vmatmul.bf16.gmra.mxu3 %v3124_v25  ;;  %v3269_v25 = vld [vmem:[%s3751_s16 + $0xa0] sm:$0xff]  ;;  %v1906_v40 = vor.u32 %v1905_v17, %v1902_v16  ;;  %v1975_v2 = vrot.slane %v1973_v49, 5 }
  0xdf   : > { %v1934_v43 = vor.u32 %v1933_v20, %v1930_v19  ;;  %v1942_v44 = vshrl.u32 %v3269_v25, 16  ;;  %v1945_v45 = vshll.u32 %v3269_v25, 16  ;;  %v3272_v25 = vld [vmem:[%s3751_s16 + $0xb8] sm:$0x11] }
  0xe0   : > { %v897_v50 = vpop.f32.mrf.mxu2  ;;  %v841_v60 = vpop.f32.mrf.mxu0  ;;  %v1907_v54 = vrot.slane %v1906_v40, 4 }
  0xe1   : > { %v926_v51 = vpop.f32.mrf.mxu3  ;;  %v898_v59 = vadd.f32 %v897_v50, %v869_v28  ;;  %v870_v61 = vpop.f32.mrf.mxu1  ;;  %v1935_v58 = vrot.slane %v1934_v43, 4 }
  0xe2   : > { %v871_v3 = vadd.f32 %v870_v61, %v841_v60  ;;  %v1944_v60 = vrot.slane %v1942_v44, 4  ;;  %v1947_v61 = vrot.slane %v1945_v45, 5  ;;  %v1912_v17 = vsel %vm3787_vm2, %v1907_v54, %v1911_v56 }
  0xe3   : > { %v4269_v7 = vadd.f32 %v926_v51, %v898_v59  ;;  %v1898_v51 = vsel %vm3787_vm2, %v1893_v30, %v1897_v31  ;;  %v1939_v59 = vrot.slane %v1937_v41, 5  ;;  %v1961_v30 = vrot.slane %v1959_v9, 5 }
  0xe4   : > { %v2126_v62 = vunpack.c.l.b16 %v1898_v51  ;;  %v2127_v6 = vunpack.c.h.b16 %v1898_v51  ;;  %v1948_v20 = vor.u32 %v1947_v61, %v1944_v60  ;;  %v1986_v31 = vrot.slane %v1984_v10, 4 }
  0xe5   : > { %v1940_v19 = vsel %vm3787_vm2, %v1935_v58, %v1939_v59  ;;  %v2128_v34 = vunpack.c.l.b16 %v1912_v17 }
  0xe6   : > { %v2132_v35 = vunpack.c.l.b16 %v1940_v19  ;;  %v1949_v40 = vrot.slane %v1948_v20, 4 }
  0xe8   : > { %v899_v26 = vpop.f32.mrf.mxu2  ;;  %v1212_v37 = vpop.f32.mrf.mxu0  ;;  %v2156_v56 = vpack.c.b16 %v2132_v35, %v2128_v34 }
  0xe9   : > { %v928_v28 = vpop.f32.mrf.mxu3  ;;  %v900_v36 = vadd.f32 %v899_v26, %v871_v3  ;;  %v1241_v38 = vpop.f32.mrf.mxu1  ;;  %v1213_v42 = vadd.f32 %v1212_v37, %v4169_v29  ;;  %v1926_v29 = vsel %vm3787_vm2, %v1921_v39, %v1925_v33  ;;  %v1956_v3 = vshrl.u32 %v3270_v52, 16  ;;  %v3276_v37 = vld [vmem:[%s3751_s16 + $0xd8] sm:$0x11] }
  0xea   : > { %v2130_v15 = vunpack.c.l.b16 %v1926_v29  ;;  %v2131_v16 = vunpack.c.h.b16 %v1926_v29  ;;  %v1989_v33 = vrot.slane %v1987_v11, 5  ;;  %v1965_v39 = vshll.u32 %v3272_v25, 16  ;;  %v3282_v11 = vld [vmem:[%s3751_s16 + $0x108] sm:$0xff] }
  0xeb   : > { %v4276_v47 = vadd.f32 %v928_v28, %v900_v36  ;;  %v1242_v50 = vadd.f32 %v1241_v38, %v1213_v42  ;;  %2382 = vmatmul.bf16.vlgmr.msrb.gmra.mxu0 %v2150_v21  ;;  %v1951_v21 = vshll.u32 %v3271_v63, 16  ;;  %v1958_v26 = vrot.slane %v1956_v3, 4 }
  0xec   : > { %2411 = vmatmul.bf16.vlgmr.msrb.gmra.mxu1 %v2151_v22  ;;  %v2129_v36 = vunpack.c.h.b16 %v1912_v17  ;;  %v2154_v38 = vpack.c.b16 %v2130_v15, %v2126_v62  ;;  %v2155_v48 = vpack.c.b16 %v2131_v16, %v2127_v6  ;;  %v1993_v51 = vshll.u32 %v3276_v37, 16 }
  0xed   : > { %2440 = vmatmul.bf16.vlgmr.msrb.gmra.mxu2 %v2152_v23  ;;  %v1976_v23 = vor.u32 %v1975_v2, %v1972_v1  ;;  %v1953_v41 = vrot.slane %v1951_v21, 5  ;;  %v1962_v49 = vor.u32 %v1961_v30, %v1958_v26  ;;  %v1967_v62 = vrot.slane %v1965_v39, 5  ;;  %v3279_v39 = vld [vmem:[%s3751_s16 + $0xf0] sm:$0x11] }
  0xee   : > { %2469 = vmatmul.bf16.vlgmr.msrb.gmra.mxu3 %v2153_v24  ;;  %v1979_v24 = vshll.u32 %v3275_v8, 16  ;;  %v1995_v3 = vrot.slane %v1993_v51, 5  ;;  %v2043_v30 = vshll.u32 %v3282_v11, 16  ;;  %v3284_v51 = vld [vmem:[%s3751_s16 + $0x118] sm:$0x11] }
  0xef   : > { %v1977_v42 = vrot.slane %v1976_v23, 4  ;;  %v1954_v60 = vsel %vm3787_vm2, %v1949_v40, %v1953_v41  ;;  %v1963_v1 = vrot.slane %v1962_v49, 4  ;;  %v3283_v40 = vld [vmem:[%s3751_s16 + $0x110] sm:$0x11] }
  0xf0   : > { %v1270_v4 = vpop.f32.mrf.mxu2  ;;  %v1214_v13 = vpop.f32.mrf.mxu0  ;;  %v1981_v43 = vrot.slane %v1979_v24, 5  ;;  %v2134_v6 = vunpack.c.l.b16 %v1954_v60  ;;  %v2135_v9 = vunpack.c.h.b16 %v1954_v60 }
  0xf1   : > { %v1299_v5 = vpop.f32.mrf.mxu3  ;;  %v1271_v12 = vadd.f32 %v1270_v4, %v1242_v50  ;;  %v1243_v14 = vpop.f32.mrf.mxu1  ;;  %v1215_v18 = vadd.f32 %v1214_v13, %v4191_v53  ;;  %v2133_v53 = vunpack.c.h.b16 %v1940_v19  ;;  %v1990_v50 = vor.u32 %v1989_v33, %v1986_v31  ;;  %v3277_v4 = vld [vmem:[%s3751_s16 + $0xe0] sm:$0xff] }
  0xf2   : > { %v1982_v61 = vsel %vm3787_vm2, %v1977_v42, %v1981_v43  ;;  %v1998_v16 = vshrl.u32 %v3277_v4, 16  ;;  %v2001_v17 = vshll.u32 %v3277_v4, 16  ;;  %v3280_v43 = vld [vmem:[%s3751_s16 + $0xf8] sm:$0x11] }
  0xf3   : > { %v4291_v22 = vadd.f32 %v1299_v5, %v1271_v12  ;;  %v1244_v28 = vadd.f32 %v1243_v14, %v1215_v18  ;;  %v2157_v57 = vpack.c.b16 %v2133_v53, %v2129_v36  ;;  %v1991_v2 = vrot.slane %v1990_v50, 4  ;;  %v3278_v5 = vld [vmem:[%s3751_s16 + $0xe8] sm:$0xff] }
  0xf4   : > { %v2138_v8 = vunpack.c.l.b16 %v1982_v61  ;;  %v2139_v10 = vunpack.c.h.b16 %v1982_v61  ;;  %v1968_v14 = vsel %vm3787_vm2, %v1963_v1, %v1967_v62  ;;  %v2012_v24 = vshrl.u32 %v3278_v5, 16 }
  0xf5   : > { %v1996_v15 = vsel %vm3787_vm2, %v1991_v2, %v1995_v3  ;;  %v2015_v26 = vshll.u32 %v3278_v5, 16  ;;  %v2136_v33 = vunpack.c.l.b16 %v1968_v14  ;;  %v2137_v35 = vunpack.c.h.b16 %v1968_v14 }
  0xf6   : > { %v2140_v34 = vunpack.c.l.b16 %v1996_v15  ;;  %v2141_v53 = vunpack.c.h.b16 %v1996_v15  ;;  %v2000_v37 = vrot.slane %v1998_v16, 4  ;;  %v2158_v49 = vpack.c.b16 %v2138_v8, %v2134_v6 }
  0xf7   : > { %v2159_v50 = vpack.c.b16 %v2139_v10, %v2135_v9  ;;  %v2035_v1 = vshll.u32 %v3283_v40, 16  ;;  %v2021_v2 = vshll.u32 %v3280_v43, 16  ;;  %v2049_v5 = vshll.u32 %v3284_v51, 16 }
  0xf8   : > { %v1272_v44 = vpop.f32.mrf.mxu2  ;;  %v1217_v29 = vpop.f32.mrf.mxu0 }
  0xf9   : > { %v1301_v45 = vpop.f32.mrf.mxu3  ;;  %v1273_v52 = vadd.f32 %v1272_v44, %v1244_v28  ;;  %v1246_v54 = vpop.f32.mrf.mxu1  ;;  %v1218_v58 = vadd.f32 %v1217_v29, %v4205_v0  ;;  %v3281_v0 = vld [vmem:[%s3751_s16 + $0x100] sm:$0xff]  ;;  %v2040_v28 = vshrl.u32 %v3282_v11, 16  ;;  %v2017_v44 = vrot.slane %v2015_v26, 5 }
  0xfa   : > { %v2026_v21 = vshrl.u32 %v3281_v0, 16  ;;  %v2029_v23 = vshll.u32 %v3281_v0, 16  ;;  %v2023_v14 = vrot.slane %v2021_v2, 5  ;;  %v2051_v16 = vrot.slane %v2049_v5, 5 }
  0xfb   : > { %v4296_v59 = vadd.f32 %v1301_v45, %v1273_v52  ;;  %v1247_v63 = vadd.f32 %v1246_v54, %v1218_v58  ;;  %2387 = vmatmul.bf16.gmra.mxu0 %v2154_v38  ;;  %v2003_v38 = vrot.slane %v2001_v17, 5  ;;  %v2042_v45 = vrot.slane %v2040_v28, 4 }
  0xfc   : > { %2416 = vmatmul.bf16.gmra.mxu1 %v2155_v48  ;;  %v2028_v41 = vrot.slane %v2026_v21, 4  ;;  %v2031_v42 = vrot.slane %v2029_v23, 5  ;;  %v2045_v48 = vrot.slane %v2043_v30, 5  ;;  %v2160_v54 = vpack.c.b16 %v2140_v34, %v2136_v33 }
  0xfd   : > { %2445 = vmatmul.bf16.gmra.mxu2 %v2156_v56  ;;  %v2161_v56 = vpack.c.b16 %v2141_v53, %v2137_v35  ;;  %v2007_v58 = vshll.u32 %v3279_v39, 16 }
  0xfe   : > { %2474 = vmatmul.bf16.gmra.mxu3 %v2157_v57  ;;  %v2004_v57 = vor.u32 %v2003_v38, %v2000_v37  ;;  %v2046_v0 = vor.u32 %v2045_v48, %v2042_v45 }
  0xff   : > { %v2009_v10 = vrot.slane %v2007_v58, 5 }
 0x100   : > { %v1275_v12 = vpop.f32.mrf.mxu2  ;;  %v1219_v19 = vpop.f32.mrf.mxu0  ;;  %v2005_v9 = vrot.slane %v2004_v57, 4  ;;  %v2047_v15 = vrot.slane %v2046_v0, 4 }
 0x101   : > { %v1304_v13 = vpop.f32.mrf.mxu3  ;;  %v1276_v18 = vadd.f32 %v1275_v12, %v1247_v63  ;;  %v1248_v20 = vpop.f32.mrf.mxu1  ;;  %v1220_v25 = vadd.f32 %v1219_v19, %v4235_v27  ;;  %v2014_v27 = vrot.slane %v2012_v24, 4  ;;  %v2032_v63 = vor.u32 %v2031_v42, %v2028_v41 }
 0x102   : > { %v2037_v12 = vrot.slane %v2035_v1, 5  ;;  %v2052_v26 = vsel %vm3787_vm2, %v2047_v15, %v2051_v16 }
 0x103   : > { %v4311_v31 = vadd.f32 %v1304_v13, %v1276_v18  ;;  %v1249_v36 = vadd.f32 %v1248_v20, %v1220_v25  ;;  %v2018_v4 = vor.u32 %v2017_v44, %v2014_v27  ;;  %v2033_v11 = vrot.slane %v2032_v63, 4 }
 0x104   : > { %v2010_v18 = vsel %vm3787_vm2, %v2005_v9, %v2009_v10  ;;  %v2148_v37 = vunpack.c.l.b16 %v2052_v26  ;;  %v2149_v39 = vunpack.c.h.b16 %v2052_v26 }
 0x105   : > { %v2019_v13 = vrot.slane %v2018_v4, 4  ;;  %v2038_v23 = vsel %vm3787_vm2, %v2033_v11, %v2037_v12  ;;  %v2142_v30 = vunpack.c.l.b16 %v2010_v18  ;;  %v2143_v35 = vunpack.c.h.b16 %v2010_v18 }
 0x106   : > { %v2146_v34 = vunpack.c.l.b16 %v2038_v23 }
 0x107   : > { %v2024_v25 = vsel %vm3787_vm2, %v2019_v13, %v2023_v14 }
 0x108   : > { %v1277_v52 = vpop.f32.mrf.mxu2  ;;  %v1222_v61 = vpop.f32.mrf.mxu0  ;;  %v2144_v53 = vunpack.c.l.b16 %v2024_v25  ;;  %v2145_v38 = vunpack.c.h.b16 %v2024_v25 }
 0x109   : > { %v1306_v29 = vpop.f32.mrf.mxu3  ;;  %v1278_v60 = vadd.f32 %v1277_v52, %v1249_v36  ;;  %v1251_v62 = vpop.f32.mrf.mxu1  ;;  %v1223_v3 = vadd.f32 %v1222_v61, %v4241_v55  ;;  %v2147_v36 = vunpack.c.h.b16 %v2038_v23 }
 0x10a   : > { %v2164_v46 = vpack.c.b16 %v2148_v37, %v2144_v53  ;;  %v2165_v45 = vpack.c.b16 %v2149_v39, %v2145_v38 }
 0x10b   : > { %v4318_v6 = vadd.f32 %v1306_v29, %v1278_v60  ;;  %v1252_v8 = vadd.f32 %v1251_v62, %v1223_v3  ;;  %2392 = vmatmul.bf16.gmra.mxu0 %v2158_v49  ;;  %v2163_v42 = vpack.c.b16 %v2147_v36, %v2143_v35 }
 0x10c   : > { %2421 = vmatmul.bf16.gmra.mxu1 %v2159_v50 }
 0x10d   : > { %2450 = vmatmul.bf16.gmra.mxu2 %v2160_v54 }
 0x10e   : > { %2479 = vmatmul.bf16.gmra.mxu3 %v2161_v56 }
 0x110   : > { %v1280_v17 = vpop.f32.mrf.mxu2  ;;  %v1224_v20 = vpop.f32.mrf.mxu0 }
 0x111   : > { %v1309_v55 = vpop.f32.mrf.mxu3  ;;  %v1281_v19 = vadd.f32 %v1280_v17, %v1252_v8  ;;  %v1253_v21 = vpop.f32.mrf.mxu1  ;;  %v1225_v24 = vadd.f32 %v1224_v20, %v4255_v32  ;;  %v2162_v32 = vpack.c.b16 %v2146_v34, %v2142_v30 }
 0x113   : > { %v4329_v28 = vadd.f32 %v1309_v55, %v1281_v19  ;;  %v1254_v33 = vadd.f32 %v1253_v21, %v1225_v24 }
 0x118   : > { %v1282_v40 = vpop.f32.mrf.mxu2  ;;  %v1227_v27 = vpop.f32.mrf.mxu0 }
 0x119   : > { %v1311_v41 = vpop.f32.mrf.mxu3  ;;  %v1283_v43 = vadd.f32 %v1282_v40, %v1254_v33  ;;  %v1256_v44 = vpop.f32.mrf.mxu1  ;;  %v1228_v48 = vadd.f32 %v1227_v27, %v4269_v7 }
 0x11b   : > { %v4332_v49 = vadd.f32 %v1311_v41, %v1283_v43  ;;  %v1257_v50 = vadd.f32 %v1256_v44, %v1228_v48  ;;  %2397 = vmatmul.bf16.gmra.mxu0 %v2162_v32 }
 0x11c   : > { %2426 = vmatmul.bf16.gmra.mxu1 %v2163_v42 }
 0x11d   : > { %2455 = vmatmul.bf16.gmra.mxu2 %v2164_v46 }
 0x11e   : > { %2484 = vmatmul.bf16.gmra.mxu3 %v2165_v45 }
 0x120   : > { %v1285_v51 = vpop.f32.mrf.mxu2  ;;  %v1229_v54 = vpop.f32.mrf.mxu0 }
 0x121   : > { %v1314_v52 = vpop.f32.mrf.mxu3  ;;  %v1286_v29 = vadd.f32 %v1285_v51, %v1257_v50  ;;  %v1258_v56 = vpop.f32.mrf.mxu1  ;;  %v1230_v57 = vadd.f32 %v1229_v54, %v4276_v47 }
 0x123   : > { %v1315_v58 = vadd.f32 %v1314_v52, %v1286_v29  ;;  %v1259_v60 = vadd.f32 %v1258_v56, %v1230_v57 }
 0x128   : > { %v1287_v61 = vpop.f32.mrf.mxu2  ;;  %v1682_v7 = vpop.f32.mrf.mxu0 }
 0x129   : > { %v1316_v62 = vpop.f32.mrf.mxu3  ;;  %v1288_v63 = vadd.f32 %v1287_v61, %v1259_v60  ;;  %v1711_v1 = vpop.f32.mrf.mxu1 }
 0x12a   : > { %v1712_v2 = vadd.f32 %v1711_v1, %v1682_v7 }
 0x12b   : > { %v4335_v3 = vadd.f32 %v1316_v62, %v1288_v63 }
 0x130   : > { %v1740_v4 = vpop.f32.mrf.mxu2  ;;  %v1684_v8 = vpop.f32.mrf.mxu0 }
 0x131   : > { %v1769_v0 = vpop.f32.mrf.mxu3  ;;  %v1741_v5 = vadd.f32 %v1740_v4, %v1712_v2  ;;  %v1713_v9 = vpop.f32.mrf.mxu1 }
 0x132   : > { %v1714_v56 = vadd.f32 %v1713_v9, %v1684_v8 }
 0x133   : > { %v1770_v10 = vadd.f32 %v1769_v0, %v1741_v5  ;;  %v4367_v0 = vld [vmem:[%s4408_s2] ss:$0 sm:$0xff] }
 0x135   : > { %v1789_v11 = vadd.f32 %v1770_v10, %v4291_v22 }
 0x138   : > { %v1742_v12 = vpop.f32.mrf.mxu2  ;;  %v1687_v13 = vpop.f32.mrf.mxu0 }
 0x139   : > { %v1771_v47 = vpop.f32.mrf.mxu3  ;;  %v1716_v14 = vpop.f32.mrf.mxu1  ;;  %v1743_v62 = vadd.f32 %v1742_v12, %v1714_v56 }
 0x13a   : > { %v1717_v15 = vadd.f32 %v1716_v14, %v1687_v13 }
 0x13b   : > { %v1772_v7 = vadd.f32 %v1771_v47, %v1743_v62 }
 0x13d   : > { %v1790_v8 = vadd.f32 %v1772_v7, %v4296_v59 }
 0x140   : > { %v1745_v16 = vpop.f32.mrf.mxu2  ;;  %v1689_v18 = vpop.f32.mrf.mxu0 }
 0x141   : > { %v1774_v17 = vpop.f32.mrf.mxu3  ;;  %v1746_v55 = vadd.f32 %v1745_v16, %v1717_v15  ;;  %v1718_v19 = vpop.f32.mrf.mxu1 }
 0x143   : > { %v1775_v20 = vadd.f32 %v1774_v17, %v1746_v55  ;;  %v1719_v17 = vadd.f32 %v1718_v19, %v1689_v18 }
 0x145   : > { %v4339_v21 = vadd.f32 %v1775_v20, %v4311_v31 }
 0x148   : > { %v1747_v23 = vpop.f32.mrf.mxu2  ;;  %v1692_v25 = vpop.f32.mrf.mxu0 }
 0x149   : > { %v4341_v24 = vpop.f32.mrf.mxu3  ;;  %v1721_v26 = vpop.f32.mrf.mxu1  ;;  %v1748_v59 = vadd.f32 %v1747_v23, %v1719_v17 }
 0x14a   : > { %v1722_v22 = vadd.f32 %v1721_v26, %v1692_v25 }
 0x150   : > { %v1750_v30 = vpop.f32.mrf.mxu2  ;;  %v4343_v35 = vpop.f32.mrf.mxu0 }
 0x151   : > { %v1779_v33 = vpop.f32.mrf.mxu3  ;;  %v1751_v34 = vadd.f32 %v1750_v30, %v1722_v22  ;;  %v4345_v36 = vpop.f32.mrf.mxu1 }
 0x153   : > { %v1780_v53 = vadd.f32 %v1779_v33, %v1751_v34  ;;  %v1777_v34 = vadd.f32 %v4341_v24, %v1748_v59 }
 0x155   : > { %v4348_v37 = vadd.f32 %v1780_v53, %v4329_v28 }
 0x158   : > { %v4350_v38 = vpop.f32.mrf.mxu2  ;;  %v1697_v39 = vpop.f32.mrf.mxu0 }
 0x159   : > { %v4352_v31 = vpop.f32.mrf.mxu3  ;;  %v1726_v40 = vpop.f32.mrf.mxu1 }
 0x15a   : > { %v1727_v41 = vadd.f32 %v1726_v40, %v1697_v39 }
 0x160   : > { %v1755_v32 = vpop.f32.mrf.mxu2  ;;  %v4354_v27 = vpop.f32.mrf.mxu0 }
 0x161   : > { %v1784_v42 = vpop.f32.mrf.mxu3  ;;  %v1756_v43 = vadd.f32 %v1755_v32, %v1727_v41  ;;  %v4356_v44 = vpop.f32.mrf.mxu1 }
 0x163   : > { %v1785_v46 = vadd.f32 %v1784_v42, %v1756_v43  ;;  %v1792_v42 = vadd.f32 %v1777_v34, %v4318_v6 }
 0x165   : > { %v4358_v45 = vadd.f32 %v1785_v46, %v1315_v58 }
 0x168   : > { %v4360_v48 = vpop.f32.mrf.mxu2  ;;  %v2383_v50 = vpop.f32.mrf.mxu0 }
 0x169   : > { %v4362_v28 = vpop.f32.mrf.mxu3  ;;  %v2412_v51 = vpop.f32.mrf.mxu1 }
 0x16a   : > { %v2413_v52 = vadd.f32 %v2412_v51, %v2383_v50 }
 0x170   : > { %v2441_v29 = vpop.f32.mrf.mxu2  ;;  %v2385_v60 = vpop.f32.mrf.mxu0 }
 0x171   : > { %v2470_v54 = vpop.f32.mrf.mxu3  ;;  %v2442_v57 = vadd.f32 %v2441_v29, %v2413_v52  ;;  %v2414_v61 = vpop.f32.mrf.mxu1  ;;  %v1724_v29 = vadd.f32 %v4345_v36, %v4343_v35 }
 0x172   : > { %v2415_v1 = vadd.f32 %v2414_v61, %v2385_v60 }
 0x173   : > { %v2471_v63 = vadd.f32 %v2470_v54, %v2442_v57  ;;  %v1753_v6 = vadd.f32 %v4350_v38, %v1724_v29 }
 0x175   : > { %v2490_v4 = vadd.f32 %v2471_v63, %v1789_v11  ;;  %v1782_v63 = vadd.f32 %v4352_v31, %v1753_v6 }
 0x177   : > { %v2502_v12 = vadd.f32 %v4367_v0, %v2490_v4  ;;  %v1794_v36 = vadd.f32 %v1782_v63, %v4332_v49 }
 0x178   : > { %v2443_v58 = vpop.f32.mrf.mxu2  ;;  %v2388_v10 = vpop.f32.mrf.mxu0 }
 0x179   : > { %v2472_v2 = vpop.f32.mrf.mxu3  ;;  %v2444_v5 = vadd.f32 %v2443_v58, %v2415_v1  ;;  %v2417_v13 = vpop.f32.mrf.mxu1  ;;  %v2510_v55 = vmax.f32 %v2502_v12, 0.0 }
 0x17a   : > { %v2418_v15 = vadd.f32 %v2417_v13, %v2388_v10 }
 0x17b   : > { %v2473_v9 = vadd.f32 %v2472_v2, %v2444_v5 }
 0x17d   : > { %v2491_v14 = vadd.f32 %v2473_v9, %v1790_v8 }
 0x17f   : > { %v2503_v47 = vadd.f32 %v4367_v0, %v2491_v14  ;;  %v1729_v14 = vadd.f32 %v4356_v44, %v4354_v27 }
 0x180   : > { %v2446_v16 = vpop.f32.mrf.mxu2  ;;  %v2390_v26 = vpop.f32.mrf.mxu0 }
 0x181   : > { %v2475_v11 = vpop.f32.mrf.mxu3  ;;  %v2511_v20 = vmax.f32 %v2503_v47, 0.0  ;;  %v2447_v25 = vadd.f32 %v2446_v16, %v2418_v15  ;;  %v2419_v22 = vpop.f32.mrf.mxu1  ;;  %v1758_v16 = vadd.f32 %v4360_v48, %v1729_v14 }
 0x182   : > { %v2420_v53 = vadd.f32 %v2419_v22, %v2390_v26 }
 0x183   : > { %v3643_v30 = vpack.c.bf16 %v2511_v20, %v2510_v55  ;;  %v2476_v33 = vadd.f32 %v2475_v11, %v2447_v25  ;;  %v1787_v20 = vadd.f32 %v4362_v28, %v1758_v16 }
 0x185   : > { %3644 = vst [vmem:[%s4376_s10] sm:$0xff] %v3643_v30   ;;  %v2492_v19 = vadd.f32 %v2476_v33, %v4339_v21  ;;  %v1796_v27 = vadd.f32 %v1787_v20, %v4335_v3 }
 0x187   : > { %v2504_v46 = vadd.f32 %v4367_v0, %v2492_v19 }
 0x188   : > { %v2448_v39 = vpop.f32.mrf.mxu2  ;;  %v2393_v41 = vpop.f32.mrf.mxu0 }
 0x189   : > { %v2477_v18 = vpop.f32.mrf.mxu3  ;;  %v2449_v40 = vadd.f32 %v2448_v39, %v2420_v53  ;;  %v2422_v32 = vpop.f32.mrf.mxu1  ;;  %v2512_v54 = vmax.f32 %v2504_v46, 0.0 }
 0x18a   : > { %v2423_v50 = vadd.f32 %v2422_v32, %v2393_v41 }
 0x18b   : > { %v2478_v43 = vadd.f32 %v2477_v18, %v2449_v40 }
 0x18d   : > { %v2493_v23 = vadd.f32 %v2478_v43, %v1792_v42 }
 0x18f   : > { %v2505_v51 = vadd.f32 %v4367_v0, %v2493_v23 }
 0x190   : > { %v2451_v52 = vpop.f32.mrf.mxu2  ;;  %v2395_v57 = vpop.f32.mrf.mxu0 }
 0x191   : > { %v2480_v24 = vpop.f32.mrf.mxu3  ;;  %v2513_v21 = vmax.f32 %v2505_v51, 0.0  ;;  %v2452_v56 = vadd.f32 %v2451_v52, %v2423_v50  ;;  %v2424_v60 = vpop.f32.mrf.mxu1 }
 0x192   : > { %v2425_v7 = vadd.f32 %v2424_v60, %v2395_v57 }
 0x193   : > { %v3648_v61 = vpack.c.bf16 %v2513_v21, %v2512_v54  ;;  %v2481_v62 = vadd.f32 %v2480_v24, %v2452_v56 }
 0x195   : > { %3660 = vst [vmem:[%s4376_s10 + $0x8] sm:$0xff] %v3648_v61   ;;  %v2494_v2 = vadd.f32 %v2481_v62, %v4348_v37 }
 0x197   : > { %v2506_v13 = vadd.f32 %v4367_v0, %v2494_v2 }
 0x198   : > { %v2453_v1 = vpop.f32.mrf.mxu2  ;;  %v2398_v5 = vpop.f32.mrf.mxu0 }
 0x199   : > { %v2482_v58 = vpop.f32.mrf.mxu3  ;;  %v2454_v4 = vadd.f32 %v2453_v1, %v2425_v7  ;;  %v2427_v35 = vpop.f32.mrf.mxu1  ;;  %v2514_v15 = vmax.f32 %v2506_v13, 0.0 }
 0x19a   : > { %v2428_v8 = vadd.f32 %v2427_v35, %v2398_v5 }
 0x19b   : > { %v2483_v10 = vadd.f32 %v2482_v58, %v2454_v4 }
 0x19d   : > { %v2495_v38 = vadd.f32 %v2483_v10, %v1794_v36 }
 0x19f   : > { %v2507_v9 = vadd.f32 %v4367_v0, %v2495_v38 }
 0x1a0   : > { %v2456_v12 = vpop.f32.mrf.mxu2  ;;  %v2400_v49 = vpop.f32.mrf.mxu0 }
 0x1a1   : > { %v2485_v31 = vpop.f32.mrf.mxu3  ;;  %v2515_v37 = vmax.f32 %v2507_v9, 0.0  ;;  %v2457_v47 = vadd.f32 %v2456_v12, %v2428_v8  ;;  %v2429_v17 = vpop.f32.mrf.mxu1 }
 0x1a2   : > { %v2430_v25 = vadd.f32 %v2429_v17, %v2400_v49 }
 0x1a3   : > { %v3653_v11 = vpack.c.bf16 %v2515_v37, %v2514_v15  ;;  %v2486_v55 = vadd.f32 %v2485_v31, %v2457_v47 }
 0x1a5   : > { %3661 = vst [vmem:[%s4376_s10 + $0x10] sm:$0xff] %v3653_v11   ;;  %v2496_v22 = vadd.f32 %v2486_v55, %v4358_v45 }
 0x1a7   : > { %v2508_v33 = vadd.f32 %v4367_v0, %v2496_v22 }
 0x1a8   : > { %v2458_v26 = vpop.f32.mrf.mxu2 }
 0x1a9   : > { %v2459_v59 = vadd.f32 %v2458_v26, %v2430_v25  ;;  %v2487_v30 = vpop.f32.mrf.mxu3  ;;  %v2516_v53 = vmax.f32 %v2508_v33, 0.0 }
 0x1ab   : > { %v2488_v44 = vadd.f32 %v2487_v30, %v2459_v59 }
 0x1ad   : > { %v2497_v48 = vadd.f32 %v2488_v44, %v1796_v27 }
 0x1af   : > { %v2509_v34 = vadd.f32 %v4367_v0, %v2497_v48 }
 0x1b1   : > { %v2517_v39 = vmax.f32 %v2509_v34, 0.0 }
 0x1b3   : > { %v3658_v18 = vpack.c.bf16 %v2517_v39, %v2516_v53 }
 0x1b5   : > { %3662 = vst [vmem:[%s4376_s10 + $0x18] sm:$0xff] %v3658_v18  }
 0x1b6 PF: > { %s13_s12 = sadd.s32 1, %s3679_s12  }
 0x1b7   : > { %p10_p4 = scmp.ge.s32.totalorder %s13_s12, 6  }
 0x1b9   :  { %12 = sbr.rel (!%p10_p4) target bundleno = 1 (0x1), region = 66 }

// kernel: monofusion_forward.9
= control target key start
LH: loop header
LB: loop body
LE: loop exit
PB: predicated region body
PF: predicated region fallthrough
CT: control target
= control target key end

     0   :  { %s735_s9 = smov 0   ;;  %s737_s10 = smov 0   ;;  %s854_s0 = inlined_call_operand.vmem [shape: bf16[4,64,128], index: 0, kind: input, shape index: {}]   ;;  %s855_s1 = inlined_call_operand.vmem [shape: bf16[4,64,128], index: 1, kind: input, shape index: {}]   ;;  %s856_s2 = inlined_call_operand.vmem [shape: bf16[4,64,128], index: 2, kind: output, shape index: {}]  }
   0x1   :  { %s739_s11 = smov 0  }
   0x2 LB: > { %s24_s12 = sadd.s32 1, %s714_s10  ;;  %p554_p0 = scmp.ge.s32.totalorder %s718_s11, 1  ;;  %s718_s11 = sphi %s739_s11, %s12_s11   ;;  %s714_s10 = sphi %s737_s10, %s858_s10   ;;  %s710_s9 = sphi %s735_s9, %s857_s9  }
   0x3   : > { %p26_p1 = scmp.ge.s32.totalorder %s24_s12, 4  ;;  %p143_p2 = scmp.lt.s32.totalorder %s718_s11, 5 }
   0x5   : > { %s860_s12 = smov (%p26_p1, %s24_s12), 0  ;;  %p144_p3 = pnand %p554_p0, %p143_p2 }
   0x6   : > { %p179_p4 = scmp.lt.s32.totalorder (!%p144_p3), %s710_s9, 3 }
   0x7   : > { %147 = sbr.rel (%p144_p3) target bundleno = 506 (0x1fa), region = 28 }
   0xc   : > { %s862_s9 = smov (!%p179_p4, %s710_s9), 3  ;;  %vm293_vm0 = vcmask 523264  }
   0xd   : > { %s753_s13 = sshll.u32 %s862_s9, 5 }
   0xe   : > { %s192_s16 = scalar_lea.vmem %s855_s1, %s753_s13  ;;  %s186_s19 = scalar_lea.vmem %s854_s0, %s753_s13 }
   0xf   : > { %v589_v0 = vld [vmem:[%s192_s16 + $0x18] sm:$0xff]  ;;  %v588_v1 = vld [vmem:[%s192_s16 + $0x10] sm:$0xff]  ;;  %v587_v2 = vld [vmem:[%s192_s16 + $0x8] sm:$0xff]  ;;  %s827_s22 = scalar_lea.vmem %s856_s2, %s753_s13 }
  0x10   : > { %268 = vmatpush.bf16.xpose.msra.mxu0 %v589_v0  ;;  %632 = vmatpush.bf16.xpose.msra.mxu2 %v589_v0  ;;  %v586_v3 = vld [vmem:[%s192_s16] sm:$0xff]  ;;  %v765_v5 = vld [vmem:[%s186_s19 + $0x10] sm:$0xff]   ;;  %v779_v16 = vld [vmem:[%s186_s19 + $0x8] sm:$0xff]  }
  0x11   : > { %636 = vmatpush.bf16.msra.mxu3 %v589_v0  ;;  %386 = vmatpush.bf16.msra.mxu1 %v589_v0  ;;  %v763_v4 = vld [vmem:[%s186_s19] sm:$0xff]   ;;  %v600_v8 = vunpack.c.l.bf16 %v765_v5  ;;  %v601_v9 = vunpack.c.h.bf16 %v765_v5  ;;  %v781_v17 = vld [vmem:[%s186_s19 + $0x18] sm:$0xff]   ;;  %v596_v18 = vunpack.c.l.bf16 %v779_v16  ;;  %v597_v19 = vunpack.c.h.bf16 %v779_v16 }
  0x12   : > { %v592_v6 = vunpack.c.l.bf16 %v763_v4  ;;  %v593_v7 = vunpack.c.h.bf16 %v763_v4  ;;  %v604_v20 = vunpack.c.l.bf16 %v781_v17  ;;  %v605_v21 = vunpack.c.h.bf16 %v781_v17 }
  0x13   : > { %v232_v12 = vmul.f32 0.088388346, %v600_v8  ;;  %v233_v13 = vmul.f32 0.088388346, %v601_v9  ;;  %v230_v22 = vmul.f32 0.088388346, %v596_v18 }
  0x14   : > { %v228_v10 = vmul.f32 0.088388346, %v592_v6  ;;  %v229_v11 = vmul.f32 0.088388346, %v593_v7  ;;  %v231_v23 = vmul.f32 0.088388346, %v597_v19 }
  0x15   : > { %637 = vmatpush.bf16.msra.mxu3 %v588_v1  ;;  %387 = vmatpush.bf16.msra.mxu1 %v588_v1  ;;  %v238_v15 = vpack.c.bf16 %v233_v13, %v232_v12  ;;  %v234_v24 = vmul.f32 0.088388346, %v604_v20  ;;  %v235_v25 = vmul.f32 0.088388346, %v605_v21 }
  0x16   : > { %v236_v14 = vpack.c.bf16 %v229_v11, %v228_v10  ;;  %v237_v26 = vpack.c.bf16 %v231_v23, %v230_v22 }
  0x17   : > { %v239_v27 = vpack.c.bf16 %v235_v25, %v234_v24 }
  0x18   : > { %269 = vmatpush.bf16.xpose.msra.mxu0 %v588_v1  ;;  %633 = vmatpush.bf16.xpose.msra.mxu2 %v588_v1 }
  0x19   : > { %638 = vmatpush.bf16.msra.mxu3 %v587_v2  ;;  %388 = vmatpush.bf16.msra.mxu1 %v587_v2 }
  0x1d   : > { %639 = vmatpush.bf16.msra.mxu3 %v586_v3  ;;  %389 = vmatpush.bf16.msra.mxu1 %v586_v3 }
  0x20   : > { %270 = vmatpush.bf16.xpose.msra.mxu0 %v587_v2  ;;  %634 = vmatpush.bf16.xpose.msra.mxu2 %v587_v2 }
  0x28   : > { %271 = vmatpush.bf16.xpose.msra.mxu0 %v586_v3  ;;  %635 = vmatpush.bf16.xpose.msra.mxu2 %v586_v3 }
  0x2f   : > { %272 = vmatmul.bf16.vlgmr.msra.gmra.mxu0 %v236_v14  ;;  %282 = vmatmul.bf16.vlgmr.msra.gmra.mxu2 %v238_v15 }
  0x3f   : > { %277 = vmatmul.bf16.gmra.mxu0 %v237_v26  ;;  %287 = vmatmul.bf16.gmra.mxu2 %v239_v27 }
  0xac   : > { %v273_v28 = vpop.f32.mrf.mxu0 }
  0xad   : > { %v294_v43 = vsel %vm293_vm0, %v273_v28, -inf }
  0xb2   : > { %v283_v29 = vpop.f32.mrf.mxu2 }
  0xb3   : > { %v306_v30 = vsel %vm293_vm0, %v283_v29, -inf }
  0xb4   : > { %307 = vmax.xlane.f32.xlu1 %v306_v30  ;;  %v275_v31 = vpop.f32.mrf.mxu0 }
  0xb5   : > { %v297_v38 = vsel %vm293_vm0, %v275_v31, -inf }
  0xba   : > { %v285_v32 = vpop.f32.mrf.mxu2 }
  0xbb   : > { %v309_v33 = vsel %vm293_vm0, %v285_v32, -inf }
  0xbc   : > { %310 = vmax.xlane.f32.xlu1 %v309_v33  ;;  %v278_v34 = vpop.f32.mrf.mxu0 }
  0xbd   : > { %v300_v35 = vsel %vm293_vm0, %v278_v34, -inf }
  0xbe   : > { %301 = vmax.xlane.f32.xlu0 %v300_v35 }
  0xc2   : > { %v798_v36 = vpop.f32.mrf.mxu2 }
  0xc3   : > { %v312_v37 = vsel %vm293_vm0, %v798_v36, -inf }
  0xc4   : > { %313 = vmax.xlane.f32.xlu2 %v312_v37  ;;  %298 = vmax.xlane.f32.xlu1 %v297_v38  ;;  %v280_v39 = vpop.f32.mrf.mxu0 }
  0xc5   : > { %v303_v40 = vsel %vm293_vm0, %v280_v39, -inf }
  0xc6   : > { %304 = vmax.xlane.f32.xlu0 %v303_v40 }
  0xca   : > { %v290_v41 = vpop.f32.mrf.mxu2 }
  0xcb   : > { %v315_v42 = vsel %vm293_vm0, %v290_v41, -inf }
  0xcc   : > { %316 = vmax.xlane.f32.xlu2 %v315_v42 }
  0xce   : > { %295 = vmax.xlane.f32.xlu0 %v294_v43 }
 0x127   : > { %v308_v44 = vpop.xlane.xlu1 %307 }
 0x128   : > { %v322_v45 = vsub.f32 %v283_v29, %v308_v44 }
 0x12a   : > { %v334_v46 = vmul.f32 1.442695, %v322_v45 }
 0x12c   : > { %664 = vpow2.f32 %v334_v46 }
 0x12f   : > { %v311_v47 = vpop.xlane.xlu1 %310 }
 0x130   : > { %v323_v52 = vsub.f32 %v285_v32, %v311_v47 }
 0x131   : > { %v302_v48 = vpop.xlane.xlu0 %301 }
 0x132   : > { %v665_v49 = vpop.eup %664  ;;  %v320_v50 = vsub.f32 %v278_v34, %v302_v48  ;;  %v336_v56 = vmul.f32 1.442695, %v323_v52 }
 0x133   : > { %v354_v51 = vsel %vm293_vm0, %v665_v49, 0.0 }
 0x134   : > { %v330_v53 = vmul.f32 1.442695, %v320_v50  ;;  %355 = vadd.xlane.f32.xlu0 %v354_v51 }
 0x136   : > { %666 = vpow2.f32 %v330_v53 }
 0x137   : > { %v314_v54 = vpop.xlane.xlu2 %313  ;;  %v299_v55 = vpop.xlane.xlu1 %298  ;;  %668 = vpow2.f32 %v336_v56 }
 0x138   : > { %v319_v57 = vsub.f32 %v275_v31, %v299_v55  ;;  %v324_v27 = vsub.f32 %v798_v36, %v314_v54 }
 0x139   : > { %v305_v58 = vpop.xlane.xlu0 %304 }
 0x13a   : > { %v328_v59 = vmul.f32 1.442695, %v319_v57  ;;  %v321_v60 = vsub.f32 %v280_v39, %v305_v58  ;;  %v338_v30 = vmul.f32 1.442695, %v324_v27 }
 0x13c   : > { %v667_v61 = vpop.eup %666  ;;  %v332_v62 = vmul.f32 1.442695, %v321_v60  ;;  %670 = vpow2.f32 %v328_v59 }
 0x13d   : > { %v348_v63 = vsel %vm293_vm0, %v667_v61, 0.0  ;;  %v669_v3 = vpop.eup %668 }
 0x13e   : > { %672 = vpow2.f32 %v332_v62  ;;  %349 = vadd.xlane.f32.xlu1 %v348_v63  ;;  %v357_v22 = vsel %vm293_vm0, %v669_v3, 0.0  ;;  %v368_v32 = vpack.c.bf16 %v669_v3, %v665_v49 }
 0x13f   : > { %v317_v0 = vpop.xlane.xlu2 %316 }
 0x140   : > { %v325_v1 = vsub.f32 %v290_v41, %v317_v0 }
 0x141   : > { %v296_v2 = vpop.xlane.xlu0 %295 }
 0x142   : > { %v340_v10 = vmul.f32 1.442695, %v325_v1  ;;  %v318_v11 = vsub.f32 %v273_v28, %v296_v2  ;;  %v671_v12 = vpop.eup %670 }
 0x143   : > { %v345_v15 = vsel %vm293_vm0, %v671_v12, 0.0 }
 0x144   : > { %v673_v13 = vpop.eup %672  ;;  %674 = vpow2.f32 %v340_v10  ;;  %v326_v14 = vmul.f32 1.442695, %v318_v11  ;;  %346 = vadd.xlane.f32.xlu0 %v345_v15 }
 0x145   : > { %v367_v23 = vpack.c.bf16 %v673_v13, %v667_v61  ;;  %v351_v31 = vsel %vm293_vm0, %v673_v13, 0.0 }
 0x146   : > { %676 = vpow2.f32 %v326_v14  ;;  %358 = vadd.xlane.f32.xlu1 %v357_v22 }
 0x147   : > { %578 = vmatmul.msk.bf16.vlgmr.msra.gmra.mxu3 %vm293_vm0, %v367_v23  ;;  %678 = vpow2.f32 %v338_v30 }
 0x14a   : > { %v675_v24 = vpop.eup %674 }
 0x14b   : > { %v363_v25 = vsel %vm293_vm0, %v675_v24, 0.0 }
 0x14c   : > { %v677_v26 = vpop.eup %676  ;;  %364 = vadd.xlane.f32.xlu0 %v363_v25 }
 0x14d   : > { %v342_v28 = vsel %vm293_vm0, %v677_v26, 0.0  ;;  %v366_v29 = vpack.c.bf16 %v671_v12, %v677_v26  ;;  %v679_v33 = vpop.eup %678 }
 0x14e   : > { %343 = vadd.xlane.f32.xlu2 %v342_v28  ;;  %v360_v34 = vsel %vm293_vm0, %v679_v33, 0.0  ;;  %v369_v35 = vpack.c.bf16 %v675_v24, %v679_v33 }
 0x14f   : > { %577 = vmatmul.msk.bf16.vlgmr.msra.gmra.mxu1 %vm293_vm0, %v366_v29 }
 0x156   : > { %352 = vadd.xlane.f32.xlu2 %v351_v31 }
 0x157   : > { %579 = vmatmul.msk.bf16.gmra.mxu3 %vm293_vm0, %v368_v32 }
 0x15e   : > { %361 = vadd.xlane.f32.xlu2 %v360_v34 }
 0x167   : > { %580 = vmatmul.msk.bf16.gmra.mxu3 %vm293_vm0, %v369_v35 }
 0x1a7   : > { %v356_v37 = vpop.xlane.xlu0 %355 }
 0x1b1   : > { %v350_v38 = vpop.xlane.xlu1 %349 }
 0x1b2   : > { %680 = vrcp.f32 %v350_v38 }
 0x1b7   : > { %v347_v41 = vpop.xlane.xlu0 %346 }
 0x1b8   : > { %v681_v43 = vpop.eup %680 }
 0x1b9   : > { %v359_v58 = vpop.xlane.xlu1 %358 }
 0x1bf   : > { %v365_v0 = vpop.xlane.xlu0 %364 }
 0x1c1   : > { %v344_v36 = vpop.xlane.xlu2 %343 }
 0x1c2   : > { %682 = vrcp.f32 %v344_v36 }
 0x1c8   : > { %v683_v44 = vpop.eup %682 }
 0x1c9   : > { %v353_v39 = vpop.xlane.xlu2 %352 }
 0x1ca   : > { %v396_v40 = vpop.f32.mrf.mxu3  ;;  %684 = vrcp.f32 %v353_v39 }
 0x1cb   : > { %686 = vrcp.f32 %v347_v41  ;;  %v421_v45 = vmul.f32 %v681_v43, %v396_v40 }
 0x1cc   : > { %v391_v42 = vpop.f32.mrf.mxu1  ;;  %688 = vrcp.f32 %v356_v37 }
 0x1cd   : > { %v419_v48 = vmul.f32 %v683_v44, %v391_v42  ;;  %v429_v52 = vadd.f32 %v596_v18, %v421_v45  ;;  %690 = vrcp.f32 %v359_v58 }
 0x1cf   : > { %v427_v55 = vadd.f32 %v592_v6, %v419_v48 }
 0x1d0   : > { %v685_v46 = vpop.eup %684 }
 0x1d1   : > { %v687_v50 = vpop.eup %686 }
 0x1d2   : > { %v398_v47 = vpop.f32.mrf.mxu3 }
 0x1d3   : > { %v422_v49 = vmul.f32 %v685_v46, %v398_v47 }
 0x1d4   : > { %v393_v51 = vpop.f32.mrf.mxu1 }
 0x1d5   : > { %v430_v53 = vadd.f32 %v597_v19, %v422_v49  ;;  %v420_v54 = vmul.f32 %v687_v50, %v393_v51  ;;  %v689_v19 = vpop.eup %688 }
 0x1d6   : > { %v691_v60 = vpop.eup %690 }
 0x1d7   : > { %v614_v56 = vpack.c.bf16 %v430_v53, %v429_v52  ;;  %v428_v57 = vadd.f32 %v593_v7, %v420_v54  ;;  %v362_v7 = vpop.xlane.xlu2 %361 }
 0x1d8   : > { %692 = vrcp.f32 %v362_v7 }
 0x1d9   : > { %629 = vst [vmem:[%s827_s22 + $0x8] sm:$0xff] %v614_v56   ;;  %v609_v16 = vpack.c.bf16 %v428_v57, %v427_v55  ;;  %694 = vrcp.f32 %v365_v0 }
 0x1da   : > { %v401_v18 = vpop.f32.mrf.mxu3 }
 0x1db   : > { %610 = vst [vmem:[%s827_s22] sm:$0xff] %v609_v16   ;;  %v423_v59 = vmul.f32 %v689_v19, %v401_v18 }
 0x1dd   : > { %v431_v6 = vadd.f32 %v600_v8, %v423_v59 }
 0x1de   : > { %v693_v2 = vpop.eup %692 }
 0x1df   : > { %v695_v10 = vpop.eup %694 }
 0x1e2   : > { %v403_v61 = vpop.f32.mrf.mxu3 }
 0x1e3   : > { %v424_v62 = vmul.f32 %v691_v60, %v403_v61 }
 0x1e5   : > { %v432_v4 = vadd.f32 %v601_v9, %v424_v62 }
 0x1e7   : > { %v619_v63 = vpack.c.bf16 %v432_v4, %v431_v6 }
 0x1e9   : > { %630 = vst [vmem:[%s827_s22 + $0x10] sm:$0xff] %v619_v63  }
 0x1ea   : > { %v406_v1 = vpop.f32.mrf.mxu3 }
 0x1eb   : > { %v425_v3 = vmul.f32 %v693_v2, %v406_v1 }
 0x1ed   : > { %v433_v13 = vadd.f32 %v604_v20, %v425_v3 }
 0x1f2   : > { %v408_v11 = vpop.f32.mrf.mxu3 }
 0x1f3   : > { %v426_v12 = vmul.f32 %v695_v10, %v408_v11 }
 0x1f5   : > { %v434_v5 = vadd.f32 %v605_v21, %v426_v12 }
 0x1f7   : > { %v624_v8 = vpack.c.bf16 %v434_v5, %v433_v13 }
 0x1f9   : > { %631 = vst [vmem:[%s827_s22 + $0x18] sm:$0xff] %v624_v8  }
 0x1fa PF: > { %s12_s11 = sadd.s32 1, %s718_s11   ;;  %s857_s9 = smov %s714_s10 }
 0x1fb   : > { %p9_p5 = scmp.ge.s32.totalorder %s12_s11, 6   ;;  %s858_s10 = smov %s860_s12 }
 0x1fd   :  { %11 = sbr.rel (!%p9_p5) target bundleno = 2 (0x2), region = 61 }

// kernel: monofusion_forward.10
= control target key start
LH: loop header
LB: loop body
LE: loop exit
PB: predicated region body
PF: predicated region fallthrough
CT: control target
= control target key end

     0   :  { %s730_s15 = smov 0   ;;  %s732_s16 = smov 0   ;;  %s793_s0 = inlined_call_operand.vmem [shape: bf16[2,64,128], index: 0, kind: input, shape index: {}]   ;;  %s794_s1 = inlined_call_operand.vmem [shape: bf16[2,64,128], index: 1, kind: input, shape index: {}]   ;;  %s795_s2 = inlined_call_operand.vmem [shape: f32[3,64], index: 2, kind: input, shape index: {}]   ;;  %s796_s3 = inlined_call_operand.vmem [shape: f32[2,64], index: 3, kind: input, shape index: {}]   ;;  %s797_s4 = inlined_call_operand.vmem [shape: f32[2,2,64], index: 4, kind: output, shape index: {}]  }
   0x1   :  { %s734_s17 = smov 0  }
   0x2 LB: > { %s26_s18 = sadd.s32 1, %s699_s16  ;;  %p573_p0 = scmp.ge.s32.totalorder %s703_s17, 1  ;;  %s703_s17 = sphi %s734_s17, %s14_s17   ;;  %s699_s16 = sphi %s732_s16, %s799_s16   ;;  %s695_s15 = sphi %s730_s15, %s798_s15  }
   0x3   : > { %p28_p1 = scmp.ge.s32.totalorder %s26_s18, 2  ;;  %p202_p2 = scmp.lt.s32.totalorder %s703_s17, 3 }
   0x5   : > { %s801_s18 = smov (%p28_p1, %s26_s18), 0  ;;  %p203_p3 = pnand %p573_p0, %p202_p2 }
   0x6   : > { %p244_p4 = scmp.lt.s32.totalorder (!%p203_p3), %s695_s15, 1 }
   0x7   : > { %206 = sbr.rel (%p203_p3) target bundleno = 506 (0x1fa), region = 36 }
   0xc   : > { %s803_s15 = smov (!%p244_p4, %s695_s15), 1  ;;  %vm359_vm0 = vcmask 523264   ;;  %vm461_vm1 = vcmask 517120  }
   0xd   : > { %s606_s19 = sshll.u32 %s803_s15, 5  ;;  %s578_s28 = sshll.u32 %s803_s15, 1 }
   0xe   : > { %s257_s22 = scalar_lea.vmem %s794_s1, %s606_s19  ;;  %s251_s25 = scalar_lea.vmem %s793_s0, %s606_s19 }
   0xf   : > { %v611_v0 = vld [vmem:[%s257_s22 + $0x18] sm:$0xff]  ;;  %v610_v1 = vld [vmem:[%s257_s22 + $0x10] sm:$0xff]  ;;  %v609_v2 = vld [vmem:[%s257_s22 + $0x8] sm:$0xff]  ;;  %s268_s7 = scalar_lea.vmem %s797_s4, %s578_s28 }
  0x10   : > { %631 = vmatpush.bf16.xpose.msra.mxu2 %v611_v0  ;;  %632 = vmatpush.bf16.xpose.msra.mxu3 %v611_v0  ;;  %v628_v3 = vld [vmem:[%s251_s25 + $0x8] sm:$0xff]   ;;  %v629_v4 = vld [vmem:[%s251_s25 + $0x10] sm:$0xff]   ;;  %v613_v5 = vld [vmem:[%s251_s25] sm:$0xff]  }
  0x11   : > { %334 = vmatpush.bf16.xpose.msra.mxu0 %v611_v0  ;;  %v618_v6 = vunpack.c.l.bf16 %v628_v3  ;;  %v619_v7 = vunpack.c.h.bf16 %v628_v3  ;;  %v622_v8 = vunpack.c.l.bf16 %v629_v4  ;;  %v623_v9 = vunpack.c.h.bf16 %v629_v4  ;;  %v608_v10 = vld [vmem:[%s257_s22] sm:$0xff]  ;;  %v630_v22 = vld [vmem:[%s251_s25 + $0x18] sm:$0xff]  }
  0x12   : > { %v614_v11 = vunpack.c.l.bf16 %v613_v5  ;;  %v615_v12 = vunpack.c.h.bf16 %v613_v5  ;;  %v626_v23 = vunpack.c.l.bf16 %v630_v22  ;;  %v627_v24 = vunpack.c.h.bf16 %v630_v22 }
  0x13   : > { %v296_v13 = vmul.f32 0.088388346, %v618_v6  ;;  %v297_v14 = vmul.f32 0.088388346, %v619_v7  ;;  %v298_v15 = vmul.f32 0.088388346, %v622_v8 }
  0x14   : > { %v299_v16 = vmul.f32 0.088388346, %v623_v9  ;;  %v294_v17 = vmul.f32 0.088388346, %v614_v11  ;;  %v295_v18 = vmul.f32 0.088388346, %v615_v12 }
  0x15   : > { %v303_v19 = vpack.c.bf16 %v297_v14, %v296_v13  ;;  %v300_v25 = vmul.f32 0.088388346, %v626_v23  ;;  %v301_v26 = vmul.f32 0.088388346, %v627_v24  ;;  %v408_v12 = vld [vmem:[%s795_s2] sm:$0x7] }
  0x16   : > { %v304_v20 = vpack.c.bf16 %v299_v16, %v298_v15  ;;  %v302_v21 = vpack.c.bf16 %v295_v18, %v294_v17  ;;  %v459_v16 = vld [vmem:[%s796_s3] sm:$0x3] }
  0x17   : > { %v305_v27 = vpack.c.bf16 %v301_v26, %v300_v25 }
  0x18   : > { %633 = vmatpush.bf16.xpose.msra.mxu2 %v610_v1  ;;  %634 = vmatpush.bf16.xpose.msra.mxu3 %v610_v1 }
  0x19   : > { %335 = vmatpush.bf16.xpose.msra.mxu0 %v610_v1 }
  0x20   : > { %635 = vmatpush.bf16.xpose.msra.mxu2 %v609_v2  ;;  %636 = vmatpush.bf16.xpose.msra.mxu3 %v609_v2 }
  0x21   : > { %336 = vmatpush.bf16.xpose.msra.mxu0 %v609_v2 }
  0x28   : > { %637 = vmatpush.bf16.xpose.msra.mxu2 %v608_v10  ;;  %638 = vmatpush.bf16.xpose.msra.mxu3 %v608_v10 }
  0x29   : > { %337 = vmatpush.bf16.xpose.msra.mxu0 %v608_v10 }
  0x2f   : > { %343 = vmatmul.bf16.vlgmr.msra.gmra.mxu2 %v303_v19  ;;  %348 = vmatmul.bf16.vlgmr.msra.gmra.mxu3 %v304_v20 }
  0x30   : > { %338 = vmatmul.bf16.vlgmr.msra.gmra.mxu0 %v302_v21 }
  0x3f   : > { %353 = vmatmul.bf16.gmra.mxu3 %v305_v27 }
  0xad   : > { %v339_v37 = vpop.f32.mrf.mxu0 }
  0xae   : > { %v360_v38 = vsel %vm359_vm0, %v339_v37, -inf }
  0xb2   : > { %v344_v28 = vpop.f32.mrf.mxu2  ;;  %v349_v29 = vpop.f32.mrf.mxu3 }
  0xb3   : > { %v366_v34 = vsel %vm359_vm0, %v344_v28, -inf  ;;  %v372_v36 = vsel %vm359_vm0, %v349_v29, -inf }
  0xb5   : > { %v341_v42 = vpop.f32.mrf.mxu0 }
  0xb6   : > { %v363_v43 = vsel %vm359_vm0, %v341_v42, -inf }
  0xba   : > { %v346_v30 = vpop.f32.mrf.mxu2  ;;  %v351_v31 = vpop.f32.mrf.mxu3 }
  0xbb   : > { %v375_v32 = vsel %vm359_vm0, %v351_v31, -inf  ;;  %v369_v33 = vsel %vm359_vm0, %v346_v30, -inf }
  0xbc   : > { %376 = vmax.xlane.f32.xlu1 %v375_v32  ;;  %370 = vmax.xlane.f32.xlu2 %v369_v33 }
  0xc2   : > { %v354_v35 = vpop.f32.mrf.mxu3 }
  0xc3   : > { %v378_v41 = vsel %vm359_vm0, %v354_v35, -inf }
  0xc4   : > { %373 = vmax.xlane.f32.xlu1 %v372_v36  ;;  %367 = vmax.xlane.f32.xlu2 %v366_v34 }
  0xca   : > { %v356_v39 = vpop.f32.mrf.mxu3 }
  0xcb   : > { %v381_v40 = vsel %vm359_vm0, %v356_v39, -inf }
  0xcc   : > { %382 = vmax.xlane.f32.xlu0 %v381_v40  ;;  %361 = vmax.xlane.f32.xlu1 %v360_v38 }
  0xd4   : > { %379 = vmax.xlane.f32.xlu0 %v378_v41 }
  0xdc   : > { %364 = vmax.xlane.f32.xlu0 %v363_v43 }
 0x12f   : > { %v377_v44 = vpop.xlane.xlu1 %376  ;;  %v371_v48 = vpop.xlane.xlu2 %370 }
 0x130   : > { %v389_v50 = vsub.f32 %v351_v31, %v377_v44  ;;  %v387_v57 = vsub.f32 %v346_v30, %v371_v48 }
 0x132   : > { %v402_v55 = vmul.f32 1.442695, %v389_v50  ;;  %v398_v61 = vmul.f32 1.442695, %v387_v57 }
 0x137   : > { %v374_v52 = vpop.xlane.xlu1 %373  ;;  %v368_v59 = vpop.xlane.xlu2 %367 }
 0x138   : > { %v388_v56 = vsub.f32 %v349_v29, %v374_v52  ;;  %v386_v62 = vsub.f32 %v344_v28, %v368_v59 }
 0x13a   : > { %v400_v58 = vmul.f32 1.442695, %v388_v56  ;;  %v396_v1 = vmul.f32 1.442695, %v386_v62 }
 0x13f   : > { %v383_v45 = vpop.xlane.xlu0 %382  ;;  %v362_v3 = vpop.xlane.xlu1 %361 }
 0x140   : > { %v391_v46 = vsub.f32 %v356_v39, %v383_v45  ;;  %v384_v5 = vsub.f32 %v339_v37, %v362_v3 }
 0x142   : > { %v406_v47 = vmul.f32 1.442695, %v391_v46  ;;  %v392_v8 = vmul.f32 1.442695, %v384_v5 }
 0x144   : > { %663 = vpow2.f32 %v406_v47 }
 0x147   : > { %v380_v49 = vpop.xlane.xlu0 %379 }
 0x148   : > { %v390_v51 = vsub.f32 %v354_v35, %v380_v49 }
 0x14a   : > { %v664_v53 = vpop.eup %663  ;;  %v404_v54 = vmul.f32 1.442695, %v390_v51 }
 0x14b   : > { %595 = vmatpush.xpose.msk.msra.mxu1 %vm359_vm0, %v664_v53 }
 0x14c   : > { %665 = vpow2.f32 %v404_v54 }
 0x14d   : > { %667 = vpow2.f32 %v402_v55 }
 0x14e   : > { %669 = vpow2.f32 %v400_v58 }
 0x14f   : > { %v365_v63 = vpop.xlane.xlu0 %364  ;;  %671 = vpow2.f32 %v398_v61 }
 0x150   : > { %v385_v2 = vsub.f32 %v341_v42, %v365_v63  ;;  %673 = vpow2.f32 %v396_v1 }
 0x152   : > { %v666_v60 = vpop.eup %665  ;;  %v394_v6 = vmul.f32 1.442695, %v385_v2 }
 0x153   : > { %596 = vmatpush.xpose.msk.msra.mxu1 %vm359_vm0, %v666_v60  ;;  %v668_v0 = vpop.eup %667 }
 0x154   : > { %v670_v4 = vpop.eup %669  ;;  %675 = vpow2.f32 %v394_v6 }
 0x155   : > { %v672_v7 = vpop.eup %671  ;;  %677 = vpow2.f32 %v392_v8 }
 0x156   : > { %v674_v9 = vpop.eup %673 }
 0x157   : > { %597 = vmatpush.xpose.msk.msra.mxu1 %vm359_vm0, %v668_v0 }
 0x15a   : > { %v676_v10 = vpop.eup %675 }
 0x15b   : > { %598 = vmatpush.xpose.msk.msra.mxu1 %vm359_vm0, %v670_v4  ;;  %v678_v11 = vpop.eup %677 }
 0x15f   : > { %599 = vmatpush.xpose.msk.msra.mxu1 %vm359_vm0, %v672_v7 }
 0x163   : > { %600 = vmatpush.xpose.msk.msra.mxu1 %vm359_vm0, %v674_v9 }
 0x167   : > { %601 = vmatpush.xpose.msk.msra.mxu1 %vm359_vm0, %v676_v10 }
 0x16b   : > { %602 = vmatpush.xpose.msk.msra.mxu1 %vm359_vm0, %v678_v11 }
 0x16e   : > { %603 = vmatmul.msk.f32.vlgmr.msra.gmra.mxu1 %vm359_vm0, %v408_v12 }
 0x1eb   : > { %v453_v13 = vpop.f32.mrf.mxu1 }
 0x1ec   : > { %679 = vrcp.f32 %v453_v13 }
 0x1f2   : > { %v680_v14 = vpop.eup %679 }
 0x1f3   : > { %v457_v15 = vperm.slane %v680_v14, 2 }
 0x1f5   : > { %v458_v17 = vmul.f32 %v457_v15, %v453_v13 }
 0x1f7   : > { %v460_v18 = vsub.f32 %v458_v17, %v459_v16 }
 0x1f9   : > { %462 = vst.msk [vmem:[%s268_s7] sm:$0x3] %vm461_vm1, %v460_v18 }
 0x1fa PF: > { %s14_s17 = sadd.s32 1, %s703_s17   ;;  %s798_s15 = smov %s699_s16 }
 0x1fb   : > { %p11_p5 = scmp.ge.s32.totalorder %s14_s17, 4   ;;  %s799_s16 = smov %s801_s18 }
 0x1fd   :  { %13 = sbr.rel (!%p11_p5) target bundleno = 2 (0x2), region = 72 }

// kernel: monofusion_forward.11
= control target key start
LH: loop header
LB: loop body
LE: loop exit
PB: predicated region body
PF: predicated region fallthrough
CT: control target
= control target key end

     0   :  { %s1999_s9 = smov 0   ;;  %s2001_s10 = smov 0   ;;  %s2692_s0 = inlined_call_operand.vmem [shape: bf16[4,256,128], index: 0, kind: input, shape index: {}]   ;;  %s2693_s1 = inlined_call_operand.vmem [shape: bf16[4,256,128], index: 1, kind: input, shape index: {}]   ;;  %s2694_s2 = inlined_call_operand.vmem [shape: bf16[4,256,128], index: 2, kind: output, shape index: {}]  }
   0x1   :  { %s2003_s11 = smov 0  }
   0x2 LB: > { %s24_s12 = sadd.s32 1, %s1978_s10  ;;  %p1478_p0 = scmp.ge.s32.totalorder %s1982_s11, 1  ;;  %s1982_s11 = sphi %s2003_s11, %s12_s11   ;;  %s1978_s10 = sphi %s2001_s10, %s2816_s10   ;;  %s1974_s9 = sphi %s1999_s9, %s2815_s9  }
   0x3   : > { %p26_p1 = scmp.ge.s32.totalorder %s24_s12, 4  ;;  %p143_p2 = scmp.lt.s32.totalorder %s1982_s11, 5 }
   0x5   : > { %s2818_s12 = smov (%p26_p1, %s24_s12), 0  ;;  %p144_p3 = pnand %p1478_p0, %p143_p2 }
   0x7   : > { %147 = sbr.rel (%p144_p3) target bundleno = 738 (0x2e2), region = 28 }
   0xc   : > { %p179_p4 = scmp.lt.s32.totalorder %s1974_s9, 3 }
   0xe   : > { %s2820_s9 = smov (!%p179_p4, %s1974_s9), 3 }
   0xf   : > { %s2017_s13 = sshll.u32 %s2820_s9, 7 }
  0x10   : > { %s2023_s16 = scalar_lea.vmem %s2693_s1, %s2017_s13  ;;  %s2045_s19 = scalar_lea.vmem %s2692_s0, %s2017_s13 }
  0x11   : > { %v1561_v0 = vld [vmem:[%s2023_s16 + $0x38] sm:$0xff]  ;;  %v1560_v2 = vld [vmem:[%s2023_s16 + $0x30] sm:$0xff]  ;;  %v1559_v4 = vld [vmem:[%s2023_s16 + $0x28] sm:$0xff]  ;;  %s2580_s22 = scalar_lea.vmem %s2694_s2, %s2017_s13 }
  0x12   : > { %v1569_v1 = vld [vmem:[%s2023_s16 + $0x78] sm:$0xff]  ;;  %443 = vmatpush.bf16.xpose.msra.mxu0 %v1561_v0  ;;  %1037 = vmatpush.bf16.msra.mxu2 %v1561_v0  ;;  %v1568_v3 = vld [vmem:[%s2023_s16 + $0x70] sm:$0xff]  ;;  %v1567_v5 = vld [vmem:[%s2023_s16 + $0x68] sm:$0xff] }
  0x13   : > { %532 = vmatpush.bf16.xpose.msra.mxu1 %v1569_v1  ;;  %1126 = vmatpush.bf16.msra.mxu3 %v1569_v1  ;;  %v1558_v6 = vld [vmem:[%s2023_s16 + $0x20] sm:$0xff]  ;;  %v1557_v8 = vld [vmem:[%s2023_s16 + $0x18] sm:$0xff]  ;;  %v1556_v10 = vld [vmem:[%s2023_s16 + $0x10] sm:$0xff] }
  0x14   : > { %v1566_v7 = vld [vmem:[%s2023_s16 + $0x60] sm:$0xff]  ;;  %v1565_v9 = vld [vmem:[%s2023_s16 + $0x58] sm:$0xff]  ;;  %v1564_v11 = vld [vmem:[%s2023_s16 + $0x50] sm:$0xff] }
  0x15   : > { %v1555_v12 = vld [vmem:[%s2023_s16 + $0x8] sm:$0xff]  ;;  %v1554_v14 = vld [vmem:[%s2023_s16] sm:$0xff]  ;;  %v2066_v28 = vld [vmem:[%s2045_s19 + $0x10] sm:$0xff]  }
  0x16   : > { %1038 = vmatpush.bf16.msra.mxu2 %v1560_v2  ;;  %v1563_v13 = vld [vmem:[%s2023_s16 + $0x48] sm:$0xff]  ;;  %v1562_v15 = vld [vmem:[%s2023_s16 + $0x40] sm:$0xff]  ;;  %2755 = vst [vmem:[#allocation2_spill] sm:$0xff] %v2066_v28  ;;  %v2720_v29 = vunpack.c.l.bf16 %v2066_v28  ;;  %v2719_v30 = vunpack.c.h.bf16 %v2066_v28  ;;  %v2075_v34 = vld [vmem:[%s2045_s19 + $0x18] sm:$0xff]  }
  0x17   : > { %1127 = vmatpush.bf16.msra.mxu3 %v1568_v3  ;;  %v2048_v16 = vld [vmem:[%s2045_s19] sm:$0xff]   ;;  %v2057_v22 = vld [vmem:[%s2045_s19 + $0x8] sm:$0xff]   ;;  %2756 = vst [vmem:[#allocation3_spill] sm:$0xff] %v2075_v34  ;;  %v2722_v35 = vunpack.c.l.bf16 %v2075_v34  ;;  %v2721_v36 = vunpack.c.h.bf16 %v2075_v34  ;;  %v2102_v52 = vld [vmem:[%s2045_s19 + $0x30] sm:$0xff]  }
  0x18   : > { %v2726_v17 = vunpack.c.l.bf16 %v2048_v16  ;;  %v2725_v18 = vunpack.c.h.bf16 %v2048_v16  ;;  %v2723_v23 = vunpack.c.l.bf16 %v2057_v22  ;;  %v2724_v24 = vunpack.c.h.bf16 %v2057_v22  ;;  %v2084_v40 = vld [vmem:[%s2045_s19 + $0x20] sm:$0xff]   ;;  %v2093_v46 = vld [vmem:[%s2045_s19 + $0x28] sm:$0xff]   ;;  %2759 = vst [vmem:[#allocation6_spill] sm:$0xff] %v2102_v52  ;;  %v2111_v58 = vld [vmem:[%s2045_s19 + $0x38] sm:$0xff]  }
  0x19   : > { %v303_v31 = vmul.f32 0.088388346, %v2720_v29  ;;  %v304_v32 = vmul.f32 0.088388346, %v2719_v30  ;;  %v305_v37 = vmul.f32 0.088388346, %v2722_v35  ;;  %v2715_v41 = vunpack.c.l.bf16 %v2084_v40 }
  0x1a   : > { %444 = vmatpush.bf16.xpose.msra.mxu0 %v1560_v2  ;;  %1039 = vmatpush.bf16.msra.mxu2 %v1559_v4  ;;  %v299_v19 = vmul.f32 0.088388346, %v2726_v17  ;;  %v300_v20 = vmul.f32 0.088388346, %v2725_v18  ;;  %v301_v25 = vmul.f32 0.088388346, %v2723_v23  ;;  %v2717_v42 = vunpack.c.h.bf16 %v2084_v40 }
  0x1b   : > { %533 = vmatpush.bf16.xpose.msra.mxu1 %v1568_v3  ;;  %1128 = vmatpush.bf16.msra.mxu3 %v1567_v5  ;;  %v302_v26 = vmul.f32 0.088388346, %v2724_v24  ;;  %v333_v33 = vpack.c.bf16 %v304_v32, %v303_v31  ;;  %v306_v38 = vmul.f32 0.088388346, %v2721_v36  ;;  %2757 = vst [vmem:[#allocation4_spill] sm:$0xff] %v2084_v40  ;;  %v2712_v47 = vunpack.c.l.bf16 %v2093_v46  ;;  %v2120_v0 = vld [vmem:[%s2045_s19 + $0x40] sm:$0xff]  }
  0x1c   : > { %v331_v21 = vpack.c.bf16 %v300_v20, %v299_v19  ;;  %v307_v43 = vmul.f32 0.088388346, %v2715_v41  ;;  %v308_v44 = vmul.f32 0.088388346, %v2717_v42  ;;  %2758 = vst [vmem:[#allocation5_spill] sm:$0xff] %v2093_v46  ;;  %v2711_v48 = vunpack.c.h.bf16 %v2093_v46 }
  0x1d   : > { %v332_v27 = vpack.c.bf16 %v302_v26, %v301_v25  ;;  %v334_v39 = vpack.c.bf16 %v306_v38, %v305_v37  ;;  %v309_v49 = vmul.f32 0.088388346, %v2712_v47  ;;  %v2714_v53 = vunpack.c.l.bf16 %v2102_v52  ;;  %2760 = vst [vmem:[#allocation7_spill] sm:$0xff] %v2111_v58 }
  0x1e   : > { %1040 = vmatpush.bf16.msra.mxu2 %v1558_v6  ;;  %v335_v45 = vpack.c.bf16 %v308_v44, %v307_v43  ;;  %v310_v50 = vmul.f32 0.088388346, %v2711_v48  ;;  %v2713_v54 = vunpack.c.h.bf16 %v2102_v52  ;;  %v2707_v59 = vunpack.c.l.bf16 %v2111_v58  ;;  %2761 = vst [vmem:[#allocation8_spill] sm:$0xff] %v2120_v0 }
  0x1f   : > { %1129 = vmatpush.bf16.msra.mxu3 %v1566_v7  ;;  %v311_v55 = vmul.f32 0.088388346, %v2714_v53  ;;  %v2709_v60 = vunpack.c.h.bf16 %v2111_v58  ;;  %v2706_v1 = vunpack.c.l.bf16 %v2120_v0  ;;  %v2705_v2 = vunpack.c.h.bf16 %v2120_v0 }
  0x20   : > { %v336_v51 = vpack.c.bf16 %v310_v50, %v309_v49  ;;  %v312_v56 = vmul.f32 0.088388346, %v2713_v54  ;;  %v313_v61 = vmul.f32 0.088388346, %v2707_v59  ;;  %v2261_v59 = vld [vmem:[%s2045_s19 + $0x78] sm:$0xff]  }
  0x21   : > { %v314_v62 = vmul.f32 0.088388346, %v2709_v60  ;;  %v315_v3 = vmul.f32 0.088388346, %v2706_v1  ;;  %2768 = vst [vmem:[#allocation15_spill] sm:$0xff] %v2261_v59 }
  0x22   : > { %445 = vmatpush.bf16.xpose.msra.mxu0 %v1559_v4  ;;  %1041 = vmatpush.bf16.msra.mxu2 %v1557_v8  ;;  %v337_v57 = vpack.c.bf16 %v312_v56, %v311_v55  ;;  %v316_v4 = vmul.f32 0.088388346, %v2705_v2 }
  0x23   : > { %534 = vmatpush.bf16.xpose.msra.mxu1 %v1567_v5  ;;  %1130 = vmatpush.bf16.msra.mxu3 %v1565_v9  ;;  %v338_v63 = vpack.c.bf16 %v314_v62, %v313_v61 }
  0x24   : > { %v339_v5 = vpack.c.bf16 %v316_v4, %v315_v3 }
  0x26   : > { %1042 = vmatpush.bf16.msra.mxu2 %v1556_v10 }
  0x27   : > { %1131 = vmatpush.bf16.msra.mxu3 %v1564_v11 }
  0x2a   : > { %446 = vmatpush.bf16.xpose.msra.mxu0 %v1558_v6  ;;  %1043 = vmatpush.bf16.msra.mxu2 %v1555_v12 }
  0x2b   : > { %535 = vmatpush.bf16.xpose.msra.mxu1 %v1566_v7  ;;  %1132 = vmatpush.bf16.msra.mxu3 %v1563_v13 }
  0x2e   : > { %1044 = vmatpush.bf16.msra.mxu2 %v1554_v14 }
  0x2f   : > { %1133 = vmatpush.bf16.msra.mxu3 %v1562_v15 }
  0x32   : > { %447 = vmatpush.bf16.xpose.msra.mxu0 %v1557_v8 }
  0x33   : > { %536 = vmatpush.bf16.xpose.msra.mxu1 %v1565_v9  ;;  %v2135_v9 = vld [vmem:[%s2045_s19 + $0x48] sm:$0xff]  }
  0x34   : > { %2762 = vst [vmem:[#allocation9_spill] sm:$0xff] %v2135_v9 }
  0x3a   : > { %448 = vmatpush.bf16.xpose.msra.mxu0 %v1556_v10  ;;  %v2704_v10 = vunpack.c.l.bf16 %v2135_v9 }
  0x3b   : > { %537 = vmatpush.bf16.xpose.msra.mxu1 %v1564_v11  ;;  %v2702_v11 = vunpack.c.h.bf16 %v2135_v9 }
  0x3d   : > { %v318_v19 = vmul.f32 0.088388346, %v2702_v11 }
  0x42   : > { %449 = vmatpush.bf16.xpose.msra.mxu0 %v1555_v12 }
  0x43   : > { %538 = vmatpush.bf16.xpose.msra.mxu1 %v1563_v13 }
  0x4a   : > { %450 = vmatpush.bf16.xpose.msra.mxu0 %v1554_v14 }
  0x4b   : > { %539 = vmatpush.bf16.xpose.msra.mxu1 %v1562_v15  ;;  %v317_v15 = vmul.f32 0.088388346, %v2704_v10 }
  0x4d   : > { %v340_v20 = vpack.c.bf16 %v318_v19, %v317_v15  ;;  %v2198_v15 = vld [vmem:[%s2045_s19 + $0x60] sm:$0xff]  }
  0x4e   : > { %2765 = vst [vmem:[#allocation12_spill] sm:$0xff] %v2198_v15  ;;  %v2695_v19 = vunpack.c.l.bf16 %v2198_v15 }
  0x51   : > { %451 = vmatmul.bf16.vlgmr.msra.gmra.mxu0 %v331_v21 }
  0x52   : > { %540 = vmatmul.bf16.vlgmr.msra.gmra.mxu1 %v331_v21 }
  0x61   : > { %456 = vmatmul.bf16.gmra.mxu0 %v332_v27 }
  0x62   : > { %545 = vmatmul.bf16.gmra.mxu1 %v332_v27  ;;  %v2156_v27 = vld [vmem:[%s2045_s19 + $0x50] sm:$0xff]  }
  0x63   : > { %2763 = vst [vmem:[#allocation10_spill] sm:$0xff] %v2156_v27  ;;  %v2700_v31 = vunpack.c.l.bf16 %v2156_v27  ;;  %v2699_v32 = vunpack.c.h.bf16 %v2156_v27 }
  0x65   : > { %v320_v43 = vmul.f32 0.088388346, %v2699_v32 }
  0x71   : > { %461 = vmatmul.bf16.gmra.mxu0 %v333_v33 }
  0x72   : > { %550 = vmatmul.bf16.gmra.mxu1 %v333_v33 }
  0x81   : > { %466 = vmatmul.bf16.gmra.mxu0 %v334_v39 }
  0x82   : > { %555 = vmatmul.bf16.gmra.mxu1 %v334_v39  ;;  %v319_v39 = vmul.f32 0.088388346, %v2700_v31  ;;  %v2240_v31 = vld [vmem:[%s2045_s19 + $0x70] sm:$0xff]  }
  0x83   : > { %2767 = vst [vmem:[#allocation14_spill] sm:$0xff] %v2240_v31 }
  0x84   : > { %v341_v44 = vpack.c.bf16 %v320_v43, %v319_v39  ;;  %v323_v43 = vmul.f32 0.088388346, %v2695_v19 }
  0x91   : > { %471 = vmatmul.bf16.gmra.mxu0 %v335_v45 }
  0x92   : > { %560 = vmatmul.bf16.gmra.mxu1 %v335_v45 }
  0xa1   : > { %476 = vmatmul.bf16.gmra.mxu0 %v336_v51 }
  0xa2   : > { %565 = vmatmul.bf16.gmra.mxu1 %v336_v51  ;;  %v2177_v51 = vld [vmem:[%s2045_s19 + $0x58] sm:$0xff]  }
  0xa3   : > { %2764 = vst [vmem:[#allocation11_spill] sm:$0xff] %v2177_v51  ;;  %v2698_v55 = vunpack.c.l.bf16 %v2177_v51  ;;  %v2697_v56 = vunpack.c.h.bf16 %v2177_v51 }
  0xa5   : > { %v322_v3 = vmul.f32 0.088388346, %v2697_v56 }
  0xb1   : > { %481 = vmatmul.bf16.gmra.mxu0 %v337_v57 }
  0xb2   : > { %570 = vmatmul.bf16.gmra.mxu1 %v337_v57 }
  0xc1   : > { %486 = vmatmul.bf16.gmra.mxu0 %v338_v63 }
  0xc2   : > { %575 = vmatmul.bf16.gmra.mxu1 %v338_v63  ;;  %v321_v63 = vmul.f32 0.088388346, %v2698_v55 }
  0xc4   : > { %v342_v4 = vpack.c.bf16 %v322_v3, %v321_v63 }
  0xce   : > { %v2128_v6 = vpop.f32.mrf.mxu0 }
  0xcf   : > { %v2130_v7 = vpop.f32.mrf.mxu1 }
  0xd0   : > { %v621_v8 = vmax.f32 %v2128_v6, %v2130_v7 }
  0xd1   : > { %491 = vmatmul.bf16.gmra.mxu0 %v339_v5 }
  0xd2   : > { %580 = vmatmul.bf16.gmra.mxu1 %v339_v5  ;;  %622 = vmax.xlane.f32.xlu0 %v621_v8 }
  0xd6   : > { %v2139_v12 = vpop.f32.mrf.mxu0 }
  0xd7   : > { %v2141_v13 = vpop.f32.mrf.mxu1 }
  0xd8   : > { %v624_v14 = vmax.f32 %v2139_v12, %v2141_v13 }
  0xda   : > { %625 = vmax.xlane.f32.xlu0 %v624_v14 }
  0xde   : > { %v2149_v21 = vpop.f32.mrf.mxu0 }
  0xdf   : > { %v2151_v25 = vpop.f32.mrf.mxu1 }
  0xe0   : > { %v627_v26 = vmax.f32 %v2149_v21, %v2151_v25 }
  0xe1   : > { %496 = vmatmul.bf16.gmra.mxu0 %v340_v20 }
  0xe2   : > { %585 = vmatmul.bf16.gmra.mxu1 %v340_v20  ;;  %628 = vmax.xlane.f32.xlu1 %v627_v26  ;;  %v2696_v20 = vunpack.c.h.bf16 %v2198_v15 }
  0xe6   : > { %v2160_v33 = vpop.f32.mrf.mxu0 }
  0xe7   : > { %v2162_v37 = vpop.f32.mrf.mxu1 }
  0xe8   : > { %v630_v38 = vmax.f32 %v2160_v33, %v2162_v37 }
  0xea   : > { %631 = vmax.xlane.f32.xlu1 %v630_v38 }
  0xee   : > { %v2170_v45 = vpop.f32.mrf.mxu0 }
  0xef   : > { %v2172_v49 = vpop.f32.mrf.mxu1 }
  0xf0   : > { %v633_v50 = vmax.f32 %v2170_v45, %v2172_v49 }
  0xf1   : > { %501 = vmatmul.bf16.gmra.mxu0 %v341_v44 }
  0xf2   : > { %590 = vmatmul.bf16.gmra.mxu1 %v341_v44  ;;  %634 = vmax.xlane.f32.xlu2 %v633_v50  ;;  %v324_v44 = vmul.f32 0.088388346, %v2696_v20 }
  0xf4   : > { %v343_v50 = vpack.c.bf16 %v324_v44, %v323_v43 }
  0xf6   : > { %v2181_v57 = vpop.f32.mrf.mxu0 }
  0xf7   : > { %v2183_v61 = vpop.f32.mrf.mxu1 }
  0xf8   : > { %v636_v62 = vmax.f32 %v2181_v57, %v2183_v61 }
  0xfa   : > { %637 = vmax.xlane.f32.xlu2 %v636_v62 }
  0xfe   : > { %v2191_v5 = vpop.f32.mrf.mxu0 }
  0xff   : > { %v2193_v8 = vpop.f32.mrf.mxu1 }
 0x100   : > { %v639_v14 = vmax.f32 %v2191_v5, %v2193_v8 }
 0x101   : > { %506 = vmatmul.bf16.gmra.mxu0 %v342_v4 }
 0x102   : > { %595 = vmatmul.bf16.gmra.mxu1 %v342_v4  ;;  %640 = vmax.xlane.f32.xlu0 %v639_v14  ;;  %v2219_v4 = vld [vmem:[%s2045_s19 + $0x68] sm:$0xff]  }
 0x103   : > { %2766 = vst [vmem:[#allocation13_spill] sm:$0xff] %v2219_v4  ;;  %v2701_v14 = vunpack.c.l.bf16 %v2219_v4 }
 0x105   : > { %v325_v20 = vmul.f32 0.088388346, %v2701_v14  ;;  %v2710_v14 = vunpack.c.h.bf16 %v2240_v31 }
 0x106   : > { %v2202_v26 = vpop.f32.mrf.mxu0 }
 0x107   : > { %v2204_v38 = vpop.f32.mrf.mxu1 }
 0x108   : > { %v642_v39 = vmax.f32 %v2202_v26, %v2204_v38 }
 0x10a   : > { %643 = vmax.xlane.f32.xlu1 %v642_v39  ;;  %v2703_v39 = vunpack.c.h.bf16 %v2219_v4 }
 0x10e   : > { %v2212_v62 = vpop.f32.mrf.mxu0 }
 0x10f   : > { %v2214_v63 = vpop.f32.mrf.mxu1 }
 0x110   : > { %v645_v3 = vmax.f32 %v2212_v62, %v2214_v63 }
 0x111   : > { %511 = vmatmul.bf16.gmra.mxu0 %v343_v50 }
 0x112   : > { %600 = vmatmul.bf16.gmra.mxu1 %v343_v50  ;;  %646 = vmax.xlane.f32.xlu2 %v645_v3  ;;  %v326_v50 = vmul.f32 0.088388346, %v2703_v39 }
 0x114   : > { %v344_v3 = vpack.c.bf16 %v326_v50, %v325_v20 }
 0x116   : > { %v2223_v19 = vpop.f32.mrf.mxu0 }
 0x117   : > { %v2225_v43 = vpop.f32.mrf.mxu1 }
 0x118   : > { %v648_v44 = vmax.f32 %v2223_v19, %v2225_v43 }
 0x11a   : > { %649 = vmax.xlane.f32.xlu0 %v648_v44  ;;  %v2708_v44 = vunpack.c.l.bf16 %v2240_v31 }
 0x11c   : > { %v327_v39 = vmul.f32 0.088388346, %v2708_v44  ;;  %v2718_v44 = vunpack.c.h.bf16 %v2261_v59 }
 0x11e   : > { %v2233_v56 = vpop.f32.mrf.mxu0 }
 0x11f   : > { %v2235_v55 = vpop.f32.mrf.mxu1 }
 0x120   : > { %v651_v32 = vmax.f32 %v2233_v56, %v2235_v55 }
 0x121   : > { %516 = vmatmul.bf16.gmra.mxu0 %v344_v3 }
 0x122   : > { %605 = vmatmul.bf16.gmra.mxu1 %v344_v3  ;;  %652 = vmax.xlane.f32.xlu1 %v651_v32  ;;  %v328_v32 = vmul.f32 0.088388346, %v2710_v14 }
 0x124   : > { %v345_v3 = vpack.c.bf16 %v328_v32, %v327_v39 }
 0x126   : > { %v2244_v11 = vpop.f32.mrf.mxu0 }
 0x127   : > { %v2246_v20 = vpop.f32.mrf.mxu1 }
 0x128   : > { %v654_v50 = vmax.f32 %v2244_v11, %v2246_v20 }
 0x12a   : > { %655 = vmax.xlane.f32.xlu2 %v654_v50  ;;  %v2716_v50 = vunpack.c.l.bf16 %v2261_v59 }
 0x12c   : > { %v329_v32 = vmul.f32 0.088388346, %v2716_v50 }
 0x12e   : > { %v2254_v10 = vpop.f32.mrf.mxu0 }
 0x12f   : > { %v2256_v2 = vpop.f32.mrf.mxu1 }
 0x130   : > { %v657_v1 = vmax.f32 %v2254_v10, %v2256_v2 }
 0x131   : > { %521 = vmatmul.bf16.gmra.mxu0 %v345_v3 }
 0x132   : > { %610 = vmatmul.bf16.gmra.mxu1 %v345_v3  ;;  %658 = vmax.xlane.f32.xlu0 %v657_v1  ;;  %v330_v1 = vmul.f32 0.088388346, %v2718_v44 }
 0x134   : > { %v346_v3 = vpack.c.bf16 %v330_v1, %v329_v32 }
 0x136   : > { %v2265_v60 = vpop.f32.mrf.mxu0 }
 0x137   : > { %v2267_v14 = vpop.f32.mrf.mxu1 }
 0x138   : > { %v660_v39 = vmax.f32 %v2265_v60, %v2267_v14 }
 0x13a   : > { %661 = vmax.xlane.f32.xlu1 %v660_v39 }
 0x13e   : > { %v2275_v48 = vpop.f32.mrf.mxu0 }
 0x13f   : > { %v2277_v47 = vpop.f32.mrf.mxu1 }
 0x140   : > { %v663_v54 = vmax.f32 %v2275_v48, %v2277_v47 }
 0x141   : > { %526 = vmatmul.bf16.gmra.mxu0 %v346_v3 }
 0x142   : > { %615 = vmatmul.bf16.gmra.mxu1 %v346_v3  ;;  %664 = vmax.xlane.f32.xlu2 %v663_v54 }
 0x145   : > { %v623_v53 = vpop.xlane.xlu0 %622 }
 0x146   : > { %v717_v39 = vsub.f32 %v2128_v6, %v623_v53  ;;  %v718_v41 = vsub.f32 %v2130_v7, %v623_v53  ;;  %v2283_v50 = vpop.f32.mrf.mxu0 }
 0x147   : > { %v2285_v42 = vpop.f32.mrf.mxu1 }
 0x148   : > { %v666_v32 = vmax.f32 %v2283_v50, %v2285_v42  ;;  %v781_v1 = vmul.f32 1.442695, %v717_v39  ;;  %v783_v44 = vmul.f32 1.442695, %v718_v41 }
 0x14a   : > { %667 = vmax.xlane.f32.xlu0 %v666_v32  ;;  %1768 = vpow2.f32 %v781_v1 }
 0x14b   : > { %1770 = vpow2.f32 %v783_v44 }
 0x14d   : > { %v626_v30 = vpop.xlane.xlu0 %625 }
 0x14e   : > { %v719_v54 = vsub.f32 %v2139_v12, %v626_v30  ;;  %v720_v3 = vsub.f32 %v2141_v13, %v626_v30  ;;  %v2291_v6 = vpop.f32.mrf.mxu0 }
 0x14f   : > { %v2293_v53 = vpop.f32.mrf.mxu1 }
 0x150   : > { %v669_v7 = vmax.f32 %v2291_v6, %v2293_v53  ;;  %v1769_v29 = vpop.eup %1768  ;;  %v785_v36 = vmul.f32 1.442695, %v719_v54  ;;  %v787_v35 = vmul.f32 1.442695, %v720_v3 }
 0x151   : > { %v1771_v39 = vpop.eup %1770 }
 0x152   : > { %670 = vmax.xlane.f32.xlu1 %v669_v7  ;;  %1772 = vpow2.f32 %v785_v36  ;;  %v2297_v41 = vadd.f32 %v1771_v39, %v1769_v29 }
 0x153   : > { %1774 = vpow2.f32 %v787_v35 }
 0x155   : > { %v629_v44 = vpop.xlane.xlu1 %628 }
 0x156   : > { %v721_v12 = vsub.f32 %v2149_v21, %v629_v44  ;;  %v722_v30 = vsub.f32 %v2151_v25, %v629_v44  ;;  %v2301_v13 = vpop.f32.mrf.mxu0 }
 0x157   : > { %v2303_v32 = vpop.f32.mrf.mxu1 }
 0x158   : > { %v672_v1 = vmax.f32 %v2301_v13, %v2303_v32  ;;  %v1773_v54 = vpop.eup %1772  ;;  %v789_v3 = vmul.f32 1.442695, %v721_v12  ;;  %v791_v23 = vmul.f32 1.442695, %v722_v30 }
 0x159   : > { %v1775_v7 = vpop.eup %1774  ;;  %v1005_v36 = vpack.c.bf16 %v1773_v54, %v1769_v29 }
 0x15a   : > { %673 = vmax.xlane.f32.xlu2 %v672_v1  ;;  %1776 = vpow2.f32 %v789_v3  ;;  %v1006_v35 = vpack.c.bf16 %v1775_v7, %v1771_v39  ;;  %v2307_v24 = vadd.f32 %v1775_v7, %v1773_v54 }
 0x15b   : > { %1778 = vpow2.f32 %v791_v23  ;;  %1045 = vmatmul.bf16.vlgmr.msra.gmra.mxu2 %v1005_v36 }
 0x15c   : > { %1134 = vmatmul.bf16.vlgmr.msra.gmra.mxu3 %v1006_v35 }
 0x15d   : > { %v632_v21 = vpop.xlane.xlu1 %631 }
 0x15e   : > { %v723_v25 = vsub.f32 %v2160_v33, %v632_v21  ;;  %v724_v44 = vsub.f32 %v2162_v37, %v632_v21  ;;  %v2311_v18 = vpop.f32.mrf.mxu0 }
 0x15f   : > { %v2313_v17 = vpop.f32.mrf.mxu1 }
 0x160   : > { %v675_v12 = vmax.f32 %v2311_v18, %v2313_v17  ;;  %v1777_v29 = vpop.eup %1776  ;;  %v793_v30 = vmul.f32 1.442695, %v723_v25  ;;  %v795_v39 = vmul.f32 1.442695, %v724_v44 }
 0x161   : > { %v1779_v1 = vpop.eup %1778 }
 0x162   : > { %676 = vmax.xlane.f32.xlu0 %v675_v12  ;;  %1780 = vpow2.f32 %v793_v30  ;;  %v2317_v23 = vadd.f32 %v1779_v1, %v1777_v29 }
 0x163   : > { %1782 = vpow2.f32 %v795_v39 }
 0x165   : > { %v635_v54 = vpop.xlane.xlu2 %634 }
 0x166   : > { %v725_v33 = vsub.f32 %v2170_v45, %v635_v54  ;;  %v726_v37 = vsub.f32 %v2172_v49, %v635_v54  ;;  %v2321_v3 = vpop.f32.mrf.mxu0 }
 0x167   : > { %v2323_v7 = vpop.f32.mrf.mxu1 }
 0x168   : > { %v678_v36 = vmax.f32 %v2321_v3, %v2323_v7  ;;  %v1781_v35 = vpop.eup %1780  ;;  %v797_v21 = vmul.f32 1.442695, %v725_v33  ;;  %v799_v25 = vmul.f32 1.442695, %v726_v37 }
 0x169   : > { %v1783_v44 = vpop.eup %1782  ;;  %v1007_v12 = vpack.c.bf16 %v1781_v35, %v1777_v29 }
 0x16a   : > { %679 = vmax.xlane.f32.xlu1 %v678_v36  ;;  %1784 = vpow2.f32 %v797_v21  ;;  %v1008_v30 = vpack.c.bf16 %v1783_v44, %v1779_v1  ;;  %v2327_v39 = vadd.f32 %v1783_v44, %v1781_v35 }
 0x16b   : > { %1786 = vpow2.f32 %v799_v25  ;;  %1050 = vmatmul.bf16.gmra.mxu2 %v1007_v12 }
 0x16c   : > { %1139 = vmatmul.bf16.gmra.mxu3 %v1008_v30 }
 0x16d   : > { %v638_v45 = vpop.xlane.xlu2 %637 }
 0x16e   : > { %v727_v49 = vsub.f32 %v2181_v57, %v638_v45  ;;  %v728_v54 = vsub.f32 %v2183_v61, %v638_v45  ;;  %v2331_v59 = vpop.f32.mrf.mxu0 }
 0x16f   : > { %v2333_v31 = vpop.f32.mrf.mxu1 }
 0x170   : > { %v681_v33 = vmax.f32 %v2331_v59, %v2333_v31  ;;  %v1785_v29 = vpop.eup %1784  ;;  %v801_v37 = vmul.f32 1.442695, %v727_v49  ;;  %v803_v1 = vmul.f32 1.442695, %v728_v54 }
 0x171   : > { %v1787_v36 = vpop.eup %1786 }
 0x172   : > { %682 = vmax.xlane.f32.xlu2 %v681_v33  ;;  %1788 = vpow2.f32 %v801_v37  ;;  %v2337_v35 = vadd.f32 %v1787_v36, %v1785_v29 }
 0x173   : > { %1790 = vpow2.f32 %v803_v1 }
 0x175   : > { %v641_v21 = vpop.xlane.xlu0 %640 }
 0x176   : > { %v729_v57 = vsub.f32 %v2191_v5, %v641_v21  ;;  %v730_v61 = vsub.f32 %v2193_v8, %v641_v21  ;;  %v2341_v25 = vpop.f32.mrf.mxu0 }
 0x177   : > { %v2343_v44 = vpop.f32.mrf.mxu1 }
 0x178   : > { %v684_v12 = vmax.f32 %v2341_v25, %v2343_v44  ;;  %v1789_v30 = vpop.eup %1788  ;;  %v805_v45 = vmul.f32 1.442695, %v729_v57  ;;  %v807_v49 = vmul.f32 1.442695, %v730_v61 }
 0x179   : > { %v1791_v54 = vpop.eup %1790  ;;  %v1009_v33 = vpack.c.bf16 %v1789_v30, %v1785_v29 }
 0x17a   : > { %685 = vmax.xlane.f32.xlu0 %v684_v12  ;;  %1792 = vpow2.f32 %v805_v45  ;;  %v1010_v37 = vpack.c.bf16 %v1791_v54, %v1787_v36  ;;  %v2347_v1 = vadd.f32 %v1791_v54, %v1789_v30 }
 0x17b   : > { %1794 = vpow2.f32 %v807_v49  ;;  %1055 = vmatmul.bf16.gmra.mxu2 %v1009_v33 }
 0x17c   : > { %1144 = vmatmul.bf16.gmra.mxu3 %v1010_v37 }
 0x17d   : > { %v644_v5 = vpop.xlane.xlu1 %643 }
 0x17e   : > { %v731_v8 = vsub.f32 %v2202_v26, %v644_v5  ;;  %v732_v21 = vsub.f32 %v2204_v38, %v644_v5  ;;  %v2351_v4 = vpop.f32.mrf.mxu0 }
 0x17f   : > { %v2353_v15 = vpop.f32.mrf.mxu1 }
 0x180   : > { %v809_v57 = vmul.f32 1.442695, %v731_v8  ;;  %v811_v61 = vmul.f32 1.442695, %v732_v21  ;;  %v687_v29 = vmax.f32 %v2351_v4, %v2353_v15  ;;  %v1793_v36 = vpop.eup %1792 }
 0x181   : > { %v1795_v12 = vpop.eup %1794 }
 0x182   : > { %1796 = vpow2.f32 %v809_v57  ;;  %688 = vmax.xlane.f32.xlu1 %v687_v29  ;;  %v2357_v30 = vadd.f32 %v1795_v12, %v1793_v36 }
 0x183   : > { %1798 = vpow2.f32 %v811_v61 }
 0x185   : > { %v647_v45 = vpop.xlane.xlu2 %646 }
 0x186   : > { %v733_v26 = vsub.f32 %v2212_v62, %v647_v45  ;;  %v734_v38 = vsub.f32 %v2214_v63, %v647_v45  ;;  %v2361_v49 = vpop.f32.mrf.mxu0 }
 0x187   : > { %v2363_v54 = vpop.f32.mrf.mxu1 }
 0x188   : > { %v1797_v33 = vpop.eup %1796  ;;  %v690_v37 = vmax.f32 %v2361_v49, %v2363_v54  ;;  %v813_v8 = vmul.f32 1.442695, %v733_v26  ;;  %v815_v21 = vmul.f32 1.442695, %v734_v38 }
 0x189   : > { %v1799_v5 = vpop.eup %1798  ;;  %v1011_v57 = vpack.c.bf16 %v1797_v33, %v1793_v36 }
 0x18a   : > { %691 = vmax.xlane.f32.xlu2 %v690_v37  ;;  %v1012_v61 = vpack.c.bf16 %v1799_v5, %v1795_v12  ;;  %v2367_v29 = vadd.f32 %v1799_v5, %v1797_v33  ;;  %1800 = vpow2.f32 %v813_v8 }
 0x18b   : > { %1802 = vpow2.f32 %v815_v21  ;;  %1060 = vmatmul.bf16.gmra.mxu2 %v1011_v57 }
 0x18c   : > { %1149 = vmatmul.bf16.gmra.mxu3 %v1012_v61 }
 0x18d   : > { %v650_v62 = vpop.xlane.xlu0 %649 }
 0x18e   : > { %v735_v63 = vsub.f32 %v2223_v19, %v650_v62  ;;  %v736_v45 = vsub.f32 %v2225_v43, %v650_v62  ;;  %v2371_v51 = vpop.f32.mrf.mxu0 }
 0x18f   : > { %v2373_v27 = vpop.f32.mrf.mxu1 }
 0x190   : > { %v817_v26 = vmul.f32 1.442695, %v735_v63  ;;  %v819_v38 = vmul.f32 1.442695, %v736_v45  ;;  %v693_v36 = vmax.f32 %v2371_v51, %v2373_v27  ;;  %v1801_v12 = vpop.eup %1800 }
 0x191   : > { %v1803_v33 = vpop.eup %1802 }
 0x192   : > { %1804 = vpow2.f32 %v817_v26  ;;  %694 = vmax.xlane.f32.xlu0 %v693_v36  ;;  %v2377_v37 = vadd.f32 %v1803_v33, %v1801_v12 }
 0x193   : > { %1806 = vpow2.f32 %v819_v38 }
 0x195   : > { %v653_v5 = vpop.xlane.xlu1 %652 }
 0x196   : > { %v2379_v19 = vpop.f32.mrf.mxu0  ;;  %v737_v21 = vsub.f32 %v2233_v56, %v653_v5  ;;  %v738_v62 = vsub.f32 %v2235_v55, %v653_v5 }
 0x197   : > { %v2381_v43 = vpop.f32.mrf.mxu1 }
 0x198   : > { %v1805_v8 = vpop.eup %1804  ;;  %v696_v57 = vmax.f32 %v2379_v19, %v2381_v43  ;;  %v821_v38 = vmul.f32 1.442695, %v737_v21  ;;  %v823_v36 = vmul.f32 1.442695, %v738_v62 }
 0x199   : > { %v1807_v61 = vpop.eup %1806  ;;  %v1013_v63 = vpack.c.bf16 %v1805_v8, %v1801_v12 }
 0x19a   : > { %697 = vmax.xlane.f32.xlu1 %v696_v57  ;;  %v1014_v45 = vpack.c.bf16 %v1807_v61, %v1803_v33  ;;  %v2387_v26 = vadd.f32 %v1807_v61, %v1805_v8  ;;  %1808 = vpow2.f32 %v821_v38 }
 0x19b   : > { %1065 = vmatmul.bf16.gmra.mxu2 %v1013_v63  ;;  %1810 = vpow2.f32 %v823_v36 }
 0x19c   : > { %1154 = vmatmul.bf16.gmra.mxu3 %v1014_v45 }
 0x19d   : > { %v656_v9 = vpop.xlane.xlu2 %655 }
 0x19e   : > { %v739_v0 = vsub.f32 %v2244_v11, %v656_v9  ;;  %v740_v56 = vsub.f32 %v2246_v20, %v656_v9  ;;  %v2391_v58 = vpop.f32.mrf.mxu0 }
 0x19f   : > { %v2393_v46 = vpop.f32.mrf.mxu1 }
 0x1a0   : > { %v825_v55 = vmul.f32 1.442695, %v739_v0  ;;  %v827_v12 = vmul.f32 1.442695, %v740_v56  ;;  %v699_v33 = vmax.f32 %v2391_v58, %v2393_v46  ;;  %v2397_v5 = vpop.eup %1808 }
 0x1a1   : > { %v2399_v11 = vpop.eup %1810 }
 0x1a2   : > { %1812 = vpow2.f32 %v825_v55  ;;  %700 = vmax.xlane.f32.xlu2 %v699_v33 }
 0x1a3   : > { %1814 = vpow2.f32 %v827_v12 }
 0x1a5   : > { %v659_v8 = vpop.xlane.xlu0 %658 }
 0x1a6   : > { %v2401_v9 = vpop.f32.mrf.mxu0  ;;  %v741_v0 = vsub.f32 %v2254_v10, %v659_v8  ;;  %v742_v62 = vsub.f32 %v2256_v2, %v659_v8 }
 0x1a7   : > { %v2403_v20 = vpop.f32.mrf.mxu1 }
 0x1a8   : > { %v1813_v21 = vpop.eup %1812  ;;  %v702_v57 = vmax.f32 %v2401_v9, %v2403_v20  ;;  %v829_v36 = vmul.f32 1.442695, %v741_v0  ;;  %v831_v56 = vmul.f32 1.442695, %v742_v62 }
 0x1a9   : > { %v1815_v61 = vpop.eup %1814  ;;  %v1015_v63 = vpack.c.bf16 %v1813_v21, %v2397_v5 }
 0x1aa   : > { %703 = vmax.xlane.f32.xlu0 %v702_v57  ;;  %v1016_v45 = vpack.c.bf16 %v1815_v61, %v2399_v11  ;;  %v2411_v38 = vadd.f32 %v1815_v61, %v1813_v21  ;;  %1816 = vpow2.f32 %v829_v36 }
 0x1ab   : > { %1070 = vmatmul.bf16.gmra.mxu2 %v1015_v63  ;;  %1818 = vpow2.f32 %v831_v56 }
 0x1ac   : > { %1159 = vmatmul.bf16.gmra.mxu3 %v1016_v45 }
 0x1ad   : > { %v662_v55 = vpop.xlane.xlu1 %661 }
 0x1ae   : > { %v743_v10 = vsub.f32 %v2265_v60, %v662_v55  ;;  %v744_v12 = vsub.f32 %v2267_v14, %v662_v55  ;;  %v2415_v33 = vpop.f32.mrf.mxu0 }
 0x1af   : > { %v2417_v52 = vpop.f32.mrf.mxu1 }
 0x1b0   : > { %v833_v2 = vmul.f32 1.442695, %v743_v10  ;;  %v835_v8 = vmul.f32 1.442695, %v744_v12  ;;  %v705_v21 = vmax.f32 %v2415_v33, %v2417_v52  ;;  %v2421_v0 = vpop.eup %1816 }
 0x1b1   : > { %v2423_v60 = vpop.eup %1818 }
 0x1b2   : > { %1820 = vpow2.f32 %v833_v2  ;;  %706 = vmax.xlane.f32.xlu1 %v705_v21 }
 0x1b3   : > { %1822 = vpow2.f32 %v835_v8 }
 0x1b5   : > { %v665_v57 = vpop.xlane.xlu2 %664 }
 0x1b6   : > { %v2425_v14 = vpop.f32.mrf.mxu0  ;;  %v745_v63 = vsub.f32 %v2275_v48, %v665_v57  ;;  %v746_v56 = vsub.f32 %v2277_v47, %v665_v57 }
 0x1b7   : > { %v2427_v61 = vpop.f32.mrf.mxu1 }
 0x1b8   : > { %v2429_v62 = vpop.eup %1820  ;;  %v708_v45 = vmax.f32 %v2425_v14, %v2427_v61  ;;  %v837_v12 = vmul.f32 1.442695, %v745_v63  ;;  %v839_v2 = vmul.f32 1.442695, %v746_v56 }
 0x1b9   : > { %v2434_v36 = vpop.eup %1822  ;;  %v1017_v55 = vpack.c.bf16 %v2429_v62, %v2421_v0 }
 0x1ba   : > { %709 = vmax.xlane.f32.xlu2 %v708_v45  ;;  %v1018_v10 = vpack.c.bf16 %v2434_v36, %v2423_v60  ;;  %1824 = vpow2.f32 %v837_v12 }
 0x1bb   : > { %1075 = vmatmul.bf16.gmra.mxu2 %v1017_v55  ;;  %1826 = vpow2.f32 %v839_v2 }
 0x1bc   : > { %1164 = vmatmul.bf16.gmra.mxu3 %v1018_v10 }
 0x1bd   : > { %v668_v8 = vpop.xlane.xlu0 %667 }
 0x1be   : > { %v747_v48 = vsub.f32 %v2283_v50, %v668_v8  ;;  %v748_v21 = vsub.f32 %v2285_v42, %v668_v8  ;;  %v2443_v40 = vpop.f32.mrf.mxu0 }
 0x1bf   : > { %v2445_v28 = vpop.f32.mrf.mxu1 }
 0x1c0   : > { %v841_v47 = vmul.f32 1.442695, %v747_v48  ;;  %v843_v57 = vmul.f32 1.442695, %v748_v21  ;;  %v711_v45 = vmax.f32 %v2443_v40, %v2445_v28  ;;  %v2450_v50 = vpop.eup %1824 }
 0x1c1   : > { %v2452_v42 = vpop.eup %1826 }
 0x1c2   : > { %1828 = vpow2.f32 %v841_v47  ;;  %910 = vadd.xlane.f32.xlu2 %v2297_v41  ;;  %712 = vmax.xlane.f32.xlu0 %v711_v45 }
 0x1c3   : > { %1830 = vpow2.f32 %v843_v57 }
 0x1c5   : > { %v671_v63 = vpop.xlane.xlu1 %670 }
 0x1c6   : > { %v2454_v56 = vpop.f32.mrf.mxu0  ;;  %v749_v12 = vsub.f32 %v2291_v6, %v671_v63  ;;  %v750_v41 = vsub.f32 %v2293_v53, %v671_v63 }
 0x1c7   : > { %v2456_v55 = vpop.f32.mrf.mxu1 }
 0x1c8   : > { %v2458_v10 = vpop.eup %1828  ;;  %v714_v2 = vmax.f32 %v2454_v56, %v2456_v55  ;;  %v845_v47 = vmul.f32 1.442695, %v749_v12  ;;  %v847_v6 = vmul.f32 1.442695, %v750_v41 }
 0x1c9   : > { %v2463_v8 = vpop.eup %1830  ;;  %v1019_v48 = vpack.c.bf16 %v2458_v10, %v2450_v50 }
 0x1ca   : > { %919 = vadd.xlane.f32.xlu2 %v2327_v39  ;;  %913 = vadd.xlane.f32.xlu0 %v2307_v24  ;;  %v1020_v21 = vpack.c.bf16 %v2463_v8, %v2452_v42  ;;  %1832 = vpow2.f32 %v845_v47  ;;  %v939_v47 = vadd.f32 %v2399_v11, %v2397_v5 }
 0x1cb   : > { %715 = vmax.xlane.f32.xlu1 %v714_v2  ;;  %1080 = vmatmul.bf16.gmra.mxu2 %v1019_v48  ;;  %1834 = vpow2.f32 %v847_v6 }
 0x1cc   : > { %1169 = vmatmul.bf16.gmra.mxu3 %v1020_v21 }
 0x1cd   : > { %v674_v57 = vpop.xlane.xlu2 %673 }
 0x1ce   : > { %v751_v45 = vsub.f32 %v2301_v13, %v674_v57  ;;  %v752_v53 = vsub.f32 %v2303_v32, %v674_v57 }
 0x1d0   : > { %v849_v63 = vmul.f32 1.442695, %v751_v45  ;;  %v851_v34 = vmul.f32 1.442695, %v752_v53  ;;  %v1833_v39 = vpop.eup %1832 }
 0x1d1   : > { %v1835_v12 = vpop.eup %1834 }
 0x1d2   : > { %1836 = vpow2.f32 %v849_v63  ;;  %928 = vadd.xlane.f32.xlu2 %v2357_v30  ;;  %922 = vadd.xlane.f32.xlu0 %v2337_v35 }
 0x1d3   : > { %1838 = vpow2.f32 %v851_v34  ;;  %916 = vadd.xlane.f32.xlu1 %v2317_v23 }
 0x1d5   : > { %v677_v24 = vpop.xlane.xlu0 %676 }
 0x1d6   : > { %v753_v13 = vsub.f32 %v2311_v18, %v677_v24  ;;  %v754_v41 = vsub.f32 %v2313_v17, %v677_v24 }
 0x1d8   : > { %v2477_v2 = vpop.eup %1836  ;;  %v853_v23 = vmul.f32 1.442695, %v753_v13  ;;  %v855_v35 = vmul.f32 1.442695, %v754_v41 }
 0x1d9   : > { %v2480_v32 = vpop.eup %1838  ;;  %v1021_v48 = vpack.c.bf16 %v2477_v2, %v1833_v39 }
 0x1da   : > { %937 = vadd.xlane.f32.xlu2 %v2387_v26  ;;  %931 = vadd.xlane.f32.xlu0 %v2367_v29  ;;  %v1022_v34 = vpack.c.bf16 %v2480_v32, %v1835_v12  ;;  %1840 = vpow2.f32 %v853_v23 }
 0x1db   : > { %925 = vadd.xlane.f32.xlu1 %v2347_v1  ;;  %1085 = vmatmul.bf16.gmra.mxu2 %v1021_v48  ;;  %v945_v1 = vadd.f32 %v2423_v60, %v2421_v0  ;;  %1842 = vpow2.f32 %v855_v35  ;;  %v954_v0 = vadd.f32 %v2463_v8, %v2458_v10  ;;  %v948_v60 = vadd.f32 %v2434_v36, %v2429_v62 }
 0x1dc   : > { %1174 = vmatmul.bf16.gmra.mxu3 %v1022_v34  ;;  %v957_v8 = vadd.f32 %v1835_v12, %v1833_v39 }
 0x1dd   : > { %v680_v30 = vpop.xlane.xlu1 %679 }
 0x1de   : > { %v755_v18 = vsub.f32 %v2321_v3, %v680_v30  ;;  %v756_v21 = vsub.f32 %v2323_v7, %v680_v30  ;;  %v1046_v17 = vpop.f32.mrf.mxu2 }
 0x1df   : > { %v1135_v6 = vpop.f32.mrf.mxu3 }
 0x1e0   : > { %v857_v26 = vmul.f32 1.442695, %v755_v18  ;;  %v859_v29 = vmul.f32 1.442695, %v756_v21  ;;  %v2494_v57 = vadd.f32 %v1135_v6, %v1046_v17  ;;  %v1841_v7 = vpop.eup %1840 }
 0x1e1   : > { %v1843_v45 = vpop.eup %1842 }
 0x1e2   : > { %1844 = vpow2.f32 %v857_v26  ;;  %946 = vadd.xlane.f32.xlu2 %v945_v1  ;;  %940 = vadd.xlane.f32.xlu0 %v939_v47  ;;  %v963_v18 = vadd.f32 %v1843_v45, %v1841_v7 }
 0x1e3   : > { %1846 = vpow2.f32 %v859_v29  ;;  %934 = vadd.xlane.f32.xlu1 %v2377_v37 }
 0x1e5   : > { %v683_v3 = vpop.xlane.xlu2 %682 }
 0x1e6   : > { %v1048_v5 = vpop.f32.mrf.mxu2  ;;  %v757_v53 = vsub.f32 %v2331_v59, %v683_v3  ;;  %v758_v13 = vsub.f32 %v2333_v31, %v683_v3 }
 0x1e7   : > { %v1137_v63 = vpop.f32.mrf.mxu3 }
 0x1e8   : > { %v1845_v11 = vpop.eup %1844  ;;  %v2503_v41 = vadd.f32 %v1137_v63, %v1048_v5  ;;  %v861_v34 = vmul.f32 1.442695, %v757_v53  ;;  %v863_v59 = vmul.f32 1.442695, %v758_v13 }
 0x1e9   : > { %v1847_v24 = vpop.eup %1846  ;;  %v1023_v37 = vpack.c.bf16 %v1845_v11, %v1841_v7 }
 0x1ea   : > { %955 = vadd.xlane.f32.xlu2 %v954_v0  ;;  %949 = vadd.xlane.f32.xlu0 %v948_v60  ;;  %v1024_v48 = vpack.c.bf16 %v1847_v24, %v1843_v45  ;;  %1848 = vpow2.f32 %v861_v34  ;;  %v966_v3 = vadd.f32 %v1847_v24, %v1845_v11 }
 0x1eb   : > { %943 = vadd.xlane.f32.xlu1 %v2411_v38  ;;  %1090 = vmatmul.bf16.gmra.mxu2 %v1023_v37  ;;  %1850 = vpow2.f32 %v863_v59  ;;  %v951_v38 = vadd.f32 %v2452_v42, %v2450_v50  ;;  %v960_v42 = vadd.f32 %v2480_v32, %v2477_v2 }
 0x1ec   : > { %1179 = vmatmul.bf16.gmra.mxu3 %v1024_v48 }
 0x1ed   : > { %v686_v23 = vpop.xlane.xlu0 %685 }
 0x1ee   : > { %v759_v10 = vsub.f32 %v2341_v25, %v686_v23  ;;  %v760_v62 = vsub.f32 %v2343_v44, %v686_v23  ;;  %v1051_v36 = vpop.f32.mrf.mxu2 }
 0x1ef   : > { %v1140_v30 = vpop.f32.mrf.mxu3 }
 0x1f0   : > { %v865_v31 = vmul.f32 1.442695, %v759_v10  ;;  %v867_v35 = vmul.f32 1.442695, %v760_v62  ;;  %v2508_v21 = vadd.f32 %v1140_v30, %v1051_v36  ;;  %v1849_v44 = vpop.eup %1848 }
 0x1f1   : > { %v1851_v17 = vpop.eup %1850 }
 0x1f2   : > { %1852 = vpow2.f32 %v865_v31  ;;  %964 = vadd.xlane.f32.xlu2 %v963_v18  ;;  %958 = vadd.xlane.f32.xlu0 %v957_v8  ;;  %v969_v37 = vadd.f32 %v1851_v17, %v1849_v44 }
 0x1f3   : > { %1854 = vpow2.f32 %v867_v35  ;;  %952 = vadd.xlane.f32.xlu1 %v951_v38 }
 0x1f5   : > { %v689_v25 = vpop.xlane.xlu1 %688 }
 0x1f6   : > { %v761_v39 = vsub.f32 %v2351_v4, %v689_v25  ;;  %v762_v12 = vsub.f32 %v2353_v15, %v689_v25  ;;  %v1053_v47 = vpop.f32.mrf.mxu2 }
 0x1f7   : > { %v1142_v1 = vpop.f32.mrf.mxu3 }
 0x1f8   : > { %v1853_v26 = vpop.eup %1852  ;;  %v869_v29 = vmul.f32 1.442695, %v761_v39  ;;  %v871_v6 = vmul.f32 1.442695, %v762_v12  ;;  %v2514_v50 = vadd.f32 %v1142_v1, %v1053_v47 }
 0x1f9   : > { %v1855_v7 = vpop.eup %1854  ;;  %v1025_v45 = vpack.c.bf16 %v1853_v26, %v1849_v44 }
 0x1fa   : > { %1856 = vpow2.f32 %v869_v29  ;;  %967 = vadd.xlane.f32.xlu0 %v966_v3  ;;  %v1026_v5 = vpack.c.bf16 %v1855_v7, %v1851_v17  ;;  %v972_v4 = vadd.f32 %v1855_v7, %v1853_v26 }
 0x1fb   : > { %1858 = vpow2.f32 %v871_v6  ;;  %961 = vadd.xlane.f32.xlu1 %v960_v42  ;;  %1095 = vmatmul.bf16.gmra.mxu2 %v1025_v45 }
 0x1fc   : > { %973 = vadd.xlane.f32.xlu2 %v972_v4  ;;  %1184 = vmatmul.bf16.gmra.mxu3 %v1026_v5 }
 0x1fd   : > { %v692_v15 = vpop.xlane.xlu2 %691 }
 0x1fe   : > { %v763_v53 = vsub.f32 %v2361_v49, %v692_v15  ;;  %v764_v11 = vsub.f32 %v2363_v54, %v692_v15  ;;  %v1056_v63 = vpop.f32.mrf.mxu2 }
 0x1ff   : > { %v1145_v2 = vpop.f32.mrf.mxu3 }
 0x200   : > { %v1857_v0 = vpop.eup %1856  ;;  %v873_v60 = vmul.f32 1.442695, %v763_v53  ;;  %v875_v24 = vmul.f32 1.442695, %v764_v11  ;;  %v2520_v13 = vadd.f32 %v1145_v2, %v1056_v63 }
 0x201   : > { %v1859_v32 = vpop.eup %1858 }
 0x202   : > { %1860 = vpow2.f32 %v873_v60  ;;  %v975_v48 = vadd.f32 %v1859_v32, %v1857_v0 }
 0x203   : > { %1862 = vpow2.f32 %v875_v24  ;;  %970 = vadd.xlane.f32.xlu1 %v969_v37 }
 0x204   : > { %976 = vadd.xlane.f32.xlu0 %v975_v48 }
 0x205   : > { %v695_v34 = vpop.xlane.xlu0 %694 }
 0x206   : > { %v765_v59 = vsub.f32 %v2371_v51, %v695_v34  ;;  %v766_v49 = vsub.f32 %v2373_v27, %v695_v34  ;;  %v1058_v54 = vpop.f32.mrf.mxu2 }
 0x207   : > { %v1147_v36 = vpop.f32.mrf.mxu3 }
 0x208   : > { %v1861_v23 = vpop.eup %1860  ;;  %v877_v10 = vmul.f32 1.442695, %v765_v59  ;;  %v879_v62 = vmul.f32 1.442695, %v766_v49  ;;  %v2524_v31 = vadd.f32 %v1147_v36, %v1058_v54 }
 0x209   : > { %v1863_v8 = vpop.eup %1862  ;;  %v1027_v35 = vpack.c.bf16 %v1861_v23, %v1857_v0 }
 0x20a   : > { %1864 = vpow2.f32 %v877_v10  ;;  %v1028_v30 = vpack.c.bf16 %v1863_v8, %v1859_v32  ;;  %v978_v18 = vadd.f32 %v1863_v8, %v1861_v23 }
 0x20b   : > { %1866 = vpow2.f32 %v879_v62  ;;  %1100 = vmatmul.bf16.gmra.mxu2 %v1027_v35 }
 0x20c   : > { %979 = vadd.xlane.f32.xlu1 %v978_v18  ;;  %1189 = vmatmul.bf16.gmra.mxu3 %v1028_v30 }
 0x20d   : > { %v698_v38 = vpop.xlane.xlu1 %697 }
 0x20e   : > { %v767_v51 = vsub.f32 %v2379_v19, %v698_v38  ;;  %v768_v27 = vsub.f32 %v2381_v43, %v698_v38  ;;  %v1061_v25 = vpop.f32.mrf.mxu2 }
 0x20f   : > { %v1150_v17 = vpop.f32.mrf.mxu3 }
 0x210   : > { %v1865_v44 = vpop.eup %1864  ;;  %v881_v39 = vmul.f32 1.442695, %v767_v51  ;;  %v883_v12 = vmul.f32 1.442695, %v768_v27  ;;  %v2528_v26 = vadd.f32 %v1150_v17, %v1061_v25 }
 0x211   : > { %v1867_v47 = vpop.eup %1866 }
 0x212   : > { %1868 = vpow2.f32 %v881_v39  ;;  %v981_v29 = vadd.f32 %v1867_v47, %v1865_v44 }
 0x213   : > { %1870 = vpow2.f32 %v883_v12 }
 0x214   : > { %982 = vadd.xlane.f32.xlu2 %v981_v29 }
 0x215   : > { %v701_v6 = vpop.xlane.xlu2 %700 }
 0x216   : > { %v769_v1 = vsub.f32 %v2391_v58, %v701_v6  ;;  %v770_v3 = vsub.f32 %v2393_v46, %v701_v6  ;;  %v2532_v19 = vpop.f32.mrf.mxu2 }
 0x217   : > { %v2534_v45 = vpop.f32.mrf.mxu3 }
 0x218   : > { %v1869_v43 = vpop.eup %1868  ;;  %v885_v7 = vmul.f32 1.442695, %v769_v1  ;;  %v887_v42 = vmul.f32 1.442695, %v770_v3 }
 0x219   : > { %v1871_v5 = vpop.eup %1870  ;;  %v1029_v4 = vpack.c.bf16 %v1869_v43, %v1865_v44 }
 0x21a   : > { %1872 = vpow2.f32 %v885_v7  ;;  %v1030_v15 = vpack.c.bf16 %v1871_v5, %v1867_v47  ;;  %v984_v53 = vadd.f32 %v1871_v5, %v1869_v43 }
 0x21b   : > { %1874 = vpow2.f32 %v887_v42  ;;  %1105 = vmatmul.bf16.gmra.mxu2 %v1029_v4 }
 0x21c   : > { %985 = vadd.xlane.f32.xlu0 %v984_v53  ;;  %1194 = vmatmul.bf16.gmra.mxu3 %v1030_v15 }
 0x21d   : > { %v704_v11 = vpop.xlane.xlu0 %703 }
 0x21e   : > { %v771_v58 = vsub.f32 %v2401_v9, %v704_v11  ;;  %v772_v46 = vsub.f32 %v2403_v20, %v704_v11  ;;  %v2538_v63 = vpop.f32.mrf.mxu2 }
 0x21f   : > { %v2540_v2 = vpop.f32.mrf.mxu3 }
 0x220   : > { %v1873_v0 = vpop.eup %1872  ;;  %v889_v60 = vmul.f32 1.442695, %v771_v58  ;;  %v891_v24 = vmul.f32 1.442695, %v772_v46 }
 0x221   : > { %v1875_v32 = vpop.eup %1874 }
 0x222   : > { %1876 = vpow2.f32 %v889_v60  ;;  %v987_v37 = vadd.f32 %v1875_v32, %v1873_v0 }
 0x223   : > { %1878 = vpow2.f32 %v891_v24 }
 0x224   : > { %988 = vadd.xlane.f32.xlu1 %v987_v37 }
 0x225   : > { %v707_v48 = vpop.xlane.xlu1 %706 }
 0x226   : > { %v773_v34 = vsub.f32 %v2415_v33, %v707_v48  ;;  %v774_v59 = vsub.f32 %v2417_v52, %v707_v48  ;;  %v2544_v9 = vpop.f32.mrf.mxu2 }
 0x227   : > { %v2546_v23 = vpop.f32.mrf.mxu3 }
 0x228   : > { %v1877_v20 = vpop.eup %1876  ;;  %v893_v49 = vmul.f32 1.442695, %v773_v34  ;;  %v895_v54 = vmul.f32 1.442695, %v774_v59 }
 0x229   : > { %v1879_v10 = vpop.eup %1878  ;;  %v1031_v62 = vpack.c.bf16 %v1877_v20, %v1873_v0 }
 0x22a   : > { %1880 = vpow2.f32 %v893_v49  ;;  %v1032_v36 = vpack.c.bf16 %v1879_v10, %v1875_v32  ;;  %v990_v8 = vadd.f32 %v1879_v10, %v1877_v20 }
 0x22b   : > { %1882 = vpow2.f32 %v895_v54  ;;  %1110 = vmatmul.bf16.gmra.mxu2 %v1031_v62  ;;  %v2769_v54 = vunpack.c.l.bf16 %v2048_v16  ;;  %v2770_v62 = vunpack.c.h.bf16 %v2048_v16 }
 0x22c   : > { %991 = vadd.xlane.f32.xlu2 %v990_v8  ;;  %1199 = vmatmul.bf16.gmra.mxu3 %v1032_v36 }
 0x22d   : > { %v710_v35 = vpop.xlane.xlu2 %709 }
 0x22e   : > { %v775_v33 = vsub.f32 %v2425_v14, %v710_v35  ;;  %v776_v52 = vsub.f32 %v2427_v61, %v710_v35  ;;  %v2550_v30 = vpop.f32.mrf.mxu2 }
 0x22f   : > { %v2552_v27 = vpop.f32.mrf.mxu3 }
 0x230   : > { %v1881_v18 = vpop.eup %1880  ;;  %v897_v38 = vmul.f32 1.442695, %v775_v33  ;;  %v899_v51 = vmul.f32 1.442695, %v776_v52 }
 0x231   : > { %v1883_v25 = vpop.eup %1882 }
 0x232   : > { %1884 = vpow2.f32 %v897_v38  ;;  %v993_v44 = vadd.f32 %v1883_v25, %v1881_v18 }
 0x233   : > { %1886 = vpow2.f32 %v899_v51 }
 0x234   : > { %994 = vadd.xlane.f32.xlu0 %v993_v44 }
 0x235   : > { %v911_v39 = vpop.xlane.xlu2 %910  ;;  %v713_v12 = vpop.xlane.xlu0 %712 }
 0x236   : > { %v777_v17 = vsub.f32 %v2443_v40, %v713_v12  ;;  %v778_v14 = vsub.f32 %v2445_v28, %v713_v12  ;;  %v2556_v47 = vpop.f32.mrf.mxu2  ;;  %1888 = vrcp.f32 %v911_v39 }
 0x237   : > { %v2558_v1 = vpop.f32.mrf.mxu3 }
 0x238   : > { %v1885_v61 = vpop.eup %1884  ;;  %v901_v29 = vmul.f32 1.442695, %v777_v17  ;;  %v903_v6 = vmul.f32 1.442695, %v778_v14 }
 0x239   : > { %v1887_v3 = vpop.eup %1886  ;;  %v1033_v43 = vpack.c.bf16 %v1885_v61, %v1881_v18 }
 0x23a   : > { %1890 = vpow2.f32 %v901_v29  ;;  %v1034_v7 = vpack.c.bf16 %v1887_v3, %v1883_v25  ;;  %v996_v42 = vadd.f32 %v1887_v3, %v1885_v61  ;;  %v2771_v61 = vunpack.c.h.bf16 %v2057_v22 }
 0x23b   : > { %1892 = vpow2.f32 %v903_v6  ;;  %1115 = vmatmul.bf16.gmra.mxu2 %v1033_v43 }
 0x23c   : > { %997 = vadd.xlane.f32.xlu1 %v996_v42  ;;  %1204 = vmatmul.bf16.gmra.mxu3 %v1034_v7  ;;  %v1889_v4 = vpop.eup %1888  ;;  %v1153_v7 = vadd.f32 %v2534_v45, %v2532_v19 }
 0x23d   : > { %v920_v40 = vpop.xlane.xlu2 %919  ;;  %v914_v5 = vpop.xlane.xlu0 %913  ;;  %v1247_v37 = vmul.f32 %v1889_v4, %v2494_v57 }
 0x23e   : > { %v716_v28 = vpop.xlane.xlu1 %715  ;;  %1894 = vrcp.f32 %v914_v5  ;;  %v2562_v11 = vpop.f32.mrf.mxu2 }
 0x23f   : > { %v779_v15 = vsub.f32 %v2454_v56, %v716_v28  ;;  %v780_v53 = vsub.f32 %v2456_v55, %v716_v28  ;;  %v2564_v46 = vpop.f32.mrf.mxu3  ;;  %1896 = vrcp.f32 %v920_v40  ;;  %v1279_v10 = vadd.f32 %v2769_v54, %v1247_v37 }
 0x240   : > { %v1891_v58 = vpop.eup %1890 }
 0x241   : > { %v1893_v0 = vpop.eup %1892  ;;  %v905_v60 = vmul.f32 1.442695, %v779_v15  ;;  %v907_v24 = vmul.f32 1.442695, %v780_v53 }
 0x242   : > { %v999_v32 = vadd.f32 %v1893_v0, %v1891_v58 }
 0x243   : > { %1898 = vpow2.f32 %v905_v60 }
 0x244   : > { %1900 = vpow2.f32 %v907_v24  ;;  %1000 = vadd.xlane.f32.xlu2 %v999_v32  ;;  %v1895_v48 = vpop.eup %1894 }
 0x245   : > { %v929_v56 = vpop.xlane.xlu2 %928  ;;  %v923_v34 = vpop.xlane.xlu0 %922  ;;  %v1248_v55 = vmul.f32 %v1895_v48, %v2503_v41 }
 0x246   : > { %v917_v59 = vpop.xlane.xlu1 %916  ;;  %v2568_v20 = vpop.f32.mrf.mxu2 }
 0x247   : > { %v1897_v49 = vpop.eup %1896  ;;  %v1280_v36 = vadd.f32 %v2770_v62, %v1248_v55  ;;  %1902 = vrcp.f32 %v917_v59  ;;  %v2574_v8 = vpop.f32.mrf.mxu3 }
 0x248   : > { %1904 = vrcp.f32 %v929_v56  ;;  %v1250_v16 = vmul.f32 %v1897_v49, %v2514_v50  ;;  %v2772_v50 = vunpack.c.l.bf16 %v2057_v22  ;;  %v1156_v49 = vadd.f32 %v2540_v2, %v2538_v63 }
 0x249   : > { %v1899_v57 = vpop.eup %1898  ;;  %v1637_v35 = vpack.c.bf16 %v1280_v36, %v1279_v10  ;;  %1906 = vrcp.f32 %v923_v34  ;;  %v1166_v2 = vadd.f32 %v2564_v46, %v2562_v11 }
 0x24a   : > { %v1901_v41 = vpop.eup %1900  ;;  %v1035_v33 = vpack.c.bf16 %v1899_v57, %v1891_v58  ;;  %v1282_v29 = vadd.f32 %v2771_v61, %v1250_v16  ;;  %v1163_v61 = vadd.f32 %v2558_v1, %v2556_v47 }
 0x24b   : > { %v1036_v52 = vpack.c.bf16 %v1901_v41, %v1893_v0  ;;  %v1002_v18 = vadd.f32 %v1901_v41, %v1899_v57  ;;  %1638 = vst [vmem:[%s2580_s22] sm:$0xff] %v1637_v35   ;;  %v2773_v0 = vld [vmem:[#allocation3_spill] sm:$0xff] }
 0x24c   : > { %1120 = vmatmul.bf16.gmra.mxu2 %v1035_v33  ;;  %v2774_v60 = vunpack.c.l.bf16 %v2773_v0 }
 0x24d   : > { %1209 = vmatmul.bf16.gmra.mxu3 %v1036_v52  ;;  %1003 = vadd.xlane.f32.xlu0 %v1002_v18  ;;  %v938_v38 = vpop.xlane.xlu2 %937  ;;  %v932_v51 = vpop.xlane.xlu0 %931 }
 0x24e   : > { %v1903_v25 = vpop.eup %1902  ;;  %v926_v44 = vpop.xlane.xlu1 %925  ;;  %1908 = vrcp.f32 %v932_v51  ;;  %v1161_v51 = vadd.f32 %v2552_v27, %v2550_v30  ;;  %v2782_v27 = vld [vmem:[#allocation6_spill] sm:$0xff] }
 0x24f   : > { %v1249_v39 = vmul.f32 %v1903_v25, %v2508_v21  ;;  %v2585_v12 = vpop.f32.mrf.mxu2  ;;  %1910 = vrcp.f32 %v926_v44  ;;  %v2587_v17 = vpop.f32.mrf.mxu3  ;;  %v1168_v44 = vadd.f32 %v2574_v8, %v2568_v20  ;;  %v2784_v20 = vunpack.c.h.bf16 %v2782_v27 }
 0x250   : > { %v1905_v14 = vpop.eup %1904  ;;  %1912 = vrcp.f32 %v938_v38 }
 0x251   : > { %v1281_v6 = vadd.f32 %v2772_v50, %v1249_v39  ;;  %v1907_v3 = vpop.eup %1906  ;;  %v1253_v21 = vmul.f32 %v1905_v14, %v2528_v26  ;;  %v2775_v26 = vunpack.c.h.bf16 %v2773_v0 }
 0x252   : > { %v1251_v40 = vmul.f32 %v1907_v3, %v2520_v13  ;;  %v2776_v13 = vld [vmem:[#allocation2_spill] sm:$0xff] }
 0x253   : > { %v1642_v43 = vpack.c.bf16 %v1282_v29, %v1281_v6  ;;  %v1285_v19 = vadd.f32 %v2774_v60, %v1253_v21  ;;  %v2777_v32 = vunpack.c.l.bf16 %v2776_v13  ;;  %v2778_v48 = vunpack.c.h.bf16 %v2776_v13 }
 0x254   : > { %v1909_v42 = vpop.eup %1908 }
 0x255   : > { %1729 = vst [vmem:[%s2580_s22 + $0x8] sm:$0xff] %v1642_v43   ;;  %v941_v5 = vpop.xlane.xlu0 %940  ;;  %v1911_v28 = vpop.eup %1910  ;;  %v1254_v4 = vmul.f32 %v1909_v42, %v1153_v7  ;;  %v1283_v37 = vadd.f32 %v2777_v32, %v1251_v40  ;;  %v2783_v43 = vunpack.c.l.bf16 %v2782_v27  ;;  %v2785_v42 = vld [vmem:[#allocation5_spill] sm:$0xff] }
 0x256   : > { %v935_v15 = vpop.xlane.xlu1 %934  ;;  %v1252_v22 = vmul.f32 %v1911_v28, %v2524_v31  ;;  %v947_v53 = vpop.xlane.xlu2 %946  ;;  %v1158_v31 = vadd.f32 %v2546_v23, %v2544_v9  ;;  %v2779_v9 = vld [vmem:[#allocation4_spill] sm:$0xff]  ;;  %v2786_v47 = vunpack.c.l.bf16 %v2785_v42  ;;  %v2787_v40 = vunpack.c.h.bf16 %v2785_v42 }
 0x257   : > { %v1083_v58 = vpop.f32.mrf.mxu2  ;;  %v1286_v45 = vadd.f32 %v2775_v26, %v1254_v4  ;;  %1914 = vrcp.f32 %v935_v15  ;;  %v1172_v24 = vpop.f32.mrf.mxu3  ;;  %v2780_v23 = vunpack.c.h.bf16 %v2779_v9  ;;  %v2781_v18 = vunpack.c.l.bf16 %v2779_v9 }
 0x258   : > { %v1284_v56 = vadd.f32 %v2778_v48, %v1252_v22  ;;  %v1913_v34 = vpop.eup %1912  ;;  %1916 = vrcp.f32 %v947_v53  ;;  %v1173_v15 = vadd.f32 %v1172_v24, %v1083_v58  ;;  %v1171_v53 = vadd.f32 %v2587_v17, %v2585_v12  ;;  %v2788_v48 = vld [vmem:[#allocation7_spill] sm:$0xff] }
 0x259   : > { %v1652_v55 = vpack.c.bf16 %v1286_v45, %v1285_v19  ;;  %1918 = vrcp.f32 %v941_v5  ;;  %v1256_v54 = vmul.f32 %v1913_v34, %v1158_v31  ;;  %v2790_v24 = vunpack.c.l.bf16 %v2788_v48 }
 0x25a   : > { %v1647_v59 = vpack.c.bf16 %v1284_v56, %v1283_v37  ;;  %v2789_v56 = vunpack.c.h.bf16 %v2788_v48 }
 0x25b   : > { %1731 = vst [vmem:[%s2580_s22 + $0x18] sm:$0xff] %v1652_v55   ;;  %v1288_v52 = vadd.f32 %v2780_v23, %v1256_v54 }
 0x25c   : > { %1730 = vst [vmem:[%s2580_s22 + $0x10] sm:$0xff] %v1647_v59  }
 0x25d   : > { %v950_v10 = vpop.xlane.xlu0 %949  ;;  %v1915_v62 = vpop.eup %1914 }
 0x25e   : > { %v944_v36 = vpop.xlane.xlu1 %943  ;;  %v1255_v57 = vmul.f32 %v1915_v62, %v1156_v49  ;;  %1920 = vrcp.f32 %v950_v10  ;;  %v1917_v33 = vpop.eup %1916 }
 0x25f   : > { %v1086_v41 = vpop.f32.mrf.mxu2  ;;  %1922 = vrcp.f32 %v944_v36  ;;  %v1175_v35 = vpop.f32.mrf.mxu3  ;;  %v1259_v39 = vmul.f32 %v1917_v33, %v1166_v2  ;;  %v2794_v2 = vld [vmem:[#allocation9_spill] sm:$0xff] }
 0x260   : > { %v1287_v16 = vadd.f32 %v2781_v18, %v1255_v57  ;;  %v956_v38 = vpop.xlane.xlu2 %955  ;;  %v1919_v63 = vpop.eup %1918  ;;  %v1176_v31 = vadd.f32 %v1175_v35, %v1086_v41  ;;  %v2791_v57 = vld [vmem:[#allocation8_spill] sm:$0xff] }
 0x261   : > { %1924 = vrcp.f32 %v956_v38  ;;  %v1257_v29 = vmul.f32 %v1919_v63, %v1161_v51  ;;  %v1291_v7 = vadd.f32 %v2783_v43, %v1259_v39  ;;  %v2792_v33 = vunpack.c.l.bf16 %v2791_v57 }
 0x262   : > { %v1657_v25 = vpack.c.bf16 %v1288_v52, %v1287_v16  ;;  %v2793_v23 = vunpack.c.h.bf16 %v2791_v57  ;;  %v2795_v51 = vunpack.c.l.bf16 %v2794_v2 }
 0x263   : > { %v1289_v1 = vadd.f32 %v2786_v47, %v1257_v29 }
 0x264   : > { %v1921_v14 = vpop.eup %1920  ;;  %1732 = vst [vmem:[%s2580_s22 + $0x20] sm:$0xff] %v1657_v25  }
 0x265   : > { %v1923_v50 = vpop.eup %1922  ;;  %v1260_v6 = vmul.f32 %v1921_v14, %v1168_v44  ;;  %v959_v46 = vpop.xlane.xlu0 %958  ;;  %v2796_v44 = vunpack.c.h.bf16 %v2794_v2 }
 0x266   : > { %v953_v3 = vpop.xlane.xlu1 %952  ;;  %v1258_v11 = vmul.f32 %v1923_v50, %v1163_v61 }
 0x267   : > { %v1088_v30 = vpop.f32.mrf.mxu2  ;;  %v1292_v8 = vadd.f32 %v2784_v20, %v1260_v6  ;;  %1926 = vrcp.f32 %v953_v3  ;;  %v1177_v21 = vpop.f32.mrf.mxu3 }
 0x268   : > { %v1290_v5 = vadd.f32 %v2787_v40, %v1258_v11  ;;  %v1925_v28 = vpop.eup %1924  ;;  %1928 = vrcp.f32 %v959_v46  ;;  %v965_v26 = vpop.xlane.xlu2 %964  ;;  %v1178_v59 = vadd.f32 %v1177_v21, %v1088_v30 }
 0x269   : > { %v1667_v4 = vpack.c.bf16 %v1292_v8, %v1291_v7  ;;  %v1262_v0 = vmul.f32 %v1925_v28, %v1173_v15  ;;  %v2797_v8 = vld [vmem:[#allocation10_spill] sm:$0xff] }
 0x26a   : > { %v1662_v22 = vpack.c.bf16 %v1290_v5, %v1289_v1  ;;  %v2798_v21 = vunpack.c.l.bf16 %v2797_v8  ;;  %v2799_v47 = vunpack.c.h.bf16 %v2797_v8 }
 0x26b   : > { %1734 = vst [vmem:[%s2580_s22 + $0x30] sm:$0xff] %v1667_v4   ;;  %v1294_v58 = vadd.f32 %v2789_v56, %v1262_v0 }
 0x26c   : > { %1733 = vst [vmem:[%s2580_s22 + $0x28] sm:$0xff] %v1662_v22  }
 0x26d   : > { %v1927_v60 = vpop.eup %1926  ;;  %v968_v55 = vpop.xlane.xlu0 %967 }
 0x26e   : > { %v962_v19 = vpop.xlane.xlu1 %961  ;;  %v1261_v45 = vmul.f32 %v1927_v60, %v1171_v53  ;;  %v1929_v37 = vpop.eup %1928 }
 0x26f   : > { %1930 = vrcp.f32 %v962_v19  ;;  %v1091_v13 = vpop.f32.mrf.mxu2  ;;  %v1180_v32 = vpop.f32.mrf.mxu3  ;;  %v1263_v17 = vmul.f32 %v1929_v37, %v1176_v31 }
 0x270   : > { %v1293_v34 = vadd.f32 %v2790_v24, %v1261_v45  ;;  %1932 = vrcp.f32 %v965_v26  ;;  %v1181_v54 = vadd.f32 %v1180_v32, %v1091_v13  ;;  %v974_v6 = vpop.xlane.xlu2 %973  ;;  %v2800_v32 = vld [vmem:[#allocation11_spill] sm:$0xff] }
 0x271   : > { %1934 = vrcp.f32 %v968_v55  ;;  %v1295_v9 = vadd.f32 %v2792_v33, %v1263_v17  ;;  %v2801_v37 = vunpack.c.l.bf16 %v2800_v32  ;;  %v2802_v56 = vunpack.c.h.bf16 %v2800_v32  ;;  %v2803_v33 = vld [vmem:[#allocation12_spill] sm:$0xff] }
 0x272   : > { %v1672_v12 = vpack.c.bf16 %v1294_v58, %v1293_v34 }
 0x274   : > { %1735 = vst [vmem:[%s2580_s22 + $0x38] sm:$0xff] %v1672_v12  }
 0x275   : > { %v1931_v49 = vpop.eup %1930 }
 0x276   : > { %v1264_v10 = vmul.f32 %v1931_v49, %v1178_v59  ;;  %v1933_v36 = vpop.eup %1932  ;;  %v971_v14 = vpop.xlane.xlu1 %970 }
 0x277   : > { %v1093_v62 = vpop.f32.mrf.mxu2  ;;  %v1182_v41 = vpop.f32.mrf.mxu3  ;;  %v1265_v35 = vmul.f32 %v1933_v36, %v1181_v54  ;;  %1936 = vrcp.f32 %v971_v14 }
 0x278   : > { %v1296_v52 = vadd.f32 %v2793_v23, %v1264_v10  ;;  %v1183_v18 = vadd.f32 %v1182_v41, %v1093_v62  ;;  %v1935_v16 = vpop.eup %1934  ;;  %1938 = vrcp.f32 %v974_v6  ;;  %v977_v40 = vpop.xlane.xlu0 %976 }
 0x279   : > { %v1297_v25 = vadd.f32 %v2795_v51, %v1265_v35  ;;  %1940 = vrcp.f32 %v977_v40 }
 0x27a   : > { %v1677_v38 = vpack.c.bf16 %v1296_v52, %v1295_v9  ;;  %v1266_v63 = vmul.f32 %v1935_v16, %v1183_v18  ;;  %v2804_v9 = vunpack.c.l.bf16 %v2803_v33  ;;  %v2805_v52 = vunpack.c.h.bf16 %v2803_v33 }
 0x27c   : > { %1736 = vst [vmem:[%s2580_s22 + $0x40] sm:$0xff] %v1677_v38   ;;  %v1298_v39 = vadd.f32 %v2796_v44, %v1266_v63 }
 0x27d   : > { %v1937_v46 = vpop.eup %1936 }
 0x27e   : > { %v1682_v61 = vpack.c.bf16 %v1298_v39, %v1297_v25  ;;  %v1939_v7 = vpop.eup %1938 }
 0x27f   : > { %v1096_v29 = vpop.f32.mrf.mxu2  ;;  %v1185_v50 = vpop.f32.mrf.mxu3 }
 0x280   : > { %1737 = vst [vmem:[%s2580_s22 + $0x48] sm:$0xff] %v1682_v61   ;;  %v1186_v3 = vadd.f32 %v1185_v50, %v1096_v29  ;;  %v980_v15 = vpop.xlane.xlu1 %979  ;;  %v1941_v0 = vpop.eup %1940  ;;  %v2806_v50 = vld [vmem:[#allocation13_spill] sm:$0xff] }
 0x281   : > { %1942 = vrcp.f32 %v980_v15  ;;  %v2807_v6 = vunpack.c.l.bf16 %v2806_v50 }
 0x282   : > { %v1267_v27 = vmul.f32 %v1937_v46, %v1186_v3 }
 0x284   : > { %v1299_v42 = vadd.f32 %v2798_v21, %v1267_v27 }
 0x287   : > { %v1098_v11 = vpop.f32.mrf.mxu2  ;;  %v1187_v30 = vpop.f32.mrf.mxu3 }
 0x288   : > { %v1188_v43 = vadd.f32 %v1187_v30, %v1098_v11  ;;  %v1943_v45 = vpop.eup %1942  ;;  %v983_v24 = vpop.xlane.xlu2 %982  ;;  %v2808_v11 = vunpack.c.h.bf16 %v2806_v50 }
 0x289   : > { %1944 = vrcp.f32 %v983_v24 }
 0x28a   : > { %v1268_v20 = vmul.f32 %v1939_v7, %v1188_v43 }
 0x28c   : > { %v1300_v1 = vadd.f32 %v2799_v47, %v1268_v20 }
 0x28e   : > { %v1687_v5 = vpack.c.bf16 %v1300_v1, %v1299_v42 }
 0x28f   : > { %v1101_v28 = vpop.f32.mrf.mxu2  ;;  %v1190_v4 = vpop.f32.mrf.mxu3 }
 0x290   : > { %1738 = vst [vmem:[%s2580_s22 + $0x50] sm:$0xff] %v1687_v5   ;;  %v1191_v22 = vadd.f32 %v1190_v4, %v1101_v28  ;;  %v986_v12 = vpop.xlane.xlu0 %985  ;;  %v1945_v49 = vpop.eup %1944  ;;  %v2809_v4 = vld [vmem:[#allocation14_spill] sm:$0xff] }
 0x291   : > { %1946 = vrcp.f32 %v986_v12  ;;  %v2810_v15 = vunpack.c.l.bf16 %v2809_v4 }
 0x292   : > { %v1269_v19 = vmul.f32 %v1941_v0, %v1191_v22 }
 0x294   : > { %v1301_v48 = vadd.f32 %v2801_v37, %v1269_v19 }
 0x297   : > { %v1103_v53 = vpop.f32.mrf.mxu2  ;;  %v1192_v60 = vpop.f32.mrf.mxu3 }
 0x298   : > { %v1193_v26 = vadd.f32 %v1192_v60, %v1103_v53  ;;  %v1947_v36 = vpop.eup %1946  ;;  %v989_v35 = vpop.xlane.xlu1 %988  ;;  %v2811_v53 = vunpack.c.h.bf16 %v2809_v4 }
 0x299   : > { %1948 = vrcp.f32 %v989_v35 }
 0x29a   : > { %v1270_v13 = vmul.f32 %v1943_v45, %v1193_v26 }
 0x29c   : > { %v1302_v58 = vadd.f32 %v2802_v56, %v1270_v13 }
 0x29e   : > { %v1692_v34 = vpack.c.bf16 %v1302_v58, %v1301_v48 }
 0x29f   : > { %v1106_v55 = vpop.f32.mrf.mxu2  ;;  %v1195_v31 = vpop.f32.mrf.mxu3 }
 0x2a0   : > { %1739 = vst [vmem:[%s2580_s22 + $0x58] sm:$0xff] %v1692_v34   ;;  %v1196_v17 = vadd.f32 %v1195_v31, %v1106_v55  ;;  %v992_v63 = vpop.xlane.xlu2 %991  ;;  %v1949_v25 = vpop.eup %1948  ;;  %v2812_v31 = vld [vmem:[#allocation15_spill] sm:$0xff] }
 0x2a1   : > { %1950 = vrcp.f32 %v992_v63  ;;  %v2813_v12 = vunpack.c.l.bf16 %v2812_v31 }
 0x2a2   : > { %v1271_v10 = vmul.f32 %v1945_v49, %v1196_v17 }
 0x2a4   : > { %v1303_v23 = vadd.f32 %v2804_v9, %v1271_v10 }
 0x2a7   : > { %v1108_v59 = vpop.f32.mrf.mxu2  ;;  %v1197_v54 = vpop.f32.mrf.mxu3 }
 0x2a8   : > { %v1198_v62 = vadd.f32 %v1197_v54, %v1108_v59  ;;  %v1951_v61 = vpop.eup %1950  ;;  %v995_v30 = vpop.xlane.xlu0 %994  ;;  %v2814_v59 = vunpack.c.h.bf16 %v2812_v31 }
 0x2a9   : > { %1952 = vrcp.f32 %v995_v30 }
 0x2aa   : > { %v1272_v57 = vmul.f32 %v1947_v36, %v1198_v62 }
 0x2ac   : > { %v1304_v41 = vadd.f32 %v2805_v52, %v1272_v57 }
 0x2ae   : > { %v1697_v18 = vpack.c.bf16 %v1304_v41, %v1303_v23 }
 0x2af   : > { %v1111_v16 = vpop.f32.mrf.mxu2  ;;  %v1200_v38 = vpop.f32.mrf.mxu3 }
 0x2b0   : > { %1740 = vst [vmem:[%s2580_s22 + $0x60] sm:$0xff] %v1697_v18   ;;  %v1201_v2 = vadd.f32 %v1200_v38, %v1111_v16  ;;  %v998_v20 = vpop.xlane.xlu1 %997  ;;  %v1953_v42 = vpop.eup %1952 }
 0x2b1   : > { %1954 = vrcp.f32 %v998_v20 }
 0x2b2   : > { %v1273_v39 = vmul.f32 %v1949_v25, %v1201_v2 }
 0x2b4   : > { %v1305_v3 = vadd.f32 %v2807_v6, %v1273_v39 }
 0x2b7   : > { %v1113_v51 = vpop.f32.mrf.mxu2  ;;  %v1202_v44 = vpop.f32.mrf.mxu3 }
 0x2b8   : > { %v1203_v14 = vadd.f32 %v1202_v44, %v1113_v51  ;;  %v1955_v5 = vpop.eup %1954  ;;  %v1001_v60 = vpop.xlane.xlu2 %1000 }
 0x2b9   : > { %1956 = vrcp.f32 %v1001_v60 }
 0x2ba   : > { %v1274_v29 = vmul.f32 %v1951_v61, %v1203_v14 }
 0x2bc   : > { %v1306_v46 = vadd.f32 %v2808_v11, %v1274_v29 }
 0x2be   : > { %v1702_v27 = vpack.c.bf16 %v1306_v46, %v1305_v3 }
 0x2bf   : > { %v1116_v43 = vpop.f32.mrf.mxu2  ;;  %v1205_v7 = vpop.f32.mrf.mxu3 }
 0x2c0   : > { %1741 = vst [vmem:[%s2580_s22 + $0x68] sm:$0xff] %v1702_v27   ;;  %v1206_v8 = vadd.f32 %v1205_v7, %v1116_v43  ;;  %v1004_v13 = vpop.xlane.xlu0 %1003  ;;  %v1957_v48 = vpop.eup %1956 }
 0x2c1   : > { %1958 = vrcp.f32 %v1004_v13 }
 0x2c2   : > { %v1275_v1 = vmul.f32 %v1953_v42, %v1206_v8 }
 0x2c4   : > { %v1307_v22 = vadd.f32 %v2810_v15, %v1275_v1 }
 0x2c7   : > { %v1118_v21 = vpop.f32.mrf.mxu2  ;;  %v1207_v47 = vpop.f32.mrf.mxu3 }
 0x2c8   : > { %v1208_v40 = vadd.f32 %v1207_v47, %v1118_v21  ;;  %v1959_v34 = vpop.eup %1958 }
 0x2ca   : > { %v1276_v28 = vmul.f32 %v1955_v5, %v1208_v40 }
 0x2cc   : > { %v1308_v0 = vadd.f32 %v2811_v53, %v1276_v28 }
 0x2ce   : > { %v1707_v19 = vpack.c.bf16 %v1308_v0, %v1307_v22 }
 0x2cf   : > { %v1121_v26 = vpop.f32.mrf.mxu2 }
 0x2d0   : > { %v1210_v45 = vpop.f32.mrf.mxu3  ;;  %1742 = vst [vmem:[%s2580_s22 + $0x70] sm:$0xff] %v1707_v19  }
 0x2d1   : > { %v1211_v32 = vadd.f32 %v1210_v45, %v1121_v26 }
 0x2d3   : > { %v1277_v58 = vmul.f32 %v1957_v48, %v1211_v32 }
 0x2d5   : > { %v1309_v17 = vadd.f32 %v2813_v12, %v1277_v58 }
 0x2d7   : > { %v1123_v37 = vpop.f32.mrf.mxu2 }
 0x2d8   : > { %v1212_v56 = vpop.f32.mrf.mxu3 }
 0x2d9   : > { %v1213_v24 = vadd.f32 %v1212_v56, %v1123_v37 }
 0x2db   : > { %v1278_v55 = vmul.f32 %v1959_v34, %v1213_v24 }
 0x2dd   : > { %v1310_v49 = vadd.f32 %v2814_v59, %v1278_v55 }
 0x2df   : > { %v1712_v54 = vpack.c.bf16 %v1310_v49, %v1309_v17 }
 0x2e1   : > { %1743 = vst [vmem:[%s2580_s22 + $0x78] sm:$0xff] %v1712_v54  }
 0x2e2 PF: > { %s12_s11 = sadd.s32 1, %s1982_s11   ;;  %s2815_s9 = smov %s1978_s10 }
 0x2e3   : > { %p9_p5 = scmp.ge.s32.totalorder %s12_s11, 6   ;;  %s2816_s10 = smov %s2818_s12 }
 0x2e5   :  { %11 = sbr.rel (!%p9_p5) target bundleno = 2 (0x2), region = 61 }

// kernel: monofusion_forward.12
= control target key start
LH: loop header
LB: loop body
LE: loop exit
PB: predicated region body
PF: predicated region fallthrough
CT: control target
= control target key end

     0   :  { %s1605_s15 = smov 0   ;;  %s1607_s16 = smov 0   ;;  %s2011_s0 = inlined_call_operand.vmem [shape: bf16[2,256,128], index: 0, kind: input, shape index: {}]   ;;  %s2012_s1 = inlined_call_operand.vmem [shape: bf16[2,256,128], index: 1, kind: input, shape index: {}]   ;;  %s2013_s2 = inlined_call_operand.vmem [shape: f32[3,256], index: 2, kind: input, shape index: {}]   ;;  %s2014_s3 = inlined_call_operand.vmem [shape: f32[2,256], index: 3, kind: input, shape index: {}]   ;;  %s2015_s4 = inlined_call_operand.vmem [shape: f32[2,2,256], index: 4, kind: output, shape index: {}]  }
   0x1   :  { %s1609_s17 = smov 0  }
   0x2 LB: > { %s26_s18 = sadd.s32 1, %s1574_s16  ;;  %p1213_p0 = scmp.ge.s32.totalorder %s1578_s17, 1  ;;  %s1578_s17 = sphi %s1609_s17, %s14_s17   ;;  %s1574_s16 = sphi %s1607_s16, %s2083_s16   ;;  %s1570_s15 = sphi %s1605_s15, %s2082_s15  }
   0x3   : > { %p28_p1 = scmp.ge.s32.totalorder %s26_s18, 2  ;;  %p204_p2 = scmp.lt.s32.totalorder %s1578_s17, 3 }
   0x5   : > { %s2085_s18 = smov (%p28_p1, %s26_s18), 0  ;;  %p205_p3 = pnand %p1213_p0, %p204_p2 }
   0x7   : > { %208 = sbr.rel (%p205_p3) target bundleno = 737 (0x2e1), region = 36 }
   0xc   : > { %p249_p4 = scmp.lt.s32.totalorder %s1570_s15, 1  ;;  %vm1090_vm0 = vcmask 1041408  }
   0xe   : > { %s2087_s15 = smov (!%p249_p4, %s1570_s15), 1 }
   0xf   : > { %s1286_s19 = sshll.u32 %s2087_s15, 7  ;;  %s1288_s30 = sshll.u32 %s2087_s15, 2 }
  0x10   : > { %s1631_s22 = scalar_lea.vmem %s2012_s1, %s1286_s19  ;;  %s1651_s25 = scalar_lea.vmem %s2011_s0, %s1286_s19 }
  0x11   : > { %v1296_v0 = vld [vmem:[%s1631_s22 + $0x38] sm:$0xff]  ;;  %v1295_v2 = vld [vmem:[%s1631_s22 + $0x30] sm:$0xff]  ;;  %v1294_v4 = vld [vmem:[%s1631_s22 + $0x28] sm:$0xff]  ;;  %s277_s7 = scalar_lea.vmem %s2015_s4, %s1288_s30 }
  0x12   : > { %v1304_v1 = vld [vmem:[%s1631_s22 + $0x78] sm:$0xff]  ;;  %519 = vmatpush.bf16.xpose.msra.mxu0 %v1296_v0  ;;  %1384 = vmatpush.bf16.xpose.msra.mxu2 %v1296_v0  ;;  %v1303_v3 = vld [vmem:[%s1631_s22 + $0x70] sm:$0xff]  ;;  %v1302_v5 = vld [vmem:[%s1631_s22 + $0x68] sm:$0xff] }
  0x13   : > { %608 = vmatpush.bf16.xpose.msra.mxu1 %v1304_v1  ;;  %1392 = vmatpush.bf16.xpose.msra.mxu3 %v1304_v1  ;;  %v1293_v6 = vld [vmem:[%s1631_s22 + $0x20] sm:$0xff]  ;;  %v1292_v8 = vld [vmem:[%s1631_s22 + $0x18] sm:$0xff]  ;;  %v1291_v10 = vld [vmem:[%s1631_s22 + $0x10] sm:$0xff] }
  0x14   : > { %v1301_v7 = vld [vmem:[%s1631_s22 + $0x60] sm:$0xff]  ;;  %v1300_v9 = vld [vmem:[%s1631_s22 + $0x58] sm:$0xff]  ;;  %v1299_v11 = vld [vmem:[%s1631_s22 + $0x50] sm:$0xff] }
  0x15   : > { %v1290_v12 = vld [vmem:[%s1631_s22 + $0x8] sm:$0xff]  ;;  %v1306_v14 = vld [vmem:[%s1651_s25] sm:$0xff]   ;;  %v1379_v15 = vld [vmem:[%s1651_s25 + $0x58] sm:$0xff]  }
  0x16   : > { %v1298_v13 = vld [vmem:[%s1631_s22 + $0x48] sm:$0xff]  ;;  %v1307_v16 = vunpack.c.l.bf16 %v1306_v14  ;;  %v1308_v17 = vunpack.c.h.bf16 %v1306_v14  ;;  %v1351_v18 = vunpack.c.l.bf16 %v1379_v15  ;;  %v1352_v19 = vunpack.c.h.bf16 %v1379_v15  ;;  %v1289_v20 = vld [vmem:[%s1631_s22] sm:$0xff]  ;;  %v1370_v40 = vld [vmem:[%s1651_s25 + $0x10] sm:$0xff]  }
  0x17   : > { %v1297_v21 = vld [vmem:[%s1631_s22 + $0x40] sm:$0xff]  ;;  %v1369_v28 = vld [vmem:[%s1651_s25 + $0x8] sm:$0xff]   ;;  %v1315_v42 = vunpack.c.l.bf16 %v1370_v40  ;;  %v1316_v43 = vunpack.c.h.bf16 %v1370_v40  ;;  %v1371_v52 = vld [vmem:[%s1651_s25 + $0x18] sm:$0xff]  }
  0x18   : > { %v375_v22 = vmul.f32 0.088388346, %v1307_v16  ;;  %v376_v23 = vmul.f32 0.088388346, %v1308_v17  ;;  %v397_v24 = vmul.f32 0.088388346, %v1351_v18  ;;  %v1311_v30 = vunpack.c.l.bf16 %v1369_v28 }
  0x19   : > { %v398_v25 = vmul.f32 0.088388346, %v1352_v19  ;;  %v1380_v29 = vld [vmem:[%s1651_s25 + $0x60] sm:$0xff]   ;;  %v1312_v31 = vunpack.c.h.bf16 %v1369_v28  ;;  %v1381_v41 = vld [vmem:[%s1651_s25 + $0x68] sm:$0xff]   ;;  %v379_v46 = vmul.f32 0.088388346, %v1315_v42  ;;  %v1319_v54 = vunpack.c.l.bf16 %v1371_v52 }
  0x1a   : > { %520 = vmatpush.bf16.xpose.msra.mxu0 %v1295_v2  ;;  %1385 = vmatpush.bf16.xpose.msra.mxu2 %v1295_v2  ;;  %v407_v26 = vpack.c.bf16 %v376_v23, %v375_v22  ;;  %v1355_v32 = vunpack.c.l.bf16 %v1380_v29  ;;  %v1356_v33 = vunpack.c.h.bf16 %v1380_v29  ;;  %v377_v34 = vmul.f32 0.088388346, %v1311_v30  ;;  %v1382_v53 = vld [vmem:[%s1651_s25 + $0x70] sm:$0xff]   ;;  %v1372_v0 = vld [vmem:[%s1651_s25 + $0x20] sm:$0xff]   ;;  %v1383_v1 = vld [vmem:[%s1651_s25 + $0x78] sm:$0xff]  }
  0x1b   : > { %609 = vmatpush.bf16.xpose.msra.mxu1 %v1303_v3  ;;  %1393 = vmatpush.bf16.xpose.msra.mxu3 %v1303_v3  ;;  %v418_v27 = vpack.c.bf16 %v398_v25, %v397_v24  ;;  %v378_v35 = vmul.f32 0.088388346, %v1312_v31  ;;  %v1359_v44 = vunpack.c.l.bf16 %v1381_v41  ;;  %v1360_v45 = vunpack.c.h.bf16 %v1381_v41  ;;  %v1374_v18 = vld [vmem:[%s1651_s25 + $0x30] sm:$0xff]   ;;  %v1375_v24 = vld [vmem:[%s1651_s25 + $0x38] sm:$0xff]   ;;  %v1376_v30 = vld [vmem:[%s1651_s25 + $0x40] sm:$0xff]  }
  0x1c   : > { %v399_v36 = vmul.f32 0.088388346, %v1355_v32  ;;  %v400_v37 = vmul.f32 0.088388346, %v1356_v33  ;;  %v380_v47 = vmul.f32 0.088388346, %v1316_v43  ;;  %v1320_v55 = vunpack.c.h.bf16 %v1371_v52 }
  0x1d   : > { %v408_v38 = vpack.c.bf16 %v378_v35, %v377_v34  ;;  %v401_v48 = vmul.f32 0.088388346, %v1359_v44  ;;  %v402_v49 = vmul.f32 0.088388346, %v1360_v45  ;;  %v1363_v56 = vunpack.c.l.bf16 %v1382_v53  ;;  %v1378_v52 = vld [vmem:[%s1651_s25 + $0x50] sm:$0xff]  }
  0x1e   : > { %v419_v39 = vpack.c.bf16 %v400_v37, %v399_v36  ;;  %v409_v50 = vpack.c.bf16 %v380_v47, %v379_v46  ;;  %v1364_v57 = vunpack.c.h.bf16 %v1382_v53  ;;  %v381_v58 = vmul.f32 0.088388346, %v1319_v54 }
  0x1f   : > { %v420_v51 = vpack.c.bf16 %v402_v49, %v401_v48  ;;  %v382_v59 = vmul.f32 0.088388346, %v1320_v55  ;;  %v403_v60 = vmul.f32 0.088388346, %v1363_v56  ;;  %v1323_v2 = vunpack.c.l.bf16 %v1372_v0 }
  0x20   : > { %v404_v61 = vmul.f32 0.088388346, %v1364_v57  ;;  %v1324_v3 = vunpack.c.h.bf16 %v1372_v0  ;;  %v1331_v19 = vunpack.c.l.bf16 %v1374_v18  ;;  %v1335_v25 = vunpack.c.l.bf16 %v1375_v24 }
  0x21   : > { %v410_v62 = vpack.c.bf16 %v382_v59, %v381_v58  ;;  %v1339_v31 = vunpack.c.l.bf16 %v1376_v30  ;;  %v1340_v32 = vunpack.c.h.bf16 %v1376_v30  ;;  %v1347_v55 = vunpack.c.l.bf16 %v1378_v52 }
  0x22   : > { %521 = vmatpush.bf16.xpose.msra.mxu0 %v1294_v4  ;;  %1386 = vmatpush.bf16.xpose.msra.mxu2 %v1294_v4  ;;  %v421_v63 = vpack.c.bf16 %v404_v61, %v403_v60  ;;  %v1367_v4 = vunpack.c.l.bf16 %v1383_v1  ;;  %v1348_v56 = vunpack.c.h.bf16 %v1378_v52 }
  0x23   : > { %610 = vmatpush.bf16.xpose.msra.mxu1 %v1302_v5  ;;  %1394 = vmatpush.bf16.xpose.msra.mxu3 %v1302_v5  ;;  %v1368_v5 = vunpack.c.h.bf16 %v1383_v1  ;;  %v391_v33 = vmul.f32 0.088388346, %v1339_v31  ;;  %v392_v34 = vmul.f32 0.088388346, %v1340_v32  ;;  %v395_v59 = vmul.f32 0.088388346, %v1347_v55 }
  0x24   : > { %v396_v60 = vmul.f32 0.088388346, %v1348_v56 }
  0x25   : > { %v415_v35 = vpack.c.bf16 %v392_v34, %v391_v33 }
  0x2a   : > { %522 = vmatpush.bf16.xpose.msra.mxu0 %v1293_v6  ;;  %1387 = vmatpush.bf16.xpose.msra.mxu2 %v1293_v6  ;;  %v383_v6 = vmul.f32 0.088388346, %v1323_v2 }
  0x2b   : > { %611 = vmatpush.bf16.xpose.msra.mxu1 %v1301_v7  ;;  %1395 = vmatpush.bf16.xpose.msra.mxu3 %v1301_v7  ;;  %v384_v7 = vmul.f32 0.088388346, %v1324_v3 }
  0x32   : > { %523 = vmatpush.bf16.xpose.msra.mxu0 %v1292_v8  ;;  %1388 = vmatpush.bf16.xpose.msra.mxu2 %v1292_v8  ;;  %v405_v8 = vmul.f32 0.088388346, %v1367_v4 }
  0x33   : > { %612 = vmatpush.bf16.xpose.msra.mxu1 %v1300_v9  ;;  %1396 = vmatpush.bf16.xpose.msra.mxu3 %v1300_v9  ;;  %v406_v9 = vmul.f32 0.088388346, %v1368_v5 }
  0x3a   : > { %524 = vmatpush.bf16.xpose.msra.mxu0 %v1291_v10  ;;  %1389 = vmatpush.bf16.xpose.msra.mxu2 %v1291_v10  ;;  %v411_v10 = vpack.c.bf16 %v384_v7, %v383_v6 }
  0x3b   : > { %613 = vmatpush.bf16.xpose.msra.mxu1 %v1299_v11  ;;  %1397 = vmatpush.bf16.xpose.msra.mxu3 %v1299_v11  ;;  %v422_v11 = vpack.c.bf16 %v406_v9, %v405_v8 }
  0x42   : > { %525 = vmatpush.bf16.xpose.msra.mxu0 %v1290_v12  ;;  %1390 = vmatpush.bf16.xpose.msra.mxu2 %v1290_v12  ;;  %v1373_v12 = vld [vmem:[%s1651_s25 + $0x28] sm:$0xff]  }
  0x43   : > { %614 = vmatpush.bf16.xpose.msra.mxu1 %v1298_v13  ;;  %1398 = vmatpush.bf16.xpose.msra.mxu3 %v1298_v13  ;;  %v1327_v13 = vunpack.c.l.bf16 %v1373_v12  ;;  %v1328_v14 = vunpack.c.h.bf16 %v1373_v12 }
  0x45   : > { %v385_v15 = vmul.f32 0.088388346, %v1327_v13  ;;  %v386_v16 = vmul.f32 0.088388346, %v1328_v14 }
  0x47   : > { %v412_v17 = vpack.c.bf16 %v386_v16, %v385_v15 }
  0x4a   : > { %526 = vmatpush.bf16.xpose.msra.mxu0 %v1289_v20  ;;  %1391 = vmatpush.bf16.xpose.msra.mxu2 %v1289_v20  ;;  %v1332_v20 = vunpack.c.h.bf16 %v1374_v18 }
  0x4b   : > { %615 = vmatpush.bf16.xpose.msra.mxu1 %v1297_v21  ;;  %1399 = vmatpush.bf16.xpose.msra.mxu3 %v1297_v21  ;;  %v387_v21 = vmul.f32 0.088388346, %v1331_v19 }
  0x4c   : > { %v388_v22 = vmul.f32 0.088388346, %v1332_v20 }
  0x4e   : > { %v413_v23 = vpack.c.bf16 %v388_v22, %v387_v21 }
  0x51   : > { %527 = vmatmul.bf16.vlgmr.msra.gmra.mxu0 %v407_v26  ;;  %582 = vmatmul.bf16.vlgmr.msra.gmra.mxu2 %v418_v27 }
  0x52   : > { %616 = vmatmul.bf16.vlgmr.msra.gmra.mxu1 %v407_v26  ;;  %671 = vmatmul.bf16.vlgmr.msra.gmra.mxu3 %v418_v27  ;;  %v1336_v26 = vunpack.c.h.bf16 %v1375_v24  ;;  %v389_v27 = vmul.f32 0.088388346, %v1335_v25 }
  0x54   : > { %v390_v28 = vmul.f32 0.088388346, %v1336_v26 }
  0x56   : > { %v414_v29 = vpack.c.bf16 %v390_v28, %v389_v27 }
  0x61   : > { %532 = vmatmul.bf16.gmra.mxu0 %v408_v38  ;;  %587 = vmatmul.bf16.gmra.mxu2 %v419_v39 }
  0x62   : > { %621 = vmatmul.bf16.gmra.mxu1 %v408_v38  ;;  %676 = vmatmul.bf16.gmra.mxu3 %v419_v39  ;;  %v1377_v38 = vld [vmem:[%s1651_s25 + $0x48] sm:$0xff]  }
  0x63   : > { %v1343_v41 = vunpack.c.l.bf16 %v1377_v38  ;;  %v1344_v42 = vunpack.c.h.bf16 %v1377_v38 }
  0x65   : > { %v393_v45 = vmul.f32 0.088388346, %v1343_v41  ;;  %v394_v46 = vmul.f32 0.088388346, %v1344_v42 }
  0x67   : > { %v416_v49 = vpack.c.bf16 %v394_v46, %v393_v45 }
  0x71   : > { %537 = vmatmul.bf16.gmra.mxu0 %v409_v50  ;;  %592 = vmatmul.bf16.gmra.mxu2 %v420_v51 }
  0x72   : > { %626 = vmatmul.bf16.gmra.mxu1 %v409_v50  ;;  %681 = vmatmul.bf16.gmra.mxu3 %v420_v51 }
  0x81   : > { %542 = vmatmul.bf16.gmra.mxu0 %v410_v62  ;;  %597 = vmatmul.bf16.gmra.mxu2 %v421_v63 }
  0x82   : > { %631 = vmatmul.bf16.gmra.mxu1 %v410_v62  ;;  %686 = vmatmul.bf16.gmra.mxu3 %v421_v63  ;;  %v417_v63 = vpack.c.bf16 %v396_v60, %v395_v59 }
  0x91   : > { %547 = vmatmul.bf16.gmra.mxu0 %v411_v10  ;;  %602 = vmatmul.bf16.gmra.mxu2 %v422_v11 }
  0x92   : > { %636 = vmatmul.bf16.gmra.mxu1 %v411_v10  ;;  %691 = vmatmul.bf16.gmra.mxu3 %v422_v11 }
  0xa1   : > { %552 = vmatmul.bf16.gmra.mxu0 %v412_v17 }
  0xa2   : > { %641 = vmatmul.bf16.gmra.mxu1 %v412_v17 }
  0xb1   : > { %557 = vmatmul.bf16.gmra.mxu0 %v413_v23 }
  0xb2   : > { %646 = vmatmul.bf16.gmra.mxu1 %v413_v23 }
  0xc1   : > { %562 = vmatmul.bf16.gmra.mxu0 %v414_v29 }
  0xc2   : > { %651 = vmatmul.bf16.gmra.mxu1 %v414_v29 }
  0xce   : > { %v1670_v36 = vpop.f32.mrf.mxu0 }
  0xcf   : > { %v1672_v37 = vpop.f32.mrf.mxu1 }
  0xd1   : > { %567 = vmatmul.bf16.gmra.mxu0 %v415_v35 }
  0xd2   : > { %656 = vmatmul.bf16.gmra.mxu1 %v415_v35 }
  0xd4   : > { %v1675_v39 = vpop.f32.mrf.mxu2 }
  0xd5   : > { %2038 = vst [vmem:[#allocation2_spill] sm:$0xff] %v1675_v39  ;;  %v1677_v40 = vpop.f32.mrf.mxu3 }
  0xd6   : > { %2039 = vst [vmem:[#allocation3_spill] sm:$0xff] %v1677_v40  ;;  %v1679_v43 = vpop.f32.mrf.mxu0 }
  0xd7   : > { %v1681_v44 = vpop.f32.mrf.mxu1 }
  0xdc   : > { %v1683_v47 = vpop.f32.mrf.mxu2 }
  0xdd   : > { %2040 = vst [vmem:[#allocation4_spill] sm:$0xff] %v1683_v47  ;;  %v1685_v48 = vpop.f32.mrf.mxu3 }
  0xde   : > { %2041 = vst [vmem:[#allocation5_spill] sm:$0xff] %v1685_v48  ;;  %v1687_v50 = vpop.f32.mrf.mxu0 }
  0xdf   : > { %v1689_v51 = vpop.f32.mrf.mxu1 }
  0xe1   : > { %572 = vmatmul.bf16.gmra.mxu0 %v416_v49 }
  0xe2   : > { %661 = vmatmul.bf16.gmra.mxu1 %v416_v49 }
  0xe4   : > { %v1692_v53 = vpop.f32.mrf.mxu2 }
  0xe5   : > { %2042 = vst [vmem:[#allocation6_spill] sm:$0xff] %v1692_v53  ;;  %v1694_v54 = vpop.f32.mrf.mxu3 }
  0xe6   : > { %2043 = vst [vmem:[#allocation7_spill] sm:$0xff] %v1694_v54  ;;  %v1696_v57 = vpop.f32.mrf.mxu0 }
  0xe7   : > { %v1698_v58 = vpop.f32.mrf.mxu1 }
  0xec   : > { %v1700_v61 = vpop.f32.mrf.mxu2 }
  0xed   : > { %2044 = vst [vmem:[#allocation8_spill] sm:$0xff] %v1700_v61  ;;  %v1702_v62 = vpop.f32.mrf.mxu3 }
  0xee   : > { %2045 = vst [vmem:[#allocation9_spill] sm:$0xff] %v1702_v62  ;;  %v1704_v0 = vpop.f32.mrf.mxu0 }
  0xef   : > { %v1706_v1 = vpop.f32.mrf.mxu1 }
  0xf1   : > { %577 = vmatmul.bf16.gmra.mxu0 %v417_v63 }
  0xf2   : > { %666 = vmatmul.bf16.gmra.mxu1 %v417_v63  ;;  %v769_v63 = vmax.f32 %v1692_v53, %v1694_v54  ;;  %v763_v54 = vmax.f32 %v1675_v39, %v1677_v40 }
  0xf4   : > { %v1708_v2 = vpop.f32.mrf.mxu2 }
  0xf5   : > { %2046 = vst [vmem:[#allocation10_spill] sm:$0xff] %v1708_v2  ;;  %v1710_v3 = vpop.f32.mrf.mxu3 }
  0xf6   : > { %2047 = vst [vmem:[#allocation11_spill] sm:$0xff] %v1710_v3  ;;  %v1712_v4 = vpop.f32.mrf.mxu0 }
  0xf7   : > { %v1714_v5 = vpop.f32.mrf.mxu1 }
  0xfc   : > { %v1716_v6 = vpop.f32.mrf.mxu2 }
  0xfd   : > { %v1718_v7 = vpop.f32.mrf.mxu3 }
  0xfe   : > { %v1720_v8 = vpop.f32.mrf.mxu0  ;;  %v778_v42 = vmax.f32 %v1716_v6, %v1718_v7 }
  0xff   : > { %v1722_v9 = vpop.f32.mrf.mxu1 }
 0x104   : > { %v1724_v10 = vpop.f32.mrf.mxu2 }
 0x105   : > { %v1726_v11 = vpop.f32.mrf.mxu3 }
 0x106   : > { %v1728_v12 = vpop.f32.mrf.mxu0 }
 0x107   : > { %v1730_v13 = vpop.f32.mrf.mxu1 }
 0x108   : > { %v718_v52 = vmax.f32 %v1728_v12, %v1730_v13 }
 0x10c   : > { %v1732_v14 = vpop.f32.mrf.mxu2 }
 0x10d   : > { %v1734_v15 = vpop.f32.mrf.mxu3 }
 0x10e   : > { %v1736_v16 = vpop.f32.mrf.mxu0  ;;  %v784_v17 = vmax.f32 %v1732_v14, %v1734_v15 }
 0x10f   : > { %v1740_v18 = vpop.f32.mrf.mxu1 }
 0x110   : > { %785 = vmax.xlane.f32.xlu1 %v784_v17  ;;  %v775_v17 = vmax.f32 %v1708_v2, %v1710_v3 }
 0x114   : > { %v1742_v19 = vpop.f32.mrf.mxu2 }
 0x115   : > { %v1744_v20 = vpop.f32.mrf.mxu3 }
 0x116   : > { %v1746_v21 = vpop.f32.mrf.mxu0  ;;  %v787_v22 = vmax.f32 %v1742_v19, %v1744_v20 }
 0x117   : > { %v1750_v23 = vpop.f32.mrf.mxu1 }
 0x118   : > { %788 = vmax.xlane.f32.xlu2 %v787_v22  ;;  %v724_v55 = vmax.f32 %v1746_v21, %v1750_v23 }
 0x11c   : > { %v1752_v24 = vpop.f32.mrf.mxu2 }
 0x11d   : > { %v1754_v25 = vpop.f32.mrf.mxu3 }
 0x11e   : > { %v1756_v26 = vpop.f32.mrf.mxu0  ;;  %v790_v27 = vmax.f32 %v1752_v24, %v1754_v25 }
 0x11f   : > { %v1760_v28 = vpop.f32.mrf.mxu1 }
 0x120   : > { %791 = vmax.xlane.f32.xlu1 %v790_v27  ;;  %v727_v29 = vmax.f32 %v1756_v26, %v1760_v28 }
 0x122   : > { %728 = vmax.xlane.f32.xlu2 %v727_v29 }
 0x126   : > { %v1764_v30 = vpop.f32.mrf.mxu0 }
 0x127   : > { %v1766_v31 = vpop.f32.mrf.mxu1 }
 0x128   : > { %v730_v32 = vmax.f32 %v1764_v30, %v1766_v31 }
 0x12a   : > { %731 = vmax.xlane.f32.xlu0 %v730_v32  ;;  %v709_v32 = vmax.f32 %v1704_v0, %v1706_v1 }
 0x12e   : > { %v1770_v33 = vpop.f32.mrf.mxu0 }
 0x12f   : > { %v1772_v34 = vpop.f32.mrf.mxu1 }
 0x130   : > { %v733_v35 = vmax.f32 %v1770_v33, %v1772_v34 }
 0x132   : > { %734 = vmax.xlane.f32.xlu2 %v733_v35  ;;  %v715_v35 = vmax.f32 %v1720_v8, %v1722_v9 }
 0x136   : > { %v1776_v38 = vpop.f32.mrf.mxu0 }
 0x137   : > { %v1778_v41 = vpop.f32.mrf.mxu1 }
 0x138   : > { %v736_v45 = vmax.f32 %v1776_v38, %v1778_v41 }
 0x13a   : > { %779 = vmax.xlane.f32.xlu2 %v778_v42  ;;  %737 = vmax.xlane.f32.xlu1 %v736_v45  ;;  %v781_v42 = vmax.f32 %v1724_v10, %v1726_v11 }
 0x13e   : > { %v1784_v46 = vpop.f32.mrf.mxu0 }
 0x13f   : > { %v1786_v49 = vpop.f32.mrf.mxu1 }
 0x140   : > { %v739_v56 = vmax.f32 %v1784_v46, %v1786_v49 }
 0x142   : > { %719 = vmax.xlane.f32.xlu2 %v718_v52  ;;  %725 = vmax.xlane.f32.xlu1 %v724_v55  ;;  %v766_v55 = vmax.f32 %v1683_v47, %v1685_v48 }
 0x143   : > { %740 = vmax.xlane.f32.xlu0 %v739_v56  ;;  %v721_v56 = vmax.f32 %v1736_v16, %v1740_v18 }
 0x146   : > { %v1794_v59 = vpop.f32.mrf.mxu0 }
 0x147   : > { %v1796_v60 = vpop.f32.mrf.mxu1 }
 0x148   : > { %v742_v22 = vmax.f32 %v1794_v59, %v1796_v60 }
 0x14a   : > { %770 = vmax.xlane.f32.xlu2 %v769_v63  ;;  %776 = vmax.xlane.f32.xlu1 %v775_v17 }
 0x14b   : > { %743 = vmax.xlane.f32.xlu0 %v742_v22  ;;  %v706_v22 = vmax.f32 %v1696_v57, %v1698_v58 }
 0x14e   : > { %v1804_v27 = vpop.f32.mrf.mxu0 }
 0x14f   : > { %2048 = vst [vmem:[#allocation12_spill] sm:$0xff] %v1804_v27  ;;  %v1806_v29 = vpop.f32.mrf.mxu1 }
 0x150   : > { %2049 = vst [vmem:[#allocation13_spill] sm:$0xff] %v1806_v29 }
 0x152   : > { %710 = vmax.xlane.f32.xlu2 %v709_v32  ;;  %716 = vmax.xlane.f32.xlu1 %v715_v35  ;;  %v772_v32 = vmax.f32 %v1700_v61, %v1702_v62  ;;  %v703_v62 = vmax.f32 %v1687_v50, %v1689_v51 }
 0x153   : > { %782 = vmax.xlane.f32.xlu0 %v781_v42 }
 0x156   : > { %v1814_v45 = vpop.f32.mrf.mxu0 }
 0x157   : > { %2050 = vst [vmem:[#allocation14_spill] sm:$0xff] %v1814_v45  ;;  %v1816_v52 = vpop.f32.mrf.mxu1 }
 0x158   : > { %2051 = vst [vmem:[#allocation15_spill] sm:$0xff] %v1816_v52 }
 0x15a   : > { %767 = vmax.xlane.f32.xlu1 %v766_v55  ;;  %v712_v55 = vmax.f32 %v1712_v4, %v1714_v5 }
 0x15b   : > { %722 = vmax.xlane.f32.xlu0 %v721_v56 }
 0x15e   : > { %v1822_v63 = vpop.f32.mrf.mxu0 }
 0x15f   : > { %2052 = vst [vmem:[#allocation16_spill] sm:$0xff] %v1822_v63  ;;  %v1824_v17 = vpop.f32.mrf.mxu1 }
 0x160   : > { %2053 = vst [vmem:[#allocation17_spill] sm:$0xff] %v1824_v17 }
 0x162   : > { %707 = vmax.xlane.f32.xlu1 %v706_v22 }
 0x163   : > { %773 = vmax.xlane.f32.xlu0 %v772_v32 }
 0x166   : > { %v1830_v35 = vpop.f32.mrf.mxu0 }
 0x167   : > { %2054 = vst [vmem:[#allocation18_spill] sm:$0xff] %v1830_v35  ;;  %v1832_v42 = vpop.f32.mrf.mxu1 }
 0x168   : > { %2055 = vst [vmem:[#allocation19_spill] sm:$0xff] %v1832_v42 }
 0x16b   : > { %713 = vmax.xlane.f32.xlu0 %v712_v55  ;;  %v697_v55 = vmax.f32 %v1670_v36, %v1672_v37 }
 0x16e   : > { %v1836_v56 = vpop.f32.mrf.mxu0 }
 0x16f   : > { %2056 = vst [vmem:[#allocation20_spill] sm:$0xff] %v1836_v56  ;;  %v1838_v48 = vpop.f32.mrf.mxu1 }
 0x170   : > { %2057 = vst [vmem:[#allocation21_spill] sm:$0xff] %v1838_v48  ;;  %v757_v47 = vmax.f32 %v1836_v56, %v1838_v48  ;;  %v754_v48 = vmax.f32 %v1830_v35, %v1832_v42  ;;  %v751_v56 = vmax.f32 %v1822_v63, %v1824_v17 }
 0x172   : > { %758 = vmax.xlane.f32.xlu1 %v757_v47  ;;  %v745_v47 = vmax.f32 %v1804_v27, %v1806_v29 }
 0x173   : > { %764 = vmax.xlane.f32.xlu0 %v763_v54  ;;  %v700_v54 = vmax.f32 %v1679_v43, %v1681_v44 }
 0x176   : > { %v1844_v22 = vpop.f32.mrf.mxu0 }
 0x177   : > { %2058 = vst [vmem:[#allocation22_spill] sm:$0xff] %v1844_v22  ;;  %v1846_v32 = vpop.f32.mrf.mxu1 }
 0x178   : > { %2059 = vst [vmem:[#allocation23_spill] sm:$0xff] %v1846_v32  ;;  %v760_v53 = vmax.f32 %v1844_v22, %v1846_v32 }
 0x17a   : > { %698 = vmax.xlane.f32.xlu1 %v697_v55  ;;  %761 = vmax.xlane.f32.xlu2 %v760_v53  ;;  %v748_v55 = vmax.f32 %v1814_v45, %v1816_v52 }
 0x17b   : > { %704 = vmax.xlane.f32.xlu0 %v703_v62 }
 0x182   : > { %746 = vmax.xlane.f32.xlu1 %v745_v47  ;;  %701 = vmax.xlane.f32.xlu2 %v700_v54 }
 0x183   : > { %755 = vmax.xlane.f32.xlu0 %v754_v48  ;;  %v1864_v53 = vpop.xlane.xlu1 %785 }
 0x18a   : > { %752 = vmax.xlane.f32.xlu2 %v751_v56 }
 0x18b   : > { %749 = vmax.xlane.f32.xlu0 %v748_v55  ;;  %v1868_v29 = vpop.xlane.xlu2 %788 }
 0x193   : > { %v1866_v62 = vpop.xlane.xlu1 %791 }
 0x195   : > { %v729_v42 = vpop.xlane.xlu2 %728 }
 0x19d   : > { %v732_v27 = vpop.xlane.xlu0 %731 }
 0x1a5   : > { %v735_v54 = vpop.xlane.xlu2 %734 }
 0x1ad   : > { %v738_v32 = vpop.xlane.xlu1 %737  ;;  %v1879_v61 = vpop.xlane.xlu2 %779 }
 0x1ae   : > { %v819_v22 = vsub.f32 %v1776_v38, %v738_v32  ;;  %v820_v3 = vsub.f32 %v1778_v41, %v738_v32 }
 0x1b5   : > { %v1870_v48 = vpop.xlane.xlu1 %725 }
 0x1b6   : > { %v741_v47 = vpop.xlane.xlu0 %740 }
 0x1b7   : > { %v821_v56 = vsub.f32 %v1784_v46, %v741_v47  ;;  %v822_v45 = vsub.f32 %v1786_v49, %v741_v47  ;;  %v817_v46 = vsub.f32 %v1770_v33, %v735_v54  ;;  %v818_v49 = vsub.f32 %v1772_v34, %v735_v54 }
 0x1b9   : > { %v913_v40 = vmul.f32 1.442695, %v821_v56  ;;  %v915_v2 = vmul.f32 1.442695, %v822_v45  ;;  %v905_v47 = vmul.f32 1.442695, %v817_v46  ;;  %v816_v45 = vsub.f32 %v1766_v31, %v732_v27 }
 0x1bb   : > { %v903_v34 = vmul.f32 1.442695, %v816_v45 }
 0x1be   : > { %v744_v35 = vpop.xlane.xlu0 %743 }
 0x1bf   : > { %v823_v17 = vsub.f32 %v1794_v59, %v744_v35  ;;  %v824_v52 = vsub.f32 %v1796_v60, %v744_v35  ;;  %v1882_v59 = vpop.xlane.xlu1 %776  ;;  %v909_v60 = vmul.f32 1.442695, %v819_v22  ;;  %v815_v35 = vsub.f32 %v1764_v30, %v732_v27 }
 0x1c0   : > { %v814_v30 = vsub.f32 %v1760_v28, %v729_v42  ;;  %v811_v27 = vsub.f32 %v1746_v21, %v1870_v48 }
 0x1c1   : > { %v917_v55 = vmul.f32 1.442695, %v823_v17  ;;  %v919_v63 = vmul.f32 1.442695, %v824_v52  ;;  %v911_v52 = vmul.f32 1.442695, %v820_v3 }
 0x1c2   : > { %v901_v3 = vmul.f32 1.442695, %v815_v35  ;;  %v899_v46 = vmul.f32 1.442695, %v814_v30 }
 0x1c3   : > { %1424 = vpow2.f32 %v917_v55 }
 0x1c4   : > { %1426 = vpow2.f32 %v919_v63  ;;  %v907_v63 = vmul.f32 1.442695, %v818_v49 }
 0x1c5   : > { %1428 = vpow2.f32 %v913_v40  ;;  %v720_v40 = vpop.xlane.xlu2 %719 }
 0x1c6   : > { %v1877_v39 = vpop.xlane.xlu0 %782  ;;  %1430 = vpow2.f32 %v915_v2  ;;  %v813_v2 = vsub.f32 %v1756_v26, %v729_v42  ;;  %v812_v26 = vsub.f32 %v1750_v23, %v1870_v48  ;;  %v893_v42 = vmul.f32 1.442695, %v811_v27 }
 0x1c7   : > { %1432 = vpow2.f32 %v909_v60  ;;  %v1888_v32 = vpop.xlane.xlu1 %716  ;;  %v807_v23 = vsub.f32 %v1728_v12, %v720_v40 }
 0x1c8   : > { %1434 = vpow2.f32 %v911_v52  ;;  %v897_v31 = vmul.f32 1.442695, %v813_v2  ;;  %v895_v52 = vmul.f32 1.442695, %v812_v26  ;;  %v806_v12 = vsub.f32 %v1722_v9, %v1888_v32 }
 0x1c9   : > { %v1425_v38 = vpop.eup %1424  ;;  %1436 = vpow2.f32 %v905_v47  ;;  %v885_v2 = vmul.f32 1.442695, %v807_v23 }
 0x1ca   : > { %v1427_v17 = vpop.eup %1426  ;;  %992 = vmatpush.xpose.msrb.mxu2 %v1425_v38  ;;  %1438 = vpow2.f32 %v907_v63 }
 0x1cb   : > { %1012 = vmatpush.xpose.msrb.mxu3 %v1427_v17  ;;  %v1429_v33 = vpop.eup %1428  ;;  %1440 = vpow2.f32 %v901_v3 }
 0x1cc   : > { %v1431_v22 = vpop.eup %1430  ;;  %1442 = vpow2.f32 %v903_v34 }
 0x1cd   : > { %v1433_v54 = vpop.eup %1432  ;;  %1444 = vpow2.f32 %v897_v31  ;;  %v1899_v38 = vpop.xlane.xlu2 %770 }
 0x1ce   : > { %v723_v41 = vpop.xlane.xlu0 %722  ;;  %993 = vmatpush.xpose.msrb.mxu2 %v1429_v33  ;;  %v1435_v56 = vpop.eup %1434  ;;  %1446 = vpow2.f32 %v899_v46 }
 0x1cf   : > { %1013 = vmatpush.xpose.msrb.mxu3 %v1431_v22  ;;  %v1437_v60 = vpop.eup %1436  ;;  %v809_v49 = vsub.f32 %v1736_v16, %v723_v41  ;;  %v1901_v21 = vpop.xlane.xlu1 %767  ;;  %v810_v17 = vsub.f32 %v1740_v18, %v723_v41  ;;  %1448 = vpow2.f32 %v893_v42  ;;  %v808_v16 = vsub.f32 %v1730_v13, %v720_v40 }
 0x1d0   : > { %v1439_v28 = vpop.eup %1438  ;;  %1450 = vpow2.f32 %v895_v52  ;;  %v805_v18 = vsub.f32 %v1720_v8, %v1888_v32  ;;  %v883_v8 = vmul.f32 1.442695, %v806_v12 }
 0x1d1   : > { %v1441_v35 = vpop.eup %1440  ;;  %v889_v48 = vmul.f32 1.442695, %v809_v49  ;;  %v891_v63 = vmul.f32 1.442695, %v810_v17  ;;  %v887_v41 = vmul.f32 1.442695, %v808_v16 }
 0x1d2   : > { %994 = vmatpush.xpose.msrb.mxu2 %v1433_v54  ;;  %v1443_v47 = vpop.eup %1442  ;;  %v881_v40 = vmul.f32 1.442695, %v805_v18 }
 0x1d3   : > { %1014 = vmatpush.xpose.msrb.mxu3 %v1435_v56  ;;  %v1445_v33 = vpop.eup %1444  ;;  %1452 = vpow2.f32 %v889_v48 }
 0x1d4   : > { %v1447_v22 = vpop.eup %1446  ;;  %1454 = vpow2.f32 %v891_v63 }
 0x1d5   : > { %v1449_v3 = vpop.eup %1448  ;;  %v711_v34 = vpop.xlane.xlu2 %710  ;;  %1456 = vpow2.f32 %v885_v2 }
 0x1d6   : > { %v1894_v55 = vpop.xlane.xlu0 %773  ;;  %995 = vmatpush.xpose.msrb.mxu2 %v1437_v60  ;;  %v1451_v30 = vpop.eup %1450  ;;  %1458 = vpow2.f32 %v887_v41  ;;  %v801_v9 = vsub.f32 %v1704_v0, %v711_v34  ;;  %v802_v26 = vsub.f32 %v1706_v1, %v711_v34 }
 0x1d7   : > { %1015 = vmatpush.xpose.msrb.mxu3 %v1439_v28  ;;  %v708_v13 = vpop.xlane.xlu1 %707  ;;  %1460 = vpow2.f32 %v881_v40  ;;  %v856_v40 = vsub.f32 %v1754_v25, %v1866_v62  ;;  %v851_v25 = vsub.f32 %v1732_v14, %v1864_v53  ;;  %v850_v14 = vsub.f32 %v1726_v11, %v1877_v39  ;;  %v2060_v11 = vld [vmem:[#allocation10_spill] sm:$0xff] }
 0x1d8   : > { %1462 = vpow2.f32 %v883_v8  ;;  %v799_v52 = vsub.f32 %v1696_v57, %v708_v13  ;;  %v875_v0 = vmul.f32 1.442695, %v802_v26  ;;  %v800_v17 = vsub.f32 %v1698_v58, %v708_v13 }
 0x1d9   : > { %v1453_v27 = vpop.eup %1452 }
 0x1da   : > { %996 = vmatpush.xpose.msrb.mxu2 %v1441_v35  ;;  %v1455_v46 = vpop.eup %1454  ;;  %v869_v23 = vmul.f32 1.442695, %v799_v52 }
 0x1db   : > { %1016 = vmatpush.xpose.msrb.mxu3 %v1443_v47 }
 0x1de   : > { %v714_v45 = vpop.xlane.xlu0 %713  ;;  %997 = vmatpush.xpose.msrb.mxu2 %v1445_v33 }
 0x1df   : > { %1017 = vmatpush.xpose.msrb.mxu3 %v1447_v22  ;;  %v803_v54 = vsub.f32 %v1712_v4, %v714_v45  ;;  %v804_v31 = vsub.f32 %v1714_v5, %v714_v45  ;;  %v1457_v4 = vpop.eup %1456  ;;  %v873_v5 = vmul.f32 1.442695, %v801_v9  ;;  %v871_v45 = vmul.f32 1.442695, %v800_v17 }
 0x1e0   : > { %v1459_v28 = vpop.eup %1458 }
 0x1e1   : > { %v877_v32 = vmul.f32 1.442695, %v803_v54  ;;  %v879_v60 = vmul.f32 1.442695, %v804_v31  ;;  %v1461_v1 = vpop.eup %1460 }
 0x1e2   : > { %998 = vmatpush.xpose.msrb.mxu2 %v1449_v3  ;;  %v1463_v47 = vpop.eup %1462  ;;  %v855_v3 = vsub.f32 %v1752_v24, %v1866_v62  ;;  %v853_v24 = vsub.f32 %v1742_v19, %v1868_v29  ;;  %v852_v19 = vsub.f32 %v1734_v15, %v1864_v53  ;;  %v847_v53 = vsub.f32 %v1716_v6, %v1879_v61 }
 0x1e3   : > { %1018 = vmatpush.xpose.msrb.mxu3 %v1451_v30  ;;  %1464 = vpow2.f32 %v877_v32 }
 0x1e4   : > { %1466 = vpow2.f32 %v879_v60  ;;  %v981_v54 = vmul.f32 1.442695, %v855_v3  ;;  %v977_v62 = vmul.f32 1.442695, %v853_v24  ;;  %v849_v60 = vsub.f32 %v1724_v10, %v1877_v39  ;;  %v2065_v3 = vld [vmem:[#allocation7_spill] sm:$0xff] }
 0x1e5   : > { %v1916_v42 = vpop.xlane.xlu1 %758  ;;  %1468 = vpow2.f32 %v873_v5  ;;  %v848_v10 = vsub.f32 %v1718_v7, %v1879_v61  ;;  %v965_v39 = vmul.f32 1.442695, %v847_v53  ;;  %v2073_v53 = vld [vmem:[#allocation21_spill] sm:$0xff] }
 0x1e6   : > { %v1911_v56 = vpop.xlane.xlu0 %764  ;;  %999 = vmatpush.xpose.msrb.mxu2 %v1453_v27  ;;  %1470 = vpow2.f32 %v875_v0  ;;  %v983_v27 = vmul.f32 1.442695, %v856_v40  ;;  %v969_v52 = vmul.f32 1.442695, %v849_v60  ;;  %v971_v0 = vmul.f32 1.442695, %v850_v14 }
 0x1e7   : > { %1019 = vmatpush.xpose.msrb.mxu3 %v1455_v46  ;;  %1472 = vpow2.f32 %v869_v23  ;;  %v2061_v23 = vld [vmem:[#allocation11_spill] sm:$0xff]  ;;  %v2066_v40 = vld [vmem:[#allocation4_spill] sm:$0xff] }
 0x1e8   : > { %1474 = vpow2.f32 %v871_v45  ;;  %v846_v6 = vsub.f32 %v2061_v23, %v1882_v59 }
 0x1e9   : > { %v1465_v57 = vpop.eup %1464 }
 0x1ea   : > { %1000 = vmatpush.xpose.msrb.mxu2 %v1457_v4  ;;  %v1467_v63 = vpop.eup %1466 }
 0x1eb   : > { %1020 = vmatpush.xpose.msrb.mxu3 %v1459_v28  ;;  %v1469_v12 = vpop.eup %1468  ;;  %v975_v28 = vmul.f32 1.442695, %v852_v19 }
 0x1ed   : > { %v1918_v49 = vpop.xlane.xlu2 %761  ;;  %v699_v18 = vpop.xlane.xlu1 %698 }
 0x1ee   : > { %v705_v35 = vpop.xlane.xlu0 %704  ;;  %1001 = vmatpush.xpose.msrb.mxu2 %v1461_v1  ;;  %v794_v34 = vsub.f32 %v1672_v37, %v699_v18  ;;  %v854_v37 = vsub.f32 %v1744_v20, %v1868_v29  ;;  %v973_v29 = vmul.f32 1.442695, %v851_v25  ;;  %v845_v1 = vsub.f32 %v2060_v11, %v1882_v59  ;;  %v2069_v25 = vld [vmem:[#allocation3_spill] sm:$0xff] }
 0x1ef   : > { %1021 = vmatpush.xpose.msrb.mxu3 %v1463_v47  ;;  %v797_v48 = vsub.f32 %v1687_v50, %v705_v35  ;;  %v798_v16 = vsub.f32 %v1689_v51, %v705_v35  ;;  %v1471_v50 = vpop.eup %1470  ;;  %v793_v51 = vsub.f32 %v1670_v36, %v699_v18  ;;  %v967_v47 = vmul.f32 1.442695, %v848_v10 }
 0x1f0   : > { %v1473_v13 = vpop.eup %1472  ;;  %v859_v36 = vmul.f32 1.442695, %v794_v34  ;;  %v979_v32 = vmul.f32 1.442695, %v854_v37  ;;  %v961_v45 = vmul.f32 1.442695, %v845_v1 }
 0x1f1   : > { %v865_v58 = vmul.f32 1.442695, %v797_v48  ;;  %v867_v2 = vmul.f32 1.442695, %v798_v16  ;;  %v857_v8 = vmul.f32 1.442695, %v793_v51 }
 0x1f2   : > { %1002 = vmatpush.xpose.msrb.mxu2 %v1465_v57  ;;  %v985_v48 = vld [vmem:[%s2013_s2] sm:$0x77]  ;;  %v2062_v16 = vld [vmem:[#allocation8_spill] sm:$0xff]  ;;  %v963_v59 = vmul.f32 1.442695, %v846_v6  ;;  %v2068_v37 = vld [vmem:[#allocation2_spill] sm:$0xff] }
 0x1f3   : > { %1022 = vmatpush.xpose.msrb.mxu3 %v1467_v63  ;;  %1476 = vpow2.f32 %v865_v58  ;;  %987 = vst [vmem:[#allocation1] ss:$2 sm:$0xff] %v985_v48  ;;  %v843_v57 = vsub.f32 %v2062_v16, %v1894_v55  ;;  %v2063_v63 = vld [vmem:[#allocation9_spill] sm:$0xff]  ;;  %v2075_v1 = vld [vmem:[#allocation19_spill] sm:$0xff] }
 0x1f4   : > { %1478 = vpow2.f32 %v867_v2  ;;  %v2064_v2 = vld [vmem:[#allocation6_spill] sm:$0xff] }
 0x1f5   : > { %v702_v33 = vpop.xlane.xlu2 %701  ;;  %v841_v18 = vsub.f32 %v2064_v2, %v1899_v38 }
 0x1f6   : > { %v795_v22 = vsub.f32 %v1679_v43, %v702_v33  ;;  %v796_v41 = vsub.f32 %v1681_v44, %v702_v33  ;;  %1003 = vmatpush.xpose.msrb.mxu2 %v1469_v12  ;;  %v1475_v44 = vpop.eup %1474  ;;  %v844_v33 = vsub.f32 %v2063_v63, %v1894_v55  ;;  %v842_v55 = vsub.f32 %v2065_v3, %v1899_v38  ;;  %v756_v14 = vpop.xlane.xlu0 %755 }
 0x1f7   : > { %1023 = vmatpush.xpose.msrb.mxu3 %v1471_v50  ;;  %v1078_v50 = vld [vmem:[%s2014_s3] sm:$0xf] }
 0x1f8   : > { %v861_v30 = vmul.f32 1.442695, %v795_v22  ;;  %v863_v43 = vmul.f32 1.442695, %v796_v41  ;;  %v957_v41 = vmul.f32 1.442695, %v843_v57 }
 0x1f9   : > { %v1477_v31 = vpop.eup %1476  ;;  %v959_v12 = vmul.f32 1.442695, %v844_v33  ;;  %v955_v38 = vmul.f32 1.442695, %v842_v55  ;;  %v2077_v57 = vld [vmem:[#allocation17_spill] sm:$0xff] }
 0x1fa   : > { %1004 = vmatpush.xpose.msrb.mxu2 %v1473_v13  ;;  %1480 = vpow2.f32 %v861_v30  ;;  %v1479_v46 = vpop.eup %1478  ;;  %v1966_v51 = vld.sshfl [vmem:[#allocation1] sm:$0xff pattern:$0x75316420]  ;;  %v1968_v30 = vld.sshfl [vmem:[#allocation1 + $0x8] sm:$0xff pattern:$0x75316420] }
 0x1fb   : > { %1024 = vmatpush.xpose.msrb.mxu3 %v1475_v44  ;;  %1482 = vpow2.f32 %v863_v43  ;;  %1080 = vst [vmem:[#allocation1] ss:$4 sm:$0xff] %v1078_v50  ;;  %v953_v13 = vmul.f32 1.442695, %v841_v18  ;;  %v839_v44 = vsub.f32 %v2066_v40, %v1901_v21  ;;  %v747_v18 = vpop.xlane.xlu1 %746  ;;  %v2081_v40 = vld [vmem:[#allocation13_spill] sm:$0xff] }
 0x1fc   : > { %1484 = vpow2.f32 %v981_v54  ;;  %v2067_v54 = vld [vmem:[#allocation5_spill] sm:$0xff] }
 0x1fd   : > { %1486 = vpow2.f32 %v857_v8  ;;  %v840_v8 = vsub.f32 %v2067_v54, %v1901_v21  ;;  %v753_v23 = vpop.xlane.xlu2 %752 }
 0x1fe   : > { %1005 = vmatpush.xpose.msrb.mxu2 %v1477_v31  ;;  %1488 = vpow2.f32 %v859_v36  ;;  %v949_v31 = vmul.f32 1.442695, %v839_v44  ;;  %v750_v16 = vpop.xlane.xlu0 %749  ;;  %v830_v63 = vsub.f32 %v2077_v57, %v753_v23  ;;  %v826_v44 = vsub.f32 %v2081_v40, %v747_v18 }
 0x1ff   : > { %1025 = vmatpush.xpose.msrb.mxu3 %v1479_v46  ;;  %1490 = vpow2.f32 %v983_v27  ;;  %v837_v27 = vsub.f32 %v2068_v37, %v1911_v56  ;;  %v951_v46 = vmul.f32 1.442695, %v840_v8 }
 0x200   : > { %v1481_v9 = vpop.eup %1480  ;;  %1492 = vpow2.f32 %v977_v62  ;;  %v838_v62 = vsub.f32 %v2069_v25, %v1911_v56  ;;  %v2072_v56 = vld [vmem:[#allocation20_spill] sm:$0xff]  ;;  %v931_v50 = vmul.f32 1.442695, %v830_v63 }
 0x201   : > { %v1483_v26 = vpop.eup %1482  ;;  %1494 = vpow2.f32 %v979_v32  ;;  %v945_v21 = vmul.f32 1.442695, %v837_v27  ;;  %v2070_v32 = vld [vmem:[#allocation22_spill] sm:$0xff] }
 0x202   : > { %1006 = vmatpush.xpose.msrb.mxu2 %v1481_v9  ;;  %v1485_v20 = vpop.eup %1484  ;;  %1496 = vpow2.f32 %v973_v29  ;;  %v2071_v29 = vld [vmem:[#allocation23_spill] sm:$0xff] }
 0x203   : > { %1026 = vmatpush.xpose.msrb.mxu3 %v1483_v26  ;;  %v1487_v4 = vpop.eup %1486  ;;  %1498 = vpow2.f32 %v975_v28  ;;  %v835_v26 = vsub.f32 %v2070_v32, %v1918_v49  ;;  %v836_v60 = vsub.f32 %v2071_v29, %v1918_v49  ;;  %v2074_v49 = vld [vmem:[#allocation18_spill] sm:$0xff] }
 0x204   : > { %v1489_v5 = vpop.eup %1488  ;;  %1500 = vpow2.f32 %v969_v52  ;;  %v834_v52 = vsub.f32 %v2073_v53, %v1916_v42 }
 0x205   : > { %v1491_v15 = vpop.eup %1490  ;;  %1502 = vpow2.f32 %v971_v0  ;;  %v943_v10 = vmul.f32 1.442695, %v836_v60 }
 0x206   : > { %1007 = vmatpush.xpose.msrb.mxu2 %v1487_v4  ;;  %v1493_v17 = vpop.eup %1492  ;;  %1504 = vpow2.f32 %v965_v39  ;;  %v831_v39 = vsub.f32 %v2074_v49, %v756_v14  ;;  %v939_v11 = vmul.f32 1.442695, %v834_v52 }
 0x207   : > { %1027 = vmatpush.xpose.msrb.mxu3 %v1489_v5  ;;  %v1495_v35 = vpop.eup %1494  ;;  %1506 = vpow2.f32 %v967_v47  ;;  %v833_v5 = vsub.f32 %v2072_v56, %v1916_v42  ;;  %v832_v47 = vsub.f32 %v2075_v1, %v756_v14  ;;  %v2076_v42 = vld [vmem:[#allocation16_spill] sm:$0xff]  ;;  %v1082_v14 = vld.sshfl [vmem:[#allocation1 + $0x8] sm:$0xff pattern:$0x73625140] }
 0x208   : > { %v1497_v61 = vpop.eup %1496  ;;  %1508 = vpow2.f32 %v961_v45 }
 0x209   : > { %v1499_v7 = vpop.eup %1498  ;;  %1510 = vpow2.f32 %v963_v59  ;;  %1008 = vmatmul.f32.vlgmr.msrb.gmra.mxu2 %v1966_v51  ;;  %v935_v45 = vmul.f32 1.442695, %v832_v47 }
 0x20a   : > { %1032 = vmatpush.xpose.msra.mxu2 %v1485_v20  ;;  %v1501_v58 = vpop.eup %1500  ;;  %1028 = vmatmul.f32.vlgmr.msrb.gmra.mxu3 %v1968_v30  ;;  %1512 = vpow2.f32 %v957_v41  ;;  %v947_v20 = vmul.f32 1.442695, %v838_v62  ;;  %v2079_v41 = vld [vmem:[#allocation15_spill] sm:$0xff] }
 0x20b   : > { %1052 = vmatpush.xpose.msra.mxu3 %v1491_v15  ;;  %v1503_v22 = vpop.eup %1502  ;;  %1514 = vpow2.f32 %v959_v12  ;;  %v941_v15 = vmul.f32 1.442695, %v835_v26  ;;  %v828_v12 = vsub.f32 %v2079_v41, %v750_v16 }
 0x20c   : > { %v1505_v34 = vpop.eup %1504  ;;  %1516 = vpow2.f32 %v953_v13 }
 0x20d   : > { %v1507_v43 = vpop.eup %1506  ;;  %1518 = vpow2.f32 %v955_v38  ;;  %v927_v38 = vmul.f32 1.442695, %v828_v12 }
 0x20e   : > { %1033 = vmatpush.xpose.msra.mxu2 %v1493_v17  ;;  %v1509_v24 = vpop.eup %1508  ;;  %1520 = vpow2.f32 %v949_v31 }
 0x20f   : > { %1053 = vmatpush.xpose.msra.mxu3 %v1495_v35  ;;  %v1511_v36 = vpop.eup %1510  ;;  %1522 = vpow2.f32 %v951_v46  ;;  %v937_v35 = vmul.f32 1.442695, %v833_v5 }
 0x210   : > { %v1513_v9 = vpop.eup %1512  ;;  %1524 = vpow2.f32 %v945_v21 }
 0x211   : > { %v1515_v19 = vpop.eup %1514  ;;  %1526 = vpow2.f32 %v947_v20 }
 0x212   : > { %1034 = vmatpush.xpose.msra.mxu2 %v1497_v61  ;;  %v1517_v4 = vpop.eup %1516  ;;  %1528 = vpow2.f32 %v941_v15  ;;  %v933_v61 = vmul.f32 1.442695, %v831_v39  ;;  %v1081_v15 = vld.sshfl [vmem:[#allocation1] sm:$0xff pattern:$0x73625140] }
 0x213   : > { %1054 = vmatpush.xpose.msra.mxu3 %v1499_v7  ;;  %v1519_v28 = vpop.eup %1518  ;;  %1530 = vpow2.f32 %v943_v10  ;;  %v829_v7 = vsub.f32 %v2076_v42, %v753_v23 }
 0x214   : > { %v1521_v0 = vpop.eup %1520  ;;  %1532 = vpow2.f32 %v937_v35 }
 0x215   : > { %v1523_v17 = vpop.eup %1522  ;;  %1534 = vpow2.f32 %v939_v11  ;;  %v929_v2 = vmul.f32 1.442695, %v829_v7 }
 0x216   : > { %1035 = vmatpush.xpose.msra.mxu2 %v1501_v58  ;;  %v1525_v6 = vpop.eup %1524  ;;  %1536 = vpow2.f32 %v933_v61  ;;  %v2078_v58 = vld [vmem:[#allocation14_spill] sm:$0xff] }
 0x217   : > { %1055 = vmatpush.xpose.msra.mxu3 %v1503_v22  ;;  %v1527_v48 = vpop.eup %1526  ;;  %v827_v22 = vsub.f32 %v2078_v58, %v750_v16  ;;  %1538 = vpow2.f32 %v935_v45 }
 0x218   : > { %v1529_v33 = vpop.eup %1528  ;;  %1540 = vpow2.f32 %v929_v2 }
 0x219   : > { %v1531_v59 = vpop.eup %1530  ;;  %v925_v13 = vmul.f32 1.442695, %v827_v22  ;;  %1542 = vpow2.f32 %v931_v50 }
 0x21a   : > { %1036 = vmatpush.xpose.msra.mxu2 %v1505_v34  ;;  %v1533_v3 = vpop.eup %1532  ;;  %v2080_v34 = vld [vmem:[#allocation12_spill] sm:$0xff] }
 0x21b   : > { %1056 = vmatpush.xpose.msra.mxu3 %v1507_v43  ;;  %v1535_v55 = vpop.eup %1534  ;;  %v825_v43 = vsub.f32 %v2080_v34, %v747_v18  ;;  %1544 = vpow2.f32 %v925_v13 }
 0x21c   : > { %v1537_v54 = vpop.eup %1536  ;;  %1546 = vpow2.f32 %v927_v38 }
 0x21d   : > { %v1539_v8 = vpop.eup %1538 }
 0x21e   : > { %1037 = vmatpush.xpose.msra.mxu2 %v1509_v24  ;;  %v921_v24 = vmul.f32 1.442695, %v825_v43  ;;  %v1541_v31 = vpop.eup %1540 }
 0x21f   : > { %1057 = vmatpush.xpose.msra.mxu3 %v1511_v36  ;;  %v923_v36 = vmul.f32 1.442695, %v826_v44  ;;  %v1543_v37 = vpop.eup %1542 }
 0x220   : > { %1548 = vpow2.f32 %v921_v24 }
 0x221   : > { %1550 = vpow2.f32 %v923_v36  ;;  %v1545_v27 = vpop.eup %1544 }
 0x222   : > { %1038 = vmatpush.xpose.msra.mxu2 %v1513_v9  ;;  %v1547_v46 = vpop.eup %1546 }
 0x223   : > { %1058 = vmatpush.xpose.msra.mxu3 %v1515_v19 }
 0x226   : > { %1039 = vmatpush.xpose.msra.mxu2 %v1517_v4  ;;  %v1549_v25 = vpop.eup %1548 }
 0x227   : > { %1059 = vmatpush.xpose.msra.mxu3 %v1519_v28  ;;  %v1551_v62 = vpop.eup %1550 }
 0x22a   : > { %1040 = vmatpush.xpose.msra.mxu2 %v1521_v0 }
 0x22b   : > { %1060 = vmatpush.xpose.msra.mxu3 %v1523_v17 }
 0x22e   : > { %1041 = vmatpush.xpose.msra.mxu2 %v1525_v6 }
 0x22f   : > { %1061 = vmatpush.xpose.msra.mxu3 %v1527_v48 }
 0x232   : > { %1042 = vmatpush.xpose.msra.mxu2 %v1529_v33 }
 0x233   : > { %1062 = vmatpush.xpose.msra.mxu3 %v1531_v59 }
 0x236   : > { %1043 = vmatpush.xpose.msra.mxu2 %v1533_v3 }
 0x237   : > { %1063 = vmatpush.xpose.msra.mxu3 %v1535_v55 }
 0x23a   : > { %1044 = vmatpush.xpose.msra.mxu2 %v1537_v54 }
 0x23b   : > { %1064 = vmatpush.xpose.msra.mxu3 %v1539_v8 }
 0x23e   : > { %1045 = vmatpush.xpose.msra.mxu2 %v1541_v31 }
 0x23f   : > { %1065 = vmatpush.xpose.msra.mxu3 %v1543_v37 }
 0x242   : > { %1046 = vmatpush.xpose.msra.mxu2 %v1545_v27 }
 0x243   : > { %1066 = vmatpush.xpose.msra.mxu3 %v1547_v46 }
 0x246   : > { %1047 = vmatpush.xpose.msra.mxu2 %v1549_v25 }
 0x247   : > { %1067 = vmatpush.xpose.msra.mxu3 %v1551_v62 }
 0x249   : > { %1048 = vmatmul.f32.vlgmr.msra.gmra.mxu2 %v1966_v51 }
 0x24a   : > { %1068 = vmatmul.f32.vlgmr.msra.gmra.mxu3 %v1968_v30 }
 0x28c   : > { %v1009_v9 = vpop.f32.mrf.mxu2 }
 0x28d   : > { %v1029_v19 = vpop.f32.mrf.mxu3 }
 0x28e   : > { %v1030_v21 = vadd.f32 %v1029_v19, %v1009_v9 }
 0x290   : > { %1552 = vrcp.f32 %v1030_v21 }
 0x296   : > { %v1553_v29 = vpop.eup %1552 }
 0x297   : > { %v1074_v60 = vperm.slane %v1553_v29, 2 }
 0x299   : > { %v1076_v56 = vmul.f32 %v1074_v60, %v1030_v21 }
 0x29b   : > { %v1085_v30 = vsub.f32 %v1076_v56, %v1081_v15 }
 0x2cc   : > { %v1049_v32 = vpop.f32.mrf.mxu2 }
 0x2cd   : > { %v1069_v26 = vpop.f32.mrf.mxu3 }
 0x2ce   : > { %v1070_v20 = vadd.f32 %v1069_v26, %v1049_v32 }
 0x2d0   : > { %1554 = vrcp.f32 %v1070_v20 }
 0x2d6   : > { %v1555_v4 = vpop.eup %1554 }
 0x2d7   : > { %v1075_v28 = vperm.slane %v1555_v4, 2 }
 0x2d9   : > { %v1077_v5 = vmul.f32 %v1075_v28, %v1070_v20 }
 0x2db   : > { %v1086_v51 = vsub.f32 %v1077_v5, %v1082_v14 }
 0x2dd   : > { %v1089_v53 = vrot.slane %v1086_v51, 6 }
 0x2df   : > { %v1091_v52 = vsel %vm1090_vm0, %v1085_v30, %v1089_v53 }
 0x2e0   : > { %1093 = vst [vmem:[%s277_s7] sm:$0xf] %v1091_v52 }
 0x2e1 PF: > { %s14_s17 = sadd.s32 1, %s1578_s17   ;;  %s2082_s15 = smov %s1574_s16 }
 0x2e2   : > { %p11_p5 = scmp.ge.s32.totalorder %s14_s17, 4   ;;  %s2083_s16 = smov %s2085_s18 }
 0x2e4   :  { %13 = sbr.rel (!%p11_p5) target bundleno = 2 (0x2), region = 72 }

// kernel: monofusion_forward.13
= control target key start
LH: loop header
LB: loop body
LE: loop exit
PB: predicated region body
PF: predicated region fallthrough
CT: control target
= control target key end

     0   :  { %s3191_s0 = inlined_call_operand.vmem [shape: bf16[512,640], index: 0, kind: input, shape index: {}]   ;;  %s3192_s1 = inlined_call_operand.vmem [shape: bf16[8,640], index: 1, kind: input, shape index: {}]   ;;  %s3193_s2 = inlined_call_operand.vmem [shape: f32[8,1], index: 2, kind: input, shape index: {}]   ;;  %s3194_s3 = inlined_call_operand.vmem [shape: f32[8,512], index: 3, kind: output, shape index: {}]  }
   0x1   :  { %v1475_v0 = vld [vmem:[%s3191_s0 + $0x118] sm:$0xf]  ;;  %v2010_v1 = vld [vmem:[%s3191_s0 + $0x128] sm:$0xf0]  ;;  %v2008_v2 = vld [vmem:[%s3191_s0 + $0x11c] sm:$0xf] }
   0x2   :  { %v1476_v3 = vor.u32 %v2010_v1, %v1475_v0  ;;  %v1477_v4 = vld [vmem:[%s3191_s0 + $0x12c] sm:$0xf0]  ;;  %v1483_v5 = vld [vmem:[%s3191_s0 + $0x120] sm:$0xf]  ;;  %v2011_v6 = vld [vmem:[%s3191_s0 + $0x130] sm:$0xf0] }
   0x3   :  { %v1480_v7 = vor.u32 %v2008_v2, %v1477_v4  ;;  %v1484_v8 = vor.u32 %v2011_v6, %v1483_v5  ;;  %v2009_v9 = vld [vmem:[%s3191_s0 + $0x124] sm:$0xf]  ;;  %v1485_v10 = vld [vmem:[%s3191_s0 + $0x134] sm:$0xf0]  ;;  %v1455_v12 = vld [vmem:[%s3191_s0 + $0xf0] sm:$0xf] }
   0x4   :  { %1065 = vmatpush.bf16.xpose.msra.mxu0 %v1476_v3  ;;  %v1488_v11 = vor.u32 %v2009_v9, %v1485_v10  ;;  %v2005_v13 = vld [vmem:[%s3191_s0 + $0x100] sm:$0xf0]  ;;  %v2003_v14 = vld [vmem:[%s3191_s0 + $0xf4] sm:$0xf]  ;;  %v1457_v15 = vld [vmem:[%s3191_s0 + $0x104] sm:$0xf0] }
   0x5   :  { %1078 = vmatpush.bf16.xpose.msra.mxu1 %v1480_v7  ;;  %1091 = vmatpush.bf16.xpose.msra.mxu2 %v1484_v8  ;;  %v1463_v16 = vld [vmem:[%s3191_s0 + $0xf8] sm:$0xf]  ;;  %v2006_v17 = vld [vmem:[%s3191_s0 + $0x108] sm:$0xf0]  ;;  %v2004_v18 = vld [vmem:[%s3191_s0 + $0xfc] sm:$0xf]  ;;  %v1456_v20 = vor.u32 %v2005_v13, %v1455_v12  ;;  %v1460_v21 = vor.u32 %v2003_v14, %v1457_v15 }
   0x6   :  { %1104 = vmatpush.bf16.xpose.msra.mxu3 %v1488_v11  ;;  %v1465_v19 = vld [vmem:[%s3191_s0 + $0x10c] sm:$0xf0]  ;;  %v1464_v22 = vor.u32 %v2006_v17, %v1463_v16  ;;  %v1435_v24 = vld [vmem:[%s3191_s0 + $0xc8] sm:$0xf]  ;;  %v2000_v25 = vld [vmem:[%s3191_s0 + $0xd8] sm:$0xf0] }
   0x7   :  { %v1468_v23 = vor.u32 %v2004_v18, %v1465_v19  ;;  %v1998_v26 = vld [vmem:[%s3191_s0 + $0xcc] sm:$0xf]  ;;  %v1437_v27 = vld [vmem:[%s3191_s0 + $0xdc] sm:$0xf0]  ;;  %v1443_v28 = vld [vmem:[%s3191_s0 + $0xd0] sm:$0xf]  ;;  %v1436_v32 = vor.u32 %v2000_v25, %v1435_v24 }
   0x8   :  { %v2001_v29 = vld [vmem:[%s3191_s0 + $0xe0] sm:$0xf0]  ;;  %v1999_v30 = vld [vmem:[%s3191_s0 + $0xd4] sm:$0xf]  ;;  %v1445_v31 = vld [vmem:[%s3191_s0 + $0xe4] sm:$0xf0]  ;;  %v1440_v33 = vor.u32 %v1998_v26, %v1437_v27 }
   0x9   :  { %v1444_v34 = vor.u32 %v2001_v29, %v1443_v28  ;;  %v1448_v35 = vor.u32 %v1999_v30, %v1445_v31  ;;  %v1415_v36 = vld [vmem:[%s3191_s0 + $0xa0] sm:$0xf]  ;;  %v1995_v37 = vld [vmem:[%s3191_s0 + $0xb0] sm:$0xf0]  ;;  %v1993_v38 = vld [vmem:[%s3191_s0 + $0xa4] sm:$0xf] }
   0xa   :  { %v1417_v39 = vld [vmem:[%s3191_s0 + $0xb4] sm:$0xf0]  ;;  %v1423_v40 = vld [vmem:[%s3191_s0 + $0xa8] sm:$0xf]  ;;  %v1996_v41 = vld [vmem:[%s3191_s0 + $0xb8] sm:$0xf0]  ;;  %v1416_v44 = vor.u32 %v1995_v37, %v1415_v36 }
   0xb   :  { %v1994_v42 = vld [vmem:[%s3191_s0 + $0xac] sm:$0xf]  ;;  %v1425_v43 = vld [vmem:[%s3191_s0 + $0xbc] sm:$0xf0]  ;;  %v1420_v45 = vor.u32 %v1993_v38, %v1417_v39  ;;  %v1424_v46 = vor.u32 %v1996_v41, %v1423_v40  ;;  %v1395_v48 = vld [vmem:[%s3191_s0 + $0x78] sm:$0xf] }
   0xc   :  { %1066 = vmatpush.bf16.xpose.msra.mxu0 %v1456_v20  ;;  %v1428_v47 = vor.u32 %v1994_v42, %v1425_v43  ;;  %v1990_v49 = vld [vmem:[%s3191_s0 + $0x88] sm:$0xf0]  ;;  %v1988_v50 = vld [vmem:[%s3191_s0 + $0x7c] sm:$0xf]  ;;  %v1397_v51 = vld [vmem:[%s3191_s0 + $0x8c] sm:$0xf0] }
   0xd   :  { %1079 = vmatpush.bf16.xpose.msra.mxu1 %v1460_v21  ;;  %1092 = vmatpush.bf16.xpose.msra.mxu2 %v1464_v22  ;;  %v1403_v52 = vld [vmem:[%s3191_s0 + $0x80] sm:$0xf]  ;;  %v1991_v53 = vld [vmem:[%s3191_s0 + $0x90] sm:$0xf0]  ;;  %v1989_v54 = vld [vmem:[%s3191_s0 + $0x84] sm:$0xf]  ;;  %v1396_v56 = vor.u32 %v1990_v49, %v1395_v48  ;;  %v1400_v57 = vor.u32 %v1988_v50, %v1397_v51 }
   0xe   :  { %1105 = vmatpush.bf16.xpose.msra.mxu3 %v1468_v23  ;;  %v1405_v55 = vld [vmem:[%s3191_s0 + $0x94] sm:$0xf0]  ;;  %v1404_v58 = vor.u32 %v1991_v53, %v1403_v52  ;;  %v1375_v60 = vld [vmem:[%s3191_s0 + $0x50] sm:$0xf]  ;;  %v1985_v61 = vld [vmem:[%s3191_s0 + $0x60] sm:$0xf0] }
   0xf   :  { %v1408_v59 = vor.u32 %v1989_v54, %v1405_v55  ;;  %v1983_v62 = vld [vmem:[%s3191_s0 + $0x54] sm:$0xf]  ;;  %v1377_v63 = vld [vmem:[%s3191_s0 + $0x64] sm:$0xf0]  ;;  %v1383_v0 = vld [vmem:[%s3191_s0 + $0x58] sm:$0xf]  ;;  %v1376_v4 = vor.u32 %v1985_v61, %v1375_v60 }
  0x10   :  { %v1986_v1 = vld [vmem:[%s3191_s0 + $0x68] sm:$0xf0]  ;;  %v1984_v2 = vld [vmem:[%s3191_s0 + $0x5c] sm:$0xf]  ;;  %v1385_v3 = vld [vmem:[%s3191_s0 + $0x6c] sm:$0xf0]  ;;  %v1380_v5 = vor.u32 %v1983_v62, %v1377_v63 }
  0x11   :  { %v1384_v6 = vor.u32 %v1986_v1, %v1383_v0  ;;  %v1388_v7 = vor.u32 %v1984_v2, %v1385_v3  ;;  %v1355_v8 = vld [vmem:[%s3191_s0 + $0x28] sm:$0xf]  ;;  %v1980_v9 = vld [vmem:[%s3191_s0 + $0x38] sm:$0xf0]  ;;  %v1978_v10 = vld [vmem:[%s3191_s0 + $0x2c] sm:$0xf] }
  0x12   :  { %v1357_v11 = vld [vmem:[%s3191_s0 + $0x3c] sm:$0xf0]  ;;  %v1363_v12 = vld [vmem:[%s3191_s0 + $0x30] sm:$0xf]  ;;  %v1981_v13 = vld [vmem:[%s3191_s0 + $0x40] sm:$0xf0]  ;;  %v1356_v16 = vor.u32 %v1980_v9, %v1355_v8 }
  0x13   :  { %v1979_v14 = vld [vmem:[%s3191_s0 + $0x34] sm:$0xf]  ;;  %v1365_v15 = vld [vmem:[%s3191_s0 + $0x44] sm:$0xf0]  ;;  %v1360_v17 = vor.u32 %v1978_v10, %v1357_v11  ;;  %v1364_v18 = vor.u32 %v1981_v13, %v1363_v12  ;;  %v1335_v20 = vld [vmem:[%s3191_s0] sm:$0xf] }
  0x14   :  { %1067 = vmatpush.bf16.xpose.msra.mxu0 %v1436_v32  ;;  %v1368_v19 = vor.u32 %v1979_v14, %v1365_v15  ;;  %v1975_v21 = vld [vmem:[%s3191_s0 + $0x10] sm:$0xf0]  ;;  %v1973_v22 = vld [vmem:[%s3191_s0 + $0x4] sm:$0xf]  ;;  %v1337_v23 = vld [vmem:[%s3191_s0 + $0x14] sm:$0xf0] }
  0x15   :  { %1080 = vmatpush.bf16.xpose.msra.mxu1 %v1440_v33  ;;  %1093 = vmatpush.bf16.xpose.msra.mxu2 %v1444_v34  ;;  %v1343_v24 = vld [vmem:[%s3191_s0 + $0x8] sm:$0xf]  ;;  %v1976_v25 = vld [vmem:[%s3191_s0 + $0x18] sm:$0xf0]  ;;  %v1974_v26 = vld [vmem:[%s3191_s0 + $0xc] sm:$0xf]  ;;  %v1336_v31 = vor.u32 %v1975_v21, %v1335_v20 }
  0x16   :  { %1106 = vmatpush.bf16.xpose.msra.mxu3 %v1448_v35  ;;  %v1345_v27 = vld [vmem:[%s3191_s0 + $0x1c] sm:$0xf0]  ;;  %v1491_v28 = vld [vmem:[%s3191_s0 + $0x128] sm:$0xf]  ;;  %v2012_v29 = vld [vmem:[%s3191_s0 + $0x138] sm:$0xf0]  ;;  %v1340_v35 = vor.u32 %v1973_v22, %v1337_v23  ;;  %v1344_v36 = vor.u32 %v1976_v25, %v1343_v24 }
  0x17   :  { %v1635_v30 = vld [vmem:[%s3191_s0 + $0x258] sm:$0xf]  ;;  %v2050_v32 = vld [vmem:[%s3191_s0 + $0x268] sm:$0xf0]  ;;  %v2048_v33 = vld [vmem:[%s3191_s0 + $0x25c] sm:$0xf]  ;;  %v1348_v39 = vor.u32 %v1974_v26, %v1345_v27  ;;  %v1492_v40 = vor.u32 %v2012_v29, %v1491_v28 }
  0x18   :  { %v1637_v34 = vld [vmem:[%s3191_s0 + $0x26c] sm:$0xf0]  ;;  %v1643_v37 = vld [vmem:[%s3191_s0 + $0x260] sm:$0xf]  ;;  %v2051_v38 = vld [vmem:[%s3191_s0 + $0x270] sm:$0xf0]  ;;  %v1636_v41 = vor.u32 %v2050_v32, %v1635_v30 }
  0x19   :  { %v1640_v42 = vor.u32 %v2048_v33, %v1637_v34  ;;  %v1644_v43 = vor.u32 %v2051_v38, %v1643_v37  ;;  %v2043_v48 = vld [vmem:[%s3191_s0 + $0x234] sm:$0xf]  ;;  %v1617_v49 = vld [vmem:[%s3191_s0 + $0x244] sm:$0xf0]  ;;  %v1623_v50 = vld [vmem:[%s3191_s0 + $0x238] sm:$0xf] }
  0x1a   :  { %v2046_v51 = vld [vmem:[%s3191_s0 + $0x248] sm:$0xf0]  ;;  %v1620_v54 = vor.u32 %v2043_v48, %v1617_v49  ;;  %v1597_v61 = vld [vmem:[%s3191_s0 + $0x21c] sm:$0xf0]  ;;  %v1603_v62 = vld [vmem:[%s3191_s0 + $0x210] sm:$0xf] }
  0x1b   :  { %v1624_v55 = vor.u32 %v2046_v51, %v1623_v50  ;;  %v2038_v60 = vld [vmem:[%s3191_s0 + $0x20c] sm:$0xf]  ;;  %v2041_v63 = vld [vmem:[%s3191_s0 + $0x220] sm:$0xf0]  ;;  %v1431_v9 = vld [vmem:[%s3191_s0 + $0xb0] sm:$0xf] }
  0x1c   :  { %1068 = vmatpush.bf16.xpose.msra.mxu0 %v1416_v44  ;;  %v1471_v44 = vld [vmem:[%s3191_s0 + $0x100] sm:$0xf]  ;;  %v1600_v2 = vor.u32 %v2038_v60, %v1597_v61  ;;  %v1604_v3 = vor.u32 %v2041_v63, %v1603_v62  ;;  %v1997_v10 = vld [vmem:[%s3191_s0 + $0xc0] sm:$0xf0]  ;;  %v2035_v13 = vld [vmem:[%s3191_s0 + $0x1f0] sm:$0xf0] }
  0x1d   :  { %1081 = vmatpush.bf16.xpose.msra.mxu1 %v1420_v45  ;;  %1094 = vmatpush.bf16.xpose.msra.mxu2 %v1424_v46  ;;  %v2007_v45 = vld [vmem:[%s3191_s0 + $0x110] sm:$0xf0]  ;;  %v1615_v46 = vld [vmem:[%s3191_s0 + $0x230] sm:$0xf]  ;;  %v1575_v11 = vld [vmem:[%s3191_s0 + $0x1e0] sm:$0xf]  ;;  %v1432_v21 = vor.u32 %v1997_v10, %v1431_v9 }
  0x1e   :  { %1107 = vmatpush.bf16.xpose.msra.mxu3 %v1428_v47  ;;  %v2045_v47 = vld [vmem:[%s3191_s0 + $0x240] sm:$0xf0]  ;;  %v1472_v52 = vor.u32 %v2007_v45, %v1471_v44  ;;  %v1577_v15 = vld [vmem:[%s3191_s0 + $0x1f4] sm:$0xf0]  ;;  %v2036_v20 = vld [vmem:[%s3191_s0 + $0x1f8] sm:$0xf0]  ;;  %v1576_v23 = vor.u32 %v2035_v13, %v1575_v11 }
  0x1f   :  { %v1616_v53 = vor.u32 %v2045_v47, %v1615_v46  ;;  %v2033_v14 = vld [vmem:[%s3191_s0 + $0x1e4] sm:$0xf]  ;;  %v1411_v26 = vld [vmem:[%s3191_s0 + $0x88] sm:$0xf]  ;;  %v1992_v27 = vld [vmem:[%s3191_s0 + $0x98] sm:$0xf0] }
  0x20   :  { %v1580_v24 = vor.u32 %v2033_v14, %v1577_v15  ;;  %v1555_v28 = vld [vmem:[%s3191_s0 + $0x1b8] sm:$0xf]  ;;  %v2030_v29 = vld [vmem:[%s3191_s0 + $0x1c8] sm:$0xf0]  ;;  %v2028_v30 = vld [vmem:[%s3191_s0 + $0x1bc] sm:$0xf]  ;;  %v1412_v34 = vor.u32 %v1992_v27, %v1411_v26 }
  0x21   :  { %v1563_v32 = vld [vmem:[%s3191_s0 + $0x1c0] sm:$0xf]  ;;  %v2031_v33 = vld [vmem:[%s3191_s0 + $0x1d0] sm:$0xf0]  ;;  %v1543_v44 = vld [vmem:[%s3191_s0 + $0x198] sm:$0xf] }
  0x22   :  { %v1564_v37 = vor.u32 %v2031_v33, %v1563_v32  ;;  %v1391_v38 = vld [vmem:[%s3191_s0 + $0x60] sm:$0xf]  ;;  %v2026_v45 = vld [vmem:[%s3191_s0 + $0x1a8] sm:$0xf0]  ;;  %v2135_v50 = vmov 0  }
  0x23   :  { %v209_v47 = vld [vmem:[%s3193_s2] sm:$0xff]  ;;  %2134 = vset.pattern.permute.xlu0 %v2135_v50  ;;  %v1544_v51 = vor.u32 %v2026_v45, %v1543_v44  ;;  %v1645_v9 = vld [vmem:[%s3191_s0 + $0x274] sm:$0xf0]  ;;  %v1651_v10 = vld [vmem:[%s3191_s0 + $0x268] sm:$0xf] }
  0x24   :  { %1069 = vmatpush.bf16.xpose.msra.mxu0 %v1396_v56  ;;  %v1451_v56 = vld [vmem:[%s3191_s0 + $0xd8] sm:$0xf]  ;;  %212 = vperm.xlu0 %2134, %v209_v47   ;;  %v2052_v11 = vld [vmem:[%s3191_s0 + $0x278] sm:$0xf0]  ;;  %v2090_v15 = vld [vmem:[%s3191_s0 + $0x3a8] sm:$0xf0] }
  0x25   :  { %1082 = vmatpush.bf16.xpose.msra.mxu1 %v1400_v57  ;;  %1095 = vmatpush.bf16.xpose.msra.mxu2 %v1404_v58  ;;  %v2002_v57 = vld [vmem:[%s3191_s0 + $0xe8] sm:$0xf0]  ;;  %v1595_v58 = vld [vmem:[%s3191_s0 + $0x208] sm:$0xf]  ;;  %v1795_v14 = vld [vmem:[%s3191_s0 + $0x398] sm:$0xf]  ;;  %v1652_v26 = vor.u32 %v2052_v11, %v1651_v10 }
  0x26   :  { %1108 = vmatpush.bf16.xpose.msra.mxu3 %v1408_v59  ;;  %v2040_v59 = vld [vmem:[%s3191_s0 + $0x218] sm:$0xf0]  ;;  %v1452_v0 = vor.u32 %v2002_v57, %v1451_v56  ;;  %v2018_v56 = vld [vmem:[%s3191_s0 + $0x16c] sm:$0xf]  ;;  %v1517_v57 = vld [vmem:[%s3191_s0 + $0x17c] sm:$0xf0]  ;;  %v1796_v27 = vor.u32 %v2090_v15, %v1795_v14 }
  0x27   :  { %v1596_v1 = vor.u32 %v2040_v59, %v1595_v58  ;;  %v1523_v58 = vld [vmem:[%s3191_s0 + $0x170] sm:$0xf]  ;;  %v2021_v59 = vld [vmem:[%s3191_s0 + $0x180] sm:$0xf0]  ;;  %v1520_v62 = vor.u32 %v2018_v56, %v1517_v57  ;;  %v1631_v33 = vld [vmem:[%s3191_s0 + $0x240] sm:$0xf] }
  0x28   :  { %v1524_v63 = vor.u32 %v2021_v59, %v1523_v58  ;;  %v1625_v32 = vld [vmem:[%s3191_s0 + $0x24c] sm:$0xf0]  ;;  %v1605_v44 = vld [vmem:[%s3191_s0 + $0x224] sm:$0xf0]  ;;  %v1611_v45 = vld [vmem:[%s3191_s0 + $0x218] sm:$0xf] }
  0x29   :  { %v1755_v47 = vld [vmem:[%s3191_s0 + $0x348] sm:$0xf]  ;;  %v1757_v50 = vld [vmem:[%s3191_s0 + $0x35c] sm:$0xf0]  ;;  %v1591_v57 = vld [vmem:[%s3191_s0 + $0x1f0] sm:$0xf] }
  0x2a   :  { %v1585_v56 = vld [vmem:[%s3191_s0 + $0x1fc] sm:$0xf0]  ;;  %v2037_v58 = vld [vmem:[%s3191_s0 + $0x200] sm:$0xf0]  ;;  %v1717_v10 = vld [vmem:[%s3191_s0 + $0x30c] sm:$0xf0] }
  0x2b   :  { %v1735_v59 = vld [vmem:[%s3191_s0 + $0x320] sm:$0xf] }
  0x2c   :  { %1070 = vmatpush.bf16.xpose.msra.mxu0 %v1376_v4  ;;  %v14_v4 = vld [vmem:[%s3192_s1] sm:$0xff] }
  0x2d   :  { %1083 = vmatpush.bf16.xpose.msra.mxu1 %v1380_v5  ;;  %1096 = vmatpush.bf16.xpose.msra.mxu2 %v1384_v6  ;;  %v15_v5 = vld [vmem:[%s3192_s1 + $0x8] sm:$0xff]  ;;  %v218_v6 = vunpack.c.l.b16 %v14_v4 }
  0x2e   :  { %1109 = vmatpush.bf16.xpose.msra.mxu3 %v1388_v7  ;;  %v220_v7 = vunpack.c.l.b16 %v15_v5  ;;  %v221_v8 = vunpack.c.h.b16 %v15_v5  ;;  %v1497_v5 = vld [vmem:[%s3191_s0 + $0x154] sm:$0xf0] }
  0x2f   :  { %v2435_v12 = vpack.c.b16 %v218_v6, %v218_v6  ;;  %v1503_v6 = vld [vmem:[%s3191_s0 + $0x148] sm:$0xf] }
  0x34   :  { %1071 = vmatpush.bf16.xpose.msra.mxu0 %v1356_v16  ;;  %v2446_v16 = vpack.c.b16 %v220_v7, %v220_v7  ;;  %v2016_v7 = vld [vmem:[%s3191_s0 + $0x158] sm:$0xf0] }
  0x35   :  { %1084 = vmatpush.bf16.xpose.msra.mxu1 %v1360_v17  ;;  %1097 = vmatpush.bf16.xpose.msra.mxu2 %v1364_v18  ;;  %v2448_v17 = vpack.c.b16 %v221_v8, %v221_v8  ;;  %v219_v18 = vunpack.c.h.b16 %v14_v4  ;;  %v2013_v4 = vld [vmem:[%s3191_s0 + $0x144] sm:$0xf] }
  0x36   :  { %1110 = vmatpush.bf16.xpose.msra.mxu3 %v1368_v19  ;;  %v1583_v19 = vld [vmem:[%s3191_s0 + $0x1e8] sm:$0xf]  ;;  %v2049_v8 = vld [vmem:[%s3191_s0 + $0x264] sm:$0xf] }
  0x37   :  { %v2459_v22 = vpack.c.b16 %v219_v18, %v219_v18  ;;  %v1584_v25 = vor.u32 %v2036_v20, %v1583_v19  ;;  %v16_v18 = vld [vmem:[%s3192_s1 + $0x10] sm:$0xf]  ;;  %v1500_v20 = vor.u32 %v2013_v4, %v1497_v5  ;;  %v1565_v4 = vld [vmem:[%s3191_s0 + $0x1d4] sm:$0xf0]  ;;  %v1571_v5 = vld [vmem:[%s3191_s0 + $0x1c8] sm:$0xf] }
  0x3c   :  { %1072 = vmatpush.bf16.xpose.msra.mxu0 %v1336_v31  ;;  %v1557_v31 = vld [vmem:[%s3191_s0 + $0x1cc] sm:$0xf0] }
  0x3d   :  { %1085 = vmatpush.bf16.xpose.msra.mxu1 %v1340_v35  ;;  %1098 = vmatpush.bf16.xpose.msra.mxu2 %v1344_v36  ;;  %v1556_v35 = vor.u32 %v2030_v29, %v1555_v28  ;;  %v1560_v36 = vor.u32 %v2028_v30, %v1557_v31  ;;  %v222_v28 = vunpack.c.l.b16 %v16_v18  ;;  %v2044_v31 = vld [vmem:[%s3191_s0 + $0x23c] sm:$0xf] }
  0x3e   :  { %1111 = vmatpush.bf16.xpose.msra.mxu3 %v1348_v39  ;;  %v1987_v39 = vld [vmem:[%s3191_s0 + $0x70] sm:$0xf0]  ;;  %v2024_v18 = vld [vmem:[%s3191_s0 + $0x19c] sm:$0xf] }
  0x3f   :  { %v1392_v46 = vor.u32 %v1987_v39, %v1391_v38  ;;  %v2588_v30 = vpack.c.b16 %v222_v28, %v222_v28  ;;  %v1777_v38 = vld [vmem:[%s3191_s0 + $0x384] sm:$0xf0]  ;;  %v1628_v39 = vor.u32 %v2044_v31, %v1625_v32  ;;  %v2019_v32 = vld [vmem:[%s3191_s0 + $0x174] sm:$0xf] }
  0x43   :  { %1073 = vmatmul.bf16.vlgmr.msra.gmra.mxu0 %v2435_v12 }
  0x44   :  { %1117 = vmatpush.bf16.xpose.msrb.mxu0 %v1492_v40  ;;  %1099 = vmatmul.bf16.vlgmr.msra.gmra.mxu2 %v2446_v16  ;;  %v1535_v40 = vld [vmem:[%s3191_s0 + $0x190] sm:$0xf] }
  0x45   :  { %1130 = vmatpush.bf16.xpose.msrb.mxu1 %v1636_v41  ;;  %1143 = vmatpush.bf16.xpose.msrb.mxu2 %v1640_v42  ;;  %v2025_v41 = vld [vmem:[%s3191_s0 + $0x1a0] sm:$0xf0]  ;;  %v2023_v42 = vld [vmem:[%s3191_s0 + $0x194] sm:$0xf] }
  0x46   :  { %1156 = vmatpush.bf16.xpose.msrb.mxu3 %v1644_v43  ;;  %1086 = vmatmul.bf16.vlgmr.msra.gmra.mxu1 %v2459_v22  ;;  %v1537_v43 = vld [vmem:[%s3191_s0 + $0x1a4] sm:$0xf0]  ;;  %v1536_v48 = vor.u32 %v2025_v41, %v1535_v40 }
  0x47   :  { %1112 = vmatmul.bf16.vlgmr.msra.gmra.mxu3 %v2448_v17  ;;  %v1540_v49 = vor.u32 %v2023_v42, %v1537_v43  ;;  %v2039_v43 = vld [vmem:[%s3191_s0 + $0x214] sm:$0xf] }
  0x4c   :  { %1118 = vmatpush.bf16.xpose.msrb.mxu0 %v1472_v52  ;;  %v1371_v52 = vld [vmem:[%s3191_s0 + $0x38] sm:$0xf] }
  0x4d   :  { %1131 = vmatpush.bf16.xpose.msrb.mxu1 %v1616_v53  ;;  %1144 = vmatpush.bf16.xpose.msrb.mxu2 %v1620_v54  ;;  %v1982_v53 = vld [vmem:[%s3191_s0 + $0x48] sm:$0xf0]  ;;  %v1515_v54 = vld [vmem:[%s3191_s0 + $0x168] sm:$0xf] }
  0x4e   :  { %1157 = vmatpush.bf16.xpose.msrb.mxu3 %v1624_v55  ;;  %v2020_v55 = vld [vmem:[%s3191_s0 + $0x178] sm:$0xf0]  ;;  %v1372_v60 = vor.u32 %v1982_v53, %v1371_v52 }
  0x4f   :  { %v1516_v61 = vor.u32 %v2020_v55, %v1515_v54  ;;  %v2034_v55 = vld [vmem:[%s3191_s0 + $0x1ec] sm:$0xf] }
  0x54   :  { %1119 = vmatpush.bf16.xpose.msrb.mxu0 %v1452_v0  ;;  %v1351_v0 = vld [vmem:[%s3191_s0 + $0x10] sm:$0xf] }
  0x55   :  { %1132 = vmatpush.bf16.xpose.msrb.mxu1 %v1596_v1  ;;  %1145 = vmatpush.bf16.xpose.msrb.mxu2 %v1600_v2  ;;  %v1977_v1 = vld [vmem:[%s3191_s0 + $0x20] sm:$0xf0]  ;;  %v1495_v2 = vld [vmem:[%s3191_s0 + $0x140] sm:$0xf] }
  0x56   :  { %1158 = vmatpush.bf16.xpose.msrb.mxu3 %v1604_v3  ;;  %v2015_v3 = vld [vmem:[%s3191_s0 + $0x150] sm:$0xf0]  ;;  %v1352_v13 = vor.u32 %v1977_v1, %v1351_v0  ;;  %v1592_v0 = vor.u32 %v2037_v58, %v1591_v57  ;;  %v1811_v57 = vld [vmem:[%s3191_s0 + $0x3a8] sm:$0xf]  ;;  %v2092_v58 = vld [vmem:[%s3191_s0 + $0x3b8] sm:$0xf0] }
  0x57   :  { %v1496_v19 = vor.u32 %v2015_v3, %v1495_v2  ;;  %v2029_v3 = vld [vmem:[%s3191_s0 + $0x1c4] sm:$0xf] }
  0x58   :  { %v1568_v11 = vor.u32 %v2029_v3, %v1565_v4  ;;  %v1783_v4 = vld [vmem:[%s3191_s0 + $0x378] sm:$0xf] }
  0x5c   :  { %1120 = vmatpush.bf16.xpose.msrb.mxu0 %v1432_v21  ;;  %v2088_v21 = vld [vmem:[%s3191_s0 + $0x39c] sm:$0xf] }
  0x5d   :  { %1133 = vmatpush.bf16.xpose.msrb.mxu1 %v1576_v23  ;;  %1146 = vmatpush.bf16.xpose.msrb.mxu2 %v1580_v24  ;;  %v1797_v23 = vld [vmem:[%s3191_s0 + $0x3ac] sm:$0xf0]  ;;  %v1504_v24 = vor.u32 %v2016_v7, %v1503_v6  ;;  %v2032_v6 = vld [vmem:[%s3191_s0 + $0x1d8] sm:$0xf0]  ;;  %v1715_v7 = vld [vmem:[%s3191_s0 + $0x2f8] sm:$0xf] }
  0x5e   :  { %1159 = vmatpush.bf16.xpose.msrb.mxu3 %v1584_v25  ;;  %v1648_v25 = vor.u32 %v2049_v8, %v1645_v9  ;;  %v1800_v29 = vor.u32 %v2088_v21, %v1797_v23  ;;  %v2070_v8 = vld [vmem:[%s3191_s0 + $0x308] sm:$0xf0]  ;;  %v2068_v9 = vld [vmem:[%s3191_s0 + $0x2fc] sm:$0xf]  ;;  %v2027_v21 = vld [vmem:[%s3191_s0 + $0x1b0] sm:$0xf0] }
  0x5f   :  { %v1716_v14 = vor.u32 %v2070_v8, %v1715_v7  ;;  %v1720_v15 = vor.u32 %v2068_v9, %v1717_v10  ;;  %v1695_v23 = vld [vmem:[%s3191_s0 + $0x2d0] sm:$0xf]  ;;  %v1791_v8 = vld [vmem:[%s3191_s0 + $0x380] sm:$0xf]  ;;  %v2087_v9 = vld [vmem:[%s3191_s0 + $0x390] sm:$0xf0] }
  0x60   :  { %v1785_v7 = vld [vmem:[%s3191_s0 + $0x38c] sm:$0xf0] }
  0x61   :  { %v1935_v10 = vld [vmem:[%s3191_s0 + $0x4b0] sm:$0xf] }
  0x64   :  { %1121 = vmatpush.bf16.xpose.msrb.mxu0 %v1412_v34  ;;  %v2047_v34 = vld [vmem:[%s3191_s0 + $0x250] sm:$0xf0] }
  0x65   :  { %1134 = vmatpush.bf16.xpose.msrb.mxu1 %v1556_v35  ;;  %1147 = vmatpush.bf16.xpose.msrb.mxu2 %v1560_v36  ;;  %v1775_v35 = vld [vmem:[%s3191_s0 + $0x370] sm:$0xf]  ;;  %v2085_v36 = vld [vmem:[%s3191_s0 + $0x380] sm:$0xf0]  ;;  %v1632_v40 = vor.u32 %v2047_v34, %v1631_v33  ;;  %v1525_v33 = vld [vmem:[%s3191_s0 + $0x184] sm:$0xf0] }
  0x66   :  { %1160 = vmatpush.bf16.xpose.msrb.mxu3 %v1564_v37  ;;  %v2083_v37 = vld [vmem:[%s3191_s0 + $0x374] sm:$0xf]  ;;  %v1776_v41 = vor.u32 %v2085_v36, %v1775_v35  ;;  %v1531_v34 = vld [vmem:[%s3191_s0 + $0x178] sm:$0xf]  ;;  %v2022_v35 = vld [vmem:[%s3191_s0 + $0x188] sm:$0xf0] }
  0x67   :  { %v1780_v42 = vor.u32 %v2083_v37, %v1777_v38  ;;  %v1675_v36 = vld [vmem:[%s3191_s0 + $0x2a8] sm:$0xf]  ;;  %v2060_v37 = vld [vmem:[%s3191_s0 + $0x2b8] sm:$0xf0]  ;;  %v2058_v38 = vld [vmem:[%s3191_s0 + $0x2ac] sm:$0xf] }
  0x6c   :  { %1122 = vmatpush.bf16.xpose.msrb.mxu0 %v1392_v46  ;;  %v2042_v46 = vld [vmem:[%s3191_s0 + $0x228] sm:$0xf0] }
  0x6d   :  { %1135 = vmatpush.bf16.xpose.msrb.mxu1 %v1536_v48  ;;  %1148 = vmatpush.bf16.xpose.msrb.mxu2 %v1540_v49  ;;  %v2080_v48 = vld [vmem:[%s3191_s0 + $0x358] sm:$0xf0]  ;;  %v2078_v49 = vld [vmem:[%s3191_s0 + $0x34c] sm:$0xf]  ;;  %v1612_v52 = vor.u32 %v2042_v46, %v1611_v45  ;;  %v1505_v45 = vld [vmem:[%s3191_s0 + $0x15c] sm:$0xf0] }
  0x6e   :  { %1161 = vmatpush.bf16.xpose.msrb.mxu3 %v1544_v51  ;;  %v1608_v51 = vor.u32 %v2039_v43, %v1605_v44  ;;  %v1756_v53 = vor.u32 %v2080_v48, %v1755_v47  ;;  %v1760_v54 = vor.u32 %v2078_v49, %v1757_v50  ;;  %v2014_v44 = vld [vmem:[%s3191_s0 + $0x14c] sm:$0xf]  ;;  %v1511_v46 = vld [vmem:[%s3191_s0 + $0x150] sm:$0xf]  ;;  %v2017_v47 = vld [vmem:[%s3191_s0 + $0x160] sm:$0xf0] }
  0x6f   :  { %v1655_v48 = vld [vmem:[%s3191_s0 + $0x280] sm:$0xf]  ;;  %v2055_v49 = vld [vmem:[%s3191_s0 + $0x290] sm:$0xf0]  ;;  %v2053_v50 = vld [vmem:[%s3191_s0 + $0x284] sm:$0xf] }
  0x74   :  { %1123 = vmatpush.bf16.xpose.msrb.mxu0 %v1372_v60  ;;  %v2075_v60 = vld [vmem:[%s3191_s0 + $0x330] sm:$0xf0] }
  0x75   :  { %1136 = vmatpush.bf16.xpose.msrb.mxu1 %v1516_v61  ;;  %1149 = vmatpush.bf16.xpose.msrb.mxu2 %v1520_v62  ;;  %v2073_v61 = vld [vmem:[%s3191_s0 + $0x324] sm:$0xf]  ;;  %v1737_v62 = vld [vmem:[%s3191_s0 + $0x334] sm:$0xf0]  ;;  %v1736_v1 = vor.u32 %v2075_v60, %v1735_v59  ;;  %v1512_v59 = vor.u32 %v2017_v47, %v1511_v46  ;;  %v1656_v60 = vor.u32 %v2055_v49, %v1655_v48  ;;  %v2071_v46 = vld [vmem:[%s3191_s0 + $0x310] sm:$0xf0] }
  0x76   :  { %1162 = vmatpush.bf16.xpose.msrb.mxu3 %v1524_v63  ;;  %v1588_v63 = vor.u32 %v2034_v55, %v1585_v56  ;;  %v1740_v2 = vor.u32 %v2073_v61, %v1737_v62  ;;  %v1508_v55 = vor.u32 %v2014_v44, %v1505_v45  ;;  %v1805_v56 = vld [vmem:[%s3191_s0 + $0x3b4] sm:$0xf0]  ;;  %v2130_v62 = vld [vmem:[%s3191_s0 + $0x4e8] sm:$0xf0]  ;;  %v1723_v45 = vld [vmem:[%s3191_s0 + $0x300] sm:$0xf] }
  0x77   :  { %v1955_v61 = vld [vmem:[%s3191_s0 + $0x4d8] sm:$0xf]  ;;  %v2069_v47 = vld [vmem:[%s3191_s0 + $0x304] sm:$0xf]  ;;  %v1731_v49 = vld [vmem:[%s3191_s0 + $0x308] sm:$0xf] }
  0x78   :  { %v1956_v3 = vor.u32 %v2130_v62, %v1955_v61  ;;  %v1725_v48 = vld [vmem:[%s3191_s0 + $0x314] sm:$0xf0]  ;;  %v1705_v61 = vld [vmem:[%s3191_s0 + $0x2ec] sm:$0xf0]  ;;  %v1711_v62 = vld [vmem:[%s3191_s0 + $0x2e0] sm:$0xf] }
  0x7c   :  { %1124 = vmatpush.bf16.xpose.msrb.mxu0 %v1352_v13  ;;  %v1572_v13 = vor.u32 %v2032_v6, %v1571_v5  ;;  %v2086_v5 = vld [vmem:[%s3191_s0 + $0x388] sm:$0xf0]  ;;  %v2084_v6 = vld [vmem:[%s3191_s0 + $0x37c] sm:$0xf] }
  0x7d   :  { %1137 = vmatpush.bf16.xpose.msrb.mxu1 %v1496_v19  ;;  %1150 = vmatpush.bf16.xpose.msrb.mxu2 %v1500_v20  ;;  %v1545_v19 = vld [vmem:[%s3191_s0 + $0x1ac] sm:$0xf0]  ;;  %v1551_v20 = vld [vmem:[%s3191_s0 + $0x1a0] sm:$0xf] }
  0x7e   :  { %1163 = vmatpush.bf16.xpose.msrb.mxu3 %v1504_v24  ;;  %v2065_v24 = vld [vmem:[%s3191_s0 + $0x2e0] sm:$0xf0]  ;;  %v1552_v28 = vor.u32 %v2027_v21, %v1551_v20  ;;  %v2079_v21 = vld [vmem:[%s3191_s0 + $0x354] sm:$0xf] }
  0x7f   :  { %v2081_v20 = vld [vmem:[%s3191_s0 + $0x360] sm:$0xf0] }
  0x83   :  { %1125 = vmatmul.bf16.vlgmr.msrb.gmra.mxu0 %v2588_v30 }
  0x84   :  { %1169 = vmatpush.bf16.xpose.msra.mxu0 %v1648_v25  ;;  %1151 = vmatmul.bf16.vlgmr.msrb.gmra.mxu2 %v2459_v22  ;;  %v2063_v25 = vld [vmem:[%s3191_s0 + $0x2d4] sm:$0xf] }
  0x85   :  { %1182 = vmatpush.bf16.xpose.msra.mxu1 %v1652_v26  ;;  %1195 = vmatpush.bf16.xpose.msra.mxu2 %v1796_v27  ;;  %v1697_v26 = vld [vmem:[%s3191_s0 + $0x2e4] sm:$0xf0]  ;;  %v1548_v27 = vor.u32 %v2024_v18, %v1545_v19  ;;  %v1763_v19 = vld [vmem:[%s3191_s0 + $0x350] sm:$0xf] }
  0x86   :  { %1208 = vmatpush.bf16.xpose.msra.mxu3 %v1800_v29  ;;  %1138 = vmatmul.bf16.vlgmr.msrb.gmra.mxu1 %v2435_v12  ;;  %v1696_v29 = vor.u32 %v2065_v24, %v1695_v23  ;;  %v1700_v31 = vor.u32 %v2063_v25, %v1697_v26  ;;  %v1765_v23 = vld [vmem:[%s3191_s0 + $0x364] sm:$0xf0]  ;;  %v1771_v24 = vld [vmem:[%s3191_s0 + $0x358] sm:$0xf]  ;;  %v2082_v25 = vld [vmem:[%s3191_s0 + $0x368] sm:$0xf0] }
  0x87   :  { %1164 = vmatmul.bf16.vlgmr.msrb.gmra.mxu3 %v2446_v16  ;;  %v1915_v26 = vld [vmem:[%s3191_s0 + $0x488] sm:$0xf] }
  0x8c   :  { %1170 = vmatpush.bf16.xpose.msra.mxu0 %v1628_v39  ;;  %v1677_v39 = vld [vmem:[%s3191_s0 + $0x2bc] sm:$0xf0] }
  0x8d   :  { %1183 = vmatpush.bf16.xpose.msra.mxu1 %v1632_v40  ;;  %1196 = vmatpush.bf16.xpose.msra.mxu2 %v1776_v41  ;;  %v1528_v40 = vor.u32 %v2019_v32, %v1525_v33  ;;  %v1532_v41 = vor.u32 %v2022_v35, %v1531_v34  ;;  %v1680_v43 = vor.u32 %v2058_v38, %v1677_v39  ;;  %v1743_v33 = vld [vmem:[%s3191_s0 + $0x328] sm:$0xf]  ;;  %v2076_v34 = vld [vmem:[%s3191_s0 + $0x338] sm:$0xf0]  ;;  %v2074_v35 = vld [vmem:[%s3191_s0 + $0x32c] sm:$0xf] }
  0x8e   :  { %1209 = vmatpush.bf16.xpose.msra.mxu3 %v1780_v42  ;;  %v1676_v42 = vor.u32 %v2060_v37, %v1675_v36  ;;  %v1745_v36 = vld [vmem:[%s3191_s0 + $0x33c] sm:$0xf0]  ;;  %v1751_v37 = vld [vmem:[%s3191_s0 + $0x330] sm:$0xf]  ;;  %v2077_v38 = vld [vmem:[%s3191_s0 + $0x340] sm:$0xf0] }
  0x8f   :  { %v1895_v39 = vld [vmem:[%s3191_s0 + $0x460] sm:$0xf] }
  0x94   :  { %1171 = vmatpush.bf16.xpose.msra.mxu0 %v1608_v51  ;;  %v1657_v51 = vld [vmem:[%s3191_s0 + $0x294] sm:$0xf0] }
  0x95   :  { %1184 = vmatpush.bf16.xpose.msra.mxu1 %v1612_v52  ;;  %1197 = vmatpush.bf16.xpose.msra.mxu2 %v1756_v53  ;;  %v1803_v52 = vld [vmem:[%s3191_s0 + $0x3a0] sm:$0xf]  ;;  %v2091_v53 = vld [vmem:[%s3191_s0 + $0x3b0] sm:$0xf0] }
  0x96   :  { %1210 = vmatpush.bf16.xpose.msra.mxu3 %v1760_v54  ;;  %v2089_v54 = vld [vmem:[%s3191_s0 + $0x3a4] sm:$0xf] }
  0x9c   :  { %1172 = vmatpush.bf16.xpose.msra.mxu0 %v1588_v63  ;;  %v1660_v63 = vor.u32 %v2053_v50, %v1657_v51  ;;  %v2072_v50 = vld [vmem:[%s3191_s0 + $0x318] sm:$0xf0]  ;;  %v1875_v51 = vld [vmem:[%s3191_s0 + $0x438] sm:$0xf] }
  0x9d   :  { %1185 = vmatpush.bf16.xpose.msra.mxu1 %v1592_v0  ;;  %1198 = vmatpush.bf16.xpose.msra.mxu2 %v1736_v1  ;;  %v1804_v0 = vor.u32 %v2091_v53, %v1803_v52  ;;  %v1808_v1 = vor.u32 %v2089_v54, %v1805_v56  ;;  %v2110_v52 = vld [vmem:[%s3191_s0 + $0x448] sm:$0xf0]  ;;  %v1724_v53 = vor.u32 %v2071_v46, %v1723_v45 }
  0x9e   :  { %1211 = vmatpush.bf16.xpose.msra.mxu3 %v1740_v2  ;;  %v1812_v2 = vor.u32 %v2092_v58, %v1811_v57  ;;  %v1732_v56 = vor.u32 %v2072_v50, %v1731_v49  ;;  %v1876_v57 = vor.u32 %v2110_v52, %v1875_v51  ;;  %v1703_v58 = vld [vmem:[%s3191_s0 + $0x2d8] sm:$0xf]  ;;  %v2990_v51 = vpop.permute.xlu0 %212 }
  0xa4   :  { %1173 = vmatpush.bf16.xpose.msra.mxu0 %v1568_v11  ;;  %v2125_v11 = vld [vmem:[%s3191_s0 + $0x4c0] sm:$0xf0] }
  0xa5   :  { %1186 = vmatpush.bf16.xpose.msra.mxu1 %v1572_v13  ;;  %1199 = vmatpush.bf16.xpose.msra.mxu2 %v1716_v14  ;;  %v1784_v13 = vor.u32 %v2086_v5, %v1783_v4  ;;  %v1788_v14 = vor.u32 %v2084_v6, %v1785_v7  ;;  %v1936_v18 = vor.u32 %v2125_v11, %v1935_v10  ;;  %v1683_v10 = vld [vmem:[%s3191_s0 + $0x2b0] sm:$0xf]  ;;  %v2061_v11 = vld [vmem:[%s3191_s0 + $0x2c0] sm:$0xf0] }
  0xa6   :  { %1212 = vmatpush.bf16.xpose.msra.mxu3 %v1720_v15  ;;  %v1792_v15 = vor.u32 %v2087_v9, %v1791_v8 }
  0xac   :  { %1174 = vmatpush.bf16.xpose.msra.mxu0 %v1548_v27  ;;  %v2120_v27 = vld [vmem:[%s3191_s0 + $0x498] sm:$0xf0] }
  0xad   :  { %1187 = vmatpush.bf16.xpose.msra.mxu1 %v1552_v28  ;;  %1200 = vmatpush.bf16.xpose.msra.mxu2 %v1696_v29  ;;  %v1764_v28 = vor.u32 %v2081_v20, %v1763_v19  ;;  %v1768_v29 = vor.u32 %v2079_v21, %v1765_v23  ;;  %v1916_v32 = vor.u32 %v2120_v27, %v1915_v26  ;;  %v1835_v19 = vld [vmem:[%s3191_s0 + $0x3e8] sm:$0xf]  ;;  %v2100_v20 = vld [vmem:[%s3191_s0 + $0x3f8] sm:$0xf0] }
  0xae   :  { %1213 = vmatpush.bf16.xpose.msra.mxu3 %v1700_v31  ;;  %v1772_v31 = vor.u32 %v2082_v25, %v1771_v24  ;;  %v1684_v21 = vor.u32 %v2061_v11, %v1683_v10  ;;  %v1923_v10 = vld [vmem:[%s3191_s0 + $0x490] sm:$0xf]  ;;  %v1925_v11 = vld [vmem:[%s3191_s0 + $0x4a4] sm:$0xf0] }
  0xb4   :  { %1175 = vmatpush.bf16.xpose.msra.mxu0 %v1528_v40  ;;  %v2115_v40 = vld [vmem:[%s3191_s0 + $0x470] sm:$0xf0] }
  0xb5   :  { %1188 = vmatpush.bf16.xpose.msra.mxu1 %v1532_v41  ;;  %1201 = vmatpush.bf16.xpose.msra.mxu2 %v1676_v42  ;;  %v1744_v41 = vor.u32 %v2076_v34, %v1743_v33  ;;  %v1748_v42 = vor.u32 %v2074_v35, %v1745_v36  ;;  %v1896_v44 = vor.u32 %v2115_v40, %v1895_v39  ;;  %v1665_v33 = vld [vmem:[%s3191_s0 + $0x29c] sm:$0xf0]  ;;  %v1671_v34 = vld [vmem:[%s3191_s0 + $0x290] sm:$0xf]  ;;  %v2057_v35 = vld [vmem:[%s3191_s0 + $0x2a0] sm:$0xf0] }
  0xb6   :  { %1214 = vmatpush.bf16.xpose.msra.mxu3 %v1680_v43  ;;  %v1752_v43 = vor.u32 %v2077_v38, %v1751_v37  ;;  %v1815_v36 = vld [vmem:[%s3191_s0 + $0x3c0] sm:$0xf]  ;;  %v2095_v37 = vld [vmem:[%s3191_s0 + $0x3d0] sm:$0xf0]  ;;  %v2128_v38 = vld [vmem:[%s3191_s0 + $0x4dc] sm:$0xf]  ;;  %v1672_v46 = vor.u32 %v2057_v35, %v1671_v34 }
  0xb7   :  { %v1957_v39 = vld [vmem:[%s3191_s0 + $0x4ec] sm:$0xf0]  ;;  %v1963_v40 = vld [vmem:[%s3191_s0 + $0x4e0] sm:$0xf]  ;;  %v1816_v49 = vor.u32 %v2095_v37, %v1815_v36 }
  0xb8   :  { %v1960_v50 = vor.u32 %v2128_v38, %v1957_v39  ;;  %v2108_v38 = vld [vmem:[%s3191_s0 + $0x43c] sm:$0xf]  ;;  %v1877_v39 = vld [vmem:[%s3191_s0 + $0x44c] sm:$0xf0] }
  0xbc   :  { %1176 = vmatpush.bf16.xpose.msra.mxu0 %v1508_v55  ;;  %v1728_v55 = vor.u32 %v2069_v47, %v1725_v48  ;;  %v1971_v47 = vld [vmem:[%s3191_s0 + $0x4e8] sm:$0xf]  ;;  %v2132_v48 = vld [vmem:[%s3191_s0 + $0x4f8] sm:$0xf0] }
  0xbd   :  { %1189 = vmatpush.bf16.xpose.msra.mxu1 %v1512_v59  ;;  %1202 = vmatpush.bf16.xpose.msra.mxu2 %v1656_v60  ;;  %v2066_v59 = vld [vmem:[%s3191_s0 + $0x2e8] sm:$0xf0]  ;;  %v2064_v60 = vld [vmem:[%s3191_s0 + $0x2dc] sm:$0xf] }
  0xbe   :  { %1215 = vmatpush.bf16.xpose.msra.mxu3 %v1660_v63  ;;  %v2067_v63 = vld [vmem:[%s3191_s0 + $0x2f0] sm:$0xf0]  ;;  %v1708_v5 = vor.u32 %v2064_v60, %v1705_v61  ;;  %v2124_v60 = vld [vmem:[%s3191_s0 + $0x4bc] sm:$0xf]  ;;  %v1945_v61 = vld [vmem:[%s3191_s0 + $0x4cc] sm:$0xf0] }
  0xbf   :  { %v1712_v6 = vor.u32 %v2067_v63, %v1711_v62  ;;  %v1951_v62 = vld [vmem:[%s3191_s0 + $0x4c0] sm:$0xf]  ;;  %v2127_v63 = vld [vmem:[%s3191_s0 + $0x4d0] sm:$0xf0] }
  0xc0   :  { %v2886_v54 = vpop.f32.mrf.mxu0 }
  0xc3   :  { %1177 = vmatmul.bf16.vlgmr.msra.gmra.mxu0 %v2448_v17 }
  0xc4   :  { %1221 = vmatpush.bf16.xpose.msrb.mxu0 %v1804_v0  ;;  %1190 = vmatmul.bf16.vlgmr.msra.gmra.mxu1 %v2588_v30  ;;  %v1855_v0 = vld [vmem:[%s3191_s0 + $0x410] sm:$0xf] }
  0xc5   :  { %1234 = vmatpush.bf16.xpose.msrb.mxu1 %v1808_v1  ;;  %1247 = vmatpush.bf16.xpose.msrb.mxu2 %v1812_v2  ;;  %v2105_v1 = vld [vmem:[%s3191_s0 + $0x420] sm:$0xf0]  ;;  %v1704_v2 = vor.u32 %v2066_v59, %v1703_v58  ;;  %v1937_v58 = vld [vmem:[%s3191_s0 + $0x4c4] sm:$0xf0]  ;;  %v1943_v59 = vld [vmem:[%s3191_s0 + $0x4b8] sm:$0xf] }
  0xc6   :  { %1260 = vmatpush.bf16.xpose.msrb.mxu3 %v1956_v3  ;;  %1203 = vmatmul.bf16.vlgmr.msra.gmra.mxu2 %v2435_v12  ;;  %v2912_v3 = vpop.f32.mrf.mxu1  ;;  %v1856_v8 = vor.u32 %v2105_v1, %v1855_v0 }
  0xc7   :  { %1216 = vmatmul.bf16.vlgmr.msra.gmra.mxu3 %v2459_v22  ;;  %v2914_v4 = vpop.f32.mrf.mxu2 }
  0xc8   :  { %v1076_v9 = vpop.f32.mrf.mxu0 }
  0xc9   :  { %v1917_v9 = vld [vmem:[%s3191_s0 + $0x49c] sm:$0xf0] }
  0xca   :  { %v2916_v7 = vpop.f32.mrf.mxu3 }
  0xcc   :  { %1222 = vmatpush.bf16.xpose.msrb.mxu0 %v1784_v13  ;;  %v2059_v13 = vld [vmem:[%s3191_s0 + $0x2b4] sm:$0xf] }
  0xcd   :  { %1235 = vmatpush.bf16.xpose.msrb.mxu1 %v1788_v14  ;;  %1248 = vmatpush.bf16.xpose.msrb.mxu2 %v1792_v15  ;;  %v1685_v14 = vld [vmem:[%s3191_s0 + $0x2c4] sm:$0xf0]  ;;  %v1691_v15 = vld [vmem:[%s3191_s0 + $0x2b8] sm:$0xf] }
  0xce   :  { %1261 = vmatpush.bf16.xpose.msrb.mxu3 %v1936_v18  ;;  %v2062_v18 = vld [vmem:[%s3191_s0 + $0x2c8] sm:$0xf0]  ;;  %v1089_v23 = vpop.f32.mrf.mxu1  ;;  %v1688_v25 = vor.u32 %v2059_v13, %v1685_v14  ;;  %v1931_v13 = vld [vmem:[%s3191_s0 + $0x498] sm:$0xf] }
  0xcf   :  { %v1102_v24 = vpop.f32.mrf.mxu2  ;;  %v1692_v26 = vor.u32 %v2062_v18, %v1691_v15  ;;  %v2122_v14 = vld [vmem:[%s3191_s0 + $0x4a8] sm:$0xf0] }
  0xd2   :  { %v1115_v27 = vpop.f32.mrf.mxu3 }
  0xd3   :  { %v2116_v27 = vld [vmem:[%s3191_s0 + $0x478] sm:$0xf0] }
  0xd4   :  { %1223 = vmatpush.bf16.xpose.msrb.mxu0 %v1764_v28  ;;  %v1836_v28 = vor.u32 %v2100_v20, %v1835_v19 }
  0xd5   :  { %1236 = vmatpush.bf16.xpose.msrb.mxu1 %v1768_v29  ;;  %1249 = vmatpush.bf16.xpose.msrb.mxu2 %v1772_v31  ;;  %v1663_v29 = vld [vmem:[%s3191_s0 + $0x288] sm:$0xf]  ;;  %v2056_v31 = vld [vmem:[%s3191_s0 + $0x298] sm:$0xf0] }
  0xd6   :  { %1262 = vmatpush.bf16.xpose.msrb.mxu3 %v1916_v32  ;;  %v2054_v32 = vld [vmem:[%s3191_s0 + $0x28c] sm:$0xf] }
  0xd7   :  { %v1668_v45 = vor.u32 %v2054_v32, %v1665_v33  ;;  %v2117_v32 = vld [vmem:[%s3191_s0 + $0x480] sm:$0xf0] }
  0xdc   :  { %1224 = vmatpush.bf16.xpose.msrb.mxu0 %v1744_v41  ;;  %v1664_v41 = vor.u32 %v2056_v31, %v1663_v29  ;;  %v1905_v29 = vld [vmem:[%s3191_s0 + $0x47c] sm:$0xf0]  ;;  %v1911_v31 = vld [vmem:[%s3191_s0 + $0x470] sm:$0xf] }
  0xdd   :  { %1237 = vmatpush.bf16.xpose.msrb.mxu1 %v1748_v42  ;;  %1250 = vmatpush.bf16.xpose.msrb.mxu2 %v1752_v43  ;;  %v2131_v42 = vld [vmem:[%s3191_s0 + $0x4f0] sm:$0xf0]  ;;  %v2129_v43 = vld [vmem:[%s3191_s0 + $0x4e4] sm:$0xf]  ;;  %v1912_v36 = vor.u32 %v2117_v32, %v1911_v31 }
  0xde   :  { %1263 = vmatpush.bf16.xpose.msrb.mxu3 %v1896_v44  ;;  %v1965_v44 = vld [vmem:[%s3191_s0 + $0x4f4] sm:$0xf0]  ;;  %v1964_v52 = vor.u32 %v2131_v42, %v1963_v40  ;;  %v1883_v40 = vld [vmem:[%s3191_s0 + $0x440] sm:$0xf]  ;;  %v2109_v42 = vld [vmem:[%s3191_s0 + $0x444] sm:$0xf] }
  0xe4   :  { %1225 = vmatpush.bf16.xpose.msrb.mxu0 %v1724_v53  ;;  %v1968_v53 = vor.u32 %v2129_v43, %v1965_v44  ;;  %v1885_v43 = vld [vmem:[%s3191_s0 + $0x454] sm:$0xf0] }
  0xe5   :  { %1238 = vmatpush.bf16.xpose.msrb.mxu1 %v1728_v55  ;;  %1251 = vmatpush.bf16.xpose.msrb.mxu2 %v1732_v56  ;;  %v1972_v55 = vor.u32 %v2132_v48, %v1971_v47  ;;  %v1075_v56 = vadd.f32 %v2886_v54, %v2990_v51  ;;  %v2126_v54 = vld [vmem:[%s3191_s0 + $0x4c8] sm:$0xf0]  ;;  %v1880_v47 = vor.u32 %v2108_v38, %v1877_v39 }
  0xe6   :  { %1264 = vmatpush.bf16.xpose.msrb.mxu3 %v1876_v57  ;;  %v2123_v57 = vld [vmem:[%s3191_s0 + $0x4b4] sm:$0xf] }
  0xe7   :  { %v1088_v0 = vadd.f32 %v2912_v3, %v1075_v56  ;;  %v1940_v1 = vor.u32 %v2123_v57, %v1937_v58  ;;  %v2118_v3 = vld [vmem:[%s3191_s0 + $0x48c] sm:$0xf] }
  0xe8   :  { %v1920_v18 = vor.u32 %v2118_v3, %v1917_v9  ;;  %v2106_v58 = vld [vmem:[%s3191_s0 + $0x428] sm:$0xf0] }
  0xec   :  { %1226 = vmatpush.bf16.xpose.msrb.mxu0 %v1704_v2  ;;  %v1944_v2 = vor.u32 %v2126_v54, %v1943_v59  ;;  %v2104_v59 = vld [vmem:[%s3191_s0 + $0x41c] sm:$0xf]  ;;  %v1865_v54 = vld [vmem:[%s3191_s0 + $0x42c] sm:$0xf0] }
  0xed   :  { %1239 = vmatpush.bf16.xpose.msrb.mxu1 %v1708_v5  ;;  %1252 = vmatpush.bf16.xpose.msrb.mxu2 %v1712_v6  ;;  %v1948_v5 = vor.u32 %v2124_v60, %v1945_v61  ;;  %v1952_v6 = vor.u32 %v2127_v63, %v1951_v62  ;;  %v1871_v61 = vld [vmem:[%s3191_s0 + $0x420] sm:$0xf]  ;;  %v2107_v62 = vld [vmem:[%s3191_s0 + $0x430] sm:$0xf0] }
  0xee   :  { %1265 = vmatpush.bf16.xpose.msrb.mxu3 %v1856_v8  ;;  %v1101_v8 = vadd.f32 %v2914_v4, %v1088_v0  ;;  %v2119_v4 = vld [vmem:[%s3191_s0 + $0x494] sm:$0xf] }
  0xef   :  { %v1928_v20 = vor.u32 %v2119_v4, %v1925_v11  ;;  %v1845_v4 = vld [vmem:[%s3191_s0 + $0x404] sm:$0xf0]  ;;  %v1851_v11 = vld [vmem:[%s3191_s0 + $0x3f8] sm:$0xf] }
  0xf0   :  { %v1114_v15 = vadd.f32 %v2916_v7, %v1101_v8  ;;  %v1897_v7 = vld [vmem:[%s3191_s0 + $0x474] sm:$0xf0]  ;;  %v1843_v8 = vld [vmem:[%s3191_s0 + $0x3f0] sm:$0xf] }
  0xf4   :  { %1227 = vmatpush.bf16.xpose.msrb.mxu0 %v1684_v21  ;;  %v1932_v21 = vor.u32 %v2122_v14, %v1931_v13  ;;  %v2102_v13 = vld [vmem:[%s3191_s0 + $0x408] sm:$0xf0] }
  0xf5   :  { %1240 = vmatpush.bf16.xpose.msrb.mxu1 %v1688_v25  ;;  %1253 = vmatpush.bf16.xpose.msrb.mxu2 %v1692_v26  ;;  %v2113_v25 = vld [vmem:[%s3191_s0 + $0x464] sm:$0xf]  ;;  %v1903_v26 = vld [vmem:[%s3191_s0 + $0x468] sm:$0xf] }
  0xf6   :  { %1266 = vmatpush.bf16.xpose.msrb.mxu3 %v1836_v28  ;;  %v2114_v28 = vld [vmem:[%s3191_s0 + $0x46c] sm:$0xf]  ;;  %v1900_v33 = vor.u32 %v2113_v25, %v1897_v7  ;;  %v1904_v34 = vor.u32 %v2116_v27, %v1903_v26  ;;  %v1825_v7 = vld [vmem:[%s3191_s0 + $0x3dc] sm:$0xf0]  ;;  %v1831_v26 = vld [vmem:[%s3191_s0 + $0x3d0] sm:$0xf] }
  0xf7   :  { %v1908_v35 = vor.u32 %v2114_v28, %v1905_v29  ;;  %v2094_v25 = vld [vmem:[%s3191_s0 + $0x3cc] sm:$0xf]  ;;  %v2097_v27 = vld [vmem:[%s3191_s0 + $0x3e0] sm:$0xf0] }
  0xf8   :  { %v1828_v31 = vor.u32 %v2094_v25, %v1825_v7  ;;  %v1832_v32 = vor.u32 %v2097_v27, %v1831_v26 }
  0xfc   :  { %1228 = vmatpush.bf16.xpose.msrb.mxu0 %v1664_v41  ;;  %v2111_v41 = vld [vmem:[%s3191_s0 + $0x450] sm:$0xf0] }
  0xfd   :  { %1241 = vmatpush.bf16.xpose.msrb.mxu1 %v1668_v45  ;;  %1254 = vmatpush.bf16.xpose.msrb.mxu2 %v1672_v46  ;;  %v1891_v45 = vld [vmem:[%s3191_s0 + $0x448] sm:$0xf]  ;;  %v2112_v46 = vld [vmem:[%s3191_s0 + $0x458] sm:$0xf0]  ;;  %v1884_v48 = vor.u32 %v2111_v41, %v1883_v40 }
  0xfe   :  { %1267 = vmatpush.bf16.xpose.msrb.mxu3 %v1816_v49  ;;  %v1888_v49 = vor.u32 %v2109_v42, %v1885_v43 }
 0x100   :  { %v1126_v23 = vpop.f32.mrf.mxu0 }
 0x101   :  { %v1127_v24 = vadd.f32 %v1126_v23, %v1114_v15  ;;  %v1823_v23 = vld [vmem:[%s3191_s0 + $0x3c8] sm:$0xf] }
 0x103   :  { %1229 = vmatmul.bf16.vlgmr.msrb.gmra.mxu0 %v2446_v16  ;;  %1325 = vst [vmem:[%s3194_s3] sm:$0xff] %v1127_v24  ;;  %v3094_v44 = vpop.f32.mrf.mxu1  ;;  %v2096_v24 = vld [vmem:[%s3191_s0 + $0x3d8] sm:$0xf0] }
 0x104   :  { %1273 = vmatpush.bf16.xpose.msra.mxu0 %v1960_v50  ;;  %1255 = vmatmul.bf16.vlgmr.msrb.gmra.mxu2 %v2588_v30  ;;  %v1892_v50 = vor.u32 %v2112_v46, %v1891_v45  ;;  %v1824_v29 = vor.u32 %v2096_v24, %v1823_v23 }
 0x105   :  { %1286 = vmatpush.bf16.xpose.msra.mxu1 %v1964_v52  ;;  %1299 = vmatpush.bf16.xpose.msra.mxu2 %v1968_v53  ;;  %v2103_v52 = vld [vmem:[%s3191_s0 + $0x414] sm:$0xf]  ;;  %v1857_v53 = vld [vmem:[%s3191_s0 + $0x424] sm:$0xf0] }
 0x106   :  { %1312 = vmatpush.bf16.xpose.msra.mxu3 %v1972_v55  ;;  %1242 = vmatmul.bf16.vlgmr.msrb.gmra.mxu1 %v2448_v17  ;;  %v1863_v55 = vld [vmem:[%s3191_s0 + $0x418] sm:$0xf]  ;;  %v1860_v63 = vor.u32 %v2103_v52, %v1857_v53 }
 0x107   :  { %1268 = vmatmul.bf16.vlgmr.msrb.gmra.mxu3 %v2435_v12  ;;  %v2121_v12 = vld [vmem:[%s3191_s0 + $0x4a0] sm:$0xf0]  ;;  %v1152_v56 = vpop.f32.mrf.mxu2  ;;  %v1864_v0 = vor.u32 %v2106_v58, %v1863_v55 }
 0x108   :  { %v1924_v19 = vor.u32 %v2121_v12, %v1923_v10  ;;  %v1128_v37 = vpop.f32.mrf.mxu0  ;;  %v2101_v10 = vld [vmem:[%s3191_s0 + $0x400] sm:$0xf0]  ;;  %v2099_v12 = vld [vmem:[%s3191_s0 + $0x3f4] sm:$0xf] }
 0x109   :  { %v1844_v15 = vor.u32 %v2101_v10, %v1843_v8 }
 0x10a   :  { %v1165_v57 = vpop.f32.mrf.mxu3 }
 0x10b   :  { %v1141_v60 = vpop.f32.mrf.mxu1 }
 0x10c   :  { %1274 = vmatpush.bf16.xpose.msra.mxu0 %v1940_v1  ;;  %v1868_v1 = vor.u32 %v2104_v59, %v1865_v54 }
 0x10d   :  { %1287 = vmatpush.bf16.xpose.msra.mxu1 %v1944_v2  ;;  %1300 = vmatpush.bf16.xpose.msra.mxu2 %v1948_v5  ;;  %v1872_v2 = vor.u32 %v2107_v62, %v1871_v61  ;;  %v2098_v5 = vld [vmem:[%s3191_s0 + $0x3ec] sm:$0xf] }
 0x10e   :  { %1313 = vmatpush.bf16.xpose.msra.mxu3 %v1952_v6  ;;  %v1837_v6 = vld [vmem:[%s3191_s0 + $0x3fc] sm:$0xf0] }
 0x10f   :  { %v1154_v3 = vpop.f32.mrf.mxu2  ;;  %v1840_v14 = vor.u32 %v2098_v5, %v1837_v6 }
 0x112   :  { %v1167_v9 = vpop.f32.mrf.mxu3 }
 0x114   :  { %1275 = vmatpush.bf16.xpose.msra.mxu0 %v1920_v18  ;;  %v1848_v18 = vor.u32 %v2099_v12, %v1845_v4 }
 0x115   :  { %1288 = vmatpush.bf16.xpose.msra.mxu1 %v1924_v19  ;;  %1301 = vmatpush.bf16.xpose.msra.mxu2 %v1928_v20  ;;  %v1852_v19 = vor.u32 %v2102_v13, %v1851_v11  ;;  %v2093_v20 = vld [vmem:[%s3191_s0 + $0x3c4] sm:$0xf] }
 0x116   :  { %1314 = vmatpush.bf16.xpose.msra.mxu3 %v1932_v21  ;;  %v1817_v21 = vld [vmem:[%s3191_s0 + $0x3d4] sm:$0xf0] }
 0x117   :  { %v1820_v28 = vor.u32 %v2093_v20, %v1817_v21 }
 0x11c   :  { %1276 = vmatpush.bf16.xpose.msra.mxu0 %v1900_v33  ;;  %v1140_v33 = vadd.f32 %v3094_v44, %v2990_v51 }
 0x11d   :  { %1289 = vmatpush.bf16.xpose.msra.mxu1 %v1904_v34  ;;  %1302 = vmatpush.bf16.xpose.msra.mxu2 %v1908_v35 }
 0x11e   :  { %1315 = vmatpush.bf16.xpose.msra.mxu3 %v1912_v36  ;;  %v1153_v34 = vadd.f32 %v1152_v56, %v1140_v33 }
 0x120   :  { %v1166_v35 = vadd.f32 %v1165_v57, %v1153_v34 }
 0x124   :  { %1277 = vmatpush.bf16.xpose.msra.mxu0 %v1880_v47 }
 0x125   :  { %1290 = vmatpush.bf16.xpose.msra.mxu1 %v1884_v48  ;;  %1303 = vmatpush.bf16.xpose.msra.mxu2 %v1888_v49 }
 0x126   :  { %1316 = vmatpush.bf16.xpose.msra.mxu3 %v1892_v50 }
 0x12c   :  { %1278 = vmatpush.bf16.xpose.msra.mxu0 %v1860_v63 }
 0x12d   :  { %1291 = vmatpush.bf16.xpose.msra.mxu1 %v1864_v0  ;;  %1304 = vmatpush.bf16.xpose.msra.mxu2 %v1868_v1 }
 0x12e   :  { %1317 = vmatpush.bf16.xpose.msra.mxu3 %v1872_v2 }
 0x134   :  { %1279 = vmatpush.bf16.xpose.msra.mxu0 %v1840_v14 }
 0x135   :  { %1292 = vmatpush.bf16.xpose.msra.mxu1 %v1844_v15  ;;  %1305 = vmatpush.bf16.xpose.msra.mxu2 %v1848_v18 }
 0x136   :  { %1318 = vmatpush.bf16.xpose.msra.mxu3 %v1852_v19 }
 0x13c   :  { %1280 = vmatpush.bf16.xpose.msra.mxu0 %v1820_v28 }
 0x13d   :  { %1293 = vmatpush.bf16.xpose.msra.mxu1 %v1824_v29  ;;  %1306 = vmatpush.bf16.xpose.msra.mxu2 %v1828_v31 }
 0x13e   :  { %1319 = vmatpush.bf16.xpose.msra.mxu3 %v1832_v32 }
 0x140   :  { %v1178_v36 = vpop.f32.mrf.mxu0 }
 0x141   :  { %v1179_v37 = vadd.f32 %v1178_v36, %v1166_v35  ;;  %v1191_v38 = vpop.f32.mrf.mxu1 }
 0x143   :  { %1281 = vmatmul.bf16.vlgmr.msra.gmra.mxu0 %v2459_v22  ;;  %v1192_v39 = vadd.f32 %v1191_v38, %v1179_v37 }
 0x144   :  { %1294 = vmatmul.bf16.vlgmr.msra.gmra.mxu1 %v2446_v16  ;;  %1307 = vmatmul.bf16.vlgmr.msra.gmra.mxu2 %v2448_v17 }
 0x145   :  { %1320 = vmatmul.bf16.vlgmr.msra.gmra.mxu3 %v2588_v30  ;;  %1326 = vst [vmem:[%s3194_s3 + $0x8] sm:$0xff] %v1192_v39 }
 0x148   :  { %v1180_v42 = vpop.f32.mrf.mxu0 }
 0x149   :  { %v1204_v40 = vpop.f32.mrf.mxu2  ;;  %v1193_v22 = vpop.f32.mrf.mxu1 }
 0x14a   :  { %v1217_v41 = vpop.f32.mrf.mxu3  ;;  %v1205_v17 = vadd.f32 %v1204_v40, %v2990_v51 }
 0x14c   :  { %v1218_v44 = vadd.f32 %v1217_v41, %v1205_v17 }
 0x151   :  { %v1206_v43 = vpop.f32.mrf.mxu2 }
 0x152   :  { %v1219_v16 = vpop.f32.mrf.mxu3 }
 0x180   :  { %v1230_v30 = vpop.f32.mrf.mxu0 }
 0x181   :  { %v1231_v45 = vadd.f32 %v1230_v30, %v1218_v44 }
 0x183   :  { %v1243_v46 = vpop.f32.mrf.mxu1 }
 0x184   :  { %v1244_v47 = vadd.f32 %v1243_v46, %v1231_v45 }
 0x187   :  { %v1256_v48 = vpop.f32.mrf.mxu2 }
 0x188   :  { %v1257_v49 = vadd.f32 %v1256_v48, %v1244_v47  ;;  %v1232_v52 = vpop.f32.mrf.mxu0 }
 0x18a   :  { %v1269_v50 = vpop.f32.mrf.mxu3  ;;  %1327 = vst [vmem:[%s3194_s3 + $0x10] sm:$0xff] %v1257_v49 }
 0x18b   :  { %v1245_v53 = vpop.f32.mrf.mxu1  ;;  %v1270_v57 = vadd.f32 %v1269_v50, %v2990_v51 }
 0x18f   :  { %v1258_v55 = vpop.f32.mrf.mxu2 }
 0x192   :  { %v1271_v56 = vpop.f32.mrf.mxu3 }
 0x1c0   :  { %v1282_v58 = vpop.f32.mrf.mxu0 }
 0x1c1   :  { %v1295_v59 = vpop.f32.mrf.mxu1  ;;  %v1283_v54 = vadd.f32 %v1282_v58, %v1270_v57 }
 0x1c3   :  { %v1296_v60 = vadd.f32 %v1295_v59, %v1283_v54 }
 0x1c7   :  { %v1308_v61 = vpop.f32.mrf.mxu2 }
 0x1c8   :  { %v1309_v62 = vadd.f32 %v1308_v61, %v1296_v60  ;;  %v1321_v63 = vpop.f32.mrf.mxu3  ;;  %v1284_v0 = vpop.f32.mrf.mxu0 }
 0x1c9   :  { %v1297_v1 = vpop.f32.mrf.mxu1 }
 0x1ca   :  { %v1322_v2 = vadd.f32 %v1321_v63, %v1309_v62 }
 0x1cc   :  { %1328 = vst [vmem:[%s3194_s3 + $0x18] sm:$0xff] %v1322_v2 }
 0x1cf   :  { %v1310_v5 = vpop.f32.mrf.mxu2 }
 0x1d0   :  { %v1323_v6 = vpop.f32.mrf.mxu3 }

</bundles_post_ra>
